<compile_context>
chip_gen: v6e
topology: v6e:2x2x1
jax: 0.10.0
libtpu: 0.0.40
codegen_flags: <defaults>
</compile_context>

<pallas_src>
import functools

import jax
import jax.numpy as jnp
from jax import lax
from jax.experimental import pallas as pl
from jax.experimental.pallas import tpu as pltpu


def _zero_halo(pad_ref, H, W):
    """Zero only the 1-pixel border of a (H+2, W+2, C) padded scratch."""
    C = pad_ref.shape[-1]
    z_row = jnp.zeros((1, W + 2, C), pad_ref.dtype)
    z_col = jnp.zeros((H, 1, C), pad_ref.dtype)
    pad_ref[0:1, :, :] = z_row
    pad_ref[H + 1:H + 2, :, :] = z_row
    pad_ref[1:H + 1, 0:1, :] = z_col
    pad_ref[1:H + 1, W + 1:W + 2, :] = z_col


def _im2col(padded, H, W):
    """(H+2, W+2, C) zero-padded slab -> (H*W, 9*C) patch matrix.

    Tap order (dy, dx) row-major along the channel axis matches the
    (kh, kw, C_in, C_out) -> (9*C_in, C_out) weight flattening in the wrapper.
    """
    taps = [padded[dy:dy + H, dx:dx + W, :] for dy in range(3) for dx in range(3)]
    return jnp.concatenate(taps, axis=-1).reshape(H * W, -1)


def _output_projection_kernel(x_ref, w1_ref, b1_ref, w2_ref, b2_ref,
                              w3_ref, b3_ref, o_ref,
                              x_pad, h1_pad, h2_pad, *, H, W):
    # x_ref : (1, H, W, C0)      bf16  unpadded input image (NHWC)
    # wN_ref: (9*C_in, C_out)    conv1 bf16, conv2/conv3 f32 (im2col-flattened)
    # bN_ref: (1, C_out)         f32
    # o_ref : (1, C3, H*W)       f32   transposed, lane-dense output
    # x_pad : (H+2, W+2, C0)     bf16  VMEM scratch (zero-bordered input)
    # h1_pad: (H+2, W+2, C1)     f32   VMEM scratch (zero-bordered conv1 out)
    # h2_pad: (H+2, W+2, C2)     f32   VMEM scratch (zero-bordered conv2 out)
    C1 = h1_pad.shape[-1]
    C2 = h2_pad.shape[-1]
    C3 = o_ref.shape[1]

    # Stage input into a zero-bordered scratch (in-VMEM padding, halo-only zero).
    _zero_halo(x_pad, H, W)
    x_pad[1:H + 1, 1:W + 1, :] = x_ref[0]

    # conv1: C0 -> C1, bf16 operands, f32 accumulate, K = 9*C0.
    p1 = _im2col(x_pad[...], H, W)                             # (H*W, 9*C0) bf16
    y1 = jnp.dot(p1, w1_ref[...],
                 preferred_element_type=jnp.float32) + b1_ref[...]

    _zero_halo(h1_pad, H, W)
    h1_pad[1:H + 1, 1:W + 1, :] = y1.reshape(H, W, C1)         # stays f32

    # conv2: C1 -> C2, f32, K = 9*C1.
    p2 = _im2col(h1_pad[...], H, W)                            # (H*W, 9*C1) f32
    y2 = jnp.dot(p2, w2_ref[...],
                 preferred_element_type=jnp.float32) + b2_ref[...]

    _zero_halo(h2_pad, H, W)
    h2_pad[1:H + 1, 1:W + 1, :] = y2.reshape(H, W, C2)         # stays f32

    # conv3: C2 -> C3, f32, K = 9*C2.  Write transposed (C3, H*W) so the output
    # store uses full 128-lane vst instead of 3/128-lane masked stores.
    p3 = _im2col(h2_pad[...], H, W)                            # (H*W, 9*C2) f32
    y3 = jnp.dot(p3, w3_ref[...],
                 preferred_element_type=jnp.float32) + b3_ref[...]   # (H*W, C3)
    o_ref[...] = y3.T.reshape(1, C3, H * W)


def output_projection_pallas(x, w1, b1, w2, b2, w3, b3):
    """Fused OutputProjection forward.

    x : (B, C_in, H, W) float32 (NCHW, PyTorch layout).
    wN: (C_out, C_in, 3, 3) float32 (PyTorch Conv2d layout); bN: (C_out,).
    Returns (B, C_out_last, H, W) float32.
    """
    B, C0, H, W = x.shape
    C1, C2, C3 = w1.shape[0], w2.shape[0], w3.shape[0]

    # Layout plumbing outside the hot loop: NCHW -> NHWC (no spatial pad; that
    # is done in VMEM inside the kernel), conv1 operands cast to bf16.
    x_nhwc = jnp.transpose(x, (0, 2, 3, 1)).astype(jnp.bfloat16)

    def flat_w(w, dtype):
        # (C_out, C_in, 3, 3) -> (3, 3, C_in, C_out) -> (9*C_in, C_out);
        # row order matches the (dy, dx) tap concatenation in _im2col.
        c_out, c_in = w.shape[0], w.shape[1]
        return jnp.transpose(w, (2, 3, 1, 0)).reshape(9 * c_in, c_out).astype(dtype)

    w1f = flat_w(w1, jnp.bfloat16)
    w2f = flat_w(w2, jnp.float32)
    w3f = flat_w(w3, jnp.float32)
    b1k = b1.reshape(1, C1).astype(jnp.float32)
    b2k = b2.reshape(1, C2).astype(jnp.float32)
    b3k = b3.reshape(1, C3).astype(jnp.float32)

    # Cost / VMEM accounting (per grid step, double-buffered pipeline blocks).
    flops = 2 * B * H * W * 9 * (C0 * C1 + C1 * C2 + C2 * C3)
    in_blk = H * W * C0 * 2
    out_blk = C3 * H * W * 4
    w_bytes = (w1f.size * 2 + (w2f.size + w3f.size) * 4
               + (b1k.size + b2k.size + b3k.size) * 4)
    scratch_bytes = (H + 2) * (W + 2) * (C0 * 2 + C1 * 4 + C2 * 4)
    im2col_tmp = H * W * 9 * (C0 * 2 + C1 * 4 + C2 * 4)
    vmem_est = 2 * (in_blk + out_blk + w_bytes) + scratch_bytes + im2col_tmp
    vmem_limit = max(4 * 1024 * 1024, 2 * vmem_est)
    bytes_accessed = (x_nhwc.size * 2 + w_bytes + B * C3 * H * W * 4)

    kernel = functools.partial(_output_projection_kernel, H=H, W=W)

    out_flat = pl.pallas_call(
        kernel,
        out_shape=jax.ShapeDtypeStruct((B, C3, H * W), jnp.float32),
        grid_spec=pltpu.PrefetchScalarGridSpec(
            num_scalar_prefetch=0,
            grid=(B,),
            in_specs=[
                pl.BlockSpec((1, H, W, C0), lambda b: (b, 0, 0, 0)),
                pl.BlockSpec((9 * C0, C1), lambda b: (0, 0)),
                pl.BlockSpec((1, C1), lambda b: (0, 0)),
                pl.BlockSpec((9 * C1, C2), lambda b: (0, 0)),
                pl.BlockSpec((1, C2), lambda b: (0, 0)),
                pl.BlockSpec((9 * C2, C3), lambda b: (0, 0)),
                pl.BlockSpec((1, C3), lambda b: (0, 0)),
            ],
            out_specs=pl.BlockSpec((1, C3, H * W), lambda b: (b, 0, 0)),
            scratch_shapes=[
                pltpu.VMEM((H + 2, W + 2, C0), jnp.bfloat16),
                pltpu.VMEM((H + 2, W + 2, C1), jnp.float32),
                pltpu.VMEM((H + 2, W + 2, C2), jnp.float32),
            ],
        ),
        compiler_params=pltpu.CompilerParams(
            dimension_semantics=("parallel",),    # batch axis -> megacore / 2 TCs
            vmem_limit_bytes=int(vmem_limit),
        ),
        cost_estimate=pl.CostEstimate(
            flops=flops, transcendentals=0, bytes_accessed=int(bytes_accessed)),
    )(x_nhwc, w1f, b1k, w2f, b2k, w3f, b3k)

    # Output is already channel-major; only a free reshape remains.
    return out_flat.reshape(B, C3, H, W)


def _init_conv(key, c_out, c_in, k=3, dtype=jnp.float32):
    """Deterministic init matching nn.Conv2d defaults (uniform +/- 1/sqrt(fan_in))."""
    kw_, kb_ = jax.random.split(key)
    fan_in = c_in * k * k
    bound = 1.0 / (fan_in ** 0.5)
    w = jax.random.uniform(kw_, (c_out, c_in, k, k), dtype, minval=-bound, maxval=bound)
    b = jax.random.uniform(kb_, (c_out,), dtype, minval=-bound, maxval=bound)
    return w, b


def _ref_output_projection(x, params, bf16_first):
    """Pure-JAX reference (NCHW conv chain).

    bf16_first=True mimics the kernel's precision (bf16 conv1 operands,
    everything else f32)."""
    def conv(h, w, b):
        y = lax.conv_general_dilated(
            h, w, window_strides=(1, 1), padding=((1, 1), (1, 1)),
            dimension_numbers=("NCHW", "OIHW", "NCHW"))
        return y + b.reshape(1, -1, 1, 1)

    (w1, b1), (w2, b2), (w3, b3) = params
    if bf16_first:
        x = x.astype(jnp.bfloat16).astype(jnp.float32)
        w1 = w1.astype(jnp.bfloat16).astype(jnp.float32)
    h = conv(x, w1, b1)
    h = conv(h, w2, b2)
    h = conv(h, w3, b3)
    return h


if __name__ == "__main__":
    # Shapes implied by the module defaults: 64 -> 32 -> 8 -> 3 channels.
    B, C_in, H, W = 2, 64, 16, 16
    C_out = 3

    key = jax.random.PRNGKey(0)
    kx, k1, k2, k3 = jax.random.split(key, 4)
    x = jax.random.normal(kx, (B, C_in, H, W), dtype=jnp.float32)
    w1, b1 = _init_conv(k1, 32, C_in)
    w2, b2 = _init_conv(k2, 8, 32)
    w3, b3 = _init_conv(k3, C_out, 8)

    y = output_projection_pallas(x, w1, b1, w2, b2, w3, b3)
    y = jax.block_until_ready(y)
    assert y.shape == (B, C_out, H, W)

    params = ((w1, b1), (w2, b2), (w3, b3))
    # Tight check vs a reference that mimics the kernel's precision
    # (bf16 conv1 operands, f32 everywhere else).
    ref_mixed = _ref_output_projection(x, params, bf16_first=True)
    assert jnp.allclose(y, ref_mixed, atol=2e-3, rtol=2e-3), \
        "mismatch vs mixed-precision reference"
    # Sanity check vs the pure-f32 PyTorch-equivalent reference.
    ref_f32 = _ref_output_projection(x, params, bf16_first=False)
    assert jnp.allclose(y, ref_f32, atol=5e-2, rtol=5e-2), \
        "mismatch vs f32 reference"

    print("KERNEL_OK")
</pallas_src>

<mosaic_0001>
module attributes {stable_mosaic.version = 11 : i64} {
  func.func @_output_projection_kernel(%arg0: i32, %arg1: memref<1x16x16x64xbf16, #tpu.memory_space<vmem>>, %arg2: memref<576x32xbf16, #tpu.memory_space<vmem>>, %arg3: memref<1x32xf32, #tpu.memory_space<vmem>>, %arg4: memref<288x8xf32, #tpu.memory_space<vmem>>, %arg5: memref<1x8xf32, #tpu.memory_space<vmem>>, %arg6: memref<72x3xf32, #tpu.memory_space<vmem>>, %arg7: memref<1x3xf32, #tpu.memory_space<vmem>>, %arg8: memref<1x3x256xf32, #tpu.memory_space<vmem>>, %arg9: memref<18x18x64xbf16, #tpu.memory_space<vmem>>, %arg10: memref<18x18x32xf32, #tpu.memory_space<vmem>>, %arg11: memref<18x18x8xf32, #tpu.memory_space<vmem>>) attributes {dimension_semantics = [#tpu.dimension_semantics<parallel>], iteration_bounds = array<i64: 2>, scalar_prefetch = 0 : i64, scratch_operands = 3 : i64, tpu.core_type = #tpu.core_type<tc>, window_params = [{transform_indices = @transform_0, window_bounds = array<i64: 1, 16, 16, 64>}, {pipeline_mode = #tpu.pipeline_mode<synchronous>, transform_indices = @transform_1, window_bounds = array<i64: 576, 32>}, {pipeline_mode = #tpu.pipeline_mode<synchronous>, transform_indices = @transform_2, window_bounds = array<i64: 1, 32>}, {pipeline_mode = #tpu.pipeline_mode<synchronous>, transform_indices = @transform_3, window_bounds = array<i64: 288, 8>}, {pipeline_mode = #tpu.pipeline_mode<synchronous>, transform_indices = @transform_4, window_bounds = array<i64: 1, 8>}, {pipeline_mode = #tpu.pipeline_mode<synchronous>, transform_indices = @transform_5, window_bounds = array<i64: 72, 3>}, {pipeline_mode = #tpu.pipeline_mode<synchronous>, transform_indices = @transform_6, window_bounds = array<i64: 1, 3>}, {transform_indices = @transform_7, window_bounds = array<i64: 1, 3, 256>}]} {
    %cst = arith.constant 0.000000e+00 : bf16
    %0 = vector.broadcast %cst : bf16 to vector<1x18x64xbf16>
    %cst_0 = arith.constant 0.000000e+00 : bf16
    %1 = vector.broadcast %cst_0 : bf16 to vector<16x1x64xbf16>
    %c0 = arith.constant 0 : index
    %c0_1 = arith.constant 0 : index
    %c0_2 = arith.constant 0 : index
    %2 = vector.load %arg9[%c0, %c0_1, %c0_2] : memref<18x18x64xbf16, #tpu.memory_space<vmem>>, vector<1x18x64xbf16>
    tpu.vector_store %arg9[%c0, %c0_1, %c0_2], %0 {strides = array<i32>} : memref<18x18x64xbf16, #tpu.memory_space<vmem>>, vector<1x18x64xbf16>,
    %c17 = arith.constant 17 : index
    %c0_3 = arith.constant 0 : index
    %c0_4 = arith.constant 0 : index
    %3 = vector.load %arg9[%c17, %c0_3, %c0_4] : memref<18x18x64xbf16, #tpu.memory_space<vmem>>, vector<1x18x64xbf16>
    tpu.vector_store %arg9[%c17, %c0_3, %c0_4], %0 {strides = array<i32>} : memref<18x18x64xbf16, #tpu.memory_space<vmem>>, vector<1x18x64xbf16>,
    %c1 = arith.constant 1 : index
    %c0_5 = arith.constant 0 : index
    %c0_6 = arith.constant 0 : index
    %4 = vector.load %arg9[%c1, %c0_5, %c0_6] : memref<18x18x64xbf16, #tpu.memory_space<vmem>>, vector<16x1x64xbf16>
    tpu.vector_store %arg9[%c1, %c0_5, %c0_6], %1 {strides = array<i32>} : memref<18x18x64xbf16, #tpu.memory_space<vmem>>, vector<16x1x64xbf16>,
    %c1_7 = arith.constant 1 : index
    %c17_8 = arith.constant 17 : index
    %c0_9 = arith.constant 0 : index
    %5 = vector.load %arg9[%c1_7, %c17_8, %c0_9] : memref<18x18x64xbf16, #tpu.memory_space<vmem>>, vector<16x1x64xbf16>
    tpu.vector_store %arg9[%c1_7, %c17_8, %c0_9], %1 {strides = array<i32>} : memref<18x18x64xbf16, #tpu.memory_space<vmem>>, vector<16x1x64xbf16>,
    %c0_10 = arith.constant 0 : index
    %c0_11 = arith.constant 0 : index
    %c0_12 = arith.constant 0 : index
    %c0_13 = arith.constant 0 : index
    %6 = vector.load %arg1[%c0_10, %c0_11, %c0_12, %c0_13] : memref<1x16x16x64xbf16, #tpu.memory_space<vmem>>, vector<1x16x16x64xbf16>
    %7 = vector.shape_cast %6 : vector<1x16x16x64xbf16> to vector<16x16x64xbf16>
    %c1_14 = arith.constant 1 : index
    %c1_15 = arith.constant 1 : index
    %c0_16 = arith.constant 0 : index
    %8 = vector.load %arg9[%c1_14, %c1_15, %c0_16] : memref<18x18x64xbf16, #tpu.memory_space<vmem>>, vector<16x16x64xbf16>
    tpu.vector_store %arg9[%c1_14, %c1_15, %c0_16], %7 {strides = array<i32>} : memref<18x18x64xbf16, #tpu.memory_space<vmem>>, vector<16x16x64xbf16>,
    %c0_17 = arith.constant 0 : index
    %c0_18 = arith.constant 0 : index
    %c0_19 = arith.constant 0 : index
    %9 = vector.load %arg9[%c0_17, %c0_18, %c0_19] : memref<18x18x64xbf16, #tpu.memory_space<vmem>>, vector<18x18x64xbf16>
    %10 = vector.extract_strided_slice %9 {offsets = [0, 0, 0], sizes = [16, 16, 64], strides = [1, 1, 1]} : vector<18x18x64xbf16> to vector<16x16x64xbf16>
    %11 = vector.extract_strided_slice %9 {offsets = [0, 1, 0], sizes = [16, 16, 64], strides = [1, 1, 1]} : vector<18x18x64xbf16> to vector<16x16x64xbf16>
    %12 = vector.extract_strided_slice %9 {offsets = [0, 2, 0], sizes = [16, 16, 64], strides = [1, 1, 1]} : vector<18x18x64xbf16> to vector<16x16x64xbf16>
    %13 = vector.extract_strided_slice %9 {offsets = [1, 0, 0], sizes = [16, 16, 64], strides = [1, 1, 1]} : vector<18x18x64xbf16> to vector<16x16x64xbf16>
    %14 = vector.extract_strided_slice %9 {offsets = [1, 1, 0], sizes = [16, 16, 64], strides = [1, 1, 1]} : vector<18x18x64xbf16> to vector<16x16x64xbf16>
    %15 = vector.extract_strided_slice %9 {offsets = [1, 2, 0], sizes = [16, 16, 64], strides = [1, 1, 1]} : vector<18x18x64xbf16> to vector<16x16x64xbf16>
    %16 = vector.extract_strided_slice %9 {offsets = [2, 0, 0], sizes = [16, 16, 64], strides = [1, 1, 1]} : vector<18x18x64xbf16> to vector<16x16x64xbf16>
    %17 = vector.extract_strided_slice %9 {offsets = [2, 1, 0], sizes = [16, 16, 64], strides = [1, 1, 1]} : vector<18x18x64xbf16> to vector<16x16x64xbf16>
    %18 = vector.extract_strided_slice %9 {offsets = [2, 2, 0], sizes = [16, 16, 64], strides = [1, 1, 1]} : vector<18x18x64xbf16> to vector<16x16x64xbf16>
    %19 = tpu.concatenate %10, %11, %12, %13, %14, %15, %16, %17, %18 in 2 : vector<16x16x64xbf16>, vector<16x16x64xbf16>, vector<16x16x64xbf16>, vector<16x16x64xbf16>, vector<16x16x64xbf16>, vector<16x16x64xbf16>, vector<16x16x64xbf16>, vector<16x16x64xbf16>, vector<16x16x64xbf16> -> vector<16x16x576xbf16>
    %20 = vector.shape_cast %19 : vector<16x16x576xbf16> to vector<256x576xbf16>
    %c0_20 = arith.constant 0 : index
    %c0_21 = arith.constant 0 : index
    %21 = vector.load %arg2[%c0_20, %c0_21] : memref<576x32xbf16, #tpu.memory_space<vmem>>, vector<576x32xbf16>
    %cst_22 = arith.constant dense<0.000000e+00> : vector<256x32xf32>
    %22 = tpu.matmul %20, %21, %cst_22 {dimension_numbers = #tpu.dot_dimension_numbers<[1], [0], [0], [1], [0, 0, 1, 1], [], []>} : vector<256x576xbf16>, vector<576x32xbf16>, vector<256x32xf32> -> vector<256x32xf32>
    %c0_23 = arith.constant 0 : index
    %c0_24 = arith.constant 0 : index
    %23 = vector.load %arg3[%c0_23, %c0_24] : memref<1x32xf32, #tpu.memory_space<vmem>>, vector<1x32xf32>
    %24 = vector.broadcast %23 : vector<1x32xf32> to vector<256x32xf32>
    %25 = arith.addf %22, %24 : vector<256x32xf32>
    %cst_25 = arith.constant 0.000000e+00 : f32
    %26 = vector.broadcast %cst_25 : f32 to vector<1x18x32xf32>
    %cst_26 = arith.constant 0.000000e+00 : f32
    %27 = vector.broadcast %cst_26 : f32 to vector<16x1x32xf32>
    %c0_27 = arith.constant 0 : index
    %c0_28 = arith.constant 0 : index
    %c0_29 = arith.constant 0 : index
    %28 = vector.load %arg10[%c0_27, %c0_28, %c0_29] : memref<18x18x32xf32, #tpu.memory_space<vmem>>, vector<1x18x32xf32>
    tpu.vector_store %arg10[%c0_27, %c0_28, %c0_29], %26 {strides = array<i32>} : memref<18x18x32xf32, #tpu.memory_space<vmem>>, vector<1x18x32xf32>,
    %c17_30 = arith.constant 17 : index
    %c0_31 = arith.constant 0 : index
    %c0_32 = arith.constant 0 : index
    %29 = vector.load %arg10[%c17_30, %c0_31, %c0_32] : memref<18x18x32xf32, #tpu.memory_space<vmem>>, vector<1x18x32xf32>
    tpu.vector_store %arg10[%c17_30, %c0_31, %c0_32], %26 {strides = array<i32>} : memref<18x18x32xf32, #tpu.memory_space<vmem>>, vector<1x18x32xf32>,
    %c1_33 = arith.constant 1 : index
    %c0_34 = arith.constant 0 : index
    %c0_35 = arith.constant 0 : index
    %30 = vector.load %arg10[%c1_33, %c0_34, %c0_35] : memref<18x18x32xf32, #tpu.memory_space<vmem>>, vector<16x1x32xf32>
    tpu.vector_store %arg10[%c1_33, %c0_34, %c0_35], %27 {strides = array<i32>} : memref<18x18x32xf32, #tpu.memory_space<vmem>>, vector<16x1x32xf32>,
    %c1_36 = arith.constant 1 : index
    %c17_37 = arith.constant 17 : index
    %c0_38 = arith.constant 0 : index
    %31 = vector.load %arg10[%c1_36, %c17_37, %c0_38] : memref<18x18x32xf32, #tpu.memory_space<vmem>>, vector<16x1x32xf32>
    tpu.vector_store %arg10[%c1_36, %c17_37, %c0_38], %27 {strides = array<i32>} : memref<18x18x32xf32, #tpu.memory_space<vmem>>, vector<16x1x32xf32>,
    %32 = vector.shape_cast %25 : vector<256x32xf32> to vector<16x16x32xf32>
    %c1_39 = arith.constant 1 : index
    %c1_40 = arith.constant 1 : index
    %c0_41 = arith.constant 0 : index
    %33 = vector.load %arg10[%c1_39, %c1_40, %c0_41] : memref<18x18x32xf32, #tpu.memory_space<vmem>>, vector<16x16x32xf32>
    tpu.vector_store %arg10[%c1_39, %c1_40, %c0_41], %32 {strides = array<i32>} : memref<18x18x32xf32, #tpu.memory_space<vmem>>, vector<16x16x32xf32>,
    %c0_42 = arith.constant 0 : index
    %c0_43 = arith.constant 0 : index
    %c0_44 = arith.constant 0 : index
    %34 = vector.load %arg10[%c0_42, %c0_43, %c0_44] : memref<18x18x32xf32, #tpu.memory_space<vmem>>, vector<18x18x32xf32>
    %35 = vector.extract_strided_slice %34 {offsets = [0, 0, 0], sizes = [16, 16, 32], strides = [1, 1, 1]} : vector<18x18x32xf32> to vector<16x16x32xf32>
    %36 = vector.extract_strided_slice %34 {offsets = [0, 1, 0], sizes = [16, 16, 32], strides = [1, 1, 1]} : vector<18x18x32xf32> to vector<16x16x32xf32>
    %37 = vector.extract_strided_slice %34 {offsets = [0, 2, 0], sizes = [16, 16, 32], strides = [1, 1, 1]} : vector<18x18x32xf32> to vector<16x16x32xf32>
    %38 = vector.extract_strided_slice %34 {offsets = [1, 0, 0], sizes = [16, 16, 32], strides = [1, 1, 1]} : vector<18x18x32xf32> to vector<16x16x32xf32>
    %39 = vector.extract_strided_slice %34 {offsets = [1, 1, 0], sizes = [16, 16, 32], strides = [1, 1, 1]} : vector<18x18x32xf32> to vector<16x16x32xf32>
    %40 = vector.extract_strided_slice %34 {offsets = [1, 2, 0], sizes = [16, 16, 32], strides = [1, 1, 1]} : vector<18x18x32xf32> to vector<16x16x32xf32>
    %41 = vector.extract_strided_slice %34 {offsets = [2, 0, 0], sizes = [16, 16, 32], strides = [1, 1, 1]} : vector<18x18x32xf32> to vector<16x16x32xf32>
    %42 = vector.extract_strided_slice %34 {offsets = [2, 1, 0], sizes = [16, 16, 32], strides = [1, 1, 1]} : vector<18x18x32xf32> to vector<16x16x32xf32>
    %43 = vector.extract_strided_slice %34 {offsets = [2, 2, 0], sizes = [16, 16, 32], strides = [1, 1, 1]} : vector<18x18x32xf32> to vector<16x16x32xf32>
    %44 = tpu.concatenate %35, %36, %37, %38, %39, %40, %41, %42, %43 in 2 : vector<16x16x32xf32>, vector<16x16x32xf32>, vector<16x16x32xf32>, vector<16x16x32xf32>, vector<16x16x32xf32>, vector<16x16x32xf32>, vector<16x16x32xf32>, vector<16x16x32xf32>, vector<16x16x32xf32> -> vector<16x16x288xf32>
    %45 = vector.shape_cast %44 : vector<16x16x288xf32> to vector<256x288xf32>
    %c0_45 = arith.constant 0 : index
    %c0_46 = arith.constant 0 : index
    %46 = vector.load %arg4[%c0_45, %c0_46] : memref<288x8xf32, #tpu.memory_space<vmem>>, vector<288x8xf32>
    %cst_47 = arith.constant dense<0.000000e+00> : vector<256x8xf32>
    %47 = tpu.matmul %45, %46, %cst_47 {dimension_numbers = #tpu.dot_dimension_numbers<[1], [0], [0], [1], [0, 0, 1, 1], [], []>} : vector<256x288xf32>, vector<288x8xf32>, vector<256x8xf32> -> vector<256x8xf32>
    %c0_48 = arith.constant 0 : index
    %c0_49 = arith.constant 0 : index
    %48 = vector.load %arg5[%c0_48, %c0_49] : memref<1x8xf32, #tpu.memory_space<vmem>>, vector<1x8xf32>
    %49 = vector.broadcast %48 : vector<1x8xf32> to vector<256x8xf32>
    %50 = arith.addf %47, %49 : vector<256x8xf32>
    %cst_50 = arith.constant 0.000000e+00 : f32
    %51 = vector.broadcast %cst_50 : f32 to vector<1x18x8xf32>
    %cst_51 = arith.constant 0.000000e+00 : f32
    %52 = vector.broadcast %cst_51 : f32 to vector<16x1x8xf32>
    %c0_52 = arith.constant 0 : index
    %c0_53 = arith.constant 0 : index
    %c0_54 = arith.constant 0 : index
    %53 = vector.load %arg11[%c0_52, %c0_53, %c0_54] : memref<18x18x8xf32, #tpu.memory_space<vmem>>, vector<1x18x8xf32>
    tpu.vector_store %arg11[%c0_52, %c0_53, %c0_54], %51 {strides = array<i32>} : memref<18x18x8xf32, #tpu.memory_space<vmem>>, vector<1x18x8xf32>,
    %c17_55 = arith.constant 17 : index
    %c0_56 = arith.constant 0 : index
    %c0_57 = arith.constant 0 : index
    %54 = vector.load %arg11[%c17_55, %c0_56, %c0_57] : memref<18x18x8xf32, #tpu.memory_space<vmem>>, vector<1x18x8xf32>
    tpu.vector_store %arg11[%c17_55, %c0_56, %c0_57], %51 {strides = array<i32>} : memref<18x18x8xf32, #tpu.memory_space<vmem>>, vector<1x18x8xf32>,
    %c1_58 = arith.constant 1 : index
    %c0_59 = arith.constant 0 : index
    %c0_60 = arith.constant 0 : index
    %55 = vector.load %arg11[%c1_58, %c0_59, %c0_60] : memref<18x18x8xf32, #tpu.memory_space<vmem>>, vector<16x1x8xf32>
    tpu.vector_store %arg11[%c1_58, %c0_59, %c0_60], %52 {strides = array<i32>} : memref<18x18x8xf32, #tpu.memory_space<vmem>>, vector<16x1x8xf32>,
    %c1_61 = arith.constant 1 : index
    %c17_62 = arith.constant 17 : index
    %c0_63 = arith.constant 0 : index
    %56 = vector.load %arg11[%c1_61, %c17_62, %c0_63] : memref<18x18x8xf32, #tpu.memory_space<vmem>>, vector<16x1x8xf32>
    tpu.vector_store %arg11[%c1_61, %c17_62, %c0_63], %52 {strides = array<i32>} : memref<18x18x8xf32, #tpu.memory_space<vmem>>, vector<16x1x8xf32>,
    %57 = vector.shape_cast %50 : vector<256x8xf32> to vector<16x16x8xf32>
    %c1_64 = arith.constant 1 : index
    %c1_65 = arith.constant 1 : index
    %c0_66 = arith.constant 0 : index
    %58 = vector.load %arg11[%c1_64, %c1_65, %c0_66] : memref<18x18x8xf32, #tpu.memory_space<vmem>>, vector<16x16x8xf32>
    tpu.vector_store %arg11[%c1_64, %c1_65, %c0_66], %57 {strides = array<i32>} : memref<18x18x8xf32, #tpu.memory_space<vmem>>, vector<16x16x8xf32>,
    %c0_67 = arith.constant 0 : index
    %c0_68 = arith.constant 0 : index
    %c0_69 = arith.constant 0 : index
    %59 = vector.load %arg11[%c0_67, %c0_68, %c0_69] : memref<18x18x8xf32, #tpu.memory_space<vmem>>, vector<18x18x8xf32>
    %60 = vector.extract_strided_slice %59 {offsets = [0, 0, 0], sizes = [16, 16, 8], strides = [1, 1, 1]} : vector<18x18x8xf32> to vector<16x16x8xf32>
    %61 = vector.extract_strided_slice %59 {offsets = [0, 1, 0], sizes = [16, 16, 8], strides = [1, 1, 1]} : vector<18x18x8xf32> to vector<16x16x8xf32>
    %62 = vector.extract_strided_slice %59 {offsets = [0, 2, 0], sizes = [16, 16, 8], strides = [1, 1, 1]} : vector<18x18x8xf32> to vector<16x16x8xf32>
    %63 = vector.extract_strided_slice %59 {offsets = [1, 0, 0], sizes = [16, 16, 8], strides = [1, 1, 1]} : vector<18x18x8xf32> to vector<16x16x8xf32>
    %64 = vector.extract_strided_slice %59 {offsets = [1, 1, 0], sizes = [16, 16, 8], strides = [1, 1, 1]} : vector<18x18x8xf32> to vector<16x16x8xf32>
    %65 = vector.extract_strided_slice %59 {offsets = [1, 2, 0], sizes = [16, 16, 8], strides = [1, 1, 1]} : vector<18x18x8xf32> to vector<16x16x8xf32>
    %66 = vector.extract_strided_slice %59 {offsets = [2, 0, 0], sizes = [16, 16, 8], strides = [1, 1, 1]} : vector<18x18x8xf32> to vector<16x16x8xf32>
    %67 = vector.extract_strided_slice %59 {offsets = [2, 1, 0], sizes = [16, 16, 8], strides = [1, 1, 1]} : vector<18x18x8xf32> to vector<16x16x8xf32>
    %68 = vector.extract_strided_slice %59 {offsets = [2, 2, 0], sizes = [16, 16, 8], strides = [1, 1, 1]} : vector<18x18x8xf32> to vector<16x16x8xf32>
    %69 = tpu.concatenate %60, %61, %62, %63, %64, %65, %66, %67, %68 in 2 : vector<16x16x8xf32>, vector<16x16x8xf32>, vector<16x16x8xf32>, vector<16x16x8xf32>, vector<16x16x8xf32>, vector<16x16x8xf32>, vector<16x16x8xf32>, vector<16x16x8xf32>, vector<16x16x8xf32> -> vector<16x16x72xf32>
    %70 = vector.shape_cast %69 : vector<16x16x72xf32> to vector<256x72xf32>
    %c0_70 = arith.constant 0 : index
    %c0_71 = arith.constant 0 : index
    %71 = vector.load %arg6[%c0_70, %c0_71] : memref<72x3xf32, #tpu.memory_space<vmem>>, vector<72x3xf32>
    %cst_72 = arith.constant dense<0.000000e+00> : vector<256x3xf32>
    %72 = tpu.matmul %70, %71, %cst_72 {dimension_numbers = #tpu.dot_dimension_numbers<[1], [0], [0], [1], [0, 0, 1, 1], [], []>} : vector<256x72xf32>, vector<72x3xf32>, vector<256x3xf32> -> vector<256x3xf32>
    %c0_73 = arith.constant 0 : index
    %c0_74 = arith.constant 0 : index
    %73 = vector.load %arg7[%c0_73, %c0_74] : memref<1x3xf32, #tpu.memory_space<vmem>>, vector<1x3xf32>
    %74 = vector.broadcast %73 : vector<1x3xf32> to vector<256x3xf32>
    %75 = arith.addf %72, %74 : vector<256x3xf32>
    %76 = tpu.transpose %75, [1, 0] : vector<256x3xf32> -> vector<3x256xf32>
    %77 = vector.shape_cast %76 : vector<3x256xf32> to vector<1x3x256xf32>
    %c0_75 = arith.constant 0 : index
    %c0_76 = arith.constant 0 : index
    %c0_77 = arith.constant 0 : index
    %78 = vector.load %arg8[%c0_75, %c0_76, %c0_77] : memref<1x3x256xf32, #tpu.memory_space<vmem>>, vector<1x3x256xf32>
    tpu.vector_store %arg8[%c0_75, %c0_76, %c0_77], %77 {strides = array<i32>} : memref<1x3x256xf32, #tpu.memory_space<vmem>>, vector<1x3x256xf32>,
    return
  }
  func.func @transform_0(%arg0: i32) -> (i32, i32, i32, i32) {
    %c0_i32 = arith.constant 0 : i32
    %c0_i32_0 = arith.constant 0 : i32
    %c0_i32_1 = arith.constant 0 : i32
    %c0_i32_2 = arith.constant 0 : i32
    return %arg0, %c0_i32, %c0_i32_0, %c0_i32_1 : i32, i32, i32, i32
  }
  func.func @transform_1(%arg0: i32) -> (i32, i32) {
    %c0_i32 = arith.constant 0 : i32
    %c0_i32_0 = arith.constant 0 : i32
    %c0_i32_1 = arith.constant 0 : i32
    return %c0_i32, %c0_i32_0 : i32, i32
  }
  func.func @transform_2(%arg0: i32) -> (i32, i32) {
    %c0_i32 = arith.constant 0 : i32
    %c0_i32_0 = arith.constant 0 : i32
    %c0_i32_1 = arith.constant 0 : i32
    return %c0_i32, %c0_i32_0 : i32, i32
  }
  func.func @transform_3(%arg0: i32) -> (i32, i32) {
    %c0_i32 = arith.constant 0 : i32
    %c0_i32_0 = arith.constant 0 : i32
    %c0_i32_1 = arith.constant 0 : i32
    return %c0_i32, %c0_i32_0 : i32, i32
  }
  func.func @transform_4(%arg0: i32) -> (i32, i32) {
    %c0_i32 = arith.constant 0 : i32
    %c0_i32_0 = arith.constant 0 : i32
    %c0_i32_1 = arith.constant 0 : i32
    return %c0_i32, %c0_i32_0 : i32, i32
  }
  func.func @transform_5(%arg0: i32) -> (i32, i32) {
    %c0_i32 = arith.constant 0 : i32
    %c0_i32_0 = arith.constant 0 : i32
    %c0_i32_1 = arith.constant 0 : i32
    return %c0_i32, %c0_i32_0 : i32, i32
  }
  func.func @transform_6(%arg0: i32) -> (i32, i32) {
    %c0_i32 = arith.constant 0 : i32
    %c0_i32_0 = arith.constant 0 : i32
    %c0_i32_1 = arith.constant 0 : i32
    return %c0_i32, %c0_i32_0 : i32, i32
  }
  func.func @transform_7(%arg0: i32) -> (i32, i32, i32) {
    %c0_i32 = arith.constant 0 : i32
    %c0_i32_0 = arith.constant 0 : i32
    %c0_i32_1 = arith.constant 0 : i32
    return %arg0, %c0_i32, %c0_i32_0 : i32, i32, i32
  }
}

</mosaic_0001>

<bundles_post_ra>
// kernel: tpu_custom_call.1
= control target key start
LH: loop header
LB: loop body
LE: loop exit
PB: predicated region body
PF: predicated region fallthrough
CT: control target
= control target key end

     0   :  { %s7355_s24 = smov 0   ;;  %s11316_s0 = inlined_call_operand.vmem [shape: bf16[2,16,16,64], index: 0, kind: input, shape index: {}]   ;;  %s11317_s1 = inlined_call_operand.vmem [shape: bf16[576,32], index: 1, kind: input, shape index: {}]   ;;  %s11318_s2 = inlined_call_operand.vmem [shape: f32[1,32], index: 2, kind: input, shape index: {}]   ;;  %s11319_s3 = inlined_call_operand.vmem [shape: f32[288,8], index: 3, kind: input, shape index: {}]   ;;  %s11320_s4 = inlined_call_operand.vmem [shape: f32[1,8], index: 4, kind: input, shape index: {}]   ;;  %s11321_s5 = inlined_call_operand.vmem [shape: f32[72,3], index: 5, kind: input, shape index: {}]   ;;  %s11322_s6 = inlined_call_operand.vmem [shape: f32[1,3], index: 6, kind: input, shape index: {}]   ;;  %s11323_s7 = inlined_call_operand.vmem [shape: f32[2,3,256], index: 7, kind: output, shape index: {}]  }
   0x1 LB: > { %s6001_s25 = sadd.s32 4294967295, %s7302_s24   ;;  %p6005_p0 = scmp.ge.s32.totalorder %s7302_s24, 1  ;;  %s7302_s24 = sphi %s7355_s24, %s17_s24  }
   0x2   : > { %p237_p1 = scmp.lt.s32.totalorder %s7302_s24, 3 }
   0x4   : > { %p238_p2 = pnand %p6005_p0, %p237_p1 }
   0x6   : > { %241 = sbr.rel (%p238_p2) target bundleno = 1756 (0x6dc), region = 48 }
   0xb   : > { %vm280_vm0 = vcmask 519168   ;;  %vm283_vm1 = vcmask 516096   ;;  %vm291_vm2 = vsmask.f32 256  ;;  %v7304_v0 = vmov 0   ;;  %p269_p3 = scmp.lt.s32.totalorder %s6001_s25, 1 }
   0xc   : > { %281 = vst.msk [vmem:[#allocation2] sm:$0xf] %vm280_vm0, %v7304_v0  ;;  %282 = vst.msk [vmem:[#allocation2 + $0x4] sm:$0xf] %vm280_vm0, %v7304_v0  ;;  %vm341_vm4 = vsmask.f32 7938 }
   0xd   : > { %284 = vst.msk [vmem:[#allocation2 + $0x8] sm:$0x1] %vm283_vm1, %v7304_v0  ;;  %vm7366_vm3 = vmand %vm283_vm1, %vm291_vm2  ;;  %v293_v3 = vld [vmem:[#allocation2 + $0xc] sm:$0x1]  ;;  %v296_v4 = vld [vmem:[#allocation2 + $0x18] sm:$0x1] }
   0xe   : > { %286 = vst.msk [vmem:[#allocation2 + $0xcc] sm:$0xf] %vm280_vm0, %v7304_v0  ;;  %287 = vst.msk [vmem:[#allocation2 + $0xd0] sm:$0xf] %vm280_vm0, %v7304_v0  ;;  %s11420_s25 = smov (!%p269_p3, %s6001_s25), 1  ;;  %v294_v5 = vsel %vm7366_vm3, 0, %v293_v3 }
   0xf   : > { %288 = vst.msk [vmem:[#allocation2 + $0xd4] sm:$0x1] %vm283_vm1, %v7304_v0  ;;  %vm7373_vm5 = vmand %vm283_vm1, %vm341_vm4  ;;  %v297_v6 = vsel %vm7366_vm3, 0, %v296_v4  ;;  %v346_v7 = vld [vmem:[#allocation2 + $0x20] sm:$0x1]  ;;  %s6167_s26 = sshll.u32 %s11420_s25, 7 }
  0x10   : > { %295 = vst [vmem:[#allocation2 + $0xc] sm:$0x1] %v294_v5  ;;  %298 = vst [vmem:[#allocation2 + $0x18] sm:$0x1] %v297_v6  ;;  %v347_v8 = vsel %vm7373_vm5, 0, %v346_v7  ;;  %s7393_s29 = scalar_lea.vmem %s11316_s0, %s6167_s26  ;;  %v7200_v63 = vld [vmem:[%s11317_s1 + $0x78] sm:$0xff]  }
  0x11   : > { %v299_v9 = vld [vmem:[#allocation2 + $0x24] sm:$0x1]  ;;  %v349_v10 = vld [vmem:[#allocation2 + $0x2c] sm:$0x1]  ;;  %348 = vst [vmem:[#allocation2 + $0x20] sm:$0x1] %v347_v8  ;;  %vm7403_vm8 = vmand %vm280_vm0, %vm341_vm4  ;;  %6169 = vmatprep.subr.bf16.mxu0 %v7200_v63  ;;  %6652 = vmatprep.subr.bf16.mxu1 %v7200_v63 }
  0x12   : > { %v300_v11 = vsel %vm7366_vm3, 0, %v299_v9  ;;  %v350_v12 = vsel %vm7373_vm5, 0, %v349_v10  ;;  %v343_v13 = vld [vmem:[#allocation2 + $0x14] sm:$0x1]  ;;  %vm1041_vm6 = vsmask.f32 7424 }
  0x13   : > { %vm423_vm7 = vsmask.f32 4368  ;;  %301 = vst [vmem:[#allocation2 + $0x24] sm:$0x1] %v300_v11  ;;  %351 = vst [vmem:[#allocation2 + $0x2c] sm:$0x1] %v350_v12 }
  0x14   : > { %v344_v14 = vsel %vm7373_vm5, 0, %v343_v13  ;;  %v391_v15 = vld [vmem:[%s7393_s29] sm:$0xf]  ;;  %v392_v16 = vld [vmem:[%s7393_s29 + $0x4] sm:$0xf]  ;;  %vm7411_vm9 = vmor %vm291_vm2, %vm423_vm7  ;;  %s7305_s11 = smov 64  }
  0x15   : > { %v393_v17 = vld [vmem:[%s7393_s29 + $0x8] sm:$0xf]  ;;  %345 = vst [vmem:[#allocation2 + $0x14] sm:$0x1] %v344_v14  ;;  %v7167_v18 = vld [vmem:[#allocation2] sm:$0xff]   ;;  %v426_v20 = vshrl.u32 %v391_v15, 16 }
  0x16   : > { %v7168_v19 = vld [vmem:[#allocation2 + $0x8] ss:$0 sps:$4 sm:$0x11]   ;;  %v429_v21 = vshll.u32 %v391_v15, 16  ;;  %v434_v22 = vshrl.u32 %v392_v16, 16  ;;  %v437_v23 = vshll.u32 %v392_v16, 16 }
  0x17   : > { %v394_v24 = vld [vmem:[%s7393_s29 + $0xc] sm:$0xf]  ;;  %v443_v25 = vshrl.u32 %v393_v17, 16  ;;  %v446_v26 = vshll.u32 %v393_v17, 16  ;;  %v1043_v27 = vshrl.u32 %v7167_v18, 16  ;;  %v1045_v28 = vshll.u32 %v7167_v18, 16 }
  0x18   : > { %v1050_v29 = vshll.u32 %v7168_v19, 16  ;;  %v428_v30 = vrot.slane %v426_v20, 7  ;;  %v7407_v32 = vrot.slane %v434_v22, 7  ;;  %v747_v33 = vld [vmem:[#allocation2 + $0xc] sm:$0xf]  ;;  %v451_v35 = vshrl.u32 %v394_v24, 16 }
  0x19   : > { %v445_v34 = vrot.slane %v443_v25, 7  ;;  %v454_v36 = vshll.u32 %v394_v24, 16  ;;  %v1047_v37 = vrot.slane %v1045_v28, 1  ;;  %v754_v42 = vld [vmem:[#allocation2 + $0x18] sm:$0xf]  ;;  %v7202_v19 = vld [vmem:[%s11317_s1 + $0x70] sm:$0xff]  }
  0x1a   : > { %v1052_v38 = vrot.slane %v1050_v29, 1  ;;  %v431_v40 = vor.u32 %v429_v21, %v428_v30  ;;  %v432_v41 = vrot.slane %v428_v30, 4  ;;  %v305_v43 = vld [vmem:[#allocation2 + $0x3c] sm:$0x1]  ;;  %v439_v44 = vor.u32 %v437_v23, %v7407_v32  ;;  %v395_v48 = vld [vmem:[%s7393_s29 + $0x10] sm:$0xf] }
  0x1b   : > { %v448_v45 = vor.u32 %v446_v26, %v445_v34  ;;  %v449_v46 = vrot.slane %v445_v34, 4  ;;  %v453_v47 = vrot.slane %v451_v35, 7  ;;  %v396_v49 = vld [vmem:[%s7393_s29 + $0x14] sm:$0xf]  ;;  %v1048_v50 = vor.u32 %v1047_v37, %v1043_v27  ;;  %v758_v52 = vld [vmem:[#allocation2 + $0x20] sm:$0x1] }
  0x1c   : > { %v748_v51 = vsel %vm7403_vm8, %v431_v40, %v747_v33  ;;  %v460_v53 = vshrl.u32 %v395_v48, 16  ;;  %v463_v54 = vshll.u32 %v395_v48, 16  ;;  %v355_v55 = vld [vmem:[#allocation2 + $0x44] sm:$0x1]  ;;  %v440_v56 = vsel %vm7411_vm9, %v432_v41, %v439_v44  ;;  %v751_v61 = vld [vmem:[#allocation2 + $0x14] sm:$0x1] }
  0x1d   : > { %749 = vst [vmem:[#allocation2 + $0xc] sm:$0xf] %v748_v51  ;;  %v456_v57 = vor.u32 %v454_v36, %v453_v47  ;;  %v755_v58 = vsel %vm7403_vm8, %v448_v45, %v754_v42  ;;  %v458_v59 = vrot.slane %v453_v47, 4  ;;  %v761_v60 = vld [vmem:[#allocation2 + $0x24] sm:$0xf]  ;;  %v1053_v0 = vsel %vm1041_vm6, %v1048_v50, %v1052_v38  ;;  %v7201_v7 = vld [vmem:[%s11317_s1 + $0x38] sm:$0xff]  }
  0x1e   : > { %v399_v62 = vld [vmem:[%s7393_s29 + $0x20] sm:$0xf]  ;;  %750 = vst.msk [vmem:[#allocation2 + $0x10] sm:$0xf] %vm280_vm0, %v440_v56  ;;  %756 = vst [vmem:[#allocation2 + $0x18] sm:$0xf] %v755_v58  ;;  %1234 = vrot.lane.b32.xlu0 %v1053_v0, %s7305_s11  ;;  %6170 = vmatpush3.bf16.msra.mxu0 %v7201_v7 }
  0x1f   : > { %v462_v3 = vrot.slane %v460_v53, 7  ;;  %v468_v4 = vshrl.u32 %v396_v49, 16  ;;  %v471_v5 = vshll.u32 %v396_v49, 16  ;;  %v400_v6 = vld [vmem:[%s7393_s29 + $0x24] sm:$0xf]  ;;  %v457_v8 = vsel %vm7411_vm9, %v449_v46, %v456_v57  ;;  %v7203_v25 = vld [vmem:[%s11317_s1 + $0x30] sm:$0xff]   ;;  %6660 = vmatpush3.bf16.msra.mxu1 %v7201_v7  ;;  %6171 = vmatprep.subr.bf16.mxu0 %v7202_v19 }
  0x20   : > { %v759_v9 = vsel %vm7366_vm3, %v458_v59, %v758_v52  ;;  %v765_v10 = vld [vmem:[#allocation2 + $0x2c] sm:$0x1]  ;;  %v441_v11 = vrot.slane %v7407_v32, 4  ;;  %v306_v12 = vsel %vm7366_vm3, 0, %v305_v43  ;;  %v302_v13 = vld [vmem:[#allocation2 + $0x30] sm:$0x1]  ;;  %6653 = vmatprep.subr.bf16.mxu1 %v7202_v19 }
  0x21   : > { %757 = vst.msk [vmem:[#allocation2 + $0x1c] sm:$0xf] %vm280_vm0, %v457_v8  ;;  %760 = vst [vmem:[#allocation2 + $0x20] sm:$0x1] %v759_v9  ;;  %v465_v14 = vor.u32 %v463_v54, %v462_v3  ;;  %v466_v15 = vrot.slane %v462_v3, 4  ;;  %v470_v16 = vrot.slane %v468_v4, 7 }
  0x22   : > { %307 = vst [vmem:[#allocation2 + $0x3c] sm:$0x1] %v306_v12  ;;  %v356_v17 = vsel %vm7373_vm5, 0, %v355_v55  ;;  %v352_v18 = vld [vmem:[#allocation2 + $0x38] sm:$0x1]  ;;  %v752_v20 = vsel %vm7366_vm3, %v441_v11, %v751_v61  ;;  %v494_v21 = vshrl.u32 %v399_v62, 16  ;;  %6172 = vmatpush3.bf16.msra.mxu0 %v7203_v25 }
  0x23   : > { %357 = vst [vmem:[#allocation2 + $0x44] sm:$0x1] %v356_v17  ;;  %v497_v22 = vshll.u32 %v399_v62, 16  ;;  %v502_v23 = vshrl.u32 %v400_v6, 16  ;;  %v397_v24 = vld [vmem:[%s7393_s29 + $0x18] sm:$0xf]  ;;  %v473_v26 = vor.u32 %v471_v5, %v470_v16  ;;  %v762_v27 = vsel %vm7403_vm8, %v465_v14, %v761_v60  ;;  %6661 = vmatpush3.bf16.msra.mxu1 %v7203_v25 }
  0x24   : > { %v475_v28 = vrot.slane %v470_v16, 4  ;;  %753 = vst [vmem:[#allocation2 + $0x14] sm:$0x1] %v752_v20  ;;  %v505_v29 = vshll.u32 %v400_v6, 16  ;;  %763 = vst [vmem:[#allocation2 + $0x24] sm:$0xf] %v762_v27 }
  0x25   : > { %v496_v30 = vrot.slane %v494_v21, 7  ;;  %v504_v32 = vrot.slane %v502_v23, 7  ;;  %v303_v33 = vsel %vm7366_vm3, 0, %v302_v13  ;;  %v353_v34 = vsel %vm7373_vm5, 0, %v352_v18  ;;  %v398_v35 = vld [vmem:[%s7393_s29 + $0x1c] sm:$0xf] }
  0x26   : > { %v474_v36 = vsel %vm7411_vm9, %v466_v15, %v473_v26  ;;  %v766_v37 = vsel %vm7366_vm3, %v475_v28, %v765_v10  ;;  %304 = vst [vmem:[#allocation2 + $0x30] sm:$0x1] %v303_v33  ;;  %354 = vst [vmem:[#allocation2 + $0x38] sm:$0x1] %v353_v34  ;;  %v477_v38 = vshrl.u32 %v397_v24, 16  ;;  %v480_v40 = vshll.u32 %v397_v24, 16 }
  0x27   : > { %v7169_v41 = vld [vmem:[#allocation2 + $0xc] sm:$0xff]   ;;  %764 = vst.msk [vmem:[#allocation2 + $0x28] sm:$0xf] %vm280_vm0, %v474_v36  ;;  %767 = vst [vmem:[#allocation2 + $0x2c] sm:$0x1] %v766_v37  ;;  %v499_v42 = vor.u32 %v497_v22, %v496_v30  ;;  %v500_v43 = vrot.slane %v496_v30, 4  ;;  %v507_v44 = vor.u32 %v505_v29, %v504_v32 }
  0x28   : > { %v509_v45 = vrot.slane %v504_v32, 4  ;;  %v479_v46 = vrot.slane %v477_v38, 7  ;;  %v485_v47 = vshrl.u32 %v398_v35, 16  ;;  %v488_v48 = vshll.u32 %v398_v35, 16  ;;  %1320 = vrot.lane.b32.xlu0 %v7169_v41, %s7305_s11  ;;  %v7170_v49 = vld [vmem:[#allocation2 + $0x18] sm:$0xff]   ;;  %v7204_v33 = vld [vmem:[%s11317_s1 + $0x68] sm:$0xff]  }
  0x29   : > { %v1055_v50 = vshrl.u32 %v7169_v41, 16  ;;  %v508_v51 = vsel %vm7411_vm9, %v500_v43, %v507_v44  ;;  %v7171_v52 = vld [vmem:[#allocation2 + $0x20] ss:$0 sps:$4 sm:$0x11]   ;;  %v1057_v53 = vshll.u32 %v7169_v41, 16  ;;  %v1067_v56 = vshrl.u32 %v7170_v49, 16  ;;  %6173 = vmatprep.subr.bf16.mxu0 %v7204_v33  ;;  %6654 = vmatprep.subr.bf16.mxu1 %v7204_v33 }
  0x2a   : > { %v775_v54 = vld [vmem:[#allocation2 + $0x3c] sm:$0xf]  ;;  %778 = vst.msk [vmem:[#allocation2 + $0x40] sm:$0xf] %vm280_vm0, %v508_v51  ;;  %v482_v55 = vor.u32 %v480_v40, %v479_v46  ;;  %v1069_v57 = vshll.u32 %v7170_v49, 16  ;;  %v1074_v61 = vshll.u32 %v7171_v52, 16 }
  0x2b   : > { %v776_v58 = vsel %vm7403_vm8, %v499_v42, %v775_v54  ;;  %v779_v59 = vld [vmem:[#allocation2 + $0x44] sm:$0x1]  ;;  %v308_v60 = vld [vmem:[#allocation2 + $0x48] sm:$0x1]  ;;  %v1059_v3 = vrot.slane %v1057_v53, 1  ;;  %v483_v4 = vrot.slane %v479_v46, 4 }
  0x2c   : > { %v7174_v62 = vld [vmem:[#allocation2 + $0x14] ss:$0 sps:$4 sm:$0x11]   ;;  %777 = vst [vmem:[#allocation2 + $0x3c] sm:$0xf] %v776_v58  ;;  %v780_v63 = vsel %vm7366_vm3, %v509_v45, %v779_v59  ;;  %1322 = vrot.lane.b32.xlu0 %v7170_v49, %s7305_s11  ;;  %v1071_v0 = vrot.slane %v1069_v57, 1 }
  0x2d   : > { %781 = vst [vmem:[#allocation2 + $0x44] sm:$0x1] %v780_v63  ;;  %v487_v5 = vrot.slane %v485_v47, 7  ;;  %v768_v6 = vld [vmem:[#allocation2 + $0x30] sm:$0xf]  ;;  %v1076_v9 = vrot.slane %v1074_v61, 1  ;;  %v1060_v14 = vor.u32 %v1059_v3, %v1055_v50 }
  0x2e   : > { %v358_v7 = vld [vmem:[#allocation2 + $0x50] sm:$0x1]  ;;  %v401_v8 = vld [vmem:[%s7393_s29 + $0x28] sm:$0xf]  ;;  %v769_v11 = vsel %vm7403_vm8, %v482_v55, %v768_v6  ;;  %v1072_v12 = vor.u32 %v1071_v0, %v1067_v56  ;;  %v1062_v15 = vshll.u32 %v7174_v62, 16  ;;  %v309_v21 = vsel %vm7366_vm3, 0, %v308_v60 }
  0x2f   : > { %v7172_v10 = vld [vmem:[#allocation2 + $0x24] sm:$0xff]   ;;  %v7173_v13 = vld [vmem:[#allocation2 + $0x2c] ss:$0 sps:$4 sm:$0x11]   ;;  %v490_v16 = vor.u32 %v488_v48, %v487_v5  ;;  %770 = vst [vmem:[#allocation2 + $0x30] sm:$0xf] %v769_v11 }
  0x30   : > { %v772_v17 = vld [vmem:[#allocation2 + $0x38] sm:$0x1]  ;;  %v1079_v18 = vshrl.u32 %v7172_v10, 16  ;;  %v1081_v19 = vshll.u32 %v7172_v10, 16  ;;  %v492_v20 = vrot.slane %v487_v5, 4  ;;  %v7482_v23 = vsel %vm1041_vm6, %v1072_v12, %v1076_v9  ;;  %1324 = vrot.lane.b32.xlu0 %v7172_v10, %s7305_s11  ;;  %v7205_v58 = vld [vmem:[%s11317_s1 + $0x28] sm:$0xff]  }
  0x31   : > { %v402_v22 = vld [vmem:[%s7393_s29 + $0x2c] sm:$0xf]  ;;  %v1086_v24 = vshll.u32 %v7173_v13, 16  ;;  %v1064_v25 = vrot.slane %v1062_v15, 1  ;;  %v491_v26 = vsel %vm7411_vm9, %v483_v4, %v490_v16  ;;  %310 = vst [vmem:[#allocation2 + $0x48] sm:$0x1] %v309_v21  ;;  %1238 = vrot.lane.b32.xlu1 %v7482_v23, %s7305_s11  ;;  %6174 = vmatpush3.bf16.msra.mxu0 %v7205_v58 }
  0x32   : > { %v1083_v27 = vrot.slane %v1081_v19, 1  ;;  %771 = vst.msk [vmem:[#allocation2 + $0x34] sm:$0xf] %vm280_vm0, %v491_v26  ;;  %v773_v28 = vsel %vm7366_vm3, %v492_v20, %v772_v17  ;;  %v359_v29 = vsel %vm7373_vm5, 0, %v358_v7  ;;  %v511_v30 = vshrl.u32 %v401_v8, 16  ;;  %6662 = vmatpush3.bf16.msra.mxu1 %v7205_v58  ;;  %v7206_v17 = vld [vmem:[%s11317_s1 + $0x60] sm:$0xff]  }
  0x33   : > { %v311_v32 = vld [vmem:[#allocation2 + $0x54] sm:$0x1]  ;;  %v1088_v34 = vrot.slane %v1086_v24, 1  ;;  %v7498_v35 = vsel %vm1041_vm6, %v1060_v14, %v1064_v25  ;;  %v7500_v36 = vld [vmem:[#allocation2 + $0x3c] sm:$0xff]   ;;  %774 = vst [vmem:[#allocation2 + $0x38] sm:$0x1] %v773_v28  ;;  %6175 = vmatprep.subr.bf16.mxu0 %v7206_v17  ;;  %6655 = vmatprep.subr.bf16.mxu1 %v7206_v17 }
  0x34   : > { %360 = vst [vmem:[#allocation2 + $0x50] sm:$0x1] %v359_v29  ;;  %v514_v37 = vshll.u32 %v401_v8, 16  ;;  %v519_v38 = vshrl.u32 %v402_v22, 16  ;;  %v361_v40 = vld [vmem:[#allocation2 + $0x5c] sm:$0x1]  ;;  %v1084_v41 = vor.u32 %v1083_v27, %v1079_v18  ;;  %1236 = vrot.lane.b32.xlu0 %v7498_v35, %s7305_s11 }
  0x35   : > { %v7176_v42 = vld [vmem:[#allocation2 + $0x44] ss:$0 sps:$4 sm:$0x11]   ;;  %v513_v43 = vrot.slane %v511_v30, 7  ;;  %v1103_v44 = vshrl.u32 %v7500_v36, 16  ;;  %v1105_v45 = vshll.u32 %v7500_v36, 16 }
  0x36   : > { %v521_v46 = vrot.slane %v519_v38, 7  ;;  %v522_v47 = vshll.u32 %v402_v22, 16  ;;  %v403_v48 = vld [vmem:[%s7393_s29 + $0x30] sm:$0xf]  ;;  %v7508_v49 = vsel %vm1041_vm6, %v1084_v41, %v1088_v34  ;;  %v1110_v50 = vshll.u32 %v7176_v42, 16  ;;  %s7307_s21 = smov 32  }
  0x37   : > { %v516_v51 = vor.u32 %v514_v37, %v513_v43  ;;  %v517_v52 = vrot.slane %v513_v43, 4  ;;  %v404_v53 = vld [vmem:[%s7393_s29 + $0x34] sm:$0xf]  ;;  %1240 = vrot.lane.b32.xlu1 %v7508_v49, %s7305_s11  ;;  %v1107_v54 = vrot.slane %v1105_v45, 1  ;;  %v312_v57 = vsel %vm7366_vm3, 0, %v311_v32  ;;  %s7308_s22 = smov 96  }
  0x38   : > { %v524_v55 = vor.u32 %v522_v47, %v521_v46  ;;  %v526_v56 = vrot.slane %v521_v46, 4  ;;  %v1112_v59 = vrot.slane %v1110_v50, 1  ;;  %v782_v60 = vld [vmem:[#allocation2 + $0x48] sm:$0xf]  ;;  %313 = vst [vmem:[#allocation2 + $0x54] sm:$0x1] %v312_v57 }
  0x39   : > { %v362_v61 = vsel %vm7373_vm5, 0, %v361_v40  ;;  %v528_v62 = vshrl.u32 %v403_v48, 16  ;;  %v531_v63 = vshll.u32 %v403_v48, 16  ;;  %v314_v0 = vld [vmem:[#allocation2 + $0x60] sm:$0x1]  ;;  %v1108_v3 = vor.u32 %v1107_v54, %v1103_v44  ;;  %v7520_v4 = vld [vmem:[#allocation2 + $0x30] sm:$0xff]  }
  0x3a   : > { %v525_v5 = vsel %vm7411_vm9, %v517_v52, %v524_v55  ;;  %v783_v6 = vsel %vm7403_vm8, %v516_v51, %v782_v60  ;;  %363 = vst [vmem:[#allocation2 + $0x5c] sm:$0x1] %v362_v61  ;;  %v536_v7 = vshrl.u32 %v404_v53, 16  ;;  %v364_v8 = vld [vmem:[#allocation2 + $0x68] sm:$0x1]  ;;  %v1091_v13 = vshrl.u32 %v7520_v4, 16 }
  0x3b   : > { %v405_v9 = vld [vmem:[%s7393_s29 + $0x38] sm:$0xf]  ;;  %784 = vst [vmem:[#allocation2 + $0x48] sm:$0xf] %v783_v6  ;;  %785 = vst.msk [vmem:[#allocation2 + $0x4c] sm:$0xf] %vm280_vm0, %v525_v5  ;;  %v7529_v12 = vsel %vm1041_vm6, %v1108_v3, %v1112_v59 }
  0x3c   : > { %v7178_v10 = vld [vmem:[#allocation2 + $0x38] ss:$0 sps:$4 sm:$0x11]   ;;  %v530_v11 = vrot.slane %v528_v62, 7  ;;  %v1093_v14 = vshll.u32 %v7520_v4, 16  ;;  %v538_v16 = vrot.slane %v536_v7, 7  ;;  %1244 = vrot.lane.b32.xlu1 %v7529_v12, %s7305_s11 }
  0x3d   : > { %v786_v15 = vld [vmem:[#allocation2 + $0x50] sm:$0x1]  ;;  %v1098_v18 = vshll.u32 %v7178_v10, 16  ;;  %v406_v22 = vld [vmem:[%s7393_s29 + $0x3c] sm:$0xf]  ;;  %v539_v26 = vshll.u32 %v404_v53, 16 }
  0x3e   : > { %v787_v19 = vsel %vm7366_vm3, %v526_v56, %v786_v15  ;;  %v533_v20 = vor.u32 %v531_v63, %v530_v11  ;;  %v534_v21 = vrot.slane %v530_v11, 4  ;;  %v320_v24 = vld [vmem:[#allocation2 + $0x78] sm:$0x1]  ;;  %v1095_v25 = vrot.slane %v1093_v14, 1  ;;  %v370_v29 = vld [vmem:[#allocation2 + $0x80] sm:$0x1] }
  0x3f   : > { %788 = vst [vmem:[#allocation2 + $0x50] sm:$0x1] %v787_v19  ;;  %v543_v27 = vrot.slane %v538_v16, 4  ;;  %v315_v28 = vsel %vm7366_vm3, 0, %v314_v0  ;;  %v1100_v30 = vrot.slane %v1098_v18, 1  ;;  %v365_v32 = vsel %vm7373_vm5, 0, %v364_v8 }
  0x40   : > { %316 = vst [vmem:[#allocation2 + $0x60] sm:$0x1] %v315_v28  ;;  %v545_v33 = vshrl.u32 %v405_v9, 16  ;;  %v548_v34 = vshll.u32 %v405_v9, 16  ;;  %v1096_v37 = vor.u32 %v1095_v25, %v1091_v13  ;;  %v541_v38 = vor.u32 %v539_v26, %v538_v16  ;;  %v789_v40 = vld [vmem:[#allocation2 + $0x54] sm:$0xf] }
  0x41   : > { %366 = vst [vmem:[#allocation2 + $0x68] sm:$0x1] %v365_v32  ;;  %v553_v41 = vshrl.u32 %v406_v22, 16  ;;  %v556_v42 = vshll.u32 %v406_v22, 16  ;;  %v409_v43 = vld [vmem:[%s7393_s29 + $0x48] sm:$0xf]  ;;  %v790_v44 = vsel %vm7403_vm8, %v533_v20, %v789_v40 }
  0x42   : > { %v793_v45 = vld [vmem:[#allocation2 + $0x5c] sm:$0x1]  ;;  %v547_v46 = vrot.slane %v545_v33, 7  ;;  %v321_v47 = vsel %vm7366_vm3, 0, %v320_v24  ;;  %v371_v48 = vsel %vm7373_vm5, 0, %v370_v29  ;;  %v7207_v51 = vld [vmem:[%s11317_s1 + $0x20] sm:$0xff]   ;;  %v7559_v52 = vsel %vm1041_vm6, %v1096_v37, %v1100_v30 }
  0x43   : > { %v7553_v50 = vld [vmem:[%s7393_s29 + $0x4c] sm:$0xf]  ;;  %v542_v54 = vsel %vm7411_vm9, %v534_v21, %v541_v38  ;;  %791 = vst [vmem:[#allocation2 + $0x54] sm:$0xf] %v790_v44  ;;  %v794_v55 = vsel %vm7366_vm3, %v543_v27, %v793_v45  ;;  %v555_v56 = vrot.slane %v553_v41, 7  ;;  %1242 = vrot.lane.b32.xlu0 %v7559_v52, %s7305_s11  ;;  %v579_v59 = vshrl.u32 %v409_v43, 16  ;;  %6176 = vmatpush3.bf16.msra.mxu0 %v7207_v51 }
  0x44   : > { %v7561_v53 = vld [vmem:[#allocation2 + $0x48] sm:$0xff]   ;;  %322 = vst [vmem:[#allocation2 + $0x78] sm:$0x1] %v321_v47  ;;  %372 = vst [vmem:[#allocation2 + $0x80] sm:$0x1] %v371_v48  ;;  %v550_v57 = vor.u32 %v548_v34, %v547_v46  ;;  %v551_v58 = vrot.slane %v547_v46, 4  ;;  %6663 = vmatpush3.bf16.msra.mxu1 %v7207_v51 }
  0x45   : > { %792 = vst.msk [vmem:[#allocation2 + $0x58] sm:$0xf] %vm280_vm0, %v542_v54  ;;  %795 = vst [vmem:[#allocation2 + $0x5c] sm:$0x1] %v794_v55  ;;  %v582_v60 = vshll.u32 %v409_v43, 16  ;;  %v7208_v62 = vld [vmem:[%s11317_s1 + $0x58] sm:$0xff]   ;;  %v558_v3 = vor.u32 %v556_v42, %v555_v56 }
  0x46   : > { %v317_v61 = vld [vmem:[#allocation2 + $0x6c] sm:$0x1]  ;;  %v1115_v63 = vshrl.u32 %v7561_v53, 16  ;;  %v1117_v0 = vshll.u32 %v7561_v53, 16  ;;  %v560_v5 = vrot.slane %v555_v56, 4  ;;  %v7209_v7 = vld [vmem:[%s11317_s1 + $0x18] sm:$0xff]   ;;  %6177 = vmatprep.subr.bf16.mxu0 %v7208_v62  ;;  %6656 = vmatprep.subr.bf16.mxu1 %v7208_v62 }
  0x47   : > { %v367_v6 = vld [vmem:[#allocation2 + $0x74] sm:$0x1]  ;;  %v7578_v8 = vld [vmem:[#allocation2 + $0x50] ss:$0 sps:$4 sm:$0x11]   ;;  %v581_v9 = vrot.slane %v579_v59, 7  ;;  %v559_v11 = vsel %vm7411_vm9, %v551_v58, %v558_v3  ;;  %6178 = vmatpush3.bf16.msra.mxu0 %v7209_v7 }
  0x48   : > { %v1119_v10 = vrot.slane %v1117_v0, 1  ;;  %v796_v13 = vld [vmem:[#allocation2 + $0x60] sm:$0xf]  ;;  %v587_v14 = vshrl.u32 %v7553_v50, 16  ;;  %v590_v15 = vshll.u32 %v7553_v50, 16  ;;  %v7210_v16 = vld [vmem:[%s11317_s1 + $0x50] sm:$0xff]   ;;  %6664 = vmatpush3.bf16.msra.mxu1 %v7209_v7 }
  0x49   : > { %v1122_v17 = vshll.u32 %v7578_v8, 16  ;;  %v797_v18 = vsel %vm7403_vm8, %v550_v57, %v796_v13  ;;  %799 = vst.msk [vmem:[#allocation2 + $0x64] sm:$0xf] %vm280_vm0, %v559_v11  ;;  %v800_v19 = vld [vmem:[#allocation2 + $0x68] sm:$0x1]  ;;  %v584_v20 = vor.u32 %v582_v60, %v581_v9  ;;  %v585_v21 = vrot.slane %v581_v9, 4  ;;  %6179 = vmatprep.subr.bf16.mxu0 %v7210_v16  ;;  %6657 = vmatprep.subr.bf16.mxu1 %v7210_v16 }
  0x4a   : > { %v1120_v22 = vor.u32 %v1119_v10, %v1115_v63  ;;  %798 = vst [vmem:[#allocation2 + $0x60] sm:$0xf] %v797_v18  ;;  %v801_v24 = vsel %vm7366_vm3, %v560_v5, %v800_v19  ;;  %v589_v25 = vrot.slane %v587_v14, 7  ;;  %v318_v26 = vsel %vm7366_vm3, 0, %v317_v61  ;;  %v407_v27 = vld [vmem:[%s7393_s29 + $0x40] sm:$0xf] }
  0x4b   : > { %v408_v28 = vld [vmem:[%s7393_s29 + $0x44] sm:$0xf]  ;;  %v1124_v29 = vrot.slane %v1122_v17, 1  ;;  %802 = vst [vmem:[#allocation2 + $0x68] sm:$0x1] %v801_v24  ;;  %v368_v32 = vsel %vm7373_vm5, 0, %v367_v6 }
  0x4c   : > { %v810_v30 = vld [vmem:[#allocation2 + $0x78] sm:$0xf]  ;;  %319 = vst [vmem:[#allocation2 + $0x6c] sm:$0x1] %v318_v26  ;;  %v329_v33 = vld [vmem:[#allocation2 + $0x9c] sm:$0x1]  ;;  %v592_v38 = vor.u32 %v590_v15, %v589_v25 }
  0x4d   : > { %v379_v34 = vld [vmem:[#allocation2 + $0xa4] sm:$0x1]  ;;  %v7599_v37 = vld [vmem:[#allocation2 + $0x54] sm:$0xff]   ;;  %v594_v40 = vrot.slane %v589_v25, 4  ;;  %v811_v41 = vsel %vm7403_vm8, %v584_v20, %v810_v30  ;;  %369 = vst [vmem:[#allocation2 + $0x74] sm:$0x1] %v368_v32  ;;  %v7604_v42 = vsel %vm1041_vm6, %v1120_v22, %v1124_v29 }
  0x4e   : > { %v7606_v43 = vld [vmem:[#allocation2 + $0x5c] ss:$0 sps:$4 sm:$0x11]   ;;  %812 = vst [vmem:[#allocation2 + $0x78] sm:$0xf] %v811_v41  ;;  %v562_v45 = vshrl.u32 %v407_v27, 16  ;;  %1246 = vrot.lane.b32.xlu1 %v7604_v42, %s7305_s11  ;;  %v593_v48 = vsel %vm7411_vm9, %v585_v21, %v592_v38 }
  0x4f   : > { %v814_v44 = vld [vmem:[#allocation2 + $0x80] sm:$0x1]  ;;  %v1127_v46 = vshrl.u32 %v7599_v37, 16  ;;  %v1129_v47 = vshll.u32 %v7599_v37, 16  ;;  %v1134_v51 = vshll.u32 %v7606_v43, 16  ;;  %v565_v55 = vshll.u32 %v407_v27, 16 }
  0x50   : > { %v815_v50 = vsel %vm7366_vm3, %v594_v40, %v814_v44  ;;  %813 = vst.msk [vmem:[#allocation2 + $0x7c] sm:$0xf] %vm280_vm0, %v593_v48  ;;  %v564_v54 = vrot.slane %v562_v45, 7  ;;  %v570_v56 = vshrl.u32 %v408_v28, 16  ;;  %v415_v57 = vld [vmem:[%s7393_s29 + $0x60] sm:$0xf] }
  0x51   : > { %816 = vst [vmem:[#allocation2 + $0x80] sm:$0x1] %v815_v50  ;;  %v1131_v58 = vrot.slane %v1129_v47, 1  ;;  %v573_v59 = vshll.u32 %v408_v28, 16  ;;  %v330_v60 = vsel %vm7366_vm3, 0, %v329_v33  ;;  %v380_v61 = vsel %vm7373_vm5, 0, %v379_v34 }
  0x52   : > { %v1136_v62 = vrot.slane %v1134_v51, 1  ;;  %v7623_v63 = vld [vmem:[#allocation2 + $0x60] sm:$0xff]   ;;  %v567_v0 = vor.u32 %v565_v55, %v564_v54  ;;  %v568_v3 = vrot.slane %v564_v54, 4  ;;  %v572_v5 = vrot.slane %v570_v56, 7  ;;  %331 = vst [vmem:[#allocation2 + $0x9c] sm:$0x1] %v330_v60 }
  0x53   : > { %381 = vst [vmem:[#allocation2 + $0xa4] sm:$0x1] %v380_v61  ;;  %v1132_v6 = vor.u32 %v1131_v58, %v1127_v46  ;;  %v7625_v7 = vld [vmem:[#allocation2 + $0x68] ss:$0 sps:$4 sm:$0x11]   ;;  %v630_v10 = vshrl.u32 %v415_v57, 16 }
  0x54   : > { %v416_v9 = vld [vmem:[%s7393_s29 + $0x64] sm:$0xf]  ;;  %v1139_v11 = vshrl.u32 %v7623_v63, 16  ;;  %v1141_v13 = vshll.u32 %v7623_v63, 16  ;;  %v575_v14 = vor.u32 %v573_v59, %v572_v5  ;;  %v577_v15 = vrot.slane %v572_v5, 4  ;;  %v7211_v18 = vld [vmem:[%s11317_s1 + $0x10] sm:$0xff]  }
  0x55   : > { %v803_v16 = vld [vmem:[#allocation2 + $0x6c] sm:$0xf]  ;;  %v323_v17 = vld [vmem:[#allocation2 + $0x84] sm:$0x1]  ;;  %v7634_v19 = vsel %vm1041_vm6, %v1132_v6, %v1136_v62  ;;  %v1146_v20 = vshll.u32 %v7625_v7, 16  ;;  %v632_v24 = vrot.slane %v630_v10, 7  ;;  %6180 = vmatpush3.bf16.msra.mxu0 %v7211_v18  ;;  %6665 = vmatpush3.bf16.msra.mxu1 %v7211_v18 }
  0x56   : > { %v804_v21 = vsel %vm7403_vm8, %v567_v0, %v803_v16  ;;  %v807_v22 = vld [vmem:[#allocation2 + $0x74] sm:$0x1]  ;;  %1248 = vrot.lane.b32.xlu0 %v7634_v19, %s7305_s11  ;;  %v1143_v25 = vrot.slane %v1141_v13, 1  ;;  %v576_v26 = vsel %vm7411_vm9, %v568_v3, %v575_v14  ;;  %v633_v28 = vshll.u32 %v415_v57, 16  ;;  %v373_v29 = vld [vmem:[#allocation2 + $0x8c] sm:$0x1] }
  0x57   : > { %805 = vst [vmem:[#allocation2 + $0x6c] sm:$0xf] %v804_v21  ;;  %v808_v27 = vsel %vm7366_vm3, %v577_v15, %v807_v22  ;;  %v411_v30 = vld [vmem:[%s7393_s29 + $0x50] sm:$0xf]  ;;  %v1148_v32 = vrot.slane %v1146_v20, 1  ;;  %v7646_v33 = vld [vmem:[#allocation2 + $0x78] sm:$0xff]  }
  0x58   : > { %806 = vst.msk [vmem:[#allocation2 + $0x70] sm:$0xf] %vm280_vm0, %v576_v26  ;;  %809 = vst [vmem:[#allocation2 + $0x74] sm:$0x1] %v808_v27  ;;  %v1144_v34 = vor.u32 %v1143_v25, %v1139_v11  ;;  %v635_v40 = vor.u32 %v633_v28, %v632_v24  ;;  %v636_v41 = vrot.slane %v632_v24, 4  ;;  %v638_v44 = vshrl.u32 %v416_v9, 16 }
  0x59   : > { %v7649_v38 = vld [vmem:[#allocation2 + $0x80] ss:$0 sps:$4 sm:$0x11]   ;;  %v7212_v45 = vld [vmem:[%s11317_s1 + $0x48] sm:$0xff]   ;;  %v1163_v46 = vshrl.u32 %v7646_v33, 16  ;;  %v1165_v47 = vshll.u32 %v7646_v33, 16 }
  0x5a   : > { %v641_v48 = vshll.u32 %v416_v9, 16  ;;  %v831_v50 = vld [vmem:[#allocation2 + $0x9c] sm:$0xf]  ;;  %v324_v51 = vsel %vm7366_vm3, 0, %v323_v17  ;;  %v7659_v54 = vsel %vm1041_vm6, %v1144_v34, %v1148_v32  ;;  %v1170_v55 = vshll.u32 %v7649_v38, 16  ;;  %6181 = vmatprep.subr.bf16.mxu0 %v7212_v45  ;;  %6658 = vmatprep.subr.bf16.mxu1 %v7212_v45  ;;  %v7213_v13 = vld [vmem:[%s11317_s1 + $0x8] sm:$0xff]  }
  0x5b   : > { %v640_v56 = vrot.slane %v638_v44, 7  ;;  %v832_v57 = vsel %vm7403_vm8, %v635_v40, %v831_v50  ;;  %v835_v58 = vld [vmem:[#allocation2 + $0xa4] sm:$0x1]  ;;  %325 = vst [vmem:[#allocation2 + $0x84] sm:$0x1] %v324_v51  ;;  %1250 = vrot.lane.b32.xlu1 %v7659_v54, %s7305_s11  ;;  %v1167_v60 = vrot.slane %v1165_v47, 1  ;;  %6182 = vmatpush3.bf16.msra.mxu0 %v7213_v13 }
  0x5c   : > { %v412_v59 = vld [vmem:[%s7393_s29 + $0x54] sm:$0xf]  ;;  %833 = vst [vmem:[#allocation2 + $0x9c] sm:$0xf] %v832_v57  ;;  %v374_v61 = vsel %vm7373_vm5, 0, %v373_v29  ;;  %v596_v62 = vshrl.u32 %v411_v30, 16  ;;  %6666 = vmatpush3.bf16.msra.mxu1 %v7213_v13 }
  0x5d   : > { %v599_v0 = vshll.u32 %v411_v30, 16  ;;  %v326_v3 = vld [vmem:[#allocation2 + $0x90] sm:$0x1]  ;;  %v1172_v5 = vrot.slane %v1170_v55, 1  ;;  %v643_v6 = vor.u32 %v641_v48, %v640_v56  ;;  %v645_v9 = vrot.slane %v640_v56, 4  ;;  %v7214_v18 = vld [vmem:[%s11317_s1 + $0x40] sm:$0xff]  }
  0x5e   : > { %375 = vst [vmem:[#allocation2 + $0x8c] sm:$0x1] %v374_v61  ;;  %v604_v10 = vshrl.u32 %v412_v59, 16  ;;  %v376_v11 = vld [vmem:[#allocation2 + $0x98] sm:$0x1]  ;;  %v1168_v14 = vor.u32 %v1167_v60, %v1163_v46  ;;  %v598_v15 = vrot.slane %v596_v62, 7  ;;  %6183 = vmatprep.subr.bf16.mxu0 %v7214_v18  ;;  %6659 = vmatprep.subr.bf16.mxu1 %v7214_v18 }
  0x5f   : > { %v607_v16 = vshll.u32 %v412_v59, 16  ;;  %v327_v17 = vsel %vm7366_vm3, 0, %v326_v3  ;;  %v7677_v20 = vld [vmem:[#allocation2 + $0x6c] sm:$0xff]   ;;  %v644_v21 = vsel %vm7411_vm9, %v636_v41, %v643_v6  ;;  %v836_v22 = vsel %vm7366_vm3, %v645_v9, %v835_v58  ;;  %v7686_v26 = vld [vmem:[#allocation2 + $0x74] ss:$0 sps:$4 sm:$0x11]  }
  0x60   : > { %v606_v24 = vrot.slane %v604_v10, 7  ;;  %328 = vst [vmem:[#allocation2 + $0x90] sm:$0x1] %v327_v17  ;;  %v7684_v25 = vsel %vm1041_vm6, %v1168_v14, %v1172_v5  ;;  %834 = vst.msk [vmem:[#allocation2 + $0xa0] sm:$0xf] %vm280_vm0, %v644_v21  ;;  %v601_v27 = vor.u32 %v599_v0, %v598_v15  ;;  %v602_v28 = vrot.slane %v598_v15, 4 }
  0x61   : > { %837 = vst [vmem:[#allocation2 + $0xa4] sm:$0x1] %v836_v22  ;;  %v377_v29 = vsel %vm7373_vm5, 0, %v376_v11  ;;  %v7215_v30 = vld [vmem:[%s11317_s1] sm:$0xff]   ;;  %1254 = vrot.lane.b32.xlu0 %v7684_v25, %s7305_s11  ;;  %v1151_v32 = vshrl.u32 %v7677_v20, 16  ;;  %v1153_v34 = vshll.u32 %v7677_v20, 16 }
  0x62   : > { %v609_v40 = vor.u32 %v607_v16, %v606_v24  ;;  %v611_v41 = vrot.slane %v606_v24, 4  ;;  %378 = vst [vmem:[#allocation2 + $0x98] sm:$0x1] %v377_v29  ;;  %v413_v44 = vld [vmem:[%s7393_s29 + $0x58] sm:$0xf]  ;;  %v1158_v46 = vshll.u32 %v7686_v26, 16  ;;  %6184 = vmatpush3.bf16.msra.mxu0 %v7215_v30  ;;  %6667 = vmatpush3.bf16.msra.mxu1 %v7215_v30 }
  0x63   : > { %v7702_v45 = vld [vmem:[%s11317_s1 + $0x118] sm:$0xff]   ;;  %v817_v47 = vld [vmem:[#allocation2 + $0x84] sm:$0xf]  ;;  %v613_v50 = vshrl.u32 %v413_v44, 16  ;;  %v1155_v51 = vrot.slane %v1153_v34, 1  ;;  %v616_v57 = vshll.u32 %v413_v44, 16 }
  0x64   : > { %v414_v48 = vld [vmem:[%s7393_s29 + $0x5c] sm:$0xf]  ;;  %v610_v55 = vsel %vm7411_vm9, %v602_v28, %v609_v40  ;;  %v818_v56 = vsel %vm7403_vm8, %v601_v27, %v817_v47  ;;  %v332_v58 = vld [vmem:[#allocation2 + $0xa8] sm:$0x1]  ;;  %v1160_v59 = vrot.slane %v1158_v46, 1  ;;  %6490 = vmatprep.subr.bf16.mxu0 %v7702_v45  ;;  %vm1266_vm10 = vcmask 1046528  }
  0x65   : > { %819 = vst [vmem:[#allocation2 + $0x84] sm:$0xf] %v818_v56  ;;  %820 = vst.msk [vmem:[#allocation2 + $0x88] sm:$0xf] %vm280_vm0, %v610_v55  ;;  %v821_v60 = vld [vmem:[#allocation2 + $0x8c] sm:$0x1]  ;;  %v1156_v3 = vor.u32 %v1155_v51, %v1151_v32 }
  0x66   : > { %v615_v61 = vrot.slane %v613_v50, 7  ;;  %v621_v62 = vshrl.u32 %v414_v48, 16  ;;  %v624_v0 = vshll.u32 %v414_v48, 16  ;;  %v822_v5 = vsel %vm7366_vm3, %v611_v41, %v821_v60  ;;  %v382_v9 = vld [vmem:[#allocation2 + $0xb0] sm:$0x1]  ;;  %s7310_s23 = smov 16  }
  0x67   : > { %v333_v6 = vsel %vm7366_vm3, 0, %v332_v58  ;;  %v417_v10 = vld [vmem:[%s7393_s29 + $0x68] sm:$0xf]  ;;  %823 = vst [vmem:[#allocation2 + $0x8c] sm:$0x1] %v822_v5  ;;  %v383_v16 = vsel %vm7373_vm5, 0, %v382_v9  ;;  %v7720_v17 = vsel %vm1041_vm6, %v1156_v3, %v1160_v59 }
  0x68   : > { %v618_v11 = vor.u32 %v616_v57, %v615_v61  ;;  %v619_v13 = vrot.slane %v615_v61, 4  ;;  %v623_v14 = vrot.slane %v621_v62, 7  ;;  %v824_v15 = vld [vmem:[#allocation2 + $0x90] sm:$0xf]  ;;  %334 = vst [vmem:[#allocation2 + $0xa8] sm:$0x1] %v333_v6  ;;  %1252 = vrot.lane.b32.xlu1 %v7720_v17, %s7305_s11 }
  0x69   : > { %v7722_v18 = vld [vmem:[#allocation2 + $0x9c] sm:$0xff]   ;;  %384 = vst [vmem:[#allocation2 + $0xb0] sm:$0x1] %v383_v16  ;;  %v647_v21 = vshrl.u32 %v417_v10, 16  ;;  %v828_v29 = vld [vmem:[#allocation2 + $0x98] sm:$0x1] }
  0x6a   : > { %v7726_v22 = vld [vmem:[#allocation2 + $0xa4] ss:$0 sps:$4 sm:$0x11]   ;;  %v626_v24 = vor.u32 %v624_v0, %v623_v14  ;;  %v628_v27 = vrot.slane %v623_v14, 4  ;;  %v825_v28 = vsel %vm7403_vm8, %v618_v11, %v824_v15  ;;  %v1199_v30 = vshrl.u32 %v7722_v18, 16  ;;  %s7311_s26 = smov 48  }
  0x6b   : > { %v1201_v32 = vshll.u32 %v7722_v18, 16  ;;  %826 = vst [vmem:[#allocation2 + $0x90] sm:$0xf] %v825_v28  ;;  %v418_v34 = vld [vmem:[%s7393_s29 + $0x6c] sm:$0xf]  ;;  %v649_v40 = vrot.slane %v647_v21, 7 }
  0x6c   : > { %v650_v41 = vshll.u32 %v417_v10, 16  ;;  %v1206_v44 = vshll.u32 %v7726_v22, 16  ;;  %v627_v46 = vsel %vm7411_vm9, %v619_v13, %v626_v24  ;;  %v829_v47 = vsel %vm7366_vm3, %v628_v27, %v828_v29  ;;  %v335_v50 = vld [vmem:[#allocation2 + $0xb4] sm:$0x1]  ;;  %v7738_v55 = vld [vmem:[#allocation2 + $0x84] sm:$0xff]   ;;  %s7312_s9 = smov 56  }
  0x6d   : > { %v655_v48 = vshrl.u32 %v418_v34, 16  ;;  %v1203_v51 = vrot.slane %v1201_v32, 1  ;;  %827 = vst.msk [vmem:[#allocation2 + $0x94] sm:$0xf] %vm280_vm0, %v627_v46  ;;  %830 = vst [vmem:[#allocation2 + $0x98] sm:$0x1] %v829_v47 }
  0x6e   : > { %v652_v56 = vor.u32 %v650_v41, %v649_v40  ;;  %v385_v57 = vld [vmem:[#allocation2 + $0xbc] sm:$0x1]  ;;  %v1208_v58 = vrot.slane %v1206_v44, 1  ;;  %v653_v59 = vrot.slane %v649_v40, 4  ;;  %v658_v61 = vshll.u32 %v418_v34, 16  ;;  %s7313_s14 = smov 24  }
  0x6f   : > { %v657_v60 = vrot.slane %v655_v48, 7  ;;  %v419_v62 = vld [vmem:[%s7393_s29 + $0x70] sm:$0xf]  ;;  %v1204_v0 = vor.u32 %v1203_v51, %v1199_v30  ;;  %v7742_v3 = vld [vmem:[#allocation2 + $0x8c] ss:$0 sps:$4 sm:$0x11]  }
  0x70   : > { %v1175_v5 = vshrl.u32 %v7738_v55, 16  ;;  %v1177_v6 = vshll.u32 %v7738_v55, 16  ;;  %v838_v11 = vld [vmem:[#allocation2 + $0xa8] sm:$0xf]  ;;  %v842_v13 = vld [vmem:[#allocation2 + $0xb0] sm:$0x1] }
  0x71   : > { %v660_v9 = vor.u32 %v658_v61, %v657_v60  ;;  %v662_v10 = vrot.slane %v657_v60, 4  ;;  %v7747_v14 = vsel %vm1041_vm6, %v1204_v0, %v1208_v58  ;;  %v1182_v15 = vshll.u32 %v7742_v3, 16  ;;  %v420_v24 = vld [vmem:[%s7393_s29 + $0x74] sm:$0xf]  ;;  %v338_v32 = vld [vmem:[#allocation2 + $0xc0] sm:$0x1] }
  0x72   : > { %v839_v16 = vsel %vm7403_vm8, %v652_v56, %v838_v11  ;;  %v336_v21 = vsel %vm7366_vm3, 0, %v335_v50  ;;  %1260 = vrot.lane.b32.xlu0 %v7747_v14, %s7305_s11  ;;  %v1179_v27 = vrot.slane %v1177_v6, 1  ;;  %v386_v30 = vsel %vm7373_vm5, 0, %v385_v57  ;;  %v421_v46 = vld [vmem:[%s7393_s29 + $0x78] sm:$0xf]  ;;  %s7314_s15 = smov 40  }
  0x73   : > { %v661_v28 = vsel %vm7411_vm9, %v653_v59, %v660_v9  ;;  %840 = vst [vmem:[#allocation2 + $0xa8] sm:$0xf] %v839_v16  ;;  %v843_v29 = vsel %vm7366_vm3, %v662_v10, %v842_v13  ;;  %337 = vst [vmem:[#allocation2 + $0xb4] sm:$0x1] %v336_v21  ;;  %v1184_v34 = vrot.slane %v1182_v15, 1  ;;  %v664_v40 = vshrl.u32 %v419_v62, 16 }
  0x74   : > { %841 = vst.msk [vmem:[#allocation2 + $0xac] sm:$0xf] %vm280_vm0, %v661_v28  ;;  %844 = vst [vmem:[#allocation2 + $0xb0] sm:$0x1] %v843_v29  ;;  %v667_v41 = vshll.u32 %v419_v62, 16  ;;  %v672_v44 = vshrl.u32 %v420_v24, 16  ;;  %v1180_v47 = vor.u32 %v1179_v27, %v1175_v5 }
  0x75   : > { %387 = vst [vmem:[#allocation2 + $0xbc] sm:$0x1] %v386_v30  ;;  %v7765_v48 = vld [vmem:[#allocation2 + $0x90] sm:$0xff]   ;;  %v675_v50 = vshll.u32 %v420_v24, 16  ;;  %v422_v51 = vld [vmem:[%s7393_s29 + $0x7c] sm:$0xf] }
  0x76   : > { %v7768_v56 = vld [vmem:[#allocation2 + $0x98] ss:$0 sps:$4 sm:$0x11]   ;;  %v666_v58 = vrot.slane %v664_v40, 7  ;;  %v674_v59 = vrot.slane %v672_v44, 7  ;;  %v339_v57 = vsel %vm7366_vm3, 0, %v338_v32  ;;  %v7773_v60 = vsel %vm1041_vm6, %v1180_v47, %v1184_v34  ;;  %1326 = vrot.lane.b32.xlu0 %v7520_v4, %s7305_s11 }
  0x77   : > { %v1187_v61 = vshrl.u32 %v7765_v48, 16  ;;  %v1189_v62 = vshll.u32 %v7765_v48, 16  ;;  %340 = vst [vmem:[#allocation2 + $0xc0] sm:$0x1] %v339_v57  ;;  %v681_v0 = vshrl.u32 %v421_v46, 16  ;;  %1256 = vrot.lane.b32.xlu1 %v7773_v60, %s7305_s11  ;;  %v1194_v5 = vshll.u32 %v7768_v56, 16 }
  0x78   : > { %v669_v6 = vor.u32 %v667_v41, %v666_v58  ;;  %v670_v9 = vrot.slane %v666_v58, 4  ;;  %v677_v10 = vor.u32 %v675_v50, %v674_v59  ;;  %v679_v13 = vrot.slane %v674_v59, 4  ;;  %s7309_s29 = smov 8  }
  0x79   : > { %v1191_v11 = vrot.slane %v1189_v62, 1  ;;  %v683_v15 = vrot.slane %v681_v0, 7  ;;  %v684_v16 = vshll.u32 %v421_v46, 16  ;;  %v1196_v21 = vrot.slane %v1194_v5, 1 }
  0x7a   : > { %v678_v4 = vsel %vm7411_vm9, %v670_v9, %v677_v10  ;;  %v845_v24 = vld [vmem:[#allocation2 + $0xb4] sm:$0xf]  ;;  %v689_v27 = vshrl.u32 %v422_v51, 16  ;;  %1328 = vrot.lane.b32.xlu0 %v7500_v36, %s7305_s11  ;;  %v692_v59 = vshll.u32 %v422_v51, 16  ;;  %vm1429_vm11 = vcmask 523264  }
  0x7b   : > { %v1192_v28 = vor.u32 %v1191_v11, %v1187_v61  ;;  %v7786_v29 = vld [vmem:[#allocation2 + $0xa8] sm:$0xff]   ;;  %v846_v30 = vsel %vm7403_vm8, %v669_v6, %v845_v24  ;;  %848 = vst.msk [vmem:[#allocation2 + $0xb8] sm:$0xf] %vm280_vm0, %v678_v4  ;;  %v686_v32 = vor.u32 %v684_v16, %v683_v15  ;;  %v7791_v34 = vld [vmem:[#allocation2 + $0xb0] ss:$0 sps:$4 sm:$0x11]  }
  0x7c   : > { %847 = vst [vmem:[#allocation2 + $0xb4] sm:$0xf] %v846_v30  ;;  %v849_v40 = vld [vmem:[#allocation2 + $0xbc] sm:$0x1]  ;;  %v7793_v41 = vrot.slane %v689_v27, 7  ;;  %v1211_v46 = vshrl.u32 %v7786_v29, 16 }
  0x7d   : > { %v7796_v44 = vsel %vm1041_vm6, %v1192_v28, %v1196_v21  ;;  %v1213_v36 = vshll.u32 %v7786_v29, 16  ;;  %v850_v47 = vsel %vm7366_vm3, %v679_v13, %v849_v40  ;;  %v1218_v50 = vshll.u32 %v7791_v34, 16  ;;  %v7834_v24 = vld [vmem:[#allocation2 + $0xc] sm:$0xff]   ;;  %v7240_v28 = vld [vmem:[#allocation2 + $0x14] ss:$0 sps:$4 sm:$0x11]  }
  0x7e   : > { %1258 = vrot.lane.b32.xlu1 %v7796_v44, %s7305_s11  ;;  %851 = vst [vmem:[#allocation2 + $0xbc] sm:$0x1] %v850_v47  ;;  %v687_v58 = vrot.slane %v683_v15, 4  ;;  %v852_v57 = vld [vmem:[#allocation2 + $0xc0] sm:$0xf]  ;;  %1332 = vrot.lane.b32.xlu0 %v7599_v37, %s7305_s11  ;;  %v694_v5 = vor.u32 %v692_v59, %v7793_v41  ;;  %v1270_v27 = vrot.slane %v7834_v24, 1 }
  0x7f   : > { %v1215_v61 = vrot.slane %v1213_v36, 1  ;;  %v853_v62 = vsel %vm7403_vm8, %v686_v32, %v852_v57  ;;  %v1220_v0 = vrot.slane %v1218_v50, 1  ;;  %v1271_v30 = vrot.slane %v7240_v28, 1  ;;  %v7218_v32 = vld [vmem:[%s11317_s1 + $0xf8] sm:$0xff]  }
  0x80   : > { %854 = vst [vmem:[#allocation2 + $0xc0] sm:$0xf] %v853_v62  ;;  %v695_v9 = vsel %vm7411_vm9, %v687_v58, %v694_v5  ;;  %v7242_v47 = vld [vmem:[#allocation2 + $0x2c] ss:$0 sps:$4 sm:$0x11]   ;;  %6281 = vmatprep.subr.bf16.mxu1 %v7218_v32  ;;  %v7857_v59 = vld [vmem:[#allocation2 + $0x3c] sm:$0xff]  }
  0x81   : > { %v1216_v6 = vor.u32 %v1215_v61, %v1211_v46  ;;  %855 = vst.msk [vmem:[#allocation2 + $0xc4] sm:$0xf] %vm280_vm0, %v695_v9  ;;  %v7845_v40 = vsel %vm1266_vm10, %v1270_v27, %v1271_v30  ;;  %v7847_v46 = vld [vmem:[#allocation2 + $0x24] sm:$0xff]   ;;  %v1277_v50 = vrot.slane %v7242_v47, 1  ;;  %v1282_v57 = vrot.slane %v7857_v59, 1 }
  0x82   : > { %1336 = vrot.lane.b32.xlu0 %v7677_v20, %s7305_s11  ;;  %v1276_v36 = vrot.slane %v7847_v46, 1  ;;  %v7244_v61 = vld [vmem:[#allocation2 + $0x44] ss:$0 sps:$4 sm:$0x11]   ;;  %v1289_v5 = vrot.slane %v7606_v43, 1  ;;  %v1294_v9 = vrot.slane %v7677_v20, 1 }
  0x83   : > { %v7813_v10 = vsel %vm1041_vm6, %v1216_v6, %v1220_v0  ;;  %v7815_v51 = vld [vmem:[#allocation2 + $0xb4] sm:$0xff]   ;;  %v1283_v62 = vrot.slane %v7244_v61, 1  ;;  %v1288_v0 = vrot.slane %v7599_v37, 1  ;;  %v7245_v37 = vld [vmem:[#allocation2] sm:$0xff]   ;;  %v1300_v27 = vrot.slane %v7738_v55, 1 }
  0x84   : > { %1262 = vrot.lane.b32.xlu1 %v7813_v10, %s7305_s11  ;;  %v1223_v11 = vshrl.u32 %v7815_v51, 16  ;;  %v1225_v39 = vshll.u32 %v7815_v51, 16  ;;  %v7855_v58 = vsel %vm1266_vm10, %v1276_v36, %v1277_v50  ;;  %v7246_v43 = vld [vmem:[#allocation2 + $0x8] ss:$0 sps:$4 sm:$0x11]   ;;  %v1301_v28 = vrot.slane %v7742_v3, 1 }
  0x85   : > { %v7822_v31 = vld [vmem:[#allocation2 + $0xbc] ss:$0 sps:$4 sm:$0x11]   ;;  %v7874_v6 = vsel %vm1266_vm10, %v1288_v0, %v1289_v5  ;;  %v7248_v50 = vld [vmem:[#allocation2 + $0x20] ss:$0 sps:$4 sm:$0x11]  }
  0x86   : > { %v1230_v13 = vshll.u32 %v7822_v31, 16  ;;  %1340 = vrot.lane.b32.xlu0 %v7738_v55, %s7305_s11  ;;  %v1227_v15 = vrot.slane %v1225_v39, 1  ;;  %v7894_v36 = vld [vmem:[#allocation2 + $0x18] sm:$0xff]   ;;  %v7217_v61 = vld [vmem:[%s11317_s1 + $0x110] sm:$0xff]   ;;  %v696_v0 = vrot.slane %v7793_v41, 4  ;;  %v1307_v41 = vrot.slane %v7726_v22, 1 }
  0x87   : > { %v1273_v47 = vrot.slane %v7894_v36, 1  ;;  %v7909_v5 = vld [vmem:[#allocation2 + $0x30] sm:$0xff]   ;;  %vm2424_vm12 = vcmask 261120   ;;  %vm2427_vm13 = vcmask 254976   ;;  %vm4147_vm14 = vcmask 64512  }
  0x88   : > { %v1232_v16 = vrot.slane %v1230_v13, 1  ;;  %v1228_v21 = vor.u32 %v1227_v15, %v1223_v11  ;;  %v1295_v11 = vrot.slane %v7686_v26, 1  ;;  %v1267_v13 = vrot.slane %v7245_v37, 1 }
  0x89   : > { %v1268_v15 = vrot.slane %v7246_v43, 1  ;;  %vm4150_vm15 = vcmask 58368   ;;  %vm2778_vm0 = vcmask 1045504   ;;  %vm2434_vm1 = vcmask 253952  }
  0x8a   : > { %1344 = vrot.lane.b32.xlu0 %v7722_v18, %s7305_s11  ;;  %v7832_v4 = vsel %vm1041_vm6, %v1228_v21, %v1232_v16  ;;  %v388_v16 = vld [vmem:[#allocation2 + $0xc8] sm:$0x1]  ;;  %v7880_v21 = vld [vmem:[#allocation2 + $0xc0] sm:$0xff]   ;;  %v7889_v30 = vsel %vm1266_vm10, %v1294_v9, %v1295_v11  ;;  %v1279_v9 = vrot.slane %v7909_v5, 1  ;;  %vm3461_vm2 = vcmask 785408  }
  0x8b   : > { %11349 = vst [vmem:[#allocation5_spill] sm:$0xff] %v7832_v4  ;;  %1264 = vrot.lane.b32.xlu1 %v7832_v4, %s7305_s11  ;;  %v389_v26 = vsel %vm7373_vm5, 0, %v388_v16  ;;  %v1269_v32 = vsel %vm1266_vm10, %v1267_v13, %v1268_v15  ;;  %v7250_v11 = vld [vmem:[#allocation2 + $0x38] ss:$0 sps:$4 sm:$0x11]   ;;  %v1306_v16 = vrot.slane %v7722_v18, 1 }
  0x8c   : > { %390 = vst [vmem:[#allocation2 + $0xc8] sm:$0x1] %v389_v26  ;;  %v1280_v13 = vrot.slane %v7250_v11, 1  ;;  %v1358_v1 = vshll.u32 %v7880_v21, 16  ;;  %vm5343_vm4 = vcmask 195584   ;;  %vm5310_vm5 = vcmask 130048  }
  0x8d   : > { %vm5441_vm7 = vcmask 392192   ;;  %vm5474_vm8 = vcmask 457728   ;;  %vm5555_vm9 = vcmask 588800  }
  0x8e   : > { %1348 = vrot.lane.b32.xlu0 %v7815_v51, %s7305_s11  ;;  %v1360_v11 = vrot.slane %v1358_v1, 1 }
  0x8f   : > { %1330 = vrot.lane.b32.xlu1 %v7561_v53, %s7305_s11  ;;  %v7865_v53 = vsel %vm1266_vm10, %v1282_v57, %v1283_v62  ;;  %v1274_v57 = vrot.slane %v7248_v50, 1  ;;  %v7904_v62 = vsel %vm1266_vm10, %v1300_v27, %v1301_v28  ;;  %v1286_v50 = vrot.slane %v7578_v8, 1 }
  0x90   : > { %v1235_v39 = vpop.permute.xlu0 %1234  ;;  %v1291_v8 = vrot.slane %v7623_v63, 1 }
  0x91   : > { %v1431_v43 = vsel %vm1429_vm11, %v7245_v37, %v1235_v39  ;;  %v7914_v15 = vsel %vm1266_vm10, %v1273_v47, %v1274_v57  ;;  %v7219_v39 = vld [vmem:[%s11317_s1 + $0x108] sm:$0xff]   ;;  %v1312_v37 = vrot.slane %v7815_v51, 1  ;;  %v7940_v57 = vsel %vm1266_vm10, %v1306_v16, %v1307_v41 }
  0x92   : > { %1370 = vrot.lane.b32.xlu0 %v7845_v40, %s7305_s11 }
  0x93   : > { %1334 = vrot.lane.b32.xlu1 %v7623_v63, %s7305_s11  ;;  %v856_v28 = vld [vmem:[#allocation2 + $0xc8] sm:$0x1] }
  0x94   : > { %v857_v22 = vsel %vm7366_vm3, %v696_v0, %v856_v28  ;;  %vm4157_vm3 = vcmask 57344  }
  0x95   : > { %858 = vst [vmem:[#allocation2 + $0xc8] sm:$0x1] %v857_v22  ;;  %v1303_v22 = vrot.slane %v7765_v48, 1 }
  0x96   : > { %1374 = vrot.lane.b32.xlu0 %v7855_v58, %s7305_s11 }
  0x97   : > { %1338 = vrot.lane.b32.xlu1 %v7646_v33, %s7305_s11 }
  0x9a   : > { %1378 = vrot.lane.b32.xlu0 %v7865_v53, %s7305_s11  ;;  %v1321_v3 = vpop.permute.xlu0 %1320 }
  0x9b   : > { %1342 = vrot.lane.b32.xlu1 %v7765_v48, %s7305_s11  ;;  %v1480_v2 = vsel %vm1429_vm11, %v1269_v32, %v1321_v3  ;;  %v1313_v32 = vrot.slane %v7822_v31, 1 }
  0x9c   : > { %1973 = vmatprep.mubr.bf16.mxu0 %v1480_v2  ;;  %v7232_v2 = vld [vmem:[%s11317_s1 + $0x100] sm:$0xff]   ;;  %v7234_v16 = vld [vmem:[#allocation2 + $0xc8] ss:$0 sps:$4 sm:$0x11]  }
  0x9d   : > { %1974 = vmatmul.mubr.bf16.vlgmr.msra.gmra.mxu0 %v1431_v43  ;;  %v7946_v3 = vsel %vm1266_vm10, %v1312_v37, %v1313_v32 }
  0x9e   : > { %1382 = vrot.lane.b32.xlu0 %v7874_v6, %s7305_s11  ;;  %v1323_v27 = vpop.permute.xlu0 %1322  ;;  %6491 = vmatpush3.bf16.msra.mxu0 %v7702_v45  ;;  %v7933_v45 = vsel %vm1266_vm10, %v1279_v9, %v1280_v13  ;;  %v1356_v9 = vshrl.u32 %v7880_v21, 16 }
  0x9f   : > { %1346 = vrot.lane.b32.xlu1 %v7786_v29, %s7305_s11  ;;  %v1484_v26 = vsel %vm1429_vm11, %v7845_v40, %v1323_v27  ;;  %6492 = vmatprep.subr.bf16.mxu0 %v7217_v61  ;;  %v7935_v40 = vld [vmem:[#allocation2 + $0x48] sm:$0xff]   ;;  %v1298_v27 = vrot.slane %v7649_v38, 1 }
  0xa0   : > { %1981 = vmatprep.mubr.bf16.mxu0 %v1484_v26  ;;  %v1285_v47 = vrot.slane %v7935_v40, 1  ;;  %v1361_v28 = vor.u32 %v1360_v11, %v1356_v9  ;;  %v1363_v26 = vshll.u32 %v7234_v16, 16 }
  0xa2   : > { %1386 = vrot.lane.b32.xlu0 %v7889_v30, %s7305_s11  ;;  %v1325_v31 = vpop.permute.xlu0 %1324  ;;  %6493 = vmatpush3.bf16.msra.mxu0 %v7217_v61  ;;  %v7955_v0 = vsel %vm1266_vm10, %v1285_v47, %v1286_v50  ;;  %v1292_v61 = vrot.slane %v7625_v7, 1  ;;  %v1297_v7 = vrot.slane %v7646_v33, 1  ;;  %v7980_v33 = vld [vmem:[#allocation2 + $0xcc] sm:$0xff]   ;;  %v1304_v47 = vrot.slane %v7768_v56, 1 }
  0xa3   : > { %1350 = vrot.lane.b32.xlu1 %v7880_v21, %s7305_s11  ;;  %6494 = vmatprep.subr.bf16.mxu0 %v7219_v39  ;;  %v1488_v63 = vsel %vm1429_vm11, %v7914_v15, %v1325_v31  ;;  %v7993_v50 = vld [vmem:[#allocation2 + $0xd4] ss:$0 sps:$4 sm:$0x11]   ;;  %v1413_v1 = vshll.u32 %v7980_v33, 16  ;;  %v1367_v56 = vrot.slane %v7880_v21, 1 }
  0xa4   : > { %v7969_v41 = vsel %vm1266_vm10, %v1291_v8, %v1292_v61  ;;  %v7975_v37 = vsel %vm1266_vm10, %v1297_v7, %v1298_v27  ;;  %v7997_v31 = vsel %vm1266_vm10, %v1303_v22, %v1304_v47  ;;  %v1368_v8 = vrot.slane %v7234_v16, 1 }
  0xa5   : > { %v1411_v61 = vshrl.u32 %v7980_v33, 16  ;;  %v1415_v9 = vrot.slane %v1413_v1, 1  ;;  %v1418_v11 = vshll.u32 %v7993_v50, 16 }
  0xa6   : > { %1390 = vrot.lane.b32.xlu0 %v7904_v62, %s7305_s11  ;;  %v1237_v13 = vpop.permute.xlu0 %1236  ;;  %6495 = vmatpush3.bf16.msra.mxu0 %v7219_v39  ;;  %v1239_v39 = vpop.permute.xlu1 %1238 }
  0xa7   : > { %1372 = vrot.lane.b32.xlu1 %v7914_v15, %s7305_s11  ;;  %v1434_v43 = vsel %vm1429_vm11, %v7834_v24, %v1237_v13  ;;  %6496 = vmatprep.subr.bf16.mxu0 %v7232_v2  ;;  %v1365_v24 = vrot.slane %v1363_v26, 1  ;;  %v7986_v38 = vsel %vm1429_vm11, %v7894_v36, %v1239_v39  ;;  %v1310_v36 = vrot.slane %v7791_v34, 1 }
  0xa8   : > { %1982 = vmatmul.mubr.bf16.gmra.mxu0 %v1434_v43  ;;  %v8012_v43 = vsel %vm1266_vm10, %v1367_v56, %v1368_v8  ;;  %v1416_v34 = vor.u32 %v1415_v9, %v1411_v61 }
  0xa9   : > { %1989 = vmatprep.mubr.bf16.mxu0 %v1488_v63  ;;  %v7978_v32 = vsel %vm1041_vm6, %v1361_v28, %v1365_v24  ;;  %v1420_v63 = vrot.slane %v1418_v11, 1 }
  0xaa   : > { %1394 = vrot.lane.b32.xlu0 %v7940_v57, %s7305_s11  ;;  %6497 = vmatpush3.bf16.msra.mxu0 %v7232_v2  ;;  %11350 = vst [vmem:[#allocation6_spill] sm:$0xff] %v7978_v32  ;;  %v1309_v2 = vrot.slane %v7786_v29, 1  ;;  %v1241_v7 = vpop.permute.xlu1 %1240 }
  0xab   : > { %1376 = vrot.lane.b32.xlu1 %v7933_v45, %s7305_s11  ;;  %v1421_v16 = vsel %vm1041_vm6, %v1416_v34, %v1420_v63  ;;  %v8032_v56 = vsel %vm1429_vm11, %v7847_v46, %v1241_v7  ;;  %vm5408_vm6 = vcmask 326656  }
  0xac   : > { %v8007_v13 = vsel %vm1266_vm10, %v1309_v2, %v1310_v36 }
  0xae   : > { %1398 = vrot.lane.b32.xlu0 %v7946_v3, %s7305_s11  ;;  %v1245_v28 = vpop.permute.xlu1 %1244 }
  0xaf   : > { %1380 = vrot.lane.b32.xlu1 %v7955_v0, %s7305_s11 }
  0xb0   : > { %1990 = vmatmul.mubr.bf16.gmra.mxu0 %v7986_v38 }
  0xb2   : > { %1422 = vrot.lane.b32.xlu0 %v7978_v32, %s7305_s11  ;;  %v7222_v32 = vld [vmem:[%s11317_s1 + $0xb0] sm:$0xff]  }
  0xb3   : > { %1384 = vrot.lane.b32.xlu1 %v7969_v41, %s7305_s11 }
  0xb5   : > { %v1243_v27 = vpop.permute.xlu0 %1242 }
  0xb6   : > { %v8041_v63 = vsel %vm1429_vm11, %v7909_v5, %v1243_v27  ;;  %v7221_v5 = vld [vmem:[%s11317_s1 + $0xf0] sm:$0xff]  }
  0xb7   : > { %1388 = vrot.lane.b32.xlu1 %v7975_v37, %s7305_s11 }
  0xbb   : > { %1392 = vrot.lane.b32.xlu1 %v7997_v31, %s7305_s11 }
  0xbf   : > { %1396 = vrot.lane.b32.xlu1 %v8007_v13, %s7305_s11 }
  0xc0   : > { %v1247_v24 = vpop.permute.xlu1 %1246 }
  0xc3   : > { %1400 = vrot.lane.b32.xlu1 %v8012_v43, %s7305_s11 }
  0xc7   : > { %1424 = vrot.lane.b32.xlu1 %v1421_v16, %s7305_s11 }
  0xc8   : > { %v8018_v26 = vpop.permute.xlu0 %1248 }
  0xcd   : > { %v8022_v22 = vpop.permute.xlu1 %1250 }
  0xd3   : > { %v8020_v39 = vpop.permute.xlu0 %1254 }
  0xda   : > { %v8026_v1 = vpop.permute.xlu1 %1252 }
  0xe4   : > { %v8024_v47 = vpop.permute.xlu0 %1260 }
  0xe8   : > { %v1327_v2 = vpop.permute.xlu0 %1326 }
  0xe9   : > { %v1492_v36 = vsel %vm1429_vm11, %v7855_v58, %v1327_v2  ;;  %v8035_v8 = vpop.permute.xlu1 %1256 }
  0xea   : > { %1997 = vmatprep.mubr.bf16.mxu0 %v1492_v36  ;;  %v7220_v36 = vld [vmem:[%s11317_s1 + $0xb8] sm:$0xff]  }
  0xeb   : > { %1998 = vmatmul.mubr.bf16.gmra.mxu0 %v8032_v56 }
  0xec   : > { %v1329_v61 = vpop.permute.xlu0 %1328 }
  0xed   : > { %v1496_v9 = vsel %vm1429_vm11, %v7933_v45, %v1329_v61 }
  0xee   : > { %2005 = vmatprep.mubr.bf16.mxu0 %v1496_v9 }
  0xf0   : > { %v1333_v11 = vpop.permute.xlu0 %1332  ;;  %v1259_v34 = vpop.permute.xlu1 %1258 }
  0xf1   : > { %v8060_v9 = vsel %vm1429_vm11, %v7765_v48, %v1259_v34  ;;  %v8073_v48 = vsel %vm1429_vm11, %v7857_v59, %v1245_v28  ;;  %v7224_v34 = vld [vmem:[%s11317_s1 + $0xa8] sm:$0xff]   ;;  %v7226_v59 = vld [vmem:[%s11317_s1 + $0xa0] sm:$0xff]  }
  0xf3   : > { %2006 = vmatmul.mubr.bf16.gmra.mxu0 %v8041_v63 }
  0xf4   : > { %v1337_v16 = vpop.permute.xlu0 %1336 }
  0xf6   : > { %v8044_v46 = vpop.permute.xlu1 %1262 }
  0xf8   : > { %v8046_v7 = vpop.permute.xlu0 %1340 }
  0xfc   : > { %v1345_v2 = vpop.permute.xlu0 %1344 }
  0xfd   : > { %v1528_v61 = vsel %vm1429_vm11, %v7997_v31, %v1345_v2  ;;  %v8056_v27 = vpop.permute.xlu1 %1264  ;;  %v7223_v2 = vld [vmem:[%s11317_s1 + $0xe8] sm:$0xff]  }
  0xfe   : > { %2069 = vmatprep.mubr.bf16.mxu1 %v1528_v61 }
  0xff   : > { %2070 = vmatmul.mubr.bf16.vlgmr.msra.gmra.mxu1 %v8060_v9 }
 0x100   : > { %6282 = vmatpush3.bf16.msra.mxu1 %v7220_v36  ;;  %v1504_v36 = vsel %vm1429_vm11, %v7955_v0, %v1333_v11  ;;  %v8092_v11 = vsel %vm1429_vm11, %v7935_v40, %v1247_v24  ;;  %v7230_v40 = vld [vmem:[%s11317_s1 + $0x90] sm:$0xff]  }
 0x101   : > { %6283 = vmatprep.subr.bf16.mxu1 %v7221_v5  ;;  %v1331_v4 = vpop.permute.xlu1 %1330 }
 0x102   : > { %v1500_v61 = vsel %vm1429_vm11, %v7865_v53, %v1331_v4  ;;  %v7225_v4 = vld [vmem:[%s11317_s1 + $0xe0] sm:$0xff]  }
 0x103   : > { %2013 = vmatprep.mubr.bf16.mxu0 %v1500_v61 }
 0x104   : > { %6284 = vmatpush3.bf16.msra.mxu1 %v7222_v32  ;;  %2014 = vmatmul.mubr.bf16.gmra.mxu0 %v8073_v48  ;;  %v7227_v32 = vld [vmem:[%s11317_s1 + $0xd8] sm:$0xff]  }
 0x105   : > { %6285 = vmatprep.subr.bf16.mxu1 %v7223_v2  ;;  %v1335_v5 = vpop.permute.xlu1 %1334  ;;  %2021 = vmatprep.mubr.bf16.mxu0 %v1504_v36  ;;  %v7228_v2 = vld [vmem:[%s11317_s1 + $0x98] sm:$0xff]  }
 0x106   : > { %v1508_v61 = vsel %vm1429_vm11, %v7874_v6, %v1335_v5 }
 0x108   : > { %6286 = vmatpush3.bf16.msra.mxu1 %v7224_v34  ;;  %v7229_v34 = vld [vmem:[%s11317_s1 + $0xd0] sm:$0xff]  }
 0x109   : > { %6287 = vmatprep.subr.bf16.mxu1 %v7225_v4  ;;  %v1339_v28 = vpop.permute.xlu1 %1338  ;;  %v1349_v4 = vpop.permute.xlu0 %1348 }
 0x10a   : > { %v1536_v5 = vsel %vm1429_vm11, %v8007_v13, %v1349_v4  ;;  %v7233_v4 = vld [vmem:[%s11317_s1 + $0x88] sm:$0xff]  }
 0x10c   : > { %6288 = vmatpush3.bf16.msra.mxu1 %v7226_v59  ;;  %2022 = vmatmul.mubr.bf16.gmra.mxu0 %v8092_v11 }
 0x10d   : > { %6289 = vmatprep.subr.bf16.mxu1 %v7227_v32  ;;  %v1343_v36 = vpop.permute.xlu1 %1342  ;;  %2029 = vmatprep.mubr.bf16.mxu0 %v1508_v61  ;;  %v7231_v32 = vld [vmem:[%s11317_s1 + $0xc8] sm:$0xff]   ;;  %v7252_v61 = vld [vmem:[#allocation2 + $0x54] sm:$0xff]  }
 0x110   : > { %6290 = vmatpush3.bf16.msra.mxu1 %v7228_v2  ;;  %v8116_v2 = vsel %vm1429_vm11, %v7722_v18, %v8024_v47  ;;  %v7235_v18 = vld [vmem:[%s11317_s1 + $0xc0] sm:$0xff]  }
 0x111   : > { %6291 = vmatprep.subr.bf16.mxu1 %v7229_v34  ;;  %v1347_v24 = vpop.permute.xlu1 %1346  ;;  %v8120_v34 = vsel %vm1429_vm11, %v7252_v61, %v8018_v26  ;;  %v7236_v47 = vld [vmem:[%s11317_s1 + $0x80] sm:$0xff]   ;;  %v8150_v61 = vsel %vm1429_vm11, %v7815_v51, %v8056_v27  ;;  %v7254_v51 = vld [vmem:[#allocation2 + $0x78] sm:$0xff]  }
 0x112   : > { %v1532_v59 = vsel %vm1429_vm11, %v7940_v57, %v1347_v24  ;;  %v1512_v24 = vsel %vm1429_vm11, %v7969_v41, %v1337_v16  ;;  %v8140_v16 = vsel %vm1429_vm11, %v7786_v29, %v8044_v46  ;;  %v1458_v29 = vsel %vm1429_vm11, %v7677_v20, %v8026_v1  ;;  %v1371_v46 = vpop.permute.xlu0 %1370 }
 0x113   : > { %2077 = vmatprep.mubr.bf16.mxu1 %v1532_v59  ;;  %v7253_v59 = vld [vmem:[#allocation2 + $0x60] sm:$0xff]   ;;  %v1461_v27 = vsel %vm1429_vm11, %v7254_v51, %v8020_v39  ;;  %v1524_v20 = vsel %vm1429_vm11, %v7904_v62, %v1343_v36 }
 0x114   : > { %6292 = vmatpush3.bf16.msra.mxu1 %v7230_v40  ;;  %2030 = vmatmul.mubr.bf16.gmra.mxu0 %v8120_v34 }
 0x115   : > { %2078 = vmatmul.mubr.bf16.gmra.mxu1 %v8116_v2  ;;  %2037 = vmatprep.mubr.bf16.mxu0 %v1512_v24  ;;  %v1351_v26 = vpop.permute.xlu1 %1350 }
 0x116   : > { %2085 = vmatprep.mubr.bf16.mxu1 %v1536_v5  ;;  %6293 = vmatprep.subr.bf16.mxu1 %v7231_v32  ;;  %v1540_v40 = vsel %vm1429_vm11, %v7946_v3, %v1351_v26  ;;  %v1455_v5 = vsel %vm1429_vm11, %v7253_v59, %v8022_v22  ;;  %v1516_v32 = vsel %vm1429_vm11, %v7889_v30, %v1339_v28  ;;  %v1375_v39 = vpop.permute.xlu0 %1374 }
 0x117   : > { %v1520_v22 = vsel %vm1429_vm11, %v7975_v37, %v8046_v7  ;;  %v1544_v28 = vsel %vm1429_vm11, %v7498_v35, %v1371_v46  ;;  %v1464_v35 = vsel %vm1429_vm11, %v7738_v55, %v8035_v8 }
 0x118   : > { %6294 = vmatpush3.bf16.msra.mxu1 %v7233_v4 }
 0x119   : > { %6295 = vmatprep.subr.bf16.mxu1 %v7235_v18  ;;  %v1373_v1 = vpop.permute.xlu1 %1372 }
 0x11c   : > { %6296 = vmatpush3.bf16.msra.mxu1 %v7236_v47  ;;  %2038 = vmatmul.mubr.bf16.gmra.mxu0 %v1455_v5 }
 0x11d   : > { %2086 = vmatmul.mubr.bf16.gmra.mxu1 %v8140_v16  ;;  %2045 = vmatprep.mubr.bf16.mxu0 %v1516_v32 }
 0x11e   : > { %2093 = vmatprep.mubr.bf16.mxu1 %v1540_v40 }
 0x124   : > { %2046 = vmatmul.mubr.bf16.gmra.mxu0 %v1458_v29 }
 0x125   : > { %2094 = vmatmul.mubr.bf16.gmra.mxu1 %v8150_v61  ;;  %2053 = vmatprep.mubr.bf16.mxu0 %v1520_v22 }
 0x126   : > { %2134 = vmatprep.mubr.bf16.mxu1 %v7986_v38  ;;  %v1548_v38 = vsel %vm1429_vm11, %v7482_v23, %v1373_v1  ;;  %v1377_v23 = vpop.permute.xlu1 %1376 }
 0x127   : > { %v1556_v55 = vsel %vm1429_vm11, %v7559_v52, %v1377_v23 }
 0x12a   : > { %v1381_v52 = vpop.permute.xlu1 %1380 }
 0x12c   : > { %2054 = vmatmul.mubr.bf16.gmra.mxu0 %v1461_v27 }
 0x12d   : > { %2135 = vmatmul.mubr.bf16.vlgmr.msra.gmra.mxu1 %v1544_v28  ;;  %2061 = vmatprep.mubr.bf16.mxu0 %v1524_v20 }
 0x12e   : > { %2142 = vmatprep.mubr.bf16.mxu1 %v8032_v56  ;;  %v1552_v56 = vsel %vm1429_vm11, %v7508_v49, %v1375_v39  ;;  %v1379_v49 = vpop.permute.xlu0 %1378 }
 0x134   : > { %2062 = vmatmul.mubr.bf16.gmra.mxu0 %v1464_v35 }
 0x135   : > { %2143 = vmatmul.mubr.bf16.gmra.mxu1 %v1548_v38  ;;  %6498 = vmatprep.mubr.msk.bf16.mxu0 %vm1429_vm11, %v7914_v15  ;;  %v1426_v15 = vrot.slane %v7980_v33, 1 }
 0x136   : > { %2150 = vmatprep.mubr.bf16.mxu1 %v8041_v63 }
 0x13c   : > { %6499 = vmatmul.mubr.msk.bf16.vlgmr.msra.gmra.mxu0 %vm1429_vm11, %v7855_v58  ;;  %v1560_v58 = vsel %vm1429_vm11, %v7529_v12, %v1379_v49  ;;  %v1383_v12 = vpop.permute.xlu0 %1382 }
 0x13d   : > { %2151 = vmatmul.mubr.bf16.gmra.mxu1 %v1552_v56  ;;  %6502 = vmatprep.mubr.msk.bf16.mxu0 %vm1429_vm11, %v7933_v45  ;;  %v1427_v45 = vrot.slane %v7993_v50, 1 }
 0x13e   : > { %2158 = vmatprep.mubr.bf16.mxu1 %v8073_v48 }
 0x144   : > { %6503 = vmatmul.mubr.msk.bf16.gmra.mxu0 %vm1429_vm11, %v7865_v53  ;;  %v1564_v53 = vsel %vm1429_vm11, %v7604_v42, %v1381_v52  ;;  %v1385_v42 = vpop.permute.xlu1 %1384 }
 0x145   : > { %2159 = vmatmul.mubr.bf16.gmra.mxu1 %v1556_v55  ;;  %6506 = vmatprep.mubr.msk.bf16.mxu0 %vm1429_vm11, %v7955_v0 }
 0x146   : > { %2166 = vmatprep.mubr.bf16.mxu1 %v8092_v11 }
 0x148   : > { %v1389_v8 = vpop.permute.xlu1 %1388 }
 0x14c   : > { %6507 = vmatmul.mubr.msk.bf16.gmra.mxu0 %vm1429_vm11, %v7874_v6  ;;  %v1568_v6 = vsel %vm1429_vm11, %v7634_v19, %v1383_v12  ;;  %v11326_v19 = vmov 0.0   ;;  %v1393_v23 = vpop.permute.xlu1 %1392 }
 0x14d   : > { %2167 = vmatmul.mubr.bf16.gmra.mxu1 %v1560_v58  ;;  %6510 = vmatprep.mubr.msk.bf16.mxu0 %vm1429_vm11, %v7969_v41  ;;  %2425 = vst.msk [vmem:[#allocation3] sm:$0xff] %vm2424_vm12, %v11326_v19  ;;  %2426 = vst.msk [vmem:[#allocation3 + $0x8] sm:$0xff] %vm2424_vm12, %v11326_v19 }
 0x14e   : > { %2174 = vmatprep.mubr.bf16.mxu1 %v8120_v34  ;;  %2428 = vst.msk [vmem:[#allocation3 + $0x10] sm:$0x3] %vm2427_vm13, %v11326_v19  ;;  %2432 = vst.msk [vmem:[#allocation3 + $0x1a8] sm:$0x3] %vm2427_vm13, %v11326_v19  ;;  %3697 = vmatprep.subr.mxu1 %v11326_v19 }
 0x14f   : > { %2430 = vst.msk [vmem:[#allocation3 + $0x198] sm:$0xff] %vm2424_vm12, %v11326_v19  ;;  %2431 = vst.msk [vmem:[#allocation3 + $0x1a0] sm:$0xff] %vm2424_vm12, %v11326_v19 }
 0x150   : > { %4149 = vst.msk [vmem:[#allocation4 + $0x8] sm:$0xff] %vm4147_vm14, %v11326_v19  ;;  %4148 = vst.msk [vmem:[#allocation4] sm:$0xff] %vm4147_vm14, %v11326_v19 }
 0x151   : > { %4151 = vst.msk [vmem:[#allocation4 + $0x10] sm:$0x3] %vm4150_vm15, %v11326_v19  ;;  %4155 = vst.msk [vmem:[#allocation4 + $0x1a8] sm:$0x3] %vm4150_vm15, %v11326_v19 }
 0x152   : > { %4153 = vst.msk [vmem:[#allocation4 + $0x198] sm:$0xff] %vm4147_vm14, %v11326_v19  ;;  %4154 = vst.msk [vmem:[#allocation4 + $0x1a0] sm:$0xff] %vm4147_vm14, %v11326_v19 }
 0x153   : > { %2436 = vst.msk [vmem:[#allocation3 + $0x30] sm:$0x1] %vm2434_vm1, %v11326_v19  ;;  %2435 = vst.msk [vmem:[#allocation3 + $0x18] sm:$0x1] %vm2434_vm1, %v11326_v19 }
 0x154   : > { %6511 = vmatmul.mubr.msk.bf16.gmra.mxu0 %vm1429_vm11, %v7889_v30  ;;  %v1572_v30 = vsel %vm1429_vm11, %v7659_v54, %v1385_v42  ;;  %v1387_v54 = vpop.permute.xlu0 %1386  ;;  %v2500_v0 = vld [vmem:[#allocation3 + $0x8] sm:$0xff]  ;;  %2437 = vst.msk [vmem:[#allocation3 + $0x48] sm:$0x1] %vm2434_vm1, %v11326_v19  ;;  %2438 = vst.msk [vmem:[#allocation3 + $0x60] sm:$0x1] %vm2434_vm1, %v11326_v19 }
 0x155   : > { %2175 = vmatmul.mubr.bf16.gmra.mxu1 %v1564_v53  ;;  %6514 = vmatprep.mubr.msk.bf16.mxu0 %vm1429_vm11, %v7975_v37  ;;  %v2501_v41 = vld [vmem:[#allocation3 + $0x10] sm:$0x3]  ;;  %v2780_v48 = vrot.slane %v2500_v0, 2  ;;  %v2552_v4 = vld [vmem:[#allocation3 + $0x1a8] sm:$0x3] }
 0x156   : > { %2182 = vmatprep.mubr.bf16.mxu1 %v1455_v5  ;;  %v2782_v11 = vrot.slane %v2501_v41, 2  ;;  %v2550_v36 = vld [vmem:[#allocation3 + $0x198] sm:$0xff]  ;;  %v2551_v34 = vld [vmem:[#allocation3 + $0x1a0] sm:$0xff]  ;;  %v3294_v40 = vrot.slane %v2552_v4, 1  ;;  %2439 = vst.msk [vmem:[#allocation3 + $0x78] sm:$0x1] %vm2434_vm1, %v11326_v19 }
 0x157   : > { %v3291_v24 = vrot.slane %v2550_v36, 1  ;;  %v3292_v18 = vrot.slane %v2551_v34, 1  ;;  %v4223_v22 = vld [vmem:[#allocation4 + $0x8] sm:$0xff]  ;;  %v6697_v28 = vpack.i.bf16 %v2551_v34, %v2550_v36  ;;  %v4222_v1 = vld [vmem:[#allocation4] sm:$0xff]  ;;  %2440 = vst.msk [vmem:[#allocation3 + $0x90] sm:$0x1] %vm2434_vm1, %v11326_v19 }
 0x158   : > { %v2783_v47 = vsel %vm2778_vm0, %v2780_v48, %v2782_v11  ;;  %v1391_v32 = vpop.permute.xlu0 %1390  ;;  %v4224_v46 = vld [vmem:[#allocation4 + $0x10] sm:$0x3]  ;;  %v4325_v51 = vrot.slane %v4223_v22, 1  ;;  %v4324_v38 = vrot.slane %v4222_v1, 1  ;;  %v4500_v49 = vrot.slane %v4222_v1, 2 }
 0x159   : > { %v3293_v59 = vsel %vm1266_vm10, %v3291_v24, %v3292_v18  ;;  %v3295_v5 = vsel %vm1266_vm10, %v3292_v18, %v3294_v40  ;;  %v1584_v20 = vsel %vm1429_vm11, %v7773_v60, %v1391_v32  ;;  %v4503_v39 = vrot.slane %v4224_v46, 2  ;;  %2441 = vst.msk [vmem:[#allocation3 + $0xa8] sm:$0x1] %vm2434_vm1, %v11326_v19  ;;  %2442 = vst.msk [vmem:[#allocation3 + $0xc0] sm:$0x1] %vm2434_vm1, %v11326_v19  ;;  %v4274_v12 = vld [vmem:[#allocation4 + $0x1a0] sm:$0xff] }
 0x15a   : > { %v4326_v56 = vsel %vm1266_vm10, %v4324_v38, %v4325_v51  ;;  %2443 = vst.msk [vmem:[#allocation3 + $0xd8] sm:$0x1] %vm2434_vm1, %v11326_v19  ;;  %2444 = vst.msk [vmem:[#allocation3 + $0xf0] sm:$0x1] %vm2434_vm1, %v11326_v19  ;;  %v11351_v11 = vld [vmem:[#allocation5_spill] sm:$0xff]  ;;  %v11352_v24 = vld [vmem:[#allocation6_spill] sm:$0xff] }
 0x15b   : > { %2445 = vst.msk [vmem:[#allocation3 + $0x108] sm:$0x1] %vm2434_vm1, %v11326_v19  ;;  %2446 = vst.msk [vmem:[#allocation3 + $0x120] sm:$0x1] %vm2434_vm1, %v11326_v19  ;;  %v3601_v32 = vld [vmem:[%s11319_s3 + $0x58] sm:$0xff] }
 0x15c   : > { %6515 = vmatmul.mubr.msk.bf16.gmra.mxu0 %vm1429_vm11, %v7904_v62  ;;  %v1576_v62 = vsel %vm1429_vm11, %v7720_v17, %v1387_v54  ;;  %2447 = vst.msk [vmem:[#allocation3 + $0x138] sm:$0x1] %vm2434_vm1, %v11326_v19  ;;  %2448 = vst.msk [vmem:[#allocation3 + $0x150] sm:$0x1] %vm2434_vm1, %v11326_v19  ;;  %v1395_v53 = vpop.permute.xlu0 %1394  ;;  %v3597_v1 = vld [vmem:[%s11319_s3 + $0x38] sm:$0xff] }
 0x15d   : > { %2183 = vmatmul.mubr.bf16.gmra.mxu1 %v1568_v6  ;;  %6518 = vmatprep.mubr.msk.bf16.mxu0 %vm1429_vm11, %v7997_v31  ;;  %v2603_v31 = vrot.slane %v2500_v0, 1  ;;  %v8264_v55 = vpop.f32.mrf.mxu0  ;;  %2449 = vst.msk [vmem:[#allocation3 + $0x168] sm:$0x1] %vm2434_vm1, %v11326_v19  ;;  %2450 = vst.msk [vmem:[#allocation3 + $0x180] sm:$0x1] %vm2434_vm1, %v11326_v19  ;;  %v4273_v6 = vld [vmem:[#allocation4 + $0x198] sm:$0xff] }
 0x15e   : > { %2190 = vmatprep.mubr.bf16.mxu1 %v1458_v29  ;;  %v6702_v29 = vpack.i.bf16 %v3295_v5, %v3293_v59  ;;  %2451 = vst.msk [vmem:[#allocation3 + $0x29] sm:$0x1] %vm2434_vm1, %v11326_v19  ;;  %2452 = vst.msk [vmem:[#allocation3 + $0x41] sm:$0x1] %vm2434_vm1, %v11326_v19  ;;  %v5076_v54 = vrot.slane %v4273_v6, 1 }
 0x15f   : > { %2453 = vst.msk [vmem:[#allocation3 + $0x59] sm:$0x1] %vm2434_vm1, %v11326_v19  ;;  %2454 = vst.msk [vmem:[#allocation3 + $0x71] sm:$0x1] %vm2434_vm1, %v11326_v19  ;;  %v8336_v52 = vpop.f32.mrf.mxu0 }
 0x160   : > { %6703 = vrot.lane.b32.xlu1 %v6702_v29, %s7308_s22  ;;  %2455 = vst.msk [vmem:[#allocation3 + $0x89] sm:$0x1] %vm2434_vm1, %v11326_v19  ;;  %2456 = vst.msk [vmem:[#allocation3 + $0xa1] sm:$0x1] %vm2434_vm1, %v11326_v19 }
 0x161   : > { %2457 = vst.msk [vmem:[#allocation3 + $0xb9] sm:$0x1] %vm2434_vm1, %v11326_v19  ;;  %2458 = vst.msk [vmem:[#allocation3 + $0xd1] sm:$0x1] %vm2434_vm1, %v11326_v19  ;;  %v8340_v42 = vpop.f32.mrf.mxu0 }
 0x162   : > { %2459 = vst.msk [vmem:[#allocation3 + $0xe9] sm:$0x1] %vm2434_vm1, %v11326_v19  ;;  %2460 = vst.msk [vmem:[#allocation3 + $0x101] sm:$0x1] %vm2434_vm1, %v11326_v19 }
 0x163   : > { %2461 = vst.msk [vmem:[#allocation3 + $0x119] sm:$0x1] %vm2434_vm1, %v11326_v19  ;;  %2462 = vst.msk [vmem:[#allocation3 + $0x131] sm:$0x1] %vm2434_vm1, %v11326_v19 }
 0x164   : > { %6519 = vmatmul.mubr.msk.bf16.gmra.mxu0 %vm1429_vm11, %v7940_v57  ;;  %v2499_v57 = vld [vmem:[#allocation3] sm:$0xff]  ;;  %2463 = vst.msk [vmem:[#allocation3 + $0x149] sm:$0x1] %vm2434_vm1, %v11326_v19  ;;  %2464 = vst.msk [vmem:[#allocation3 + $0x161] sm:$0x1] %vm2434_vm1, %v11326_v19 }
 0x165   : > { %2191 = vmatmul.mubr.bf16.gmra.mxu1 %v1572_v30  ;;  %6522 = vmatprep.mubr.msk.bf16.mxu0 %vm1429_vm11, %v8007_v13  ;;  %v2602_v37 = vrot.slane %v2499_v57, 1  ;;  %v2605_v13 = vrot.slane %v2501_v41, 1  ;;  %v2779_v7 = vrot.slane %v2499_v57, 2  ;;  %2465 = vst.msk [vmem:[#allocation3 + $0x179] sm:$0x1] %vm2434_vm1, %v11326_v19  ;;  %v5077_v30 = vrot.slane %v4274_v12, 1 }
 0x166   : > { %2198 = vmatprep.mubr.bf16.mxu1 %v1461_v27  ;;  %v4327_v27 = vrot.slane %v4224_v46, 1  ;;  %2466 = vst.msk [vmem:[#allocation3 + $0x191] sm:$0x1] %vm2434_vm1, %v11326_v19  ;;  %v3624_v41 = vld [vmem:[%s11319_s3 + $0x110] sm:$0xff] }
 0x167   : > { %v2604_v17 = vsel %vm1266_vm10, %v2602_v37, %v2603_v31  ;;  %v2606_v63 = vsel %vm1266_vm10, %v2603_v31, %v2605_v13  ;;  %v2781_v26 = vsel %vm2778_vm0, %v2779_v7, %v2780_v48  ;;  %v5078_v0 = vsel %vm1266_vm10, %v5076_v54, %v5077_v30  ;;  %v8354_v37 = vpop.f32.mrf.mxu0  ;;  %v1397_v13 = vpop.permute.xlu1 %1396  ;;  %v3600_v46 = vld [vmem:[%s11319_s3 + $0x50] sm:$0xff] }
 0x168   : > { %v6687_v50 = vpack.i.bf16 %v2606_v63, %v2604_v17 }
 0x169   : > { %v8361_v31 = vpop.f32.mrf.mxu0 }
 0x16a   : > { %6688 = vrot.lane.b32.xlu0 %v6687_v50, %s7307_s21 }
 0x16b   : > { %v8367_v63 = vpop.f32.mrf.mxu0  ;;  %v1401_v50 = vpop.permute.xlu1 %1400 }
 0x16c   : > { %6523 = vmatmul.mubr.msk.bf16.gmra.mxu0 %vm1429_vm11, %v7946_v3  ;;  %v1428_v3 = vsel %vm1266_vm10, %v1426_v15, %v1427_v45  ;;  %v1399_v45 = vpop.permute.xlu0 %1398  ;;  %v1604_v18 = vsel %vm1429_vm11, %v11352_v24, %v1401_v50 }
 0x16d   : > { %2199 = vmatmul.mubr.bf16.gmra.mxu1 %v1576_v62  ;;  %6526 = vmatprep.mubr.msk.bf16.mxu0 %vm1429_vm11, %v8012_v43  ;;  %v1580_v43 = vsel %vm1429_vm11, %v7684_v25, %v1389_v8  ;;  %v6692_v25 = vpack.i.bf16 %v2783_v47, %v2781_v26  ;;  %v3625_v62 = vld [vmem:[%s11319_s3 + $0x118] sm:$0xff]  ;;  %v3622_v8 = vld [vmem:[%s11319_s3 + $0x100] sm:$0xff]  ;;  %v1600_v36 = vsel %vm1429_vm11, %v11351_v11, %v1399_v45  ;;  %v3603_v47 = vld [vmem:[%s11319_s3 + $0x68] sm:$0xff] }
 0x16e   : > { %2206 = vmatprep.mubr.bf16.mxu1 %v1464_v35  ;;  %v4501_v35 = vrot.slane %v4223_v22, 2  ;;  %6530 = vmatprep.subr.mxu0 %v3625_v62  ;;  %v3621_v11 = vld [vmem:[%s11319_s3 + $0xf8] sm:$0xff] }
 0x16f   : > { %6693 = vrot.lane.b32.xlu0 %v6692_v25, %s7305_s11  ;;  %6531 = vmatpush3.msra.mxu0 %v3625_v62  ;;  %v1425_v7 = vpop.permute.xlu1 %1424  ;;  %v3602_v25 = vld [vmem:[%s11319_s3 + $0x60] sm:$0xff]  ;;  %v3592_v62 = vld [vmem:[%s11319_s3 + $0x10] sm:$0xff] }
 0x170   : > { %v4504_v60 = vsel %vm2778_vm0, %v4501_v35, %v4503_v39  ;;  %v4502_v58 = vsel %vm2778_vm0, %v4500_v49, %v4501_v35  ;;  %6532 = vmatprep.subr.mxu0 %v3624_v41  ;;  %v1423_v17 = vpop.permute.xlu0 %1422  ;;  %v1610_v34 = vsel %vm1429_vm11, %v7980_v33, %v1425_v7  ;;  %v3604_v33 = vld [vmem:[%s11319_s3 + $0x70] sm:$0xff] }
 0x171   : > { %6533 = vmatpush3.msra.mxu0 %v3624_v41  ;;  %v3596_v35 = vld [vmem:[%s11319_s3 + $0x30] sm:$0xff] }
 0x173   : > { %6698 = vrot.lane.b32.xlu0 %v6697_v28, %s7305_s11 }
 0x174   : > { %6527 = vmatmul.mubr.msk.bf16.gmra.mxu0 %vm1429_vm11, %v1428_v3  ;;  %v1596_v3 = vsel %vm1429_vm11, %v7813_v10, %v1397_v13  ;;  %v3605_v10 = vld [vmem:[%s11319_s3 + $0x78] sm:$0xff] }
 0x175   : > { %2207 = vmatmul.mubr.bf16.gmra.mxu1 %v1580_v43  ;;  %v1607_v43 = vsel %vm1429_vm11, %v7880_v21, %v1423_v17  ;;  %v3590_v17 = vld [vmem:[%s11319_s3] sm:$0xff] }
 0x176   : > { %2214 = vmatprep.mubr.bf16.mxu1 %v8060_v9  ;;  %v4328_v9 = vsel %vm1266_vm10, %v4325_v51, %v4327_v27  ;;  %3698 = vmatpush1.msra.mxu1 %v3605_v10  ;;  %v3599_v51 = vld [vmem:[%s11319_s3 + $0x48] sm:$0xff] }
 0x177   : > { %4406 = vrot.lane.b32.xlu1 %v4328_v9, %s7309_s29  ;;  %4404 = vrot.lane.b32.xlu0 %v4326_v56, %s7309_s29  ;;  %v3595_v56 = vld [vmem:[%s11319_s3 + $0x28] sm:$0xff] }
 0x178   : > { %3699 = vmatprep.subr.mxu1 %v11326_v19 }
 0x179   : > { %3700 = vmatpush1.msra.mxu1 %v3604_v33  ;;  %v3620_v33 = vld [vmem:[%s11319_s3 + $0xf0] sm:$0xff] }
 0x17a   : > { %3701 = vmatprep.subr.mxu1 %v11326_v19 }
 0x17b   : > { %4582 = vrot.lane.b32.xlu1 %v4504_v60, %s7310_s23  ;;  %4580 = vrot.lane.b32.xlu0 %v4502_v58, %s7310_s23 }
 0x17c   : > { %3702 = vmatpush1.msra.mxu1 %v3603_v47 }
 0x17d   : > { %2215 = vmatmul.mubr.bf16.gmra.mxu1 %v1584_v20  ;;  %3703 = vmatprep.subr.mxu1 %v11326_v19  ;;  %v3598_v20 = vld [vmem:[%s11319_s3 + $0x40] sm:$0xff] }
 0x17e   : > { %2222 = vmatprep.mubr.bf16.mxu1 %v8116_v2  ;;  %v1588_v2 = vsel %vm1429_vm11, %v7796_v44, %v1393_v23  ;;  %v4275_v44 = vld [vmem:[#allocation4 + $0x1a8] sm:$0x3]  ;;  %3704 = vmatpush1.msra.mxu1 %v3602_v25 }
 0x17f   : > { %5041 = vrot.lane.b32.xlu1 %v4274_v12, %s7311_s26  ;;  %5039 = vrot.lane.b32.xlu0 %v4273_v6, %s7311_s26  ;;  %v5079_v15 = vrot.slane %v4275_v44, 1  ;;  %v3593_v6 = vld [vmem:[%s11319_s3 + $0x18] sm:$0xff] }
 0x180   : > { %3705 = vmatprep.subr.mxu1 %v11326_v19 }
 0x181   : > { %v5080_v57 = vsel %vm1266_vm10, %v5077_v30, %v5079_v15  ;;  %3706 = vmatpush1.msra.mxu1 %v3601_v32 }
 0x182   : > { %3707 = vmatprep.subr.mxu1 %v11326_v19 }
 0x183   : > { %5143 = vrot.lane.b32.xlu1 %v5080_v57, %s7312_s9  ;;  %5141 = vrot.lane.b32.xlu0 %v5078_v0, %s7312_s9  ;;  %v3591_v0 = vld [vmem:[%s11319_s3 + $0x8] sm:$0xff] }
 0x184   : > { %3708 = vmatpush1.msra.mxu1 %v3600_v46 }
 0x185   : > { %2223 = vmatmul.mubr.bf16.gmra.mxu1 %v1588_v2  ;;  %3709 = vmatprep.subr.mxu1 %v11326_v19  ;;  %v3594_v2 = vld [vmem:[%s11319_s3 + $0x20] sm:$0xff] }
 0x186   : > { %2230 = vmatprep.mubr.bf16.mxu1 %v8140_v16  ;;  %v1592_v16 = vsel %vm1429_vm11, %v7747_v14, %v1395_v53  ;;  %v3623_v14 = vld [vmem:[%s11319_s3 + $0x108] sm:$0xff]  ;;  %3710 = vmatpush1.msra.mxu1 %v3599_v51 }
 0x187   : > { %6534 = vmatprep.subr.mxu0 %v3623_v14  ;;  %3711 = vmatprep.subr.mxu1 %v11326_v19 }
 0x188   : > { %6535 = vmatpush3.msra.mxu0 %v3623_v14  ;;  %3712 = vmatpush1.msra.mxu1 %v3598_v20  ;;  %v3619_v20 = vld [vmem:[%s11319_s3 + $0xe8] sm:$0xff] }
 0x189   : > { %6536 = vmatprep.subr.mxu0 %v3622_v8  ;;  %3713 = vmatprep.subr.mxu1 %v11326_v19 }
 0x18a   : > { %6537 = vmatpush3.msra.mxu0 %v3622_v8  ;;  %3714 = vmatpush1.msra.mxu1 %v3597_v1 }
 0x18b   : > { %3715 = vmatprep.subr.mxu1 %v11326_v19 }
 0x18c   : > { %3716 = vmatpush1.msra.mxu1 %v3596_v35 }
 0x18d   : > { %2231 = vmatmul.mubr.bf16.gmra.mxu1 %v1592_v16  ;;  %3717 = vmatprep.subr.mxu1 %v11326_v19 }
 0x18e   : > { %2238 = vmatprep.mubr.bf16.mxu1 %v8150_v61  ;;  %v8373_v61 = vpop.f32.mrf.mxu0  ;;  %3718 = vmatpush1.msra.mxu1 %v3595_v56 }
 0x18f   : > { %3719 = vmatprep.subr.mxu1 %v11326_v19 }
 0x190   : > { %v8375_v48 = vpop.f32.mrf.mxu0  ;;  %3720 = vmatpush1.msra.mxu1 %v3594_v2 }
 0x191   : > { %3721 = vmatprep.subr.mxu1 %v11326_v19 }
 0x192   : > { %v8381_v4 = vpop.f32.mrf.mxu0  ;;  %3722 = vmatpush1.msra.mxu1 %v3593_v6 }
 0x193   : > { %3723 = vmatprep.subr.mxu1 %v11326_v19 }
 0x194   : > { %v8387_v21 = vpop.f32.mrf.mxu0  ;;  %3724 = vmatpush1.msra.mxu1 %v3592_v62  ;;  %v3618_v62 = vld [vmem:[%s11319_s3 + $0xe0] sm:$0xff] }
 0x195   : > { %2239 = vmatmul.mubr.bf16.gmra.mxu1 %v1596_v3  ;;  %3725 = vmatprep.subr.mxu1 %v11326_v19 }
 0x196   : > { %2246 = vmatprep.mubr.bf16.mxu1 %v1607_v43  ;;  %v8395_v26 = vpop.f32.mrf.mxu0  ;;  %3726 = vmatpush1.msra.mxu1 %v3591_v0 }
 0x197   : > { %3727 = vmatprep.subr.mxu1 %v11326_v19 }
 0x198   : > { %v8401_v40 = vpop.f32.mrf.mxu0  ;;  %3728 = vmatpush1.msra.mxu1 %v3590_v17 }
 0x199   : > { %3729 = vmatprep.subr.mxu1 %v11326_v19 }
 0x19a   : > { %3730 = vmatpush2.msra.mxu1 %v3621_v11 }
 0x19b   : > { %3731 = vmatprep.subr.mxu1 %v11326_v19 }
 0x19c   : > { %3732 = vmatpush2.msra.mxu1 %v3620_v33 }
 0x19d   : > { %2247 = vmatmul.mubr.bf16.gmra.mxu1 %v1600_v36  ;;  %3733 = vmatprep.subr.mxu1 %v11326_v19 }
 0x19e   : > { %2254 = vmatprep.mubr.bf16.mxu1 %v1610_v34  ;;  %3734 = vmatpush2.msra.mxu1 %v3619_v20 }
 0x19f   : > { %3735 = vmatprep.subr.mxu1 %v11326_v19 }
 0x1a0   : > { %3736 = vmatpush2.msra.mxu1 %v3618_v62  ;;  %v3615_v62 = vld [vmem:[%s11319_s3 + $0xc8] sm:$0xff] }
 0x1a1   : > { %3737 = vmatprep.subr.mxu1 %v11326_v19 }
 0x1a5   : > { %2255 = vmatmul.mubr.bf16.gmra.mxu1 %v1604_v18 }
 0x1ab   : > { %v8406_v59 = vpop.f32.mrf.mxu0 }
 0x1ad   : > { %v8409_v5 = vpop.f32.mrf.mxu0 }
 0x1af   : > { %v8414_v29 = vpop.f32.mrf.mxu0 }
 0x1b1   : > { %v8417_v22 = vpop.f32.mrf.mxu0 }
 0x1b3   : > { %v8423_v28 = vpop.f32.mrf.mxu0 }
 0x1b5   : > { %v8429_v27 = vpop.f32.mrf.mxu0 }
 0x1b7   : > { %v8435_v9 = vpop.f32.mrf.mxu0 }
 0x1b9   : > { %v8441_v38 = vpop.f32.mrf.mxu0 }
 0x1bf   : > { %v8454_v60 = vpop.f32.mrf.mxu1 }
 0x1c1   : > { %v8464_v53 = vpop.f32.mrf.mxu1 }
 0x1c3   : > { %v8472_v30 = vpop.f32.mrf.mxu1 }
 0x1c4   : > { %v8447_v39 = vpop.f32.mrf.mxu0 }
 0x1c5   : > { %v8482_v15 = vpop.f32.mrf.mxu1 }
 0x1c6   : > { %v8452_v23 = vpop.f32.mrf.mxu0 }
 0x1c8   : > { %v8457_v49 = vpop.f32.mrf.mxu0 }
 0x1ca   : > { %v8462_v58 = vpop.f32.mrf.mxu0 }
 0x1cc   : > { %v8467_v12 = vpop.f32.mrf.mxu0 }
 0x1ce   : > { %v8474_v54 = vpop.f32.mrf.mxu0 }
 0x1d0   : > { %v8477_v44 = vpop.f32.mrf.mxu0 }
 0x1d2   : > { %v8484_v16 = vpop.f32.mrf.mxu0 }
 0x1d4   : > { %v8489_v57 = vpop.f32.mrf.mxu0 }
 0x1d5   : > { %v8487_v45 = vpop.f32.mrf.mxu1 }
 0x1d6   : > { %v8496_v14 = vpop.f32.mrf.mxu0 }
 0x1d7   : > { %v8494_v41 = vpop.f32.mrf.mxu1 }
 0x1d8   : > { %11353 = vst [vmem:[#allocation5_spill] sm:$0xff] %v8494_v41  ;;  %v8501_v8 = vpop.f32.mrf.mxu0 }
 0x1d9   : > { %v8499_v13 = vpop.f32.mrf.mxu1 }
 0x1da   : > { %11354 = vst [vmem:[#allocation6_spill] sm:$0xff] %v8499_v13  ;;  %v8508_v50 = vpop.f32.mrf.mxu0 }
 0x1db   : > { %v8506_v3 = vpop.f32.mrf.mxu1 }
 0x1dc   : > { %11355 = vst [vmem:[#allocation7_spill] sm:$0xff] %v8506_v3  ;;  %v6233_v7 = vpop.f32.mrf.mxu0 }
 0x1dd   : > { %v8511_v43 = vpop.f32.mrf.mxu1 }
 0x1de   : > { %11356 = vst [vmem:[#allocation8_spill] sm:$0xff] %v8511_v43  ;;  %v6234_v34 = vpop.f32.mrf.mxu0 }
 0x1df   : > { %v8516_v36 = vpop.f32.mrf.mxu1  ;;  %v8518_v10 = vadd.f32 %v6234_v34, %v6233_v7 }
 0x1e0   : > { %11357 = vst [vmem:[#allocation9_spill] sm:$0xff] %v8516_v36  ;;  %v6236_v18 = vpop.f32.mrf.mxu0 }
 0x1e1   : > { %v8521_v24 = vpop.f32.mrf.mxu1 }
 0x1e2   : > { %11358 = vst [vmem:[#allocation10_spill] sm:$0xff] %v8521_v24  ;;  %v6237_v25 = vpop.f32.mrf.mxu0 }
 0x1e3   : > { %v8526_v47 = vpop.f32.mrf.mxu1  ;;  %v8528_v32 = vadd.f32 %v6237_v25, %v6236_v18  ;;  %v3617_v18 = vld [vmem:[%s11319_s3 + $0xd8] sm:$0xff] }
 0x1e4   : > { %11359 = vst [vmem:[#allocation11_spill] sm:$0xff] %v8526_v47  ;;  %v6239_v51 = vpop.f32.mrf.mxu0  ;;  %3738 = vmatpush2.msra.mxu1 %v3617_v18 }
 0x1e5   : > { %v8531_v46 = vpop.f32.mrf.mxu1  ;;  %3739 = vmatprep.subr.mxu1 %v11326_v19 }
 0x1e6   : > { %11360 = vst [vmem:[#allocation12_spill] sm:$0xff] %v8531_v46  ;;  %v6240_v35 = vpop.f32.mrf.mxu0  ;;  %v6187_v46 = vadd.f32 %v8336_v52, %v8264_v55  ;;  %v6196_v52 = vadd.f32 %v8375_v48, %v8373_v61 }
 0x1e7   : > { %v8536_v1 = vpop.f32.mrf.mxu1  ;;  %v8538_v56 = vadd.f32 %v6240_v35, %v6239_v51 }
 0x1e8   : > { %11361 = vst [vmem:[#allocation13_spill] sm:$0xff] %v8536_v1  ;;  %v6242_v6 = vpop.f32.mrf.mxu0  ;;  %v3614_v1 = vld [vmem:[%s11319_s3 + $0xc0] sm:$0xff] }
 0x1e9   : > { %v8541_v2 = vpop.f32.mrf.mxu1 }
 0x1ea   : > { %11362 = vst [vmem:[#allocation14_spill] sm:$0xff] %v8541_v2  ;;  %v6243_v17 = vpop.f32.mrf.mxu0 }
 0x1eb   : > { %v8546_v0 = vpop.f32.mrf.mxu1  ;;  %v8548_v7 = vadd.f32 %v6243_v17, %v6242_v6  ;;  %v3616_v6 = vld [vmem:[%s11319_s3 + $0xd0] sm:$0xff] }
 0x1ec   : > { %11363 = vst [vmem:[#allocation15_spill] sm:$0xff] %v8546_v0  ;;  %v6245_v34 = vpop.f32.mrf.mxu0  ;;  %3740 = vmatpush2.msra.mxu1 %v3616_v6 }
 0x1ed   : > { %v6297_v11 = vpop.f32.mrf.mxu1  ;;  %3741 = vmatprep.subr.mxu1 %v11326_v19 }
 0x1ee   : > { %v6246_v25 = vpop.f32.mrf.mxu0  ;;  %3742 = vmatpush2.msra.mxu1 %v3615_v62 }
 0x1ef   : > { %v6298_v33 = vpop.f32.mrf.mxu1  ;;  %v8554_v51 = vadd.f32 %v6246_v25, %v6245_v34  ;;  %v6193_v25 = vadd.f32 %v8367_v63, %v8361_v31  ;;  %3743 = vmatprep.subr.mxu1 %v11326_v19  ;;  %v8580_v31 = vld [vmem:[%s11318_s2] ss:$0 sm:$0xff] }
 0x1f0   : > { %v6248_v35 = vpop.f32.mrf.mxu0  ;;  %3744 = vmatpush2.msra.mxu1 %v3614_v1  ;;  %v6299_v1 = vadd.f32 %v6298_v33, %v6297_v11  ;;  %v1976_v36 = vadd.f32 %v6187_v46, %v8580_v31  ;;  %v3612_v46 = vld [vmem:[%s11319_s3 + $0xb0] sm:$0xff] }
 0x1f1   : > { %v6300_v20 = vpop.f32.mrf.mxu1  ;;  %3745 = vmatprep.subr.mxu1 %v11326_v19  ;;  %v1984_v55 = vadd.f32 %v6193_v25, %v8580_v31  ;;  %v1987_v25 = vadd.f32 %v6196_v52, %v8580_v31  ;;  %v6205_v52 = vadd.f32 %v8409_v5, %v8406_v59 }
 0x1f2   : > { %v6249_v0 = vpop.f32.mrf.mxu0  ;;  %v2137_v48 = vadd.f32 %v6299_v1, %v1976_v36 }
 0x1f3   : > { %v6301_v17 = vpop.f32.mrf.mxu1  ;;  %v8563_v2 = vadd.f32 %v6249_v0, %v6248_v35  ;;  %v3613_v35 = vld [vmem:[%s11319_s3 + $0xb8] sm:$0xff] }
 0x1f4   : > { %v6251_v18 = vpop.f32.mrf.mxu0  ;;  %3746 = vmatpush2.msra.mxu1 %v3613_v35  ;;  %v6302_v41 = vadd.f32 %v6301_v17, %v6300_v20  ;;  %v3611_v17 = vld [vmem:[%s11319_s3 + $0xa8] sm:$0xff] }
 0x1f5   : > { %v6303_v34 = vpop.f32.mrf.mxu1  ;;  %3747 = vmatprep.subr.mxu1 %v11326_v19 }
 0x1f6   : > { %v6252_v0 = vpop.f32.mrf.mxu0  ;;  %3748 = vmatpush2.msra.mxu1 %v3612_v46 }
 0x1f7   : > { %v6304_v6 = vpop.f32.mrf.mxu1  ;;  %v8582_v62 = vadd.f32 %v6252_v0, %v6251_v18  ;;  %3749 = vmatprep.subr.mxu1 %v11326_v19 }
 0x1f8   : > { %v6305_v63 = vadd.f32 %v6304_v6, %v6303_v34  ;;  %v6254_v24 = vpop.f32.mrf.mxu0  ;;  %v6190_v34 = vadd.f32 %v8354_v37, %v8340_v42  ;;  %v6199_v37 = vadd.f32 %v8387_v21, %v8381_v4  ;;  %3750 = vmatpush2.msra.mxu1 %v3611_v17  ;;  %v6202_v21 = vadd.f32 %v8401_v40, %v8395_v26 }
 0x1f9   : > { %v6306_v47 = vpop.f32.mrf.mxu1  ;;  %3751 = vmatprep.subr.mxu1 %v11326_v19  ;;  %v6208_v26 = vadd.f32 %v8417_v22, %v8414_v29  ;;  %v3609_v22 = vld [vmem:[%s11319_s3 + $0x98] sm:$0xff] }
 0x1fa   : > { %v6255_v3 = vpop.f32.mrf.mxu0  ;;  %v2145_v0 = vadd.f32 %v6305_v63, %v1984_v55  ;;  %v1979_v42 = vadd.f32 %v6190_v34, %v8580_v31  ;;  %v1992_v4 = vadd.f32 %v6199_v37, %v8580_v31  ;;  %v1995_v5 = vadd.f32 %v6202_v21, %v8580_v31 }
 0x1fb   : > { %v6307_v43 = vpop.f32.mrf.mxu1  ;;  %v8592_v6 = vadd.f32 %v6255_v3, %v6254_v24 }
 0x1fc   : > { %v6308_v18 = vadd.f32 %v6307_v43, %v6306_v47  ;;  %v6500_v13 = vpop.f32.mrf.mxu0  ;;  %v2140_v20 = vadd.f32 %v6302_v41, %v1979_v42  ;;  %v6211_v42 = vadd.f32 %v8429_v27, %v8423_v28 }
 0x1fd   : > { %v6309_v35 = vpop.f32.mrf.mxu1  ;;  %v2306_v61 = vadd.f32 %v6500_v13, %v2145_v0 }
 0x1fe   : > { %v2297_v33 = vpop.f32.mrf.mxu0  ;;  %v2148_v43 = vadd.f32 %v6308_v18, %v1987_v25  ;;  %v2000_v25 = vadd.f32 %v6205_v52, %v8580_v31 }
 0x1ff   : > { %v6310_v11 = vpop.f32.mrf.mxu1  ;;  %2469 = vst.msk [vmem:[#allocation3 + $0x31] sm:$0xff] %vm2424_vm12, %v2306_v61  ;;  %v2298_v3 = vadd.f32 %v2297_v33, %v2137_v48 }
 0x200   : > { %v6501_v36 = vpop.f32.mrf.mxu0  ;;  %v6311_v24 = vadd.f32 %v6310_v11, %v6309_v35  ;;  %v3610_v35 = vld [vmem:[%s11319_s3 + $0xa0] sm:$0xff] }
 0x201   : > { %v6312_v13 = vpop.f32.mrf.mxu1  ;;  %2467 = vst.msk [vmem:[#allocation3 + $0x19] sm:$0xff] %vm2424_vm12, %v2298_v3  ;;  %v2309_v47 = vadd.f32 %v6501_v36, %v2148_v43  ;;  %3752 = vmatpush2.msra.mxu1 %v3610_v35  ;;  %v2003_v3 = vadd.f32 %v6208_v26, %v8580_v31  ;;  %v6214_v35 = vadd.f32 %v8441_v38, %v8435_v9 }
 0x202   : > { %v2300_v55 = vpop.f32.mrf.mxu0  ;;  %v2153_v0 = vadd.f32 %v6311_v24, %v1992_v4  ;;  %3753 = vmatprep.subr.mxu1 %v11326_v19 }
 0x203   : > { %v6313_v63 = vpop.f32.mrf.mxu1  ;;  %2470 = vst.msk [vmem:[#allocation3 + $0x39] sm:$0xff] %vm2424_vm12, %v2309_v47  ;;  %v2301_v1 = vadd.f32 %v2300_v55, %v2140_v20  ;;  %3754 = vmatpush2.msra.mxu1 %v3609_v22 }
 0x204   : > { %v6504_v34 = vpop.f32.mrf.mxu0  ;;  %v6314_v18 = vadd.f32 %v6313_v63, %v6312_v13  ;;  %3755 = vmatprep.subr.mxu1 %v11326_v19 }
 0x205   : > { %v6315_v41 = vpop.f32.mrf.mxu1  ;;  %2468 = vst.msk [vmem:[#allocation3 + $0x21] sm:$0xff] %vm2424_vm12, %v2301_v1 }
 0x206   : > { %v2313_v59 = vpop.f32.mrf.mxu0  ;;  %v2505_v46 = vld [vmem:[#allocation3 + $0x30] sm:$0xff]  ;;  %v2156_v29 = vadd.f32 %v6314_v18, %v1995_v5 }
 0x207   : > { %v6316_v40 = vpop.f32.mrf.mxu1  ;;  %v2314_v48 = vadd.f32 %v2313_v59, %v2153_v0  ;;  %v2789_v24 = vrot.slane %v2505_v46, 2  ;;  %v3608_v0 = vld [vmem:[%s11319_s3 + $0x90] sm:$0xff] }
 0x208   : > { %v6317_v61 = vadd.f32 %v6316_v40, %v6315_v41  ;;  %v6505_v33 = vpop.f32.mrf.mxu0  ;;  %v2008_v41 = vadd.f32 %v6211_v42, %v8580_v31  ;;  %3756 = vmatpush2.msra.mxu1 %v3608_v0 }
 0x209   : > { %v6318_v11 = vpop.f32.mrf.mxu1  ;;  %2471 = vst.msk [vmem:[#allocation3 + $0x49] sm:$0xff] %vm2424_vm12, %v2314_v48  ;;  %3757 = vmatprep.subr.mxu1 %v11326_v19 }
 0x20a   : > { %v2161_v37 = vadd.f32 %v6317_v61, %v2000_v25  ;;  %v2316_v13 = vpop.f32.mrf.mxu0  ;;  %v2506_v36 = vld [vmem:[#allocation3 + $0x38] sm:$0xff]  ;;  %v2507_v47 = vld [vmem:[#allocation3 + $0x40] sm:$0x3]  ;;  %v2612_v61 = vrot.slane %v2505_v46, 1 }
 0x20b   : > { %v6319_v43 = vpop.f32.mrf.mxu1  ;;  %v2317_v63 = vadd.f32 %v2316_v13, %v2156_v29  ;;  %v6712_v28 = vpack.i.bf16 %v2506_v36, %v2505_v46  ;;  %v2790_v55 = vrot.slane %v2506_v36, 2  ;;  %v2792_v21 = vrot.slane %v2507_v47, 2  ;;  %v8647_v25 = vld [vmem:[#allocation3 + $0x18] sm:$0xff] }
 0x20c   : > { %v2322_v20 = vadd.f32 %v6504_v34, %v2161_v37  ;;  %v6320_v17 = vadd.f32 %v6319_v43, %v6318_v11  ;;  %v8631_v4 = vpop.f32.mrf.mxu0  ;;  %v8633_v52 = vld [vmem:[#allocation3 + $0x20] sm:$0xff]  ;;  %v2613_v1 = vrot.slane %v2506_v36, 1  ;;  %v2615_v34 = vrot.slane %v2507_v47, 1  ;;  %v8649_v48 = vld [vmem:[#allocation3 + $0x28] sm:$0x3]  ;;  %v3607_v36 = vld [vmem:[%s11319_s3 + $0x88] sm:$0xff] }
 0x20d   : > { %v6321_v27 = vpop.f32.mrf.mxu1  ;;  %2472 = vst.msk [vmem:[#allocation3 + $0x51] sm:$0xff] %vm2424_vm12, %v2317_v63  ;;  %6713 = vrot.lane.b32.xlu0 %v6712_v28, %s7305_s11  ;;  %6708 = vrot.lane.b32.xlu1 %v6712_v28, %s7308_s22  ;;  %v2791_v40 = vsel %vm2778_vm0, %v2789_v24, %v2790_v55  ;;  %v2793_v59 = vsel %vm2778_vm0, %v2790_v55, %v2792_v21  ;;  %v2610_v13 = vrot.slane %v8649_v48, 1 }
 0x20e   : > { %2473 = vst.msk [vmem:[#allocation3 + $0x61] sm:$0xff] %vm2424_vm12, %v2322_v20  ;;  %v2164_v18 = vadd.f32 %v6320_v17, %v2003_v3  ;;  %v2329_v5 = vpop.f32.mrf.mxu0  ;;  %6538 = vmatprep.mubr.msk.f32.mxu0 %vm2424_vm12, %v2791_v40  ;;  %v6732_v37 = vpack.i.bf16 %v2793_v59, %v2791_v40  ;;  %v6717_v9 = vpack.i.bf16 %v8633_v52, %v8647_v25  ;;  %v2607_v17 = vrot.slane %v8647_v25, 1 }
 0x20f   : > { %v6322_v26 = vpop.f32.mrf.mxu1  ;;  %6539 = vmatmul.mubr.msk.f32.vlgmr.msra.gmra.mxu0 %vm2424_vm12, %v2793_v59  ;;  %v8658_v22 = vsel %vm1266_vm10, %v2612_v61, %v2613_v1  ;;  %v8661_v46 = vsel %vm1266_vm10, %v2613_v1, %v2615_v34  ;;  %v2011_v24 = vadd.f32 %v6214_v35, %v8580_v31  ;;  %v6217_v47 = vadd.f32 %v8452_v23, %v8447_v39  ;;  %v3606_v59 = vld [vmem:[%s11319_s3 + $0x80] sm:$0xff] }
 0x210   : > { %v2325_v11 = vadd.f32 %v6505_v33, %v2164_v18  ;;  %v6323_v42 = vadd.f32 %v6322_v26, %v6321_v27  ;;  %v8655_v29 = vpop.f32.mrf.mxu0  ;;  %v2608_v33 = vrot.slane %v8633_v52, 1  ;;  %v8666_v43 = vld [vmem:[#allocation3 + $0x48] sm:$0xff]  ;;  %3758 = vmatpush2.msra.mxu1 %v3607_v36  ;;  %v6737_v27 = vpack.i.bf16 %v8661_v46, %v8658_v22 }
 0x211   : > { %v6324_v38 = vpop.f32.mrf.mxu1  ;;  %6718 = vrot.lane.b32.xlu0 %v6717_v9, %s7308_s22  ;;  %6733 = vrot.lane.b32.xlu1 %v6732_v37, %s7307_s21  ;;  %v2785_v18 = vrot.slane %v8633_v52, 2  ;;  %v2787_v34 = vrot.slane %v8649_v48, 2  ;;  %v2016_v52 = vadd.f32 %v6217_v47, %v8580_v31 }
 0x212   : > { %2474 = vst.msk [vmem:[#allocation3 + $0x69] sm:$0xff] %vm2424_vm12, %v2325_v11  ;;  %v2169_v3 = vadd.f32 %v6323_v42, %v2008_v41  ;;  %3759 = vmatprep.subr.mxu1 %v11326_v19  ;;  %v2332_v21 = vpop.f32.mrf.mxu0  ;;  %v2794_v41 = vrot.slane %v8666_v43, 2  ;;  %v8685_v39 = vsel %vm1266_vm10, %v2607_v17, %v2608_v33  ;;  %v8695_v26 = vsel %vm1266_vm10, %v2608_v33, %v2610_v13 }
 0x213   : > { %v6325_v20 = vpop.f32.mrf.mxu1  ;;  %v2784_v11 = vrot.slane %v8647_v25, 2  ;;  %3760 = vmatpush2.msra.mxu1 %v3606_v59  ;;  %v2788_v13 = vsel %vm2778_vm0, %v2785_v18, %v2787_v34 }
 0x214   : > { %v2330_v63 = vadd.f32 %v2329_v5, %v2169_v3  ;;  %v6326_v28 = vadd.f32 %v6325_v20, %v6324_v38  ;;  %v8681_v1 = vld [vmem:[#allocation3 + $0x50] sm:$0xff]  ;;  %v8687_v23 = vld [vmem:[#allocation3 + $0x58] sm:$0x3]  ;;  %v6220_v5 = vadd.f32 %v8462_v58, %v8457_v49  ;;  %v6742_v49 = vpack.i.bf16 %v8695_v26, %v8685_v39 }
 0x215   : > { %v6327_v55 = vpop.f32.mrf.mxu1  ;;  %6723 = vrot.lane.b32.xlu0 %v6737_v27, %s7307_s21  ;;  %v2795_v35 = vrot.slane %v8681_v1, 2  ;;  %v2797_v40 = vrot.slane %v8687_v23, 2  ;;  %6738 = vrot.lane.b32.xlu1 %v6737_v27, %s7308_s22  ;;  %v8705_v48 = vld [vmem:[#allocation3 + $0x60] sm:$0xff]  ;;  %v2786_v25 = vsel %vm2778_vm0, %v2784_v11, %v2785_v18  ;;  %v6223_v27 = vadd.f32 %v8474_v54, %v8467_v12 }
 0x216   : > { %2475 = vst.msk [vmem:[#allocation3 + $0x79] sm:$0xff] %vm2424_vm12, %v2330_v63  ;;  %v2172_v0 = vadd.f32 %v6326_v28, %v2011_v24  ;;  %v8722_v24 = vpop.f32.mrf.mxu0  ;;  %v2799_v20 = vrot.slane %v8705_v48, 2  ;;  %v2019_v28 = vadd.f32 %v6220_v5, %v8580_v31  ;;  %v6752_v18 = vpack.i.bf16 %v2788_v13, %v2786_v25 }
 0x217   : > { %v6328_v61 = vpop.f32.mrf.mxu1  ;;  %v8709_v38 = vsel %vm2778_vm0, %v2794_v41, %v2795_v35  ;;  %v8712_v33 = vsel %vm2778_vm0, %v2795_v35, %v2797_v40  ;;  %v6226_v12 = vadd.f32 %v8484_v16, %v8477_v44  ;;  %v2024_v59 = vadd.f32 %v6223_v27, %v8580_v31 }
 0x218   : > { %v2333_v42 = vadd.f32 %v2332_v21, %v2172_v0  ;;  %v6329_v9 = vadd.f32 %v6328_v61, %v6327_v55  ;;  %6541 = vmatprep.mubr.msk.f32.mxu0 %vm2424_vm12, %v8709_v38  ;;  %v2345_v35 = vpop.f32.mrf.mxu0 }
 0x219   : > { %v6330_v3 = vpop.f32.mrf.mxu1  ;;  %v8718_v58 = vld [vmem:[#allocation3 + $0x68] sm:$0xff]  ;;  %v2513_v36 = vld [vmem:[#allocation3 + $0x70] sm:$0x3]  ;;  %6728 = vrot.lane.b32.xlu0 %v6732_v37, %s7305_s11  ;;  %6542 = vmatmul.mubr.msk.f32.gmra.mxu0 %vm2424_vm12, %v8712_v33 }
 0x21a   : > { %2476 = vst.msk [vmem:[#allocation3 + $0x81] sm:$0xff] %vm2424_vm12, %v2333_v42  ;;  %v2177_v47 = vadd.f32 %v6329_v9, %v2016_v52  ;;  %v2800_v17 = vrot.slane %v8718_v58, 2  ;;  %v2802_v63 = vrot.slane %v2513_v36, 2  ;;  %6743 = vrot.lane.b32.xlu1 %v6742_v49, %s7307_s21  ;;  %v6762_v61 = vpack.i.bf16 %v8718_v58, %v8705_v48  ;;  %v8750_v9 = vpop.f32.mrf.mxu0 }
 0x21b   : > { %v6331_v55 = vpop.f32.mrf.mxu1  ;;  %v2625_v11 = vrot.slane %v2513_v36, 1  ;;  %v2623_v16 = vrot.slane %v8718_v58, 1  ;;  %v2027_v36 = vadd.f32 %v6226_v12, %v8580_v31  ;;  %v6767_v58 = vpack.i.bf16 %v8681_v1, %v8666_v43 }
 0x21c   : > { %v2338_v21 = vadd.f32 %v8631_v4, %v2177_v47  ;;  %v6332_v41 = vadd.f32 %v6331_v55, %v6330_v3  ;;  %v2801_v37 = vsel %vm2778_vm0, %v2799_v20, %v2800_v17  ;;  %v2803_v0 = vsel %vm2778_vm0, %v2800_v17, %v2802_v63 }
 0x21d   : > { %v6333_v34 = vpop.f32.mrf.mxu1  ;;  %6544 = vmatprep.mubr.msk.f32.mxu0 %vm2424_vm12, %v2801_v37  ;;  %6753 = vrot.lane.b32.xlu0 %v6752_v18, %s7307_s21  ;;  %v8744_v4 = vld [vmem:[#allocation3 + $0x78] sm:$0xff]  ;;  %v6229_v47 = vadd.f32 %v8496_v14, %v8489_v57  ;;  %v2622_v17 = vrot.slane %v8705_v48, 1  ;;  %v2348_v57 = vpop.f32.mrf.mxu0 }
 0x21e   : > { %2477 = vst.msk [vmem:[#allocation3 + $0x91] sm:$0xff] %vm2424_vm12, %v2338_v21  ;;  %v2180_v40 = vadd.f32 %v6332_v41, %v2019_v28  ;;  %6545 = vmatmul.mubr.msk.f32.gmra.mxu0 %vm2424_vm12, %v2803_v0  ;;  %6748 = vrot.lane.b32.xlu1 %v6752_v18, %s7305_s11  ;;  %v8781_v41 = vsel %vm1266_vm10, %v2623_v16, %v2625_v11 }
 0x21f   : > { %v6334_v54 = vpop.f32.mrf.mxu1  ;;  %v8778_v14 = vsel %vm1266_vm10, %v2622_v17, %v2623_v16  ;;  %v6232_v18 = vadd.f32 %v8508_v50, %v8501_v8  ;;  %v8800_v8 = vpop.f32.mrf.mxu0  ;;  %v2618_v50 = vrot.slane %v8681_v1, 1 }
 0x220   : > { %v2341_v52 = vadd.f32 %v8655_v29, %v2180_v40  ;;  %v6335_v5 = vadd.f32 %v6334_v54, %v6333_v34  ;;  %v2804_v29 = vrot.slane %v8744_v4, 2  ;;  %v2032_v40 = vadd.f32 %v6229_v47, %v8580_v31 }
 0x221   : > { %v6336_v42 = vpop.f32.mrf.mxu1  ;;  %v8752_v3 = vld [vmem:[#allocation3 + $0x80] sm:$0xff]  ;;  %v8754_v44 = vld [vmem:[#allocation3 + $0x88] sm:$0x3]  ;;  %6763 = vrot.lane.b32.xlu0 %v6762_v61, %s7305_s11 }
 0x222   : > { %2478 = vst.msk [vmem:[#allocation3 + $0x99] sm:$0xff] %vm2424_vm12, %v2341_v52  ;;  %v2185_v49 = vadd.f32 %v6335_v5, %v2024_v59  ;;  %v2805_v25 = vrot.slane %v8752_v3, 2  ;;  %v2807_v13 = vrot.slane %v8754_v44, 2  ;;  %6758 = vrot.lane.b32.xlu1 %v6762_v61, %s7308_s22  ;;  %v6777_v59 = vpack.i.bf16 %v8781_v41, %v8778_v14 }
 0x223   : > { %v6337_v20 = vpop.f32.mrf.mxu1  ;;  %v2620_v52 = vrot.slane %v8687_v23, 1  ;;  %v6787_v61 = vpack.i.bf16 %v2803_v0, %v2801_v37  ;;  %v2035_v37 = vadd.f32 %v6232_v18, %v8580_v31  ;;  %v6807_v18 = vpack.i.bf16 %v8712_v33, %v8709_v38 }
 0x224   : > { %v2346_v63 = vadd.f32 %v2345_v35, %v2185_v49  ;;  %v6338_v28 = vadd.f32 %v6337_v20, %v6336_v42  ;;  %v8770_v27 = vsel %vm2778_vm0, %v2804_v29, %v2805_v25  ;;  %v8773_v55 = vsel %vm2778_vm0, %v2805_v25, %v2807_v13 }
 0x225   : > { %v6339_v21 = vpop.f32.mrf.mxu1  ;;  %6547 = vmatprep.mubr.msk.f32.mxu0 %vm2424_vm12, %v8770_v27  ;;  %6768 = vrot.lane.b32.xlu0 %v6767_v58, %s7308_s22  ;;  %v8790_v35 = vld [vmem:[#allocation3 + $0x90] sm:$0xff]  ;;  %v2617_v25 = vrot.slane %v8666_v43, 1  ;;  %v2043_v33 = vadd.f32 %v8528_v32, %v8580_v31 }
 0x226   : > { %2479 = vst.msk [vmem:[#allocation3 + $0xa9] sm:$0xff] %vm2424_vm12, %v2346_v63  ;;  %6548 = vmatmul.mubr.msk.f32.gmra.mxu0 %vm2424_vm12, %v8773_v55  ;;  %v2188_v48 = vadd.f32 %v6338_v28, %v2027_v36  ;;  %6773 = vrot.lane.b32.xlu1 %v6767_v58, %s7305_s11  ;;  %v2809_v49 = vrot.slane %v8790_v35, 2  ;;  %v2361_v58 = vpop.f32.mrf.mxu0 }
 0x227   : > { %v6340_v34 = vpop.f32.mrf.mxu1  ;;  %v8825_v43 = vsel %vm1266_vm10, %v2617_v25, %v2618_v50  ;;  %v2048_v25 = vadd.f32 %v8538_v56, %v8580_v31 }
 0x228   : > { %v2349_v12 = vadd.f32 %v2348_v57, %v2188_v48  ;;  %v6341_v54 = vadd.f32 %v6340_v34, %v6339_v21  ;;  %v2040_v21 = vadd.f32 %v8518_v10, %v8580_v31 }
 0x229   : > { %v6342_v5 = vpop.f32.mrf.mxu1  ;;  %v8796_v11 = vld [vmem:[#allocation3 + $0x98] sm:$0xff]  ;;  %v8798_v42 = vld [vmem:[#allocation3 + $0xa0] sm:$0x3]  ;;  %6778 = vrot.lane.b32.xlu0 %v6777_v59, %s7307_s21 }
 0x22a   : > { %2480 = vst.msk [vmem:[#allocation3 + $0xb1] sm:$0xff] %vm2424_vm12, %v2349_v12  ;;  %v2193_v16 = vadd.f32 %v6341_v54, %v2032_v40  ;;  %v2810_v29 = vrot.slane %v8796_v11, 2  ;;  %v2812_v23 = vrot.slane %v8798_v42, 2  ;;  %6788 = vrot.lane.b32.xlu1 %v6787_v61, %s7307_s21  ;;  %v8840_v12 = vpop.f32.mrf.mxu0 }
 0x22b   : > { %v6343_v0 = vpop.f32.mrf.mxu1 }
 0x22c   : > { %v2354_v1 = vadd.f32 %v8722_v24, %v2193_v16  ;;  %v6344_v13 = vadd.f32 %v6343_v0, %v6342_v5  ;;  %v8813_v36 = vsel %vm2778_vm0, %v2809_v49, %v2810_v29  ;;  %v8816_v47 = vsel %vm2778_vm0, %v2810_v29, %v2812_v23  ;;  %v2364_v32 = vpop.f32.mrf.mxu0 }
 0x22d   : > { %v6345_v20 = vpop.f32.mrf.mxu1  ;;  %6550 = vmatprep.mubr.msk.f32.mxu0 %vm2424_vm12, %v8813_v36  ;;  %6783 = vrot.lane.b32.xlu0 %v6787_v61, %s7305_s11  ;;  %v8828_v24 = vsel %vm1266_vm10, %v2618_v50, %v2620_v52  ;;  %v8831_v28 = vld [vmem:[#allocation3 + $0xa8] sm:$0xff]  ;;  %v2635_v5 = vrot.slane %v8798_v42, 1  ;;  %v6822_v50 = vpack.i.bf16 %v8796_v11, %v8790_v35  ;;  %v2633_v16 = vrot.slane %v8796_v11, 1 }
 0x22e   : > { %2481 = vst.msk [vmem:[#allocation3 + $0xc1] sm:$0xff] %vm2424_vm12, %v2354_v1  ;;  %v2196_v17 = vadd.f32 %v6344_v13, %v2035_v37  ;;  %6551 = vmatmul.mubr.msk.f32.gmra.mxu0 %vm2424_vm12, %v8816_v47  ;;  %6793 = vrot.lane.b32.xlu1 %v6777_v59, %s7308_s22  ;;  %v6797_v40 = vpack.i.bf16 %v8828_v24, %v8825_v43  ;;  %v2814_v10 = vrot.slane %v8831_v28, 2  ;;  %v2632_v11 = vrot.slane %v8790_v35, 1 }
 0x22f   : > { %v6346_v63 = vpop.f32.mrf.mxu1  ;;  %v6827_v13 = vpack.i.bf16 %v8752_v3, %v8744_v4 }
 0x230   : > { %v2357_v57 = vadd.f32 %v8750_v9, %v2196_v17  ;;  %v6347_v48 = vadd.f32 %v6346_v63, %v6345_v20  ;;  %v8879_v63 = vsel %vm1266_vm10, %v2632_v11, %v2633_v16 }
 0x231   : > { %v6348_v34 = vpop.f32.mrf.mxu1  ;;  %v8842_v54 = vld [vmem:[#allocation3 + $0xb0] sm:$0xff]  ;;  %v8844_v59 = vld [vmem:[#allocation3 + $0xb8] sm:$0x3]  ;;  %6808 = vrot.lane.b32.xlu0 %v6807_v18, %s7307_s21 }
 0x232   : > { %2482 = vst.msk [vmem:[#allocation3 + $0xc9] sm:$0xff] %vm2424_vm12, %v2357_v57  ;;  %v2201_v52 = vadd.f32 %v6347_v48, %v2040_v21  ;;  %v2815_v9 = vrot.slane %v8842_v54, 2  ;;  %v2817_v38 = vrot.slane %v8844_v59, 2  ;;  %6798 = vrot.lane.b32.xlu1 %v6797_v40, %s7307_s21  ;;  %v8882_v21 = vsel %vm1266_vm10, %v2633_v16, %v2635_v5  ;;  %v8888_v48 = vpop.f32.mrf.mxu0 }
 0x233   : > { %v6349_v61 = vpop.f32.mrf.mxu1  ;;  %11364 = vst [vmem:[#allocation16_spill] sm:$0xff] %v8882_v21 }
 0x234   : > { %v2362_v49 = vadd.f32 %v2361_v58, %v2201_v52  ;;  %v6350_v29 = vadd.f32 %v6349_v61, %v6348_v34  ;;  %v8859_v23 = vsel %vm2778_vm0, %v2814_v10, %v2815_v9  ;;  %v8862_v37 = vsel %vm2778_vm0, %v2815_v9, %v2817_v38 }
 0x235   : > { %v6351_v0 = vpop.f32.mrf.mxu1  ;;  %6553 = vmatprep.mubr.msk.f32.mxu0 %vm2424_vm12, %v8859_v23  ;;  %6823 = vrot.lane.b32.xlu0 %v6822_v50, %s7305_s11  ;;  %v8876_v20 = vld [vmem:[#allocation3 + $0xc0] sm:$0xff]  ;;  %v2051_v9 = vadd.f32 %v8548_v7, %v8580_v31  ;;  %v2377_v7 = vpop.f32.mrf.mxu0 }
 0x236   : > { %2483 = vst.msk [vmem:[#allocation3 + $0xd9] sm:$0xff] %vm2424_vm12, %v2362_v49  ;;  %6554 = vmatmul.mubr.msk.f32.gmra.mxu0 %vm2424_vm12, %v8862_v37  ;;  %v2204_v42 = vadd.f32 %v6350_v29, %v2043_v33  ;;  %6803 = vrot.lane.b32.xlu1 %v6807_v18, %s7305_s11  ;;  %v2819_v34 = vrot.slane %v8876_v20, 2  ;;  %v8900_v33 = vpack.i.bf16 %v8882_v21, %v8879_v63  ;;  %v9146_v21 = vpop.permute.xlu1 %6703 }
 0x237   : > { %v6352_v1 = vpop.f32.mrf.mxu1 }
 0x238   : > { %v2365_v58 = vadd.f32 %v2364_v32, %v2204_v42  ;;  %v6353_v17 = vadd.f32 %v6352_v1, %v6351_v0  ;;  %v2056_v32 = vadd.f32 %v8554_v51, %v8580_v31 }
 0x239   : > { %v6354_v35 = vpop.f32.mrf.mxu1  ;;  %v8884_v57 = vld [vmem:[#allocation3 + $0xc8] sm:$0xff]  ;;  %v8886_v56 = vld [vmem:[#allocation3 + $0xd0] sm:$0x3]  ;;  %6828 = vrot.lane.b32.xlu0 %v6827_v13, %s7308_s22 }
 0x23a   : > { %2484 = vst.msk [vmem:[#allocation3 + $0xe1] sm:$0xff] %vm2424_vm12, %v2365_v58  ;;  %v2209_v18 = vadd.f32 %v6353_v17, %v2048_v25  ;;  %v2820_v52 = vrot.slane %v8884_v57, 2  ;;  %v2822_v10 = vrot.slane %v8886_v56, 2  ;;  %6813 = vrot.lane.b32.xlu1 %v6797_v40, %s7308_s22  ;;  %v6842_v25 = vpack.i.bf16 %v8816_v47, %v8813_v36  ;;  %v8924_v58 = vpop.f32.mrf.mxu0 }
 0x23b   : > { %v6355_v38 = vpop.f32.mrf.mxu1  ;;  %v2059_v36 = vadd.f32 %v8563_v2, %v8580_v31 }
 0x23c   : > { %v2370_v5 = vadd.f32 %v8800_v8, %v2209_v18  ;;  %v6356_v61 = vadd.f32 %v6355_v38, %v6354_v35  ;;  %v8904_v16 = vsel %vm2778_vm0, %v2819_v34, %v2820_v52  ;;  %v8907_v49 = vsel %vm2778_vm0, %v2820_v52, %v2822_v10 }
 0x23d   : > { %v6357_v29 = vpop.f32.mrf.mxu1  ;;  %6556 = vmatprep.mubr.msk.f32.mxu0 %vm2424_vm12, %v8904_v16  ;;  %6838 = vrot.lane.b32.xlu0 %v8900_v33, %s7307_s21  ;;  %v8917_v0 = vld [vmem:[#allocation3 + $0xd8] sm:$0xff]  ;;  %v8940_v34 = vpack.i.bf16 %v8773_v55, %v8770_v27  ;;  %v2628_v52 = vrot.slane %v8752_v3, 1  ;;  %v2627_v27 = vrot.slane %v8744_v4, 1  ;;  %v2064_v55 = vadd.f32 %v8582_v62, %v8580_v31 }
 0x23e   : > { %2485 = vst.msk [vmem:[#allocation3 + $0xf1] sm:$0xff] %vm2424_vm12, %v2370_v5  ;;  %v2212_v40 = vadd.f32 %v6356_v61, %v2051_v9  ;;  %6557 = vmatmul.mubr.msk.f32.gmra.mxu0 %vm2424_vm12, %v8907_v49  ;;  %6818 = vrot.lane.b32.xlu1 %v6822_v50, %s7308_s22  ;;  %v2824_v51 = vrot.slane %v8917_v0, 2  ;;  %v2630_v61 = vrot.slane %v8754_v44, 1 }
 0x23f   : > { %v6358_v8 = vpop.f32.mrf.mxu1 }
 0x240   : > { %v2373_v42 = vadd.f32 %v8840_v12, %v2212_v40  ;;  %v6359_v11 = vadd.f32 %v6358_v8, %v6357_v29  ;;  %v8965_v8 = vpack.i.bf16 %v8884_v57, %v8876_v20 }
 0x241   : > { %v6360_v1 = vpop.f32.mrf.mxu1  ;;  %v8926_v17 = vld [vmem:[#allocation3 + $0xe0] sm:$0xff]  ;;  %v8928_v35 = vld [vmem:[#allocation3 + $0xe8] sm:$0x3]  ;;  %6843 = vrot.lane.b32.xlu0 %v6842_v25, %s7305_s11 }
 0x242   : > { %2486 = vst.msk [vmem:[#allocation3 + $0xf9] sm:$0xff] %vm2424_vm12, %v2373_v42  ;;  %v2217_v50 = vadd.f32 %v6359_v11, %v2056_v32  ;;  %v2825_v12 = vrot.slane %v8926_v17, 2  ;;  %v2827_v18 = vrot.slane %v8928_v35, 2  ;;  %6833 = vrot.lane.b32.xlu1 %v6827_v13, %s7305_s11  ;;  %v2380_v13 = vpop.f32.mrf.mxu0  ;;  %v8968_v32 = vsel %vm1266_vm10, %v2627_v27, %v2628_v52 }
 0x243   : > { %v6361_v47 = vpop.f32.mrf.mxu1  ;;  %v2645_v42 = vrot.slane %v8886_v56, 1 }
 0x244   : > { %v2378_v10 = vadd.f32 %v2377_v7, %v2217_v50  ;;  %v6362_v9 = vadd.f32 %v6361_v47, %v6360_v1  ;;  %v8944_v38 = vsel %vm2778_vm0, %v2824_v51, %v2825_v12  ;;  %v8947_v5 = vsel %vm2778_vm0, %v2825_v12, %v2827_v18  ;;  %v8978_v1 = vpop.f32.mrf.mxu0 }
 0x245   : > { %v6363_v2 = vpop.f32.mrf.mxu1  ;;  %6559 = vmatprep.mubr.msk.f32.mxu0 %vm2424_vm12, %v8944_v38  ;;  %6868 = vrot.lane.b32.xlu0 %v8940_v34, %s7307_s21  ;;  %v8961_v29 = vld [vmem:[#allocation3 + $0xf0] sm:$0xff]  ;;  %v2643_v50 = vrot.slane %v8884_v57, 1  ;;  %v2067_v47 = vadd.f32 %v8592_v6, %v8580_v31 }
 0x246   : > { %2487 = vst.msk [vmem:[#allocation3 + $0x109] sm:$0xff] %vm2424_vm12, %v2378_v10  ;;  %6560 = vmatmul.mubr.msk.f32.gmra.mxu0 %vm2424_vm12, %v8947_v5  ;;  %v2220_v3 = vadd.f32 %v6362_v9, %v2059_v36  ;;  %6848 = vrot.lane.b32.xlu1 %v6842_v25, %s7307_s21  ;;  %v8976_v25 = vsel %vm1266_vm10, %v2628_v52, %v2630_v61  ;;  %v2829_v56 = vrot.slane %v8961_v29, 2  ;;  %v2642_v10 = vrot.slane %v8876_v20, 1 }
 0x247   : > { %v6364_v44 = vpop.f32.mrf.mxu1  ;;  %v6259_v36 = vadd.f32 %v8464_v53, %v8454_v60  ;;  %v8995_v52 = vpack.i.bf16 %v8842_v54, %v8831_v28  ;;  %v6857_v6 = vpack.i.bf16 %v8976_v25, %v8968_v32  ;;  %v9013_v20 = vsel %vm1266_vm10, %v2643_v50, %v2645_v42 }
 0x248   : > { %v2381_v7 = vadd.f32 %v2380_v13, %v2220_v3  ;;  %v6365_v40 = vadd.f32 %v6364_v44, %v6363_v2  ;;  %v9010_v13 = vsel %vm1266_vm10, %v2642_v10, %v2643_v50  ;;  %11366 = vst [vmem:[#allocation18_spill] sm:$0xff] %v9013_v20  ;;  %v6262_v3 = vadd.f32 %v8482_v15, %v8472_v30 }
 0x249   : > { %v6366_v4 = vpop.f32.mrf.mxu1  ;;  %v8971_v11 = vld [vmem:[#allocation3 + $0xf8] sm:$0xff]  ;;  %v8973_v62 = vld [vmem:[#allocation3 + $0x100] sm:$0x3]  ;;  %6883 = vrot.lane.b32.xlu0 %v8965_v8, %s7305_s11  ;;  %11365 = vst [vmem:[#allocation17_spill] sm:$0xff] %v9010_v13  ;;  %v2072_v44 = vadd.f32 %v6259_v36, %v8580_v31  ;;  %v9029_v42 = vpack.i.bf16 %v9013_v20, %v9010_v13 }
 0x24a   : > { %2488 = vst.msk [vmem:[#allocation3 + $0x111] sm:$0xff] %vm2424_vm12, %v2381_v7  ;;  %v2225_v51 = vadd.f32 %v6365_v40, %v2064_v55  ;;  %v2830_v12 = vrot.slane %v8971_v11, 2  ;;  %v2832_v18 = vrot.slane %v8973_v62, 2  ;;  %6853 = vrot.lane.b32.xlu1 %v8900_v33, %s7308_s22  ;;  %v2393_v33 = vpop.f32.mrf.mxu0  ;;  %v11367_v36 = vld [vmem:[#allocation5_spill] sm:$0xff] }
 0x24b   : > { %v6367_v57 = vpop.f32.mrf.mxu1 }
 0x24c   : > { %v2386_v9 = vadd.f32 %v8888_v48, %v2225_v51  ;;  %v6368_v61 = vadd.f32 %v6367_v57, %v6366_v4  ;;  %v9000_v2 = vsel %vm2778_vm0, %v2829_v56, %v2830_v12  ;;  %v9003_v60 = vsel %vm2778_vm0, %v2830_v12, %v2832_v18  ;;  %v9031_v50 = vpop.f32.mrf.mxu0 }
 0x24d   : > { %v6369_v53 = vpop.f32.mrf.mxu1  ;;  %6562 = vmatprep.mubr.msk.f32.mxu0 %vm2424_vm12, %v9000_v2  ;;  %6888 = vrot.lane.b32.xlu0 %v8995_v52, %s7308_s22  ;;  %v9023_v55 = vld [vmem:[#allocation3 + $0x108] sm:$0xff]  ;;  %v2075_v18 = vadd.f32 %v6262_v3, %v8580_v31  ;;  %v9048_v57 = vpack.i.bf16 %v8907_v49, %v8904_v16  ;;  %v9061_v49 = vpop.permute.xlu0 %6688 }
 0x24e   : > { %2489 = vst.msk [vmem:[#allocation3 + $0x121] sm:$0xff] %vm2424_vm12, %v2386_v9  ;;  %v2228_v48 = vadd.f32 %v6368_v61, %v2067_v47  ;;  %6563 = vmatmul.mubr.msk.f32.gmra.mxu0 %vm2424_vm12, %v9003_v60  ;;  %6858 = vrot.lane.b32.xlu1 %v6857_v6, %s7307_s21  ;;  %v6265_v47 = vadd.f32 %v11367_v36, %v8487_v45  ;;  %v2396_v45 = vpop.f32.mrf.mxu0 }
 0x24f   : > { %v6370_v27 = vpop.f32.mrf.mxu1 }
 0x250   : > { %v2389_v7 = vadd.f32 %v8924_v58, %v2228_v48  ;;  %v6371_v40 = vadd.f32 %v6370_v27, %v6369_v53  ;;  %v2834_v58 = vrot.slane %v9023_v55, 2 }
 0x251   : > { %v6372_v4 = vpop.f32.mrf.mxu1  ;;  %v9033_v51 = vld [vmem:[#allocation3 + $0x110] sm:$0xff]  ;;  %v9035_v30 = vld [vmem:[#allocation3 + $0x118] sm:$0x3]  ;;  %6898 = vrot.lane.b32.xlu0 %v9029_v42, %s7307_s21 }
 0x252   : > { %2490 = vst.msk [vmem:[#allocation3 + $0x129] sm:$0xff] %vm2424_vm12, %v2389_v7  ;;  %v2233_v15 = vadd.f32 %v6371_v40, %v2072_v44  ;;  %v2835_v56 = vrot.slane %v9033_v51, 2  ;;  %v2837_v12 = vrot.slane %v9035_v30, 2  ;;  %6863 = vrot.lane.b32.xlu1 %v8940_v34, %s7305_s11  ;;  %v11368_v34 = vld [vmem:[#allocation6_spill] sm:$0xff] }
 0x253   : > { %v6373_v10 = vpop.f32.mrf.mxu1  ;;  %11377 = vst [vmem:[#allocation6_spill] sm:$0xff] %v9146_v21 }
 0x254   : > { %v2394_v9 = vadd.f32 %v2393_v33, %v2233_v15  ;;  %v6374_v61 = vadd.f32 %v6373_v10, %v6372_v4  ;;  %v2836_v53 = vsel %vm2778_vm0, %v2834_v58, %v2835_v56  ;;  %v2838_v48 = vsel %vm2778_vm0, %v2835_v56, %v2837_v12  ;;  %v11369_v33 = vld [vmem:[#allocation7_spill] sm:$0xff]  ;;  %v9077_v10 = vpop.f32.mrf.mxu0 }
 0x255   : > { %v6375_v27 = vpop.f32.mrf.mxu1  ;;  %6565 = vmatprep.mubr.msk.f32.mxu0 %vm2424_vm12, %v2836_v53  ;;  %v9055_v3 = vpack.i.bf16 %v2838_v48, %v2836_v53  ;;  %6903 = vrot.lane.b32.xlu0 %v9048_v57, %s7305_s11  ;;  %v6268_v44 = vadd.f32 %v11369_v33, %v11368_v34  ;;  %v9066_v40 = vld [vmem:[#allocation3 + $0x120] sm:$0xff]  ;;  %v2080_v4 = vadd.f32 %v6265_v47, %v8580_v31 }
 0x256   : > { %2491 = vst.msk [vmem:[#allocation3 + $0x139] sm:$0xff] %vm2424_vm12, %v2394_v9  ;;  %6566 = vmatmul.mubr.msk.f32.gmra.mxu0 %vm2424_vm12, %v2838_v48  ;;  %v2236_v16 = vadd.f32 %v6374_v61, %v2075_v18  ;;  %6873 = vrot.lane.b32.xlu1 %v6857_v6, %s7308_s22  ;;  %v9071_v15 = vpack.i.bf16 %v8862_v37, %v8859_v23  ;;  %v2839_v47 = vrot.slane %v9066_v40, 2  ;;  %v11370_v61 = vld [vmem:[#allocation8_spill] sm:$0xff]  ;;  %v11371_v53 = vld [vmem:[#allocation9_spill] sm:$0xff] }
 0x257   : > { %v6376_v7 = vpop.f32.mrf.mxu1  ;;  %v2083_v9 = vadd.f32 %v6268_v44, %v8580_v31  ;;  %v6271_v48 = vadd.f32 %v11371_v53, %v11370_v61  ;;  %v9094_v33 = vpack.i.bf16 %v8971_v11, %v8961_v29 }
 0x258   : > { %v2397_v58 = vadd.f32 %v2396_v45, %v2236_v16  ;;  %v6377_v56 = vadd.f32 %v6376_v7, %v6375_v27  ;;  %v11372_v27 = vld [vmem:[#allocation10_spill] sm:$0xff]  ;;  %v11373_v45 = vld [vmem:[#allocation11_spill] sm:$0xff] }
 0x259   : > { %v6378_v12 = vpop.f32.mrf.mxu1  ;;  %v9073_v18 = vld [vmem:[#allocation3 + $0x128] sm:$0xff]  ;;  %v9075_v36 = vld [vmem:[#allocation3 + $0x130] sm:$0x3]  ;;  %6928 = vrot.lane.b32.xlu0 %v9071_v15, %s7307_s21  ;;  %v6274_v16 = vadd.f32 %v11373_v45, %v11372_v27  ;;  %v6947_v27 = vpack.i.bf16 %v8926_v17, %v8917_v0  ;;  %v2655_v45 = vrot.slane %v8973_v62, 1 }
 0x25a   : > { %2492 = vst.msk [vmem:[#allocation3 + $0x141] sm:$0xff] %vm2424_vm12, %v2397_v58  ;;  %v2241_v6 = vadd.f32 %v6377_v56, %v2080_v4  ;;  %v2840_v23 = vrot.slane %v9073_v18, 2  ;;  %v2842_v37 = vrot.slane %v9075_v36, 2  ;;  %6878 = vrot.lane.b32.xlu1 %v8965_v8, %s7308_s22  ;;  %v9103_v56 = vpop.permute.xlu0 %6693  ;;  %v2409_v8 = vpop.f32.mrf.mxu0 }
 0x25b   : > { %v6379_v34 = vpop.f32.mrf.mxu1 }
 0x25c   : > { %v2402_v7 = vadd.f32 %v8978_v1, %v2241_v6  ;;  %v6380_v4 = vadd.f32 %v6379_v34, %v6378_v12  ;;  %v9098_v58 = vsel %vm2778_vm0, %v2839_v47, %v2840_v23  ;;  %v9101_v44 = vsel %vm2778_vm0, %v2840_v23, %v2842_v37 }
 0x25d   : > { %v6381_v61 = vpop.f32.mrf.mxu1  ;;  %6568 = vmatprep.mubr.msk.f32.mxu0 %vm2424_vm12, %v9098_v58  ;;  %6943 = vrot.lane.b32.xlu0 %v9094_v33, %s7305_s11  ;;  %v2088_v1 = vadd.f32 %v6271_v48, %v8580_v31  ;;  %v2091_v12 = vadd.f32 %v6274_v16, %v8580_v31  ;;  %v9116_v47 = vld [vmem:[#allocation3 + $0x138] sm:$0xff]  ;;  %v2640_v23 = vrot.slane %v8844_v59, 1  ;;  %v9123_v48 = vpop.f32.mrf.mxu0 }
 0x25e   : > { %2493 = vst.msk [vmem:[#allocation3 + $0x151] sm:$0xff] %vm2424_vm12, %v2402_v7  ;;  %v2244_v53 = vadd.f32 %v6380_v4, %v2083_v9  ;;  %6569 = vmatmul.mubr.msk.f32.gmra.mxu0 %vm2424_vm12, %v9101_v44  ;;  %6893 = vrot.lane.b32.xlu1 %v8995_v52, %s7305_s11  ;;  %v2638_v52 = vrot.slane %v8842_v54, 1  ;;  %v2653_v7 = vrot.slane %v8971_v11, 1  ;;  %v2637_v11 = vrot.slane %v8831_v28, 1 }
 0x25f   : > { %v6382_v6 = vpop.f32.mrf.mxu1 }
 0x260   : > { %v2405_v37 = vadd.f32 %v9031_v50, %v2244_v53  ;;  %v6383_v9 = vadd.f32 %v6382_v6, %v6381_v61  ;;  %v2844_v50 = vrot.slane %v9116_v47, 2  ;;  %v9136_v61 = vpop.permute.xlu0 %6698  ;;  %v11375_v53 = vld [vmem:[#allocation12_spill] sm:$0xff]  ;;  %v11376_v6 = vld [vmem:[#allocation13_spill] sm:$0xff]  ;;  %v9155_v28 = vsel %vm1266_vm10, %v2653_v7, %v2655_v45 }
 0x261   : > { %v6384_v34 = vpop.f32.mrf.mxu1  ;;  %v9125_v31 = vld [vmem:[#allocation3 + $0x140] sm:$0xff]  ;;  %v9127_v16 = vld [vmem:[#allocation3 + $0x148] sm:$0x3]  ;;  %6948 = vrot.lane.b32.xlu0 %v6947_v27, %s7308_s22  ;;  %11374 = vst [vmem:[#allocation5_spill] sm:$0xff] %v9136_v61  ;;  %v6277_v19 = vadd.f32 %v11376_v6, %v11375_v53  ;;  %v2412_v6 = vpop.f32.mrf.mxu0  ;;  %11379 = vst [vmem:[#allocation8_spill] sm:$0xff] %v9155_v28 }
 0x262   : > { %2494 = vst.msk [vmem:[#allocation3 + $0x159] sm:$0xff] %vm2424_vm12, %v2405_v37  ;;  %v2249_v59 = vadd.f32 %v6383_v9, %v2088_v1  ;;  %v2845_v62 = vrot.slane %v9125_v31, 2  ;;  %v2847_v4 = vrot.slane %v9127_v16, 2  ;;  %6908 = vrot.lane.b32.xlu1 %v9048_v57, %s7307_s21  ;;  %v2652_v1 = vrot.slane %v8961_v29, 1 }
 0x263   : > { %v6385_v54 = vpop.f32.mrf.mxu1 }
 0x264   : > { %v2410_v37 = vadd.f32 %v2409_v8, %v2249_v59  ;;  %v6386_v9 = vadd.f32 %v6385_v54, %v6384_v34  ;;  %v2846_v20 = vsel %vm2778_vm0, %v2844_v50, %v2845_v62  ;;  %v2848_v13 = vsel %vm2778_vm0, %v2845_v62, %v2847_v4  ;;  %v11380_v34 = vld [vmem:[#allocation14_spill] sm:$0xff]  ;;  %v11381_v59 = vld [vmem:[#allocation15_spill] sm:$0xff] }
 0x265   : > { %v6387_v61 = vpop.f32.mrf.mxu1  ;;  %6571 = vmatprep.mubr.msk.f32.mxu0 %vm2424_vm12, %v2846_v20  ;;  %v9149_v53 = vpack.i.bf16 %v2848_v13, %v2846_v20  ;;  %v9152_v57 = vsel %vm1266_vm10, %v2652_v1, %v2653_v7  ;;  %6953 = vrot.lane.b32.xlu0 %v6947_v27, %s7305_s11  ;;  %v9161_v8 = vsel %vm1266_vm10, %v2637_v11, %v2638_v52  ;;  %v9170_v7 = vld [vmem:[#allocation3 + $0x150] sm:$0xff] }
 0x266   : > { %11378 = vst [vmem:[#allocation7_spill] sm:$0xff] %v9152_v57  ;;  %2495 = vst.msk [vmem:[#allocation3 + $0x169] sm:$0xff] %vm2424_vm12, %v2410_v37  ;;  %6572 = vmatmul.mubr.msk.f32.gmra.mxu0 %vm2424_vm12, %v2848_v13  ;;  %v2252_v29 = vadd.f32 %v6386_v9, %v2091_v12  ;;  %v9164_v20 = vsel %vm1266_vm10, %v2638_v52, %v2640_v23  ;;  %v6280_v50 = vadd.f32 %v11381_v59, %v11380_v34  ;;  %v7255_v13 = vld [vmem:[%s11318_s2] ss:$0 sm:$0xff]  ;;  %v9179_v52 = vpop.permute.xlu0 %4404  ;;  %v9196_v34 = vpop.permute.xlu1 %4406 }
 0x267   : > { %6913 = vrot.lane.b32.xlu1 %v9029_v42, %s7308_s22  ;;  %v6388_v45 = vpop.f32.mrf.mxu1  ;;  %v2096_v12 = vadd.f32 %v7255_v13, %v6277_v19  ;;  %v9177_v23 = vpack.i.bf16 %v9155_v28, %v9152_v57  ;;  %11382 = vst [vmem:[#allocation9_spill] sm:$0xff] %v9179_v52  ;;  %v6917_v42 = vpack.i.bf16 %v9164_v20, %v9161_v8  ;;  %v2849_v19 = vrot.slane %v9170_v7, 2 }
 0x268   : > { %v2413_v27 = vadd.f32 %v2412_v6, %v2252_v29  ;;  %v6389_v62 = vadd.f32 %v6388_v45, %v6387_v61  ;;  %v2099_v9 = vadd.f32 %v7255_v13, %v6280_v50  ;;  %v6962_v6 = vpack.i.bf16 %v9003_v60, %v9000_v2  ;;  %11383 = vst [vmem:[#allocation10_spill] sm:$0xff] %v9196_v34 }
 0x269   : > { %v6390_v4 = vpop.f32.mrf.mxu1  ;;  %v9183_v54 = vld [vmem:[#allocation3 + $0x158] sm:$0xff]  ;;  %v9185_v11 = vld [vmem:[#allocation3 + $0x160] sm:$0x3]  ;;  %6958 = vrot.lane.b32.xlu0 %v9177_v23, %s7307_s21 }
 0x26a   : > { %2496 = vst.msk [vmem:[#allocation3 + $0x171] sm:$0xff] %vm2424_vm12, %v2413_v27  ;;  %v2257_v1 = vadd.f32 %v6389_v62, %v2096_v12  ;;  %v2850_v61 = vrot.slane %v9183_v54, 2  ;;  %v2852_v37 = vrot.slane %v9185_v11, 2  ;;  %v9207_v2 = vpop.permute.xlu0 %4580 }
 0x26b   : > { %6918 = vrot.lane.b32.xlu1 %v6917_v42, %s7307_s21  ;;  %v6391_v29 = vpop.f32.mrf.mxu1  ;;  %11384 = vst [vmem:[#allocation11_spill] sm:$0xff] %v9207_v2  ;;  %v6695_v2 = vunpack.i.l.bf16 %v9103_v56 }
 0x26c   : > { %v2418_v59 = vadd.f32 %v9077_v10, %v2257_v1  ;;  %v6392_v45 = vadd.f32 %v6391_v29, %v6390_v4  ;;  %v2851_v12 = vsel %vm2778_vm0, %v2849_v19, %v2850_v61  ;;  %v2853_v27 = vsel %vm2778_vm0, %v2850_v61, %v2852_v37  ;;  %v9216_v4 = vpop.permute.xlu1 %4582 }
 0x26d   : > { %6574 = vmatprep.mubr.msk.f32.mxu0 %vm2424_vm12, %v2851_v12  ;;  %v9202_v62 = vpack.i.bf16 %v2853_v27, %v2851_v12  ;;  %6963 = vrot.lane.b32.xlu0 %v6962_v6, %s7305_s11  ;;  %v9211_v60 = vld [vmem:[#allocation3 + $0x168] sm:$0xff]  ;;  %v6987_v10 = vpack.i.bf16 %v8947_v5, %v8944_v38  ;;  %11385 = vst [vmem:[#allocation12_spill] sm:$0xff] %v9216_v4  ;;  %v2650_v12 = vrot.slane %v8928_v35, 1  ;;  %v2648_v35 = vrot.slane %v8926_v17, 1 }
 0x26e   : > { %2497 = vst.msk [vmem:[#allocation3 + $0x181] sm:$0xff] %vm2424_vm12, %v2418_v59  ;;  %v2260_v50 = vadd.f32 %v6392_v45, %v2099_v9  ;;  %6575 = vmatmul.mubr.msk.f32.gmra.mxu0 %vm2424_vm12, %v2853_v27  ;;  %v2854_v61 = vrot.slane %v9211_v60, 2  ;;  %v9232_v9 = vpop.permute.xlu0 %5039  ;;  %v7007_v45 = vpack.i.bf16 %v9033_v51, %v9023_v55  ;;  %v2665_v27 = vrot.slane %v9075_v36, 1 }
 0x26f   : > { %6923 = vrot.lane.b32.xlu1 %v9071_v15, %s7305_s11  ;;  %11386 = vst [vmem:[#allocation13_spill] sm:$0xff] %v9232_v9 }
 0x270   : > { %v2421_v13 = vadd.f32 %v9123_v48, %v2260_v50  ;;  %v7002_v48 = vpack.i.bf16 %v9073_v18, %v9066_v40  ;;  %v9237_v59 = vpop.permute.xlu1 %5041 }
 0x271   : > { %v9218_v1 = vld [vmem:[#allocation3 + $0x170] sm:$0xff]  ;;  %v9220_v19 = vld [vmem:[#allocation3 + $0x178] sm:$0x3]  ;;  %6988 = vrot.lane.b32.xlu0 %v6987_v10, %s7307_s21  ;;  %11387 = vst [vmem:[#allocation14_spill] sm:$0xff] %v9237_v59 }
 0x272   : > { %2498 = vst.msk [vmem:[#allocation3 + $0x189] sm:$0xff] %vm2424_vm12, %v2421_v13  ;;  %v2855_v15 = vrot.slane %v9218_v1, 2  ;;  %v2857_v37 = vrot.slane %v9220_v19, 2 }
 0x273   : > { %6933 = vrot.lane.b32.xlu1 %v6917_v42, %s7308_s22 }
 0x274   : > { %v2856_v38 = vsel %vm2778_vm0, %v2854_v61, %v2855_v15  ;;  %v2858_v5 = vsel %vm2778_vm0, %v2855_v15, %v2857_v37  ;;  %v2663_v61 = vrot.slane %v9073_v18, 1  ;;  %v9257_v37 = vpop.permute.xlu0 %5141  ;;  %v9262_v36 = vpop.permute.xlu1 %5143 }
 0x275   : > { %6577 = vmatprep.mubr.msk.f32.mxu0 %vm2424_vm12, %v2856_v38  ;;  %v9235_v29 = vpack.i.bf16 %v2858_v5, %v2856_v38  ;;  %7003 = vrot.lane.b32.xlu0 %v7002_v48, %s7305_s11  ;;  %v9243_v42 = vld [vmem:[#allocation3 + $0x180] sm:$0xff]  ;;  %11388 = vst [vmem:[#allocation15_spill] sm:$0xff] %v9257_v37  ;;  %11389 = vst [vmem:[#allocation19_spill] sm:$0xff] %v9262_v36  ;;  %v2647_v37 = vrot.slane %v8917_v0, 1  ;;  %v9293_v0 = vsel %vm1266_vm10, %v2648_v35, %v2650_v12 }
 0x276   : > { %6578 = vmatmul.mubr.msk.f32.gmra.mxu0 %vm2424_vm12, %v2858_v5  ;;  %v3091_v15 = vrot.slane %v9243_v42, 2  ;;  %v2662_v5 = vrot.slane %v9066_v40, 1  ;;  %11392 = vst [vmem:[#allocation22_spill] sm:$0xff] %v9293_v0  ;;  %v2660_v36 = vrot.slane %v9035_v30, 1 }
 0x277   : > { %6938 = vrot.lane.b32.xlu1 %v9094_v33, %s7308_s22 }
 0x278   : > { %v9281_v40 = vsel %vm1266_vm10, %v2662_v5, %v2663_v61  ;;  %v6690_v5 = vunpack.i.l.bf16 %v9061_v49 }
 0x279   : > { %v9249_v50 = vld [vmem:[#allocation3 + $0x188] sm:$0xff]  ;;  %v9251_v13 = vld [vmem:[#allocation3 + $0x190] sm:$0x3]  ;;  %7008 = vrot.lane.b32.xlu0 %v7007_v45, %s7308_s22  ;;  %11390 = vst [vmem:[#allocation20_spill] sm:$0xff] %v9281_v40 }
 0x27a   : > { %v3092_v33 = vrot.slane %v9249_v50, 2  ;;  %v3094_v38 = vrot.slane %v9251_v13, 2  ;;  %v9267_v18 = vpack.i.bf16 %v9249_v50, %v9243_v42 }
 0x27b   : > { %6968 = vrot.lane.b32.xlu1 %v6962_v6, %s7307_s21  ;;  %v9284_v6 = vsel %vm1266_vm10, %v2663_v61, %v2665_v27 }
 0x27c   : > { %v9270_v59 = vsel %vm2778_vm0, %v3091_v15, %v3092_v33  ;;  %v9273_v9 = vsel %vm2778_vm0, %v3092_v33, %v3094_v38  ;;  %11391 = vst [vmem:[#allocation21_spill] sm:$0xff] %v9284_v6  ;;  %v9290_v15 = vsel %vm1266_vm10, %v2647_v37, %v2648_v35  ;;  %v7017_v38 = vpack.i.bf16 %v9284_v6, %v9281_v40 }
 0x27d   : > { %6580 = vmatprep.mubr.msk.f32.mxu0 %vm2424_vm12, %v9270_v59  ;;  %7013 = vrot.lane.b32.xlu0 %v7007_v45, %s7305_s11  ;;  %v6977_v61 = vpack.i.bf16 %v9293_v0, %v9290_v15  ;;  %v7022_v45 = vpack.i.bf16 %v9101_v44, %v9098_v58  ;;  %v2658_v44 = vrot.slane %v9033_v51, 1  ;;  %v7057_v51 = vpack.i.bf16 %v9125_v31, %v9116_v47 }
 0x27e   : > { %6581 = vmatmul.mubr.msk.f32.gmra.mxu0 %vm2424_vm12, %v9273_v9 }
 0x27f   : > { %6973 = vrot.lane.b32.xlu1 %v9177_v23, %s7308_s22  ;;  %v6714_v33 = vpop.permute.xlu0 %6713  ;;  %v9299_v27 = vpop.permute.xlu1 %6708 }
 0x281   : > { %7018 = vrot.lane.b32.xlu0 %v7017_v38, %s7307_s21 }
 0x283   : > { %6978 = vrot.lane.b32.xlu1 %v6977_v61, %s7307_s21  ;;  %v9307_v12 = vpop.permute.xlu0 %6718  ;;  %v9309_v37 = vpop.permute.xlu1 %6733 }
 0x285   : > { %7023 = vrot.lane.b32.xlu0 %v7022_v45, %s7305_s11 }
 0x287   : > { %6983 = vrot.lane.b32.xlu1 %v6987_v10, %s7305_s11  ;;  %v9313_v23 = vpop.permute.xlu0 %6723  ;;  %v6739_v35 = vpop.permute.xlu1 %6738  ;;  %v2657_v10 = vrot.slane %v9023_v55, 1  ;;  %v6715_v55 = vunpack.i.l.bf16 %v6714_v33 }
 0x289   : > { %7033 = vrot.lane.b32.xlu0 %v7017_v38, %s7308_s22  ;;  %v6691_v38 = vunpack.i.h.bf16 %v9061_v49  ;;  %v9336_v6 = vsel %vm1266_vm10, %v2657_v10, %v2658_v44  ;;  %v6720_v49 = vunpack.i.l.bf16 %v9307_v12  ;;  %v6696_v10 = vunpack.i.h.bf16 %v9103_v56  ;;  %v7257_v56 = vld [vmem:[#allocation3 + $0x8] sm:$0xff] }
 0x28b   : > { %6993 = vrot.lane.b32.xlu1 %v6977_v61, %s7308_s22  ;;  %v9318_v17 = vpop.permute.xlu0 %6728  ;;  %v7256_v61 = vld [vmem:[#allocation3] sm:$0xff] }
 0x28c   : > { %v9320_v58 = vpop.permute.xlu1 %6743  ;;  %v3397_v4 = vsel %vm2424_vm12, %v7256_v61, %v6690_v5  ;;  %v9341_v5 = vsel %vm1266_vm10, %v2658_v44, %v2660_v36  ;;  %v6740_v61 = vunpack.i.l.bf16 %v6739_v35  ;;  %v6741_v36 = vunpack.i.h.bf16 %v6739_v35 }
 0x28d   : > { %7048 = vrot.lane.b32.xlu0 %v9055_v3, %s7307_s21 }
 0x28f   : > { %6998 = vrot.lane.b32.xlu1 %v7002_v48, %s7308_s22  ;;  %v6754_v34 = vpop.permute.xlu0 %6753  ;;  %v6716_v48 = vunpack.i.h.bf16 %v6714_v33 }
 0x290   : > { %v9333_v52 = vpop.permute.xlu1 %6748  ;;  %v6756_v30 = vunpack.i.h.bf16 %v6754_v34  ;;  %v6755_v21 = vunpack.i.l.bf16 %v6754_v34 }
 0x291   : > { %7058 = vrot.lane.b32.xlu0 %v7057_v51, %s7308_s22 }
 0x292   : > { %v3494_v40 = vsel %vm2424_vm12, %v8685_v39, %v6755_v21  ;;  %v3495_v34 = vsel %vm2424_vm12, %v8695_v26, %v6756_v30  ;;  %v3429_v39 = vsel %vm1429_vm11, %v3397_v4, %v6695_v2  ;;  %v6721_v26 = vunpack.i.h.bf16 %v9307_v12 }
 0x293   : > { %7028 = vrot.lane.b32.xlu1 %v7022_v45, %s7307_s21  ;;  %v9349_v33 = vpop.permute.xlu0 %6763  ;;  %v3526_v28 = vsel %vm1429_vm11, %v3494_v40, %v6715_v55  ;;  %v3527_v57 = vsel %vm1429_vm11, %v3495_v34, %v6716_v48  ;;  %v7037_v45 = vpack.i.bf16 %v9341_v5, %v9336_v6  ;;  %v3462_v21 = vsel %vm3461_vm2, %v3429_v39, %v6720_v49 }
 0x294   : > { %v9353_v44 = vpop.permute.xlu1 %6758  ;;  %v3558_v0 = vsel %vm3461_vm2, %v3526_v28, %v6740_v61  ;;  %v3398_v40 = vsel %vm2424_vm12, %v7257_v56, %v6691_v38  ;;  %v3559_v35 = vsel %vm3461_vm2, %v3527_v57, %v6741_v36  ;;  %v7072_v28 = vpack.i.bf16 %v9183_v54, %v9170_v7 }
 0x295   : > { %7063 = vrot.lane.b32.xlu0 %v7057_v51, %s7305_s11  ;;  %3761 = vmatprep.mubr.f32.mxu1 %v3558_v0  ;;  %v2675_v2 = vrot.slane %v9185_v11, 1  ;;  %v3430_v0 = vsel %vm1429_vm11, %v3398_v40, %v6696_v10  ;;  %v2673_v12 = vrot.slane %v9183_v54, 1  ;;  %v2672_v57 = vrot.slane %v9170_v7, 1 }
 0x296   : > { %3762 = vmatmul.mubr.f32.vlgmr.msra.gmra.mxu1 %v3462_v21  ;;  %v3463_v38 = vsel %vm3461_vm2, %v3430_v0, %v6721_v26  ;;  %v2670_v54 = vrot.slane %v9127_v16, 1  ;;  %v2667_v61 = vrot.slane %v9116_v47, 1  ;;  %v6735_v39 = vunpack.i.l.bf16 %v9309_v37 }
 0x297   : > { %7038 = vrot.lane.b32.xlu1 %v7037_v45, %s7307_s21  ;;  %v9365_v30 = vpop.permute.xlu0 %6768  ;;  %3766 = vmatprep.mubr.f32.mxu1 %v3559_v35  ;;  %v9384_v11 = vsel %vm1266_vm10, %v2672_v57, %v2673_v12  ;;  %v9387_v55 = vsel %vm1266_vm10, %v2673_v12, %v2675_v2  ;;  %v6745_v26 = vunpack.i.l.bf16 %v9320_v58  ;;  %v6750_v56 = vunpack.i.l.bf16 %v9333_v52 }
 0x298   : > { %v9370_v4 = vpop.permute.xlu1 %6773  ;;  %11393 = vst [vmem:[#allocation23_spill] sm:$0xff] %v9384_v11  ;;  %11394 = vst [vmem:[#allocation24_spill] sm:$0xff] %v9387_v55  ;;  %v7097_v49 = vpack.i.bf16 %v9387_v55, %v9384_v11  ;;  %v2680_v40 = vrot.slane %v9220_v19, 1  ;;  %v2678_v2 = vrot.slane %v9218_v1, 1  ;;  %v6736_v0 = vunpack.i.h.bf16 %v9309_v37 }
 0x299   : > { %7073 = vrot.lane.b32.xlu0 %v7072_v28, %s7305_s11  ;;  %v6775_v35 = vunpack.i.l.bf16 %v9370_v4  ;;  %v7117_v57 = vpack.i.bf16 %v9218_v1, %v9211_v60  ;;  %v6746_v19 = vunpack.i.h.bf16 %v9320_v58  ;;  %v6751_v37 = vunpack.i.h.bf16 %v9333_v52 }
 0x29a   : > { %3767 = vmatmul.mubr.f32.gmra.mxu1 %v3463_v38 }
 0x29b   : > { %7043 = vrot.lane.b32.xlu1 %v9055_v3, %s7305_s11  ;;  %v9379_v51 = vpop.permute.xlu0 %6778  ;;  %v2668_v3 = vrot.slane %v9125_v31, 1 }
 0x29c   : > { %v9381_v48 = vpop.permute.xlu1 %6788 }
 0x29d   : > { %7088 = vrot.lane.b32.xlu0 %v9149_v53, %s7307_s21  ;;  %v9403_v16 = vsel %vm1266_vm10, %v2667_v61, %v2668_v3  ;;  %v9406_v10 = vsel %vm1266_vm10, %v2668_v3, %v2670_v54  ;;  %v6776_v54 = vunpack.i.h.bf16 %v9370_v4 }
 0x29e   : > { %11395 = vst [vmem:[#allocation25_spill] sm:$0xff] %v9406_v10 }
 0x29f   : > { %7053 = vrot.lane.b32.xlu1 %v7037_v45, %s7308_s22  ;;  %v9394_v7 = vpop.permute.xlu0 %6783  ;;  %v7077_v45 = vpack.i.bf16 %v9406_v10, %v9403_v16 }
 0x2a0   : > { %v9399_v34 = vpop.permute.xlu1 %6793 }
 0x2a1   : > { %7098 = vrot.lane.b32.xlu0 %v7097_v49, %s7307_s21 }
 0x2a3   : > { %7068 = vrot.lane.b32.xlu1 %v7072_v28, %s7308_s22  ;;  %v9409_v31 = vpop.permute.xlu0 %6808  ;;  %v2677_v28 = vrot.slane %v9211_v60, 1  ;;  %v6710_v60 = vunpack.i.l.bf16 %v9299_v27 }
 0x2a4   : > { %v9411_v36 = vpop.permute.xlu1 %6798  ;;  %v6810_v12 = vunpack.i.l.bf16 %v9409_v31  ;;  %v6811_v52 = vunpack.i.h.bf16 %v9409_v31  ;;  %v7259_v31 = vld [vmem:[#allocation3 + $0x20] sm:$0xff] }
 0x2a5   : > { %7103 = vrot.lane.b32.xlu0 %v9202_v62, %s7305_s11  ;;  %v9450_v58 = vsel %vm1266_vm10, %v2677_v28, %v2678_v2 }
 0x2a7   : > { %7078 = vrot.lane.b32.xlu1 %v7077_v45, %s7307_s21  ;;  %v9418_v47 = vpop.permute.xlu0 %6823 }
 0x2a8   : > { %v9422_v21 = vpop.permute.xlu1 %6803 }
 0x2a9   : > { %7113 = vrot.lane.b32.xlu0 %v7097_v49, %s7308_s22  ;;  %v7258_v49 = vld [vmem:[#allocation3 + $0x18] sm:$0xff] }
 0x2aa   : > { %v3399_v61 = vsel %vm2424_vm12, %v7258_v49, %v6745_v26  ;;  %v3497_v26 = vsel %vm2424_vm12, %v8661_v46, %v6736_v0  ;;  %v6725_v0 = vunpack.i.l.bf16 %v9313_v23 }
 0x2ab   : > { %7083 = vrot.lane.b32.xlu1 %v9149_v53, %s7305_s11  ;;  %v9434_v38 = vpop.permute.xlu0 %6828  ;;  %v3496_v53 = vsel %vm2424_vm12, %v8658_v22, %v6735_v39  ;;  %v3431_v10 = vsel %vm1429_vm11, %v3399_v61, %v6750_v56  ;;  %v9453_v22 = vsel %vm1266_vm10, %v2678_v2, %v2680_v40  ;;  %v6765_v56 = vunpack.i.l.bf16 %v9349_v33 }
 0x2ac   : > { %v6814_v3 = vpop.permute.xlu1 %6813  ;;  %v3528_v1 = vsel %vm1429_vm11, %v3496_v53, %v6775_v35  ;;  %v3464_v40 = vsel %vm3461_vm2, %v3431_v10, %v6710_v60  ;;  %v3529_v28 = vsel %vm1429_vm11, %v3497_v26, %v6776_v54  ;;  %v3400_v2 = vsel %vm2424_vm12, %v7259_v31, %v6746_v19 }
 0x2ad   : > { %v6816_v55 = vunpack.i.h.bf16 %v6814_v3  ;;  %v6815_v11 = vunpack.i.l.bf16 %v6814_v3  ;;  %7118 = vrot.lane.b32.xlu0 %v7117_v57, %s7308_s22  ;;  %v7127_v10 = vpack.i.bf16 %v9453_v22, %v9450_v58  ;;  %v3057_v19 = vrot.slane %v9251_v13, 1 }
 0x2ae   : > { %v6766_v3 = vunpack.i.h.bf16 %v9349_v33  ;;  %v3055_v61 = vrot.slane %v9249_v50, 1  ;;  %v6731_v50 = vunpack.i.h.bf16 %v9318_v17 }
 0x2af   : > { %7093 = vrot.lane.b32.xlu1 %v7077_v45, %s7308_s22  ;;  %v9456_v4 = vpop.permute.xlu0 %6838  ;;  %v3560_v39 = vsel %vm3461_vm2, %v3528_v1, %v6815_v11  ;;  %v3498_v45 = vsel %vm2424_vm12, %v8825_v43, %v6810_v12  ;;  %v3561_v46 = vsel %vm3461_vm2, %v3529_v28, %v6816_v55  ;;  %v3432_v11 = vsel %vm1429_vm11, %v3400_v2, %v6751_v37 }
 0x2b0   : > { %v9464_v35 = vpop.permute.xlu1 %6818  ;;  %3771 = vmatprep.mubr.f32.mxu1 %v3560_v39  ;;  %v6711_v43 = vunpack.i.h.bf16 %v9299_v27  ;;  %v3530_v12 = vsel %vm1429_vm11, %v3498_v45, %v6765_v56  ;;  %v6795_v55 = vunpack.i.l.bf16 %v9399_v34  ;;  %v3499_v27 = vsel %vm2424_vm12, %v8828_v24, %v6811_v52  ;;  %v7260_v24 = vld [vmem:[#allocation3 + $0x30] sm:$0xff] }
 0x2b1   : > { %3772 = vmatmul.mubr.f32.gmra.mxu1 %v3464_v40  ;;  %7123 = vrot.lane.b32.xlu0 %v7117_v57, %s7305_s11  ;;  %v6730_v57 = vunpack.i.l.bf16 %v9318_v17  ;;  %v6726_v37 = vunpack.i.h.bf16 %v9313_v23  ;;  %v3401_v33 = vsel %vm2424_vm12, %v7260_v24, %v6725_v0  ;;  %v3531_v60 = vsel %vm1429_vm11, %v3499_v27, %v6766_v3  ;;  %v7261_v17 = vld [vmem:[#allocation3 + $0x38] sm:$0xff] }
 0x2b2   : > { %3776 = vmatprep.mubr.f32.mxu1 %v3561_v46  ;;  %v3465_v49 = vsel %vm3461_vm2, %v3432_v11, %v6711_v43  ;;  %v3562_v13 = vsel %vm3461_vm2, %v3530_v12, %v6795_v55  ;;  %v3054_v1 = vrot.slane %v9243_v42, 1  ;;  %v6796_v52 = vunpack.i.h.bf16 %v9399_v34  ;;  %v7262_v0 = vld [vmem:[#allocation3 + $0x198] sm:$0xff] }
 0x2b3   : > { %7108 = vrot.lane.b32.xlu1 %v9202_v62, %s7307_s21  ;;  %v9482_v54 = vpop.permute.xlu0 %6843  ;;  %v6770_v62 = vunpack.i.l.bf16 %v9365_v30  ;;  %v3433_v26 = vsel %vm1429_vm11, %v3401_v33, %v6730_v57  ;;  %v6771_v23 = vunpack.i.h.bf16 %v9365_v30  ;;  %v9513_v28 = vsel %vm1266_vm10, %v3055_v61, %v3057_v19  ;;  %v7263_v19 = vld [vmem:[#allocation3 + $0x1a0] sm:$0xff] }
 0x2b4   : > { %v9488_v53 = vpop.permute.xlu1 %6833  ;;  %v9510_v40 = vsel %vm1266_vm10, %v3054_v1, %v3055_v61  ;;  %v3563_v42 = vsel %vm3461_vm2, %v3531_v60, %v6796_v52  ;;  %v3402_v30 = vsel %vm2424_vm12, %v7261_v17, %v6726_v37  ;;  %v3392_v12 = vrot.slane %v7262_v0, 2  ;;  %v7264_v61 = vld [vmem:[#allocation3 + $0x1a8] sm:$0x3] }
 0x2b5   : > { %3777 = vmatmul.mubr.f32.gmra.mxu1 %v3465_v49  ;;  %7138 = vrot.lane.b32.xlu0 %v9235_v29, %s7307_s21  ;;  %v3466_v56 = vsel %vm3461_vm2, %v3433_v26, %v6770_v62  ;;  %v3434_v31 = vsel %vm1429_vm11, %v3402_v30, %v6731_v50  ;;  %v7162_v2 = vpack.i.bf16 %v9513_v28, %v9510_v40  ;;  %v3393_v57 = vrot.slane %v7263_v19, 2 }
 0x2b6   : > { %3781 = vmatprep.mubr.f32.mxu1 %v3562_v13  ;;  %v3467_v11 = vsel %vm3461_vm2, %v3434_v31, %v6771_v23  ;;  %v6790_v27 = vunpack.i.l.bf16 %v9381_v48  ;;  %v6800_v3 = vunpack.i.l.bf16 %v9411_v36  ;;  %v6805_v49 = vunpack.i.l.bf16 %v9422_v21  ;;  %v7266_v31 = vld [vmem:[#allocation3 + $0x50] sm:$0xff] }
 0x2b7   : > { %7128 = vrot.lane.b32.xlu1 %v7127_v10, %s7307_s21  ;;  %v9502_v39 = vpop.permute.xlu0 %6868  ;;  %v6835_v13 = vunpack.i.l.bf16 %v9488_v53  ;;  %v11396_v37 = vpack.i.bf16 %v9273_v9, %v9270_v59  ;;  %v6791_v24 = vunpack.i.h.bf16 %v9381_v48  ;;  %v6801_v33 = vunpack.i.h.bf16 %v9411_v36 }
 0x2b8   : > { %v9506_v45 = vpop.permute.xlu1 %6848  ;;  %v6806_v50 = vunpack.i.h.bf16 %v9422_v21  ;;  %v6836_v52 = vunpack.i.h.bf16 %v9488_v53  ;;  %v3500_v23 = vsel %vm2424_vm12, %v8778_v14, %v6790_v27  ;;  %v6870_v59 = vunpack.i.l.bf16 %v9502_v39 }
 0x2b9   : > { %3782 = vmatmul.mubr.f32.gmra.mxu1 %v3466_v56  ;;  %7153 = vrot.lane.b32.xlu0 %v9267_v18, %s7305_s11  ;;  %v7265_v56 = vld [vmem:[#allocation3 + $0x48] sm:$0xff]  ;;  %v6760_v17 = vunpack.i.l.bf16 %v9353_v44  ;;  %v3532_v21 = vsel %vm1429_vm11, %v3500_v23, %v6835_v13  ;;  %v3501_v14 = vsel %vm2424_vm12, %v8781_v41, %v6791_v24 }
 0x2ba   : > { %3786 = vmatprep.mubr.f32.mxu1 %v3563_v42  ;;  %v3403_v9 = vsel %vm2424_vm12, %v7265_v56, %v6800_v3  ;;  %v3502_v41 = vsel %vm2424_vm12, %v8968_v32, %v6870_v59  ;;  %v6786_v56 = vunpack.i.h.bf16 %v9394_v7  ;;  %v6831_v59 = vunpack.i.h.bf16 %v9434_v38 }
 0x2bb   : > { %7133 = vrot.lane.b32.xlu1 %v9235_v29, %s7305_s11  ;;  %v9521_v34 = vpop.permute.xlu0 %6883  ;;  %v3435_v42 = vsel %vm1429_vm11, %v3403_v9, %v6805_v49  ;;  %v6780_v49 = vunpack.i.l.bf16 %v9379_v51 }
 0x2bc   : > { %v9526_v46 = vpop.permute.xlu1 %6853  ;;  %v3468_v0 = vsel %vm3461_vm2, %v3435_v42, %v6760_v17 }
 0x2bd   : > { %3787 = vmatmul.mubr.f32.gmra.mxu1 %v3467_v11  ;;  %7163 = vrot.lane.b32.xlu0 %v7162_v2, %s7308_s22  ;;  %v3404_v2 = vsel %vm2424_vm12, %v7266_v31, %v6801_v33  ;;  %v6855_v27 = vunpack.i.l.bf16 %v9526_v46  ;;  %v6856_v32 = vunpack.i.h.bf16 %v9526_v46 }
 0x2be   : > { %v3436_v19 = vsel %vm1429_vm11, %v3404_v2, %v6806_v50  ;;  %v6781_v50 = vunpack.i.h.bf16 %v9379_v51  ;;  %v6850_v2 = vunpack.i.l.bf16 %v9506_v45 }
 0x2bf   : > { %7143 = vrot.lane.b32.xlu1 %v7127_v10, %s7308_s22  ;;  %v9531_v29 = vpop.permute.xlu0 %6888  ;;  %v3394_v10 = vsel %vm2778_vm0, %v3392_v12, %v3393_v57  ;;  %v3533_v12 = vsel %vm1429_vm11, %v3501_v14, %v6836_v52  ;;  %v6826_v52 = vunpack.i.h.bf16 %v9418_v47 }
 0x2c0   : > { %v9533_v43 = vpop.permute.xlu1 %6858  ;;  %6583 = vmatprep.mubr.msk.f32.mxu0 %vm2424_vm12, %v3394_v10  ;;  %v6761_v10 = vunpack.i.h.bf16 %v9353_v44 }
 0x2c2   : > { %v3469_v24 = vsel %vm3461_vm2, %v3436_v19, %v6761_v10  ;;  %v11397_v19 = vmov 0.0  }
 0x2c3   : > { %7148 = vrot.lane.b32.xlu1 %v9267_v18, %s7308_s22  ;;  %v9537_v55 = vpop.permute.xlu0 %6898  ;;  %v3395_v18 = vrot.slane %v7264_v61, 2  ;;  %v6825_v61 = vunpack.i.l.bf16 %v9418_v47  ;;  %4158 = vst.msk [vmem:[#allocation4 + $0x18] sm:$0x1] %vm4157_vm3, %v11397_v19  ;;  %4159 = vst.msk [vmem:[#allocation4 + $0x30] sm:$0x1] %vm4157_vm3, %v11397_v19 }
 0x2c4   : > { %v9541_v62 = vpop.permute.xlu1 %6863  ;;  %4160 = vst.msk [vmem:[#allocation4 + $0x48] sm:$0x1] %vm4157_vm3, %v11397_v19  ;;  %4161 = vst.msk [vmem:[#allocation4 + $0x60] sm:$0x1] %vm4157_vm3, %v11397_v19 }
 0x2c5   : > { %v3396_v1 = vsel %vm2778_vm0, %v3393_v57, %v3395_v18  ;;  %v6871_v57 = vunpack.i.h.bf16 %v9502_v39  ;;  %v6785_v18 = vunpack.i.l.bf16 %v9394_v7  ;;  %v6830_v39 = vunpack.i.l.bf16 %v9434_v38  ;;  %4162 = vst.msk [vmem:[#allocation4 + $0x78] sm:$0x1] %vm4157_vm3, %v11397_v19  ;;  %4163 = vst.msk [vmem:[#allocation4 + $0x90] sm:$0x1] %vm4157_vm3, %v11397_v19 }
 0x2c6   : > { %6584 = vmatmul.mubr.msk.f32.gmra.mxu0 %vm2424_vm12, %v3396_v1  ;;  %v3534_v33 = vsel %vm1429_vm11, %v3502_v41, %v6825_v61  ;;  %4164 = vst.msk [vmem:[#allocation4 + $0xa8] sm:$0x1] %vm4157_vm3, %v11397_v19  ;;  %4165 = vst.msk [vmem:[#allocation4 + $0xc0] sm:$0x1] %vm4157_vm3, %v11397_v19  ;;  %v6861_v41 = vunpack.i.h.bf16 %v9533_v43 }
 0x2c7   : > { %7158 = vrot.lane.b32.xlu1 %v11396_v37, %s7307_s21  ;;  %v9553_v60 = vpop.permute.xlu0 %6903  ;;  %v3566_v44 = vsel %vm3461_vm2, %v3534_v33, %v6855_v27  ;;  %v3503_v1 = vsel %vm2424_vm12, %v8976_v25, %v6871_v57  ;;  %4166 = vst.msk [vmem:[#allocation4 + $0xd8] sm:$0x1] %vm4157_vm3, %v11397_v19  ;;  %4167 = vst.msk [vmem:[#allocation4 + $0xf0] sm:$0x1] %vm4157_vm3, %v11397_v19  ;;  %v6865_v57 = vunpack.i.l.bf16 %v9541_v62 }
 0x2c8   : > { %v6874_v26 = vpop.permute.xlu1 %6873  ;;  %v3535_v51 = vsel %vm1429_vm11, %v3503_v1, %v6826_v52  ;;  %4168 = vst.msk [vmem:[#allocation4 + $0x108] sm:$0x1] %vm4157_vm3, %v11397_v19  ;;  %4169 = vst.msk [vmem:[#allocation4 + $0x120] sm:$0x1] %vm4157_vm3, %v11397_v19  ;;  %v11398_v52 = vld [vmem:[#allocation16_spill] sm:$0xff] }
 0x2c9   : > { %v6876_v48 = vunpack.i.h.bf16 %v6874_v26  ;;  %v6875_v36 = vunpack.i.l.bf16 %v6874_v26  ;;  %v7267_v26 = vld [vmem:[#allocation3 + $0x60] sm:$0xff]  ;;  %v3567_v47 = vsel %vm3461_vm2, %v3535_v51, %v6856_v32  ;;  %4170 = vst.msk [vmem:[#allocation4 + $0x138] sm:$0x1] %vm4157_vm3, %v11397_v19  ;;  %4171 = vst.msk [vmem:[#allocation4 + $0x150] sm:$0x1] %vm4157_vm3, %v11397_v19 }
 0x2ca   : > { %v3405_v23 = vsel %vm2424_vm12, %v7267_v26, %v6780_v49  ;;  %4172 = vst.msk [vmem:[#allocation4 + $0x168] sm:$0x1] %vm4157_vm3, %v11397_v19  ;;  %4173 = vst.msk [vmem:[#allocation4 + $0x180] sm:$0x1] %vm4157_vm3, %v11397_v19  ;;  %v6866_v49 = vunpack.i.h.bf16 %v9541_v62  ;;  %v7270_v26 = vld [vmem:[#allocation3 + $0x80] sm:$0xff] }
 0x2cb   : > { %v9566_v53 = vpop.permute.xlu0 %6928  ;;  %v3564_v30 = vsel %vm3461_vm2, %v3532_v21, %v6875_v36  ;;  %v3565_v3 = vsel %vm3461_vm2, %v3533_v12, %v6876_v48  ;;  %v3437_v46 = vsel %vm1429_vm11, %v3405_v23, %v6785_v18  ;;  %v7268_v36 = vld [vmem:[#allocation3 + $0x68] sm:$0xff]  ;;  %4174 = vst.msk [vmem:[#allocation4 + $0x29] sm:$0x1] %vm4157_vm3, %v11397_v19  ;;  %4175 = vst.msk [vmem:[#allocation4 + $0x41] sm:$0x1] %vm4157_vm3, %v11397_v19 }
 0x2cc   : > { %v9572_v11 = vpop.permute.xlu1 %6878  ;;  %3791 = vmatprep.mubr.f32.mxu1 %v3564_v30  ;;  %v3470_v25 = vsel %vm3461_vm2, %v3437_v46, %v6830_v39  ;;  %v3406_v42 = vsel %vm2424_vm12, %v7268_v36, %v6781_v50  ;;  %4176 = vst.msk [vmem:[#allocation4 + $0x59] sm:$0x1] %vm4157_vm3, %v11397_v19  ;;  %4177 = vst.msk [vmem:[#allocation4 + $0x71] sm:$0x1] %vm4157_vm3, %v11397_v19  ;;  %v3504_v39 = vsel %vm2424_vm12, %v8879_v63, %v6850_v2 }
 0x2cd   : > { %3792 = vmatmul.mubr.f32.gmra.mxu1 %v3468_v0  ;;  %v3438_v17 = vsel %vm1429_vm11, %v3406_v42, %v6786_v56  ;;  %v6860_v0 = vunpack.i.l.bf16 %v9533_v43  ;;  %4178 = vst.msk [vmem:[#allocation4 + $0x89] sm:$0x1] %vm4157_vm3, %v11397_v19  ;;  %4179 = vst.msk [vmem:[#allocation4 + $0xa1] sm:$0x1] %vm4157_vm3, %v11397_v19  ;;  %v6930_v32 = vunpack.i.l.bf16 %v9566_v53  ;;  %v6820_v43 = vunpack.i.l.bf16 %v9464_v35 }
 0x2ce   : > { %3796 = vmatprep.mubr.f32.mxu1 %v3565_v3  ;;  %v3471_v38 = vsel %vm3461_vm2, %v3438_v17, %v6831_v59  ;;  %4180 = vst.msk [vmem:[#allocation4 + $0xb9] sm:$0x1] %vm4157_vm3, %v11397_v19  ;;  %4181 = vst.msk [vmem:[#allocation4 + $0xd1] sm:$0x1] %vm4157_vm3, %v11397_v19  ;;  %v6851_v3 = vunpack.i.h.bf16 %v9506_v45  ;;  %v3408_v23 = vsel %vm2424_vm12, %v7270_v26, %v6861_v41  ;;  %v6931_v51 = vunpack.i.h.bf16 %v9566_v53 }
 0x2cf   : > { %v9586_v13 = vpop.permute.xlu0 %6943  ;;  %4182 = vst.msk [vmem:[#allocation4 + $0xe9] sm:$0x1] %vm4157_vm3, %v11397_v19  ;;  %4183 = vst.msk [vmem:[#allocation4 + $0x101] sm:$0x1] %vm4157_vm3, %v11397_v19  ;;  %v3506_v42 = vsel %vm2424_vm12, %v9161_v8, %v6930_v32  ;;  %v6821_v17 = vunpack.i.h.bf16 %v9464_v35  ;;  %v6885_v2 = vunpack.i.l.bf16 %v9521_v34  ;;  %v6890_v53 = vunpack.i.l.bf16 %v9531_v29 }
 0x2d0   : > { %v9589_v37 = vpop.permute.xlu1 %6893  ;;  %4184 = vst.msk [vmem:[#allocation4 + $0x119] sm:$0x1] %vm4157_vm3, %v11397_v19  ;;  %4185 = vst.msk [vmem:[#allocation4 + $0x131] sm:$0x1] %vm4157_vm3, %v11397_v19  ;;  %v3505_v63 = vsel %vm2424_vm12, %v11398_v52, %v6851_v3  ;;  %v3507_v41 = vsel %vm2424_vm12, %v9164_v20, %v6931_v51  ;;  %v6891_v32 = vunpack.i.h.bf16 %v9531_v29 }
 0x2d1   : > { %3797 = vmatmul.mubr.f32.gmra.mxu1 %v3469_v24  ;;  %4186 = vst.msk [vmem:[#allocation4 + $0x149] sm:$0x1] %vm4157_vm3, %v11397_v19  ;;  %4187 = vst.msk [vmem:[#allocation4 + $0x161] sm:$0x1] %vm4157_vm3, %v11397_v19  ;;  %v6895_v27 = vunpack.i.l.bf16 %v9589_v37  ;;  %v6896_v61 = vunpack.i.h.bf16 %v9589_v37  ;;  %v7269_v24 = vld [vmem:[#allocation3 + $0x78] sm:$0xff]  ;;  %v3538_v3 = vsel %vm1429_vm11, %v3506_v42, %v6885_v2  ;;  %v7273_v2 = vld [vmem:[#allocation3 + $0xa8] sm:$0xff] }
 0x2d2   : > { %3801 = vmatprep.mubr.f32.mxu1 %v3566_v44  ;;  %4188 = vst.msk [vmem:[#allocation4 + $0x179] sm:$0x1] %vm4157_vm3, %v11397_v19  ;;  %4189 = vst.msk [vmem:[#allocation4 + $0x191] sm:$0x1] %vm4157_vm3, %v11397_v19  ;;  %v3407_v33 = vsel %vm2424_vm12, %v7269_v24, %v6860_v0  ;;  %v6845_v0 = vunpack.i.l.bf16 %v9482_v54  ;;  %v6846_v24 = vunpack.i.h.bf16 %v9482_v54 }
 0x2d3   : > { %v9601_v9 = vpop.permute.xlu0 %6948  ;;  %v3439_v45 = vsel %vm1429_vm11, %v3407_v33, %v6865_v57  ;;  %v3536_v50 = vsel %vm1429_vm11, %v3504_v39, %v6895_v27  ;;  %v3537_v59 = vsel %vm1429_vm11, %v3505_v63, %v6896_v61  ;;  %v6886_v61 = vunpack.i.h.bf16 %v9521_v34 }
 0x2d4   : > { %v9605_v48 = vpop.permute.xlu1 %6908  ;;  %v3472_v46 = vsel %vm3461_vm2, %v3439_v45, %v6820_v43 }
 0x2d5   : > { %3802 = vmatmul.mubr.f32.gmra.mxu1 %v3470_v25  ;;  %v3440_v25 = vsel %vm1429_vm11, %v3408_v23, %v6866_v49  ;;  %v6841_v49 = vunpack.i.h.bf16 %v9456_v4  ;;  %v6910_v52 = vunpack.i.l.bf16 %v9605_v48 }
 0x2d6   : > { %3806 = vmatprep.mubr.f32.mxu1 %v3567_v47  ;;  %v3473_v27 = vsel %vm3461_vm2, %v3440_v25, %v6821_v17  ;;  %v11399_v17 = vld [vmem:[#allocation17_spill] sm:$0xff] }
 0x2d7   : > { %v9611_v7 = vpop.permute.xlu0 %6953 }
 0x2d9   : > { %v9614_v21 = vpop.permute.xlu1 %6913  ;;  %3807 = vmatmul.mubr.f32.gmra.mxu1 %v3471_v38  ;;  %v6840_v38 = vunpack.i.l.bf16 %v9456_v4  ;;  %v3539_v4 = vsel %vm1429_vm11, %v3507_v41, %v6886_v61 }
 0x2da   : > { %v6915_v47 = vunpack.i.l.bf16 %v9614_v21  ;;  %v6916_v8 = vunpack.i.h.bf16 %v9614_v21 }
 0x2db   : > { %v9617_v30 = vpop.permute.xlu0 %6958 }
 0x2dc   : > { %v3570_v35 = vsel %vm3461_vm2, %v3538_v3, %v6915_v47  ;;  %v3571_v34 = vsel %vm3461_vm2, %v3539_v4, %v6916_v8  ;;  %v6956_v47 = vunpack.i.h.bf16 %v9611_v7 }
 0x2dd   : > { %v9619_v14 = vpop.permute.xlu1 %6918 }
 0x2de   : > { %v6920_v63 = vunpack.i.l.bf16 %v9619_v14  ;;  %v6921_v25 = vunpack.i.h.bf16 %v9619_v14  ;;  %v6880_v14 = vunpack.i.l.bf16 %v9572_v11 }
 0x2df   : > { %v9621_v31 = vpop.permute.xlu0 %6963 }
 0x2e1   : > { %v9625_v12 = vpop.permute.xlu1 %6923 }
 0x2e2   : > { %v6925_v23 = vunpack.i.l.bf16 %v9625_v12 }
 0x2e3   : > { %v9695_v10 = vpop.permute.xlu0 %6988 }
 0x2e5   : > { %v6934_v18 = vpop.permute.xlu1 %6933 }
 0x2e6   : > { %v6936_v44 = vunpack.i.h.bf16 %v6934_v18  ;;  %v6935_v1 = vunpack.i.l.bf16 %v6934_v18  ;;  %v7271_v18 = vld [vmem:[#allocation3 + $0x90] sm:$0xff] }
 0x2e7   : > { %v9706_v62 = vpop.permute.xlu0 %7003  ;;  %v3409_v39 = vsel %vm2424_vm12, %v7271_v18, %v6840_v38  ;;  %v3508_v38 = vsel %vm2424_vm12, %v11399_v17, %v6910_v52 }
 0x2e8   : > { %v3568_v37 = vsel %vm3461_vm2, %v3536_v50, %v6935_v1  ;;  %v3569_v36 = vsel %vm3461_vm2, %v3537_v59, %v6936_v44  ;;  %v3441_v21 = vsel %vm1429_vm11, %v3409_v39, %v6845_v0  ;;  %v7272_v1 = vld [vmem:[#allocation3 + $0x98] sm:$0xff]  ;;  %v6911_v59 = vunpack.i.h.bf16 %v9605_v48 }
 0x2e9   : > { %v9712_v56 = vpop.permute.xlu1 %6938  ;;  %3811 = vmatprep.mubr.f32.mxu1 %v3568_v37  ;;  %v3474_v20 = vsel %vm3461_vm2, %v3441_v21, %v6890_v53  ;;  %v3410_v45 = vsel %vm2424_vm12, %v7272_v1, %v6841_v49  ;;  %v3411_v0 = vsel %vm2424_vm12, %v7273_v2, %v6920_v63  ;;  %v6990_v53 = vunpack.i.l.bf16 %v9695_v10  ;;  %v7274_v49 = vld [vmem:[#allocation3 + $0xb0] sm:$0xff] }
 0x2ea   : > { %3812 = vmatmul.mubr.f32.gmra.mxu1 %v3472_v46  ;;  %v3442_v43 = vsel %vm1429_vm11, %v3410_v45, %v6846_v24  ;;  %v6955_v46 = vunpack.i.l.bf16 %v9611_v7  ;;  %v3443_v48 = vsel %vm1429_vm11, %v3411_v0, %v6925_v23  ;;  %v3412_v61 = vsel %vm2424_vm12, %v7274_v49, %v6921_v25 }
 0x2eb   : > { %3816 = vmatprep.mubr.f32.mxu1 %v3569_v36  ;;  %v9726_v19 = vpop.permute.xlu0 %7008  ;;  %v3475_v29 = vsel %vm3461_vm2, %v3442_v43, %v6891_v32  ;;  %v6926_v36 = vunpack.i.h.bf16 %v9625_v12  ;;  %v3476_v39 = vsel %vm3461_vm2, %v3443_v48, %v6880_v14  ;;  %v6991_v32 = vunpack.i.h.bf16 %v9695_v10 }
 0x2ec   : > { %v3540_v8 = vsel %vm1429_vm11, %v3508_v38, %v6955_v46  ;;  %v6900_v1 = vunpack.i.l.bf16 %v9537_v55  ;;  %v6881_v45 = vunpack.i.h.bf16 %v9572_v11  ;;  %v6945_v43 = vunpack.i.l.bf16 %v9586_v13 }
 0x2ed   : > { %v9729_v57 = vpop.permute.xlu1 %6968  ;;  %v3444_v21 = vsel %vm1429_vm11, %v3412_v61, %v6926_v36  ;;  %v6950_v10 = vunpack.i.l.bf16 %v9601_v9  ;;  %v6946_v36 = vunpack.i.h.bf16 %v9586_v13  ;;  %v6906_v38 = vunpack.i.h.bf16 %v9553_v60 }
 0x2ee   : > { %3817 = vmatmul.mubr.f32.gmra.mxu1 %v3473_v27  ;;  %v3477_v23 = vsel %vm3461_vm2, %v3444_v21, %v6881_v45  ;;  %v6951_v0 = vunpack.i.h.bf16 %v9601_v9  ;;  %v6971_v61 = vunpack.i.h.bf16 %v9729_v57 }
 0x2ef   : > { %3821 = vmatprep.mubr.f32.mxu1 %v3570_v35  ;;  %v9741_v33 = vpop.permute.xlu0 %7013  ;;  %v11400_v35 = vld [vmem:[#allocation18_spill] sm:$0xff] }
 0x2f0   : > { %v3509_v41 = vsel %vm2424_vm12, %v11400_v35, %v6911_v59  ;;  %v11401_v59 = vld [vmem:[#allocation22_spill] sm:$0xff]  ;;  %v7015_v49 = vunpack.i.l.bf16 %v9741_v33  ;;  %v7016_v21 = vunpack.i.h.bf16 %v9741_v33 }
 0x2f1   : > { %v9745_v44 = vpop.permute.xlu1 %6973  ;;  %v3541_v24 = vsel %vm1429_vm11, %v3509_v41, %v6956_v47  ;;  %v3511_v25 = vsel %vm2424_vm12, %v11401_v59, %v6991_v32  ;;  %v6901_v47 = vunpack.i.h.bf16 %v9537_v55 }
 0x2f2   : > { %3822 = vmatmul.mubr.f32.gmra.mxu1 %v3474_v20  ;;  %v6975_v20 = vunpack.i.l.bf16 %v9745_v44  ;;  %v3543_v55 = vsel %vm1429_vm11, %v3511_v25, %v6946_v36  ;;  %v7005_v25 = vunpack.i.l.bf16 %v9706_v62 }
 0x2f3   : > { %3826 = vmatprep.mubr.f32.mxu1 %v3571_v34  ;;  %v9751_v54 = vpop.permute.xlu0 %7018  ;;  %v3510_v34 = vsel %vm2424_vm12, %v9290_v15, %v6990_v53  ;;  %v6976_v15 = vunpack.i.h.bf16 %v9745_v44 }
 0x2f4   : > { %v3542_v46 = vsel %vm1429_vm11, %v3510_v34, %v6945_v43 }
 0x2f5   : > { %v9754_v50 = vpop.permute.xlu1 %6978  ;;  %v3574_v11 = vsel %vm3461_vm2, %v3542_v46, %v6975_v20  ;;  %v3575_v13 = vsel %vm3461_vm2, %v3543_v55, %v6976_v15  ;;  %v6965_v55 = vunpack.i.l.bf16 %v9621_v31 }
 0x2f6   : > { %3827 = vmatmul.mubr.f32.gmra.mxu1 %v3475_v29  ;;  %v6905_v29 = vunpack.i.l.bf16 %v9553_v60  ;;  %v6980_v9 = vunpack.i.l.bf16 %v9754_v50  ;;  %v6981_v32 = vunpack.i.h.bf16 %v9754_v50 }
 0x2f7   : > { %v9757_v37 = vpop.permute.xlu0 %7023 }
 0x2f9   : > { %v9761_v26 = vpop.permute.xlu1 %6983 }
 0x2fa   : > { %v6985_v41 = vunpack.i.l.bf16 %v9761_v26  ;;  %v6986_v43 = vunpack.i.h.bf16 %v9761_v26 }
 0x2fb   : > { %v9767_v51 = vpop.permute.xlu0 %7033 }
 0x2fd   : > { %v6994_v42 = vpop.permute.xlu1 %6993 }
 0x2fe   : > { %v6996_v27 = vunpack.i.h.bf16 %v6994_v42  ;;  %v6995_v3 = vunpack.i.l.bf16 %v6994_v42  ;;  %v7275_v42 = vld [vmem:[#allocation3 + $0xc0] sm:$0xff] }
 0x2ff   : > { %v9778_v7 = vpop.permute.xlu0 %7048  ;;  %v3413_v17 = vsel %vm2424_vm12, %v7275_v42, %v6900_v1  ;;  %v7277_v1 = vld [vmem:[#allocation3 + $0xd8] sm:$0xff] }
 0x300   : > { %v3572_v12 = vsel %vm3461_vm2, %v3540_v8, %v6995_v3  ;;  %v3573_v4 = vsel %vm3461_vm2, %v3541_v24, %v6996_v27  ;;  %v3445_v44 = vsel %vm1429_vm11, %v3413_v17, %v6905_v29  ;;  %v7276_v3 = vld [vmem:[#allocation3 + $0xc8] sm:$0xff]  ;;  %v6970_v8 = vunpack.i.l.bf16 %v9729_v57 }
 0x301   : > { %v9784_v18 = vpop.permute.xlu1 %6998  ;;  %3831 = vmatprep.mubr.f32.mxu1 %v3572_v12  ;;  %v3478_v27 = vsel %vm3461_vm2, %v3445_v44, %v6950_v10  ;;  %v3414_v48 = vsel %vm2424_vm12, %v7276_v3, %v6901_v47  ;;  %v3415_v45 = vsel %vm2424_vm12, %v7277_v1, %v6980_v9  ;;  %v7051_v33 = vunpack.i.h.bf16 %v9778_v7 }
 0x302   : > { %3832 = vmatmul.mubr.f32.gmra.mxu1 %v3476_v39  ;;  %v3446_v14 = vsel %vm1429_vm11, %v3414_v48, %v6906_v38  ;;  %v7050_v39 = vunpack.i.l.bf16 %v9778_v7  ;;  %v3447_v57 = vsel %vm1429_vm11, %v3415_v45, %v6985_v41  ;;  %v7278_v7 = vld [vmem:[#allocation3 + $0xe0] sm:$0xff] }
 0x303   : > { %3836 = vmatprep.mubr.f32.mxu1 %v3573_v4  ;;  %v9798_v52 = vpop.permute.xlu0 %7058  ;;  %v3479_v35 = vsel %vm3461_vm2, %v3446_v14, %v6951_v0  ;;  %v11402_v4 = vld [vmem:[#allocation7_spill] sm:$0xff]  ;;  %v3416_v17 = vsel %vm2424_vm12, %v7278_v7, %v6981_v32  ;;  %v6960_v0 = vunpack.i.l.bf16 %v9617_v30  ;;  %v3515_v48 = vsel %vm2424_vm12, %v9341_v5, %v7051_v33 }
 0x304   : > { %v3512_v34 = vsel %vm2424_vm12, %v11402_v4, %v6970_v8  ;;  %v3514_v26 = vsel %vm2424_vm12, %v9336_v6, %v7050_v39  ;;  %v3448_v44 = vsel %vm1429_vm11, %v3416_v17, %v6986_v43  ;;  %v6941_v6 = vunpack.i.h.bf16 %v9712_v56 }
 0x305   : > { %v9801_v63 = vpop.permute.xlu1 %7028  ;;  %v3544_v46 = vsel %vm1429_vm11, %v3512_v34, %v7015_v49  ;;  %v7006_v14 = vunpack.i.h.bf16 %v9706_v62  ;;  %v7010_v8 = vunpack.i.l.bf16 %v9726_v19  ;;  %v6966_v49 = vunpack.i.h.bf16 %v9621_v31 }
 0x306   : > { %3837 = vmatmul.mubr.f32.gmra.mxu1 %v3477_v23  ;;  %v6940_v23 = vunpack.i.l.bf16 %v9712_v56  ;;  %v3481_v56 = vsel %vm3461_vm2, %v3448_v44, %v6941_v6  ;;  %v7011_v62 = vunpack.i.h.bf16 %v9726_v19  ;;  %v7280_v19 = vld [vmem:[#allocation3 + $0xf8] sm:$0xff]  ;;  %v7000_v17 = vunpack.i.l.bf16 %v9784_v18  ;;  %v11405_v44 = vld [vmem:[#allocation21_spill] sm:$0xff]  ;;  %v7282_v6 = vld [vmem:[#allocation3 + $0x110] sm:$0xff] }
 0x307   : > { %3841 = vmatprep.mubr.f32.mxu1 %v3574_v11  ;;  %v9813_v2 = vpop.permute.xlu0 %7063  ;;  %v11403_v11 = vld [vmem:[#allocation8_spill] sm:$0xff]  ;;  %v3547_v5 = vsel %vm1429_vm11, %v3515_v48, %v7006_v14 }
 0x308   : > { %v3513_v59 = vsel %vm2424_vm12, %v11403_v11, %v6971_v61  ;;  %v3480_v36 = vsel %vm3461_vm2, %v3447_v57, %v6940_v23  ;;  %v7279_v61 = vld [vmem:[#allocation3 + $0xf0] sm:$0xff]  ;;  %v7065_v43 = vunpack.i.l.bf16 %v9813_v2  ;;  %v7066_v33 = vunpack.i.h.bf16 %v9813_v2 }
 0x309   : > { %v9817_v53 = vpop.permute.xlu1 %7038  ;;  %v3545_v42 = vsel %vm1429_vm11, %v3513_v59, %v7016_v21  ;;  %v3417_v39 = vsel %vm2424_vm12, %v7279_v61, %v6960_v0  ;;  %v7036_v21 = vunpack.i.h.bf16 %v9767_v51  ;;  %v11404_v59 = vld [vmem:[#allocation20_spill] sm:$0xff]  ;;  %v7001_v61 = vunpack.i.h.bf16 %v9784_v18 }
 0x30a   : > { %3842 = vmatmul.mubr.f32.gmra.mxu1 %v3478_v27  ;;  %v3546_v27 = vsel %vm1429_vm11, %v3514_v26, %v7005_v25  ;;  %v7040_v4 = vunpack.i.l.bf16 %v9817_v53  ;;  %v7041_v57 = vunpack.i.h.bf16 %v9817_v53  ;;  %v7281_v25 = vld [vmem:[#allocation3 + $0x108] sm:$0xff] }
 0x30b   : > { %3846 = vmatprep.mubr.f32.mxu1 %v3575_v13  ;;  %v9823_v60 = vpop.permute.xlu0 %7073  ;;  %v7035_v13 = vunpack.i.l.bf16 %v9767_v51  ;;  %v3579_v45 = vsel %vm3461_vm2, %v3547_v5, %v7036_v21  ;;  %v7025_v5 = vunpack.i.l.bf16 %v9757_v37 }
 0x30d   : > { %v9828_v12 = vpop.permute.xlu1 %7043  ;;  %v3578_v41 = vsel %vm3461_vm2, %v3546_v27, %v7035_v13  ;;  %v3420_v27 = vsel %vm2424_vm12, %v7282_v6, %v7041_v57 }
 0x30e   : > { %3847 = vmatmul.mubr.f32.gmra.mxu1 %v3479_v35  ;;  %v6961_v35 = vunpack.i.h.bf16 %v9617_v30  ;;  %v7030_v30 = vunpack.i.l.bf16 %v9801_v63  ;;  %v7045_v1 = vunpack.i.l.bf16 %v9828_v12 }
 0x30f   : > { %v9835_v24 = vpop.permute.xlu0 %7088 }
 0x310   : > { %v3418_v51 = vsel %vm2424_vm12, %v7280_v19, %v6961_v35  ;;  %v3516_v26 = vsel %vm2424_vm12, %v11404_v59, %v7030_v30  ;;  %v7076_v19 = vunpack.i.h.bf16 %v9823_v60 }
 0x311   : > { %v7054_v20 = vpop.permute.xlu1 %7053  ;;  %v3548_v2 = vsel %vm1429_vm11, %v3516_v26, %v7065_v43 }
 0x312   : > { %v7056_v29 = vunpack.i.h.bf16 %v7054_v20  ;;  %v7055_v10 = vunpack.i.l.bf16 %v7054_v20  ;;  %v3449_v20 = vsel %vm1429_vm11, %v3417_v39, %v6965_v55  ;;  %v7075_v39 = vunpack.i.l.bf16 %v9823_v60 }
 0x313   : > { %v9847_v50 = vpop.permute.xlu0 %7098  ;;  %v3482_v31 = vsel %vm3461_vm2, %v3449_v20, %v7010_v8  ;;  %v7091_v8 = vunpack.i.h.bf16 %v9835_v24 }
 0x314   : > { %v3576_v15 = vsel %vm3461_vm2, %v3544_v46, %v7055_v10  ;;  %v3577_v38 = vsel %vm3461_vm2, %v3545_v42, %v7056_v29  ;;  %v3450_v29 = vsel %vm1429_vm11, %v3418_v51, %v6966_v49  ;;  %v7031_v10 = vunpack.i.h.bf16 %v9801_v63  ;;  %v7283_v51 = vld [vmem:[#allocation3 + $0x120] sm:$0xff] }
 0x315   : > { %v9855_v47 = vpop.permute.xlu1 %7068  ;;  %3851 = vmatprep.mubr.f32.mxu1 %v3576_v15  ;;  %v3483_v46 = vsel %vm3461_vm2, %v3450_v29, %v7011_v62  ;;  %v7046_v15 = vunpack.i.h.bf16 %v9828_v12  ;;  %v7090_v42 = vunpack.i.l.bf16 %v9835_v24  ;;  %v7020_v49 = vunpack.i.l.bf16 %v9751_v54 }
 0x316   : > { %3852 = vmatmul.mubr.f32.gmra.mxu1 %v3480_v36  ;;  %v3419_v36 = vsel %vm2424_vm12, %v7281_v25, %v7040_v4  ;;  %v3517_v0 = vsel %vm2424_vm12, %v11405_v44, %v7031_v10  ;;  %v7060_v24 = vunpack.i.l.bf16 %v9798_v52  ;;  %v7061_v29 = vunpack.i.h.bf16 %v9798_v52  ;;  %v7284_v52 = vld [vmem:[#allocation3 + $0x128] sm:$0xff] }
 0x317   : > { %3856 = vmatprep.mubr.f32.mxu1 %v3577_v38  ;;  %v9867_v3 = vpop.permute.xlu0 %7103  ;;  %v3451_v53 = vsel %vm1429_vm11, %v3419_v36, %v7045_v1  ;;  %v3549_v48 = vsel %vm1429_vm11, %v3517_v0, %v7066_v33  ;;  %v3452_v14 = vsel %vm1429_vm11, %v3420_v27, %v7046_v15  ;;  %v3421_v43 = vsel %vm2424_vm12, %v7283_v51, %v7020_v49  ;;  %v7286_v49 = vld [vmem:[#allocation3 + $0x140] sm:$0xff] }
 0x318   : > { %v3484_v13 = vsel %vm3461_vm2, %v3451_v53, %v7000_v17  ;;  %v3485_v20 = vsel %vm3461_vm2, %v3452_v14, %v7001_v61 }
 0x319   : > { %v9873_v9 = vpop.permute.xlu1 %7078 }
 0x31a   : > { %3857 = vmatmul.mubr.f32.gmra.mxu1 %v3481_v56 }
 0x31b   : > { %3861 = vmatprep.mubr.f32.mxu1 %v3578_v41  ;;  %v9883_v32 = vpop.permute.xlu0 %7113  ;;  %v3518_v41 = vsel %vm2424_vm12, %v9403_v16, %v7090_v42  ;;  %v7021_v16 = vunpack.i.h.bf16 %v9751_v54  ;;  %v3453_v54 = vsel %vm1429_vm11, %v3421_v43, %v7025_v5  ;;  %v11407_v42 = vld [vmem:[#allocation23_spill] sm:$0xff] }
 0x31c   : > { %v7115_v56 = vunpack.i.l.bf16 %v9883_v32  ;;  %v3550_v30 = vsel %vm1429_vm11, %v3518_v41, %v7075_v39  ;;  %v7116_v4 = vunpack.i.h.bf16 %v9883_v32  ;;  %v7080_v32 = vunpack.i.l.bf16 %v9873_v9 }
 0x31d   : > { %v9888_v34 = vpop.permute.xlu1 %7083  ;;  %v3486_v33 = vsel %vm3461_vm2, %v3453_v54, %v7060_v24  ;;  %v3422_v59 = vsel %vm2424_vm12, %v7284_v52, %v7021_v16  ;;  %v7105_v16 = vunpack.i.l.bf16 %v9867_v3 }
 0x31e   : > { %3862 = vmatmul.mubr.f32.gmra.mxu1 %v3482_v31  ;;  %v3582_v18 = vsel %vm3461_vm2, %v3550_v30, %v7115_v56  ;;  %v11406_v31 = vld [vmem:[#allocation25_spill] sm:$0xff]  ;;  %v7085_v60 = vunpack.i.l.bf16 %v9888_v34  ;;  %v7086_v53 = vunpack.i.h.bf16 %v9888_v34  ;;  %v7100_v30 = vunpack.i.l.bf16 %v9847_v50 }
 0x31f   : > { %3866 = vmatprep.mubr.f32.mxu1 %v3579_v45  ;;  %v9898_v23 = vpop.permute.xlu0 %7118  ;;  %v3519_v1 = vsel %vm2424_vm12, %v11406_v31, %v7091_v8  ;;  %v7026_v45 = vunpack.i.h.bf16 %v9757_v37 }
 0x320   : > { %v3551_v37 = vsel %vm1429_vm11, %v3519_v1, %v7076_v19  ;;  %v7120_v31 = vunpack.i.l.bf16 %v9898_v23 }
 0x321   : > { %v7094_v11 = vpop.permute.xlu1 %7093  ;;  %v3454_v25 = vsel %vm1429_vm11, %v3422_v59, %v7026_v45 }
 0x322   : > { %v7096_v63 = vunpack.i.h.bf16 %v7094_v11  ;;  %v7095_v7 = vunpack.i.l.bf16 %v7094_v11  ;;  %3867 = vmatmul.mubr.f32.gmra.mxu1 %v3483_v46  ;;  %v3583_v11 = vsel %vm3461_vm2, %v3551_v37, %v7116_v4  ;;  %v3487_v36 = vsel %vm3461_vm2, %v3454_v25, %v7061_v29 }
 0x323   : > { %v9910_v38 = vpop.permute.xlu0 %7123 }
 0x324   : > { %v3580_v12 = vsel %vm3461_vm2, %v3548_v2, %v7095_v7  ;;  %v3581_v35 = vsel %vm3461_vm2, %v3549_v48, %v7096_v63  ;;  %v7125_v26 = vunpack.i.l.bf16 %v9910_v38  ;;  %v7081_v7 = vunpack.i.h.bf16 %v9873_v9 }
 0x325   : > { %v7109_v55 = vpop.permute.xlu1 %7108  ;;  %3871 = vmatprep.mubr.f32.mxu1 %v3580_v12  ;;  %v7126_v17 = vunpack.i.h.bf16 %v9910_v38  ;;  %v7285_v12 = vld [vmem:[#allocation3 + $0x138] sm:$0xff]  ;;  %v7070_v48 = vunpack.i.l.bf16 %v9855_v47 }
 0x326   : > { %3872 = vmatmul.mubr.f32.gmra.mxu1 %v3484_v13  ;;  %v7110_v10 = vunpack.i.l.bf16 %v7109_v55  ;;  %v7111_v15 = vunpack.i.h.bf16 %v7109_v55  ;;  %v3423_v44 = vsel %vm2424_vm12, %v7285_v12, %v7080_v32  ;;  %v11408_v55 = vld [vmem:[#allocation24_spill] sm:$0xff]  ;;  %v3424_v61 = vsel %vm2424_vm12, %v7286_v49, %v7081_v7 }
 0x327   : > { %3876 = vmatprep.mubr.f32.mxu1 %v3581_v35  ;;  %v9928_v62 = vpop.permute.xlu0 %7138  ;;  %v3455_v27 = vsel %vm1429_vm11, %v3423_v44, %v7085_v60  ;;  %v3456_v24 = vsel %vm1429_vm11, %v3424_v61, %v7086_v53  ;;  %v11409_v60 = vld [vmem:[#allocation5_spill] sm:$0xff]  ;;  %v7289_v44 = vld [vmem:[#allocation3 + $0x168] sm:$0xff] }
 0x328   : > { %v3520_v63 = vsel %vm2424_vm12, %v11407_v42, %v7110_v10  ;;  %v3521_v13 = vsel %vm2424_vm12, %v11408_v55, %v7111_v15  ;;  %v7140_v34 = vunpack.i.l.bf16 %v9928_v62  ;;  %v3488_v35 = vsel %vm3461_vm2, %v3455_v27, %v7070_v48 }
 0x329   : > { %v9931_v21 = vpop.permute.xlu1 %7128  ;;  %v3552_v9 = vsel %vm1429_vm11, %v3520_v63, %v7125_v26  ;;  %v3553_v41 = vsel %vm1429_vm11, %v3521_v13, %v7126_v17  ;;  %v7141_v4 = vunpack.i.h.bf16 %v9928_v62  ;;  %v7101_v10 = vunpack.i.h.bf16 %v9847_v50  ;;  %v7288_v26 = vld [vmem:[#allocation3 + $0x158] sm:$0xff] }
 0x32a   : > { %3877 = vmatmul.mubr.f32.gmra.mxu1 %v3485_v20  ;;  %v7071_v20 = vunpack.i.h.bf16 %v9855_v47  ;;  %v7106_v62 = vunpack.i.h.bf16 %v9867_v3  ;;  %v6700_v15 = vunpack.i.l.bf16 %v11409_v60  ;;  %v7130_v59 = vunpack.i.l.bf16 %v9931_v21 }
 0x32b   : > { %3881 = vmatprep.mubr.f32.mxu1 %v3582_v18  ;;  %v9948_v46 = vpop.permute.xlu0 %7153  ;;  %v3522_v18 = vsel %vm2424_vm12, %v9450_v58, %v7140_v34  ;;  %v7287_v58 = vld [vmem:[#allocation3 + $0x150] sm:$0xff]  ;;  %v6701_v7 = vunpack.i.h.bf16 %v11409_v60  ;;  %v7131_v12 = vunpack.i.h.bf16 %v9931_v21 }
 0x32c   : > { %v7155_v8 = vunpack.i.l.bf16 %v9948_v46  ;;  %v7156_v1 = vunpack.i.h.bf16 %v9948_v46  ;;  %v3489_v19 = vsel %vm3461_vm2, %v3456_v24, %v7071_v20  ;;  %v3425_v54 = vsel %vm2424_vm12, %v7287_v58, %v7100_v30  ;;  %v7290_v21 = vld [vmem:[#allocation3 + $0x170] sm:$0xff] }
 0x32d   : > { %v9946_v57 = vpop.permute.xlu1 %7133  ;;  %v3457_v46 = vsel %vm1429_vm11, %v3425_v54, %v7105_v16 }
 0x32e   : > { %3882 = vmatmul.mubr.f32.gmra.mxu1 %v3486_v33  ;;  %v3554_v51 = vsel %vm1429_vm11, %v3522_v18, %v7155_v8  ;;  %v3523_v33 = vsel %vm2424_vm12, %v9453_v22, %v7141_v4  ;;  %v3490_v50 = vsel %vm3461_vm2, %v3457_v46, %v7120_v31  ;;  %v3426_v22 = vsel %vm2424_vm12, %v7288_v26, %v7101_v10  ;;  %v6540_v8 = vpop.f32.mrf.mxu0 }
 0x32f   : > { %3886 = vmatprep.mubr.f32.mxu1 %v3583_v11  ;;  %v7164_v14 = vpop.permute.xlu0 %7163  ;;  %v7121_v11 = vunpack.i.h.bf16 %v9898_v23  ;;  %v3555_v3 = vsel %vm1429_vm11, %v3523_v33, %v7156_v1  ;;  %v7135_v42 = vunpack.i.l.bf16 %v9946_v57  ;;  %v3458_v23 = vsel %vm1429_vm11, %v3426_v22, %v7106_v62 }
 0x330   : > { %v7165_v39 = vunpack.i.l.bf16 %v7164_v14  ;;  %v7166_v47 = vunpack.i.h.bf16 %v7164_v14 }
 0x331   : > { %v7144_v2 = vpop.permute.xlu1 %7143  ;;  %v3491_v17 = vsel %vm3461_vm2, %v3458_v23, %v7121_v11 }
 0x332   : > { %v7146_v0 = vunpack.i.h.bf16 %v7144_v2  ;;  %v7145_v6 = vunpack.i.l.bf16 %v7144_v2  ;;  %3887 = vmatmul.mubr.f32.gmra.mxu1 %v3487_v36  ;;  %v3586_v29 = vsel %vm3461_vm2, %v3554_v51, %v7165_v39  ;;  %v3587_v52 = vsel %vm3461_vm2, %v3555_v3, %v7166_v47 }
 0x334   : > { %v3584_v38 = vsel %vm3461_vm2, %v3552_v9, %v7145_v6  ;;  %v3585_v5 = vsel %vm3461_vm2, %v3553_v41, %v7146_v0  ;;  %v3427_v0 = vsel %vm2424_vm12, %v7289_v44, %v7130_v59  ;;  %v3428_v9 = vsel %vm2424_vm12, %v7290_v21, %v7131_v12  ;;  %v3988_v41 = vpop.f32.mrf.mxu0  ;;  %v5546_v12 = vld [vmem:[%s11321_s5 + $0x38] sm:$0xff]  ;;  %v5545_v44 = vld [vmem:[%s11321_s5 + $0x30] sm:$0xff] }
 0x335   : > { %v9972_v56 = vpop.permute.xlu1 %7148  ;;  %3891 = vmatprep.mubr.f32.mxu1 %v3584_v38  ;;  %v3459_v55 = vsel %vm1429_vm11, %v3427_v0, %v7135_v42  ;;  %v5547_v42 = vld [vmem:[%s11321_s5 + $0x40] sm:$0xff] }
 0x336   : > { %3892 = vmatmul.mubr.f32.gmra.mxu1 %v3488_v35  ;;  %v7150_v53 = vunpack.i.l.bf16 %v9972_v56  ;;  %v7151_v13 = vunpack.i.h.bf16 %v9972_v56  ;;  %v6543_v62 = vpop.f32.mrf.mxu0  ;;  %6586 = vmatprep.subr.mxu0 %v5547_v42 }
 0x337   : > { %3896 = vmatprep.mubr.f32.mxu1 %v3585_v5  ;;  %6587 = vmatpush3.msra.mxu0 %v5547_v42 }
 0x338   : > { %v3492_v48 = vsel %vm3461_vm2, %v3459_v55, %v7150_v53  ;;  %6588 = vmatprep.subr.mxu0 %v5546_v12 }
 0x339   : > { %v7159_v45 = vpop.permute.xlu1 %7158  ;;  %6589 = vmatpush3.msra.mxu0 %v5546_v12 }
 0x33a   : > { %v7160_v43 = vunpack.i.l.bf16 %v7159_v45  ;;  %3897 = vmatmul.mubr.f32.gmra.mxu1 %v3489_v19  ;;  %v7161_v32 = vunpack.i.h.bf16 %v7159_v45  ;;  %6590 = vmatprep.subr.mxu0 %v5545_v44 }
 0x33b   : > { %3901 = vmatprep.mubr.f32.mxu1 %v3586_v29  ;;  %6591 = vmatpush3.msra.mxu0 %v5545_v44 }
 0x33c   : > { %v3524_v37 = vsel %vm2424_vm12, %v9510_v40, %v7160_v43  ;;  %v11410_v40 = vld [vmem:[#allocation6_spill] sm:$0xff]  ;;  %v3525_v63 = vsel %vm2424_vm12, %v9513_v28, %v7161_v32  ;;  %v7136_v28 = vunpack.i.h.bf16 %v9946_v57  ;;  %v3998_v32 = vpop.f32.mrf.mxu0 }
 0x33d   : > { %v3556_v25 = vsel %vm1429_vm11, %v3524_v37, %v6700_v15  ;;  %v6705_v36 = vunpack.i.l.bf16 %v11410_v40  ;;  %v3557_v6 = vsel %vm1429_vm11, %v3525_v63, %v6701_v7  ;;  %v6706_v27 = vunpack.i.h.bf16 %v11410_v40  ;;  %v10030_v57 = vld [vmem:[%s11320_s4] ss:$0 sm:$0xff] }
 0x33e   : > { %3902 = vmatmul.mubr.f32.gmra.mxu1 %v3490_v50  ;;  %v3460_v34 = vsel %vm1429_vm11, %v3428_v9, %v7136_v28  ;;  %v6546_v15 = vpop.f32.mrf.mxu0  ;;  %v5544_v28 = vld [vmem:[%s11321_s5 + $0x28] sm:$0xff]  ;;  %v5542_v9 = vld [vmem:[%s11321_s5 + $0x18] sm:$0xff] }
 0x33f   : > { %3906 = vmatprep.mubr.f32.mxu1 %v3587_v52  ;;  %v3588_v2 = vsel %vm3461_vm2, %v3556_v25, %v6705_v36  ;;  %v3589_v14 = vsel %vm3461_vm2, %v3557_v6, %v6706_v27  ;;  %v3493_v38 = vsel %vm3461_vm2, %v3460_v34, %v7151_v13  ;;  %6592 = vmatprep.subr.mxu0 %v5544_v28  ;;  %v5543_v13 = vld [vmem:[%s11321_s5 + $0x20] sm:$0xff] }
 0x340   : > { %v4008_v59 = vpop.f32.mrf.mxu0  ;;  %6593 = vmatpush3.msra.mxu0 %v5544_v28 }
 0x341   : > { %6594 = vmatprep.subr.mxu0 %v5543_v13 }
 0x342   : > { %3907 = vmatmul.mubr.f32.gmra.mxu1 %v3491_v17  ;;  %v6549_v34 = vpop.f32.mrf.mxu0  ;;  %6595 = vmatpush3.msra.mxu0 %v5543_v13 }
 0x343   : > { %3911 = vmatprep.mubr.f32.mxu1 %v3588_v2  ;;  %6596 = vmatprep.subr.mxu0 %v5542_v9 }
 0x344   : > { %6597 = vmatpush3.msra.mxu0 %v5542_v9 }
 0x346   : > { %3912 = vmatmul.mubr.f32.gmra.mxu1 %v3492_v48 }
 0x347   : > { %3916 = vmatprep.mubr.f32.mxu1 %v3589_v14 }
 0x34a   : > { %3917 = vmatmul.mubr.f32.gmra.mxu1 %v3493_v38 }
 0x356   : > { %v3763_v56 = vpop.f32.mrf.mxu1 }
 0x357   : > { %v3764_v35 = vadd.f32 %v10030_v57, %v3763_v56  ;;  %v5541_v56 = vld [vmem:[%s11321_s5 + $0x10] sm:$0xff] }
 0x358   : > { %v3765_v49 = vpop.f32.mrf.mxu1  ;;  %6598 = vmatprep.subr.mxu0 %v5541_v56 }
 0x359   : > { %v3989_v61 = vadd.f32 %v3988_v41, %v3764_v35  ;;  %v4018_v41 = vpop.f32.mrf.mxu0  ;;  %6599 = vmatpush3.msra.mxu0 %v5541_v56 }
 0x35a   : > { %v3768_v39 = vpop.f32.mrf.mxu1 }
 0x35b   : > { %4190 = vst.msk [vmem:[#allocation4 + $0x19] sm:$0xff] %vm4147_vm14, %v3989_v61  ;;  %v3769_v5 = vadd.f32 %v10030_v57, %v3768_v39  ;;  %v5540_v39 = vld [vmem:[%s11321_s5 + $0x8] sm:$0xff] }
 0x35c   : > { %v3770_v24 = vpop.f32.mrf.mxu1  ;;  %6600 = vmatprep.subr.mxu0 %v5540_v39 }
 0x35d   : > { %v3994_v20 = vadd.f32 %v6540_v8, %v3769_v5  ;;  %6601 = vmatpush3.msra.mxu0 %v5540_v39 }
 0x35f   : > { %4191 = vst.msk [vmem:[#allocation4 + $0x21] sm:$0xff] %vm4147_vm14, %v3994_v20  ;;  %v5539_v20 = vld [vmem:[%s11321_s5] sm:$0xff] }
 0x360   : > { %6602 = vmatprep.subr.mxu0 %v5539_v20 }
 0x361   : > { %6603 = vmatpush3.msra.mxu0 %v5539_v20 }
 0x362   : > { %v10036_v30 = vld [vmem:[#allocation4 + $0x18] sm:$0xff] }
 0x363   : > { %4678 = vrot.lane.b32.xlu0 %v10036_v30, %s7313_s14  ;;  %v4329_v18 = vrot.slane %v10036_v30, 1  ;;  %v4505_v43 = vrot.slane %v10036_v30, 2 }
 0x366   : > { %v10040_v16 = vld [vmem:[#allocation4 + $0x20] sm:$0xff]  ;;  %v4227_v4 = vld [vmem:[#allocation4 + $0x28] sm:$0x3] }
 0x367   : > { %4680 = vrot.lane.b32.xlu1 %v10040_v16, %s7313_s14  ;;  %v4330_v31 = vrot.slane %v10040_v16, 1  ;;  %v4332_v1 = vrot.slane %v4227_v4, 1  ;;  %v4506_v45 = vrot.slane %v10040_v16, 2  ;;  %v4508_v47 = vrot.slane %v4227_v4, 2  ;;  %v6552_v4 = vpop.f32.mrf.mxu0 }
 0x369   : > { %v4331_v19 = vsel %vm1266_vm10, %v4329_v18, %v4330_v31  ;;  %v4333_v51 = vsel %vm1266_vm10, %v4330_v31, %v4332_v1  ;;  %v4507_v29 = vsel %vm2778_vm0, %v4505_v43, %v4506_v45  ;;  %v4509_v10 = vsel %vm2778_vm0, %v4506_v45, %v4508_v47 }
 0x36a   : > { %4408 = vrot.lane.b32.xlu0 %v4331_v19, %s7309_s29 }
 0x36b   : > { %4410 = vrot.lane.b32.xlu1 %v4333_v51, %s7309_s29 }
 0x36e   : > { %4584 = vrot.lane.b32.xlu0 %v4507_v29, %s7310_s23 }
 0x36f   : > { %4586 = vrot.lane.b32.xlu1 %v4509_v10, %s7310_s23 }
 0x371   : > { %v3773_v58 = vpop.f32.mrf.mxu1 }
 0x372   : > { %v3774_v54 = vadd.f32 %v10030_v57, %v3773_v58  ;;  %4780 = vrot.lane.b32.xlu0 %v4331_v19, %s7307_s21  ;;  %v4028_v19 = vpop.f32.mrf.mxu0 }
 0x373   : > { %v3775_v46 = vpop.f32.mrf.mxu1  ;;  %4782 = vrot.lane.b32.xlu1 %v4333_v51, %s7307_s21 }
 0x374   : > { %v3999_v33 = vadd.f32 %v3998_v32, %v3774_v54 }
 0x375   : > { %v3778_v37 = vpop.f32.mrf.mxu1 }
 0x376   : > { %4192 = vst.msk [vmem:[#allocation4 + $0x31] sm:$0xff] %vm4147_vm14, %v3999_v33  ;;  %v3779_v60 = vadd.f32 %v10030_v57, %v3778_v37  ;;  %4881 = vrot.lane.b32.xlu0 %v4507_v29, %s7314_s15 }
 0x377   : > { %v3780_v11 = vpop.f32.mrf.mxu1  ;;  %4883 = vrot.lane.b32.xlu1 %v4509_v10, %s7314_s15 }
 0x378   : > { %v4004_v50 = vadd.f32 %v6543_v62, %v3779_v60  ;;  %v6555_v11 = vpop.f32.mrf.mxu0 }
 0x379   : > { %v3783_v3 = vpop.f32.mrf.mxu1 }
 0x37a   : > { %4193 = vst.msk [vmem:[#allocation4 + $0x39] sm:$0xff] %vm4147_vm14, %v4004_v50  ;;  %v3784_v52 = vadd.f32 %v10030_v57, %v3783_v3 }
 0x37b   : > { %v3785_v26 = vpop.f32.mrf.mxu1 }
 0x37c   : > { %v4009_v22 = vadd.f32 %v4008_v59, %v3784_v52 }
 0x37d   : > { %v3788_v25 = vpop.f32.mrf.mxu1  ;;  %v10065_v40 = vld [vmem:[#allocation4 + $0x30] sm:$0xff] }
 0x37e   : > { %4194 = vst.msk [vmem:[#allocation4 + $0x49] sm:$0xff] %vm4147_vm14, %v4009_v22  ;;  %v3789_v36 = vadd.f32 %v10030_v57, %v3788_v25  ;;  %4682 = vrot.lane.b32.xlu0 %v10065_v40, %s7313_s14  ;;  %v4334_v53 = vrot.slane %v10065_v40, 1  ;;  %v4510_v55 = vrot.slane %v10065_v40, 2  ;;  %v4038_v25 = vpop.f32.mrf.mxu0 }
 0x37f   : > { %v3790_v23 = vpop.f32.mrf.mxu1 }
 0x380   : > { %v4014_v63 = vadd.f32 %v6546_v15, %v3789_v36 }
 0x381   : > { %v10074_v7 = vld [vmem:[#allocation4 + $0x38] sm:$0xff]  ;;  %v4230_v2 = vld [vmem:[#allocation4 + $0x40] sm:$0x3] }
 0x382   : > { %4195 = vst.msk [vmem:[#allocation4 + $0x51] sm:$0xff] %vm4147_vm14, %v4014_v63  ;;  %4684 = vrot.lane.b32.xlu1 %v10074_v7, %s7313_s14  ;;  %4979 = vrot.lane.b32.xlu0 %v10065_v40, %s7311_s26  ;;  %v4335_v17 = vrot.slane %v10074_v7, 1  ;;  %v4337_v6 = vrot.slane %v4230_v2, 1  ;;  %v4511_v27 = vrot.slane %v10074_v7, 2  ;;  %v4513_v21 = vrot.slane %v4230_v2, 2 }
 0x384   : > { %v4336_v0 = vsel %vm1266_vm10, %v4334_v53, %v4335_v17  ;;  %v4338_v48 = vsel %vm1266_vm10, %v4335_v17, %v4337_v6  ;;  %v4512_v14 = vsel %vm2778_vm0, %v4510_v55, %v4511_v27  ;;  %v4514_v8 = vsel %vm2778_vm0, %v4511_v27, %v4513_v21  ;;  %v6558_v17 = vpop.f32.mrf.mxu0 }
 0x385   : > { %v10133_v58 = vld [vmem:[#allocation4 + $0x48] sm:$0xff] }
 0x386   : > { %4981 = vrot.lane.b32.xlu1 %v10074_v7, %s7311_s26  ;;  %4412 = vrot.lane.b32.xlu0 %v4336_v0, %s7309_s29  ;;  %v4339_v33 = vrot.slane %v10133_v58, 1  ;;  %v4515_v50 = vrot.slane %v10133_v58, 2  ;;  %v4048_v6 = vpop.f32.mrf.mxu0 }
 0x389   : > { %v10139_v54 = vld [vmem:[#allocation4 + $0x50] sm:$0xff]  ;;  %v4233_v46 = vld [vmem:[#allocation4 + $0x58] sm:$0x3] }
 0x38a   : > { %4414 = vrot.lane.b32.xlu1 %v4338_v48, %s7309_s29  ;;  %4588 = vrot.lane.b32.xlu0 %v4512_v14, %s7310_s23  ;;  %v4340_v32 = vrot.slane %v10139_v54, 1  ;;  %v4342_v60 = vrot.slane %v4233_v46, 1  ;;  %v4516_v15 = vrot.slane %v10139_v54, 2  ;;  %v4518_v26 = vrot.slane %v4233_v46, 2 }
 0x38c   : > { %v4341_v37 = vsel %vm1266_vm10, %v4339_v33, %v4340_v32  ;;  %v4343_v52 = vsel %vm1266_vm10, %v4340_v32, %v4342_v60  ;;  %v4517_v59 = vsel %vm2778_vm0, %v4515_v50, %v4516_v15  ;;  %v4519_v63 = vsel %vm2778_vm0, %v4516_v15, %v4518_v26 }
 0x38d   : > { %v3793_v38 = vpop.f32.mrf.mxu1 }
 0x38e   : > { %v3794_v35 = vadd.f32 %v10030_v57, %v3793_v38  ;;  %4590 = vrot.lane.b32.xlu1 %v4514_v8, %s7310_s23  ;;  %4784 = vrot.lane.b32.xlu0 %v4336_v0, %s7307_s21 }
 0x38f   : > { %v3795_v49 = vpop.f32.mrf.mxu1 }
 0x390   : > { %v4019_v61 = vadd.f32 %v4018_v41, %v3794_v35 }
 0x391   : > { %v3798_v5 = vpop.f32.mrf.mxu1 }
 0x392   : > { %4196 = vst.msk [vmem:[#allocation4 + $0x61] sm:$0xff] %vm4147_vm14, %v4019_v61  ;;  %v3799_v24 = vadd.f32 %v10030_v57, %v3798_v5  ;;  %4786 = vrot.lane.b32.xlu1 %v4338_v48, %s7307_s21  ;;  %5081 = vrot.lane.b32.xlu0 %v4336_v0, %s7312_s9 }
 0x393   : > { %v3800_v18 = vpop.f32.mrf.mxu1 }
 0x394   : > { %v4024_v31 = vadd.f32 %v6549_v34, %v3799_v24  ;;  %v6561_v34 = vpop.f32.mrf.mxu0 }
 0x395   : > { %v3803_v1 = vpop.f32.mrf.mxu1 }
 0x396   : > { %4197 = vst.msk [vmem:[#allocation4 + $0x69] sm:$0xff] %vm4147_vm14, %v4024_v31  ;;  %v3804_v45 = vadd.f32 %v10030_v57, %v3803_v1  ;;  %5083 = vrot.lane.b32.xlu1 %v4338_v48, %s7312_s9  ;;  %5182 = vrot.lane.b32.xlu0 %v4512_v14, %s7305_s11  ;;  %v4058_v41 = vpop.f32.mrf.mxu0 }
 0x397   : > { %v3805_v51 = vpop.f32.mrf.mxu1 }
 0x398   : > { %v4029_v47 = vadd.f32 %v4028_v19, %v3804_v45  ;;  %v6564_v31 = vpop.f32.mrf.mxu0 }
 0x399   : > { %v3808_v43 = vpop.f32.mrf.mxu1  ;;  %v10174_v21 = vld [vmem:[#allocation4 + $0x60] sm:$0xff] }
 0x39a   : > { %4198 = vst.msk [vmem:[#allocation4 + $0x79] sm:$0xff] %vm4147_vm14, %v4029_v47  ;;  %v3809_v29 = vadd.f32 %v10030_v57, %v3808_v43  ;;  %4885 = vrot.lane.b32.xlu1 %v4512_v14, %s7314_s15  ;;  %5184 = vrot.lane.b32.xlu0 %v4514_v8, %s7305_s11  ;;  %v4344_v61 = vrot.slane %v10174_v21, 1  ;;  %v4520_v45 = vrot.slane %v10174_v21, 2 }
 0x39b   : > { %v3810_v10 = vpop.f32.mrf.mxu1 }
 0x39c   : > { %v4034_v62 = vadd.f32 %v6552_v4, %v3809_v29 }
 0x39d   : > { %v10179_v9 = vld [vmem:[#allocation4 + $0x68] sm:$0xff]  ;;  %v4236_v35 = vld [vmem:[#allocation4 + $0x70] sm:$0x3] }
 0x39e   : > { %4199 = vst.msk [vmem:[#allocation4 + $0x81] sm:$0xff] %vm4147_vm14, %v4034_v62  ;;  %4887 = vrot.lane.b32.xlu1 %v4514_v8, %s7314_s15  ;;  %4686 = vrot.lane.b32.xlu0 %v10133_v58, %s7313_s14  ;;  %v4345_v8 = vrot.slane %v10179_v9, 1  ;;  %v4347_v20 = vrot.slane %v4236_v35, 1  ;;  %v4521_v4 = vrot.slane %v10179_v9, 2  ;;  %v4523_v29 = vrot.slane %v4236_v35, 2  ;;  %v4068_v62 = vpop.f32.mrf.mxu0 }
 0x3a0   : > { %v4346_v24 = vsel %vm1266_vm10, %v4344_v61, %v4345_v8  ;;  %v4348_v47 = vsel %vm1266_vm10, %v4345_v8, %v4347_v20  ;;  %v4522_v43 = vsel %vm2778_vm0, %v4520_v45, %v4521_v4  ;;  %v6567_v50 = vpop.f32.mrf.mxu0 }
 0x3a2   : > { %4688 = vrot.lane.b32.xlu1 %v10139_v54, %s7313_s14  ;;  %4983 = vrot.lane.b32.xlu0 %v10133_v58, %s7311_s26 }
 0x3a5   : > { %v4239_v8 = vld [vmem:[#allocation4 + $0x88] sm:$0x3] }
 0x3a6   : > { %4985 = vrot.lane.b32.xlu1 %v10139_v54, %s7311_s26  ;;  %4416 = vrot.lane.b32.xlu0 %v4341_v37, %s7309_s29 }
 0x3aa   : > { %v3813_v3 = vpop.f32.mrf.mxu1  ;;  %4418 = vrot.lane.b32.xlu1 %v4343_v52, %s7309_s29  ;;  %4592 = vrot.lane.b32.xlu0 %v4517_v59, %s7310_s23 }
 0x3ab   : > { %v3814_v22 = vadd.f32 %v10030_v57, %v3813_v3 }
 0x3ac   : > { %v3815_v36 = vpop.f32.mrf.mxu1 }
 0x3ad   : > { %v4039_v42 = vadd.f32 %v4038_v25, %v3814_v22 }
 0x3ae   : > { %v3818_v23 = vpop.f32.mrf.mxu1  ;;  %4594 = vrot.lane.b32.xlu1 %v4519_v63, %s7310_s23  ;;  %4788 = vrot.lane.b32.xlu0 %v4341_v37, %s7307_s21 }
 0x3af   : > { %4200 = vst.msk [vmem:[#allocation4 + $0x91] sm:$0xff] %vm4147_vm14, %v4039_v42  ;;  %v3819_v53 = vadd.f32 %v10030_v57, %v3818_v23 }
 0x3b0   : > { %v3820_v2 = vpop.f32.mrf.mxu1 }
 0x3b1   : > { %v4044_v12 = vadd.f32 %v6555_v11, %v3819_v53 }
 0x3b2   : > { %v3823_v44 = vpop.f32.mrf.mxu1  ;;  %4790 = vrot.lane.b32.xlu1 %v4343_v52, %s7307_s21  ;;  %5085 = vrot.lane.b32.xlu0 %v4341_v37, %s7312_s9  ;;  %v4524_v37 = vsel %vm2778_vm0, %v4521_v4, %v4523_v29  ;;  %v4528_v29 = vrot.slane %v4239_v8, 2 }
 0x3b3   : > { %4201 = vst.msk [vmem:[#allocation4 + $0x99] sm:$0xff] %vm4147_vm14, %v4044_v12  ;;  %v3824_v0 = vadd.f32 %v10030_v57, %v3823_v44  ;;  %v10223_v44 = vld [vmem:[#allocation4 + $0x78] sm:$0xff] }
 0x3b4   : > { %v3825_v27 = vpop.f32.mrf.mxu1  ;;  %v4525_v45 = vrot.slane %v10223_v44, 2 }
 0x3b5   : > { %v4049_v28 = vadd.f32 %v4048_v6, %v3824_v0  ;;  %v10232_v27 = vld [vmem:[#allocation4 + $0x80] sm:$0xff] }
 0x3b6   : > { %v3828_v55 = vpop.f32.mrf.mxu1  ;;  %5087 = vrot.lane.b32.xlu1 %v4343_v52, %s7312_s9  ;;  %5186 = vrot.lane.b32.xlu0 %v4517_v59, %s7305_s11  ;;  %v4526_v20 = vrot.slane %v10232_v27, 2 }
 0x3b7   : > { %4202 = vst.msk [vmem:[#allocation4 + $0xa9] sm:$0xff] %vm4147_vm14, %v4049_v28  ;;  %v3829_v13 = vadd.f32 %v10030_v57, %v3828_v55 }
 0x3b8   : > { %v3830_v48 = vpop.f32.mrf.mxu1 }
 0x3b9   : > { %v4054_v14 = vadd.f32 %v6558_v17, %v3829_v13 }
 0x3ba   : > { %4889 = vrot.lane.b32.xlu1 %v4517_v59, %s7314_s15  ;;  %5188 = vrot.lane.b32.xlu0 %v4519_v63, %s7305_s11  ;;  %v4078_v59 = vpop.f32.mrf.mxu0 }
 0x3bb   : > { %4203 = vst.msk [vmem:[#allocation4 + $0xb1] sm:$0xff] %vm4147_vm14, %v4054_v14 }
 0x3be   : > { %4891 = vrot.lane.b32.xlu1 %v4519_v63, %s7314_s15  ;;  %4690 = vrot.lane.b32.xlu0 %v10174_v21, %s7313_s14  ;;  %v6570_v63 = vpop.f32.mrf.mxu0 }
 0x3c0   : > { %v4088_v28 = vpop.f32.mrf.mxu0 }
 0x3c2   : > { %v3833_v38 = vpop.f32.mrf.mxu1  ;;  %4692 = vrot.lane.b32.xlu1 %v10179_v9, %s7313_s14  ;;  %4987 = vrot.lane.b32.xlu0 %v10174_v21, %s7311_s26 }
 0x3c3   : > { %v3834_v56 = vadd.f32 %v10030_v57, %v3833_v38 }
 0x3c4   : > { %v3835_v49 = vpop.f32.mrf.mxu1 }
 0x3c5   : > { %v4059_v39 = vadd.f32 %v4058_v41, %v3834_v56  ;;  %v6573_v56 = vpop.f32.mrf.mxu0  ;;  %v4349_v41 = vrot.slane %v10223_v44, 1 }
 0x3c6   : > { %v3838_v5 = vpop.f32.mrf.mxu1  ;;  %4989 = vrot.lane.b32.xlu1 %v10179_v9, %s7311_s26  ;;  %4420 = vrot.lane.b32.xlu0 %v4346_v24, %s7309_s29 }
 0x3c7   : > { %4204 = vst.msk [vmem:[#allocation4 + $0xc1] sm:$0xff] %vm4147_vm14, %v4059_v39  ;;  %v3839_v18 = vadd.f32 %v10030_v57, %v3838_v5 }
 0x3c8   : > { %v3840_v1 = vpop.f32.mrf.mxu1 }
 0x3c9   : > { %v4064_v19 = vadd.f32 %v6561_v34, %v3839_v18  ;;  %v4350_v34 = vrot.slane %v10232_v27, 1 }
 0x3ca   : > { %v3843_v51 = vpop.f32.mrf.mxu1  ;;  %4422 = vrot.lane.b32.xlu1 %v4348_v47, %s7309_s29  ;;  %4596 = vrot.lane.b32.xlu0 %v4522_v43, %s7310_s23 }
 0x3cb   : > { %4205 = vst.msk [vmem:[#allocation4 + $0xc9] sm:$0xff] %vm4147_vm14, %v4064_v19  ;;  %v3844_v10 = vadd.f32 %v10030_v57, %v3843_v51  ;;  %v4351_v5 = vsel %vm1266_vm10, %v4349_v41, %v4350_v34 }
 0x3cc   : > { %v3845_v32 = vpop.f32.mrf.mxu1 }
 0x3cd   : > { %v4069_v46 = vadd.f32 %v4068_v62, %v3844_v10 }
 0x3ce   : > { %v3848_v33 = vpop.f32.mrf.mxu1  ;;  %4598 = vrot.lane.b32.xlu1 %v4524_v37, %s7310_s23  ;;  %4792 = vrot.lane.b32.xlu0 %v4346_v24, %s7307_s21 }
 0x3cf   : > { %4206 = vst.msk [vmem:[#allocation4 + $0xd9] sm:$0xff] %vm4147_vm14, %v4069_v46  ;;  %v3849_v60 = vadd.f32 %v10030_v57, %v3848_v33 }
 0x3d0   : > { %v3850_v15 = vpop.f32.mrf.mxu1 }
 0x3d1   : > { %v4074_v11 = vadd.f32 %v6564_v31, %v3849_v60  ;;  %v4098_v31 = vpop.f32.mrf.mxu0  ;;  %v4529_v15 = vsel %vm2778_vm0, %v4526_v20, %v4528_v29 }
 0x3d2   : > { %4794 = vrot.lane.b32.xlu1 %v4348_v47, %s7307_s21  ;;  %5089 = vrot.lane.b32.xlu0 %v4346_v24, %s7312_s9  ;;  %v4352_v24 = vrot.slane %v4239_v8, 1 }
 0x3d3   : > { %4207 = vst.msk [vmem:[#allocation4 + $0xe1] sm:$0xff] %vm4147_vm14, %v4074_v11  ;;  %v6576_v32 = vpop.f32.mrf.mxu0 }
 0x3d5   : > { %v10213_v25 = vpop.permute.xlu0 %4678 }
 0x3d6   : > { %v3853_v3 = vpop.f32.mrf.mxu1  ;;  %5091 = vrot.lane.b32.xlu1 %v4348_v47, %s7312_s9  ;;  %5190 = vrot.lane.b32.xlu0 %v4522_v43, %s7305_s11  ;;  %v4353_v47 = vsel %vm1266_vm10, %v4350_v34, %v4352_v24 }
 0x3d7   : > { %v3854_v52 = vadd.f32 %v10030_v57, %v3853_v3 }
 0x3d8   : > { %v3855_v26 = vpop.f32.mrf.mxu1 }
 0x3d9   : > { %v4079_v22 = vadd.f32 %v4078_v59, %v3854_v52  ;;  %v10215_v42 = vpop.permute.xlu1 %4680 }
 0x3da   : > { %v3858_v36 = vpop.f32.mrf.mxu1  ;;  %4893 = vrot.lane.b32.xlu1 %v4522_v43, %s7314_s15  ;;  %5192 = vrot.lane.b32.xlu0 %v4524_v37, %s7305_s11  ;;  %v4527_v43 = vsel %vm2778_vm0, %v4525_v45, %v4526_v20  ;;  %v10299_v20 = vld [vmem:[#allocation4 + $0x90] sm:$0xff] }
 0x3db   : > { %4208 = vst.msk [vmem:[#allocation4 + $0xf1] sm:$0xff] %vm4147_vm14, %v4079_v22  ;;  %v3859_v23 = vadd.f32 %v10030_v57, %v3858_v36 }
 0x3dc   : > { %v3860_v53 = vpop.f32.mrf.mxu1  ;;  %v10221_v2 = vpop.permute.xlu0 %4408 }
 0x3dd   : > { %v4084_v17 = vadd.f32 %v6567_v50, %v3859_v23  ;;  %v10228_v6 = vpop.permute.xlu1 %4410  ;;  %v4108_v50 = vpop.f32.mrf.mxu0 }
 0x3de   : > { %v3863_v12 = vpop.f32.mrf.mxu1  ;;  %4895 = vrot.lane.b32.xlu1 %v4524_v37, %s7314_s15  ;;  %4694 = vrot.lane.b32.xlu0 %v10223_v44, %s7313_s14 }
 0x3df   : > { %4209 = vst.msk [vmem:[#allocation4 + $0xf9] sm:$0xff] %vm4147_vm14, %v4084_v17  ;;  %v3864_v0 = vadd.f32 %v10030_v57, %v3863_v12  ;;  %v6579_v23 = vpop.f32.mrf.mxu0 }
 0x3e0   : > { %v3865_v55 = vpop.f32.mrf.mxu1  ;;  %v10234_v48 = vpop.permute.xlu0 %4584 }
 0x3e1   : > { %v4089_v13 = vadd.f32 %v4088_v28, %v3864_v0  ;;  %v10244_v61 = vpop.permute.xlu1 %4586  ;;  %v4118_v55 = vpop.f32.mrf.mxu0 }
 0x3e2   : > { %v3868_v14 = vpop.f32.mrf.mxu1  ;;  %4696 = vrot.lane.b32.xlu1 %v10232_v27, %s7313_s14  ;;  %4991 = vrot.lane.b32.xlu0 %v10223_v44, %s7311_s26 }
 0x3e3   : > { %4210 = vst.msk [vmem:[#allocation4 + $0x109] sm:$0xff] %vm4147_vm14, %v4089_v13  ;;  %v3869_v38 = vadd.f32 %v10030_v57, %v3868_v14 }
 0x3e4   : > { %v3870_v35 = vpop.f32.mrf.mxu1  ;;  %v10250_v18 = vpop.permute.xlu0 %4780 }
 0x3e5   : > { %v4094_v49 = vadd.f32 %v6570_v63, %v3869_v38  ;;  %v10259_v10 = vpop.permute.xlu1 %4782  ;;  %v6582_v35 = vpop.f32.mrf.mxu0 }
 0x3e6   : > { %v3873_v39 = vpop.f32.mrf.mxu1  ;;  %4993 = vrot.lane.b32.xlu1 %v10232_v27, %s7311_s26  ;;  %4424 = vrot.lane.b32.xlu0 %v4351_v5, %s7309_s29 }
 0x3e7   : > { %4211 = vst.msk [vmem:[#allocation4 + $0x111] sm:$0xff] %vm4147_vm14, %v4094_v49  ;;  %v3874_v4 = vadd.f32 %v10030_v57, %v3873_v39 }
 0x3e8   : > { %v3875_v1 = vpop.f32.mrf.mxu1  ;;  %v10264_v37 = vpop.permute.xlu0 %4881 }
 0x3e9   : > { %v4099_v19 = vadd.f32 %v4098_v31, %v3874_v4  ;;  %v10271_v52 = vpop.permute.xlu1 %4883  ;;  %v10306_v31 = vld [vmem:[#allocation4 + $0x98] sm:$0xff]  ;;  %v4128_v1 = vpop.f32.mrf.mxu0 }
 0x3ea   : > { %v3878_v51 = vpop.f32.mrf.mxu1  ;;  %4426 = vrot.lane.b32.xlu1 %v4353_v47, %s7309_s29  ;;  %4600 = vrot.lane.b32.xlu0 %v4527_v43, %s7310_s23 }
 0x3eb   : > { %4212 = vst.msk [vmem:[#allocation4 + $0x121] sm:$0xff] %vm4147_vm14, %v4099_v19  ;;  %v3879_v62 = vadd.f32 %v10030_v57, %v3878_v51  ;;  %v7291_v19 = vld [vmem:[#allocation4] sm:$0xff]  ;;  %v11411_v51 = vld [vmem:[#allocation9_spill] sm:$0xff] }
 0x3ec   : > { %v3880_v46 = vpop.f32.mrf.mxu1 }
 0x3ed   : > { %v4104_v33 = vadd.f32 %v6573_v56, %v3879_v62  ;;  %v6585_v46 = vpop.f32.mrf.mxu0 }
 0x3ee   : > { %v3883_v60 = vpop.f32.mrf.mxu1  ;;  %4602 = vrot.lane.b32.xlu1 %v4529_v15, %s7310_s23  ;;  %4796 = vrot.lane.b32.xlu0 %v4351_v5, %s7307_s21 }
 0x3ef   : > { %4213 = vst.msk [vmem:[#allocation4 + $0x129] sm:$0xff] %vm4147_vm14, %v4104_v33  ;;  %v3884_v11 = vadd.f32 %v10030_v57, %v3883_v60  ;;  %v4355_v33 = vrot.slane %v10306_v31, 1 }
 0x3f0   : > { %v3885_v3 = vpop.f32.mrf.mxu1  ;;  %v10273_v26 = vpop.permute.xlu0 %4682 }
 0x3f1   : > { %v4109_v59 = vadd.f32 %v4108_v50, %v3884_v11  ;;  %v7292_v11 = vld [vmem:[#allocation4 + $0x8] sm:$0xff]  ;;  %v11412_v50 = vld [vmem:[#allocation10_spill] sm:$0xff] }
 0x3f2   : > { %v3888_v22 = vpop.f32.mrf.mxu1  ;;  %4798 = vrot.lane.b32.xlu1 %v4353_v47, %s7307_s21  ;;  %5093 = vrot.lane.b32.xlu0 %v4351_v5, %s7312_s9  ;;  %v5279_v3 = vsel %vm4147_vm14, %v7292_v11, %v11412_v50 }
 0x3f3   : > { %4214 = vst.msk [vmem:[#allocation4 + $0x139] sm:$0xff] %vm4147_vm14, %v4109_v59  ;;  %v3889_v36 = vadd.f32 %v10030_v57, %v3888_v22  ;;  %v11413_v59 = vld [vmem:[#allocation11_spill] sm:$0xff] }
 0x3f4   : > { %v3890_v63 = vpop.f32.mrf.mxu1  ;;  %v10279_v17 = vpop.permute.xlu1 %4684 }
 0x3f5   : > { %v4114_v53 = vadd.f32 %v6576_v32, %v3889_v36  ;;  %v10281_v12 = vpop.permute.xlu0 %4979 }
 0x3f6   : > { %v3893_v0 = vpop.f32.mrf.mxu1  ;;  %5095 = vrot.lane.b32.xlu1 %v4353_v47, %s7312_s9  ;;  %5194 = vrot.lane.b32.xlu0 %v4527_v43, %s7305_s11  ;;  %v5278_v47 = vsel %vm4147_vm14, %v7291_v19, %v11411_v51 }
 0x3f7   : > { %4215 = vst.msk [vmem:[#allocation4 + $0x141] sm:$0xff] %vm4147_vm14, %v4114_v53  ;;  %v3894_v28 = vadd.f32 %v10030_v57, %v3893_v0  ;;  %v5311_v22 = vsel %vm5310_vm5, %v5278_v47, %v11413_v59 }
 0x3f8   : > { %v3895_v13 = vpop.f32.mrf.mxu1  ;;  %v10287_v34 = vpop.permute.xlu1 %4981  ;;  %v5344_v63 = vsel %vm5343_vm4, %v5311_v22, %v10213_v25 }
 0x3f9   : > { %v4119_v14 = vadd.f32 %v4118_v55, %v3894_v28  ;;  %v10289_v38 = vpop.permute.xlu0 %4412  ;;  %v5376_v55 = vsel %vm2424_vm12, %v5344_v63, %v10250_v18  ;;  %v11414_v18 = vld [vmem:[#allocation12_spill] sm:$0xff] }
 0x3fa   : > { %v3898_v8 = vpop.f32.mrf.mxu1  ;;  %4897 = vrot.lane.b32.xlu1 %v4527_v43, %s7314_s15  ;;  %5196 = vrot.lane.b32.xlu0 %v4529_v15, %s7305_s11 }
 0x3fb   : > { %4216 = vst.msk [vmem:[#allocation4 + $0x151] sm:$0xff] %vm4147_vm14, %v4119_v14  ;;  %v3899_v56 = vadd.f32 %v10030_v57, %v3898_v8  ;;  %v4138_v8 = vpop.f32.mrf.mxu0 }
 0x3fc   : > { %v3900_v41 = vpop.f32.mrf.mxu1  ;;  %v10295_v39 = vpop.permute.xlu1 %4414 }
 0x3fd   : > { %v4124_v49 = vadd.f32 %v6579_v23, %v3899_v56  ;;  %v10297_v5 = vpop.permute.xlu0 %4588  ;;  %v4354_v23 = vrot.slane %v10299_v20, 1  ;;  %v4531_v41 = vrot.slane %v10306_v31, 2 }
 0x3fe   : > { %v3903_v24 = vpop.f32.mrf.mxu1  ;;  %4899 = vrot.lane.b32.xlu1 %v4529_v15, %s7314_s15  ;;  %4698 = vrot.lane.b32.xlu0 %v10299_v20, %s7313_s14  ;;  %v4242_v15 = vld [vmem:[#allocation4 + $0xa0] sm:$0x3] }
 0x3ff   : > { %4217 = vst.msk [vmem:[#allocation4 + $0x159] sm:$0xff] %vm4147_vm14, %v4124_v49  ;;  %v3904_v4 = vadd.f32 %v10030_v57, %v3903_v24  ;;  %v4356_v14 = vsel %vm1266_vm10, %v4354_v23, %v4355_v33  ;;  %v4357_v56 = vrot.slane %v4242_v15, 1  ;;  %v5409_v49 = vsel %vm5408_vm6, %v5376_v55, %v10264_v37 }
 0x400   : > { %v3905_v45 = vpop.f32.mrf.mxu1  ;;  %v10310_v29 = vpop.permute.xlu1 %4590  ;;  %v5442_v24 = vsel %vm5441_vm7, %v5409_v49, %v10281_v12 }
 0x401   : > { %v4129_v43 = vadd.f32 %v4128_v1, %v3904_v4  ;;  %v10312_v62 = vpop.permute.xlu0 %4784  ;;  %v4530_v1 = vrot.slane %v10299_v20, 2  ;;  %v4358_v12 = vsel %vm1266_vm10, %v4355_v33, %v4357_v56 }
 0x402   : > { %v3908_v32 = vpop.f32.mrf.mxu1  ;;  %4700 = vrot.lane.b32.xlu1 %v10306_v31, %s7313_s14  ;;  %4995 = vrot.lane.b32.xlu0 %v10299_v20, %s7311_s26 }
 0x403   : > { %4218 = vst.msk [vmem:[#allocation4 + $0x169] sm:$0xff] %vm4147_vm14, %v4129_v43  ;;  %v3909_v60 = vadd.f32 %v10030_v57, %v3908_v32  ;;  %v4533_v43 = vrot.slane %v4242_v15, 2  ;;  %v4532_v50 = vsel %vm2778_vm0, %v4530_v1, %v4531_v41 }
 0x404   : > { %v3910_v36 = vpop.f32.mrf.mxu1  ;;  %v10328_v0 = vpop.permute.xlu1 %4786 }
 0x405   : > { %v4134_v53 = vadd.f32 %v6582_v35, %v3909_v60  ;;  %v5082_v28 = vpop.permute.xlu0 %5081  ;;  %v5312_v35 = vsel %vm5310_vm5, %v5279_v3, %v11414_v18  ;;  %v4534_v23 = vsel %vm2778_vm0, %v4531_v41, %v4533_v43  ;;  %v4245_v18 = vld [vmem:[#allocation4 + $0xb8] sm:$0x3] }
 0x406   : > { %v3913_v13 = vpop.f32.mrf.mxu1  ;;  %4997 = vrot.lane.b32.xlu1 %v10306_v31, %s7311_s26  ;;  %4428 = vrot.lane.b32.xlu0 %v4356_v14, %s7309_s29  ;;  %v5345_v37 = vsel %vm5343_vm4, %v5312_v35, %v10215_v42  ;;  %v5475_v45 = vsel %vm5474_vm8, %v5442_v24, %v5082_v28 }
 0x407   : > { %4219 = vst.msk [vmem:[#allocation4 + $0x171] sm:$0xff] %vm4147_vm14, %v4134_v53  ;;  %v3914_v25 = vadd.f32 %v10030_v57, %v3913_v13  ;;  %v5377_v32 = vsel %vm2424_vm12, %v5345_v37, %v10259_v10 }
 0x408   : > { %v3915_v4 = vpop.f32.mrf.mxu1  ;;  %v5084_v51 = vpop.permute.xlu1 %5083  ;;  %v5410_v3 = vsel %vm5408_vm6, %v5377_v32, %v10271_v52 }
 0x409   : > { %v4139_v19 = vadd.f32 %v4138_v8, %v3914_v25  ;;  %v5183_v47 = vpop.permute.xlu0 %5182  ;;  %v5443_v10 = vsel %vm5441_vm7, %v5410_v3, %v10287_v34  ;;  %v10386_v8 = vld [vmem:[#allocation4 + $0xa8] sm:$0xff]  ;;  %v5280_v25 = vsel %vm4147_vm14, %v10036_v30, %v10221_v2 }
 0x40a   : > { %v5507_v60 = vsel %vm1429_vm11, %v5475_v45, %v5183_v47  ;;  %v3918_v11 = vpop.f32.mrf.mxu1  ;;  %4430 = vrot.lane.b32.xlu1 %v4358_v12, %s7309_s29  ;;  %4604 = vrot.lane.b32.xlu0 %v4532_v50, %s7310_s23  ;;  %v5476_v33 = vsel %vm5474_vm8, %v5443_v10, %v5084_v51  ;;  %v5313_v35 = vsel %vm5310_vm5, %v5280_v25, %v10234_v48  ;;  %v4359_v24 = vrot.slane %v10386_v8, 1  ;;  %v10467_v25 = vld [vmem:[#allocation4 + $0xc8] sm:$0xff] }
 0x40b   : > { %4220 = vst.msk [vmem:[#allocation4 + $0x181] sm:$0xff] %vm4147_vm14, %v4139_v19  ;;  %v3919_v42 = vadd.f32 %v10030_v57, %v3918_v11  ;;  %6604 = vmatprep.mubr.msk.f32.mxu0 %vm5555_vm9, %v5507_v60  ;;  %v5346_v4 = vsel %vm5343_vm4, %v5313_v35, %v10273_v26  ;;  %v4362_v45 = vrot.slane %v4245_v18, 1  ;;  %v5281_v48 = vsel %vm4147_vm14, %v10040_v16, %v10228_v6 }
 0x40c   : > { %v3920_v15 = vpop.f32.mrf.mxu1  ;;  %v4886_v22 = vpop.permute.xlu1 %4885  ;;  %v5378_v30 = vsel %vm2424_vm12, %v5346_v4, %v10312_v62  ;;  %v5314_v26 = vsel %vm5310_vm5, %v5281_v48, %v10244_v61  ;;  %v4535_v47 = vrot.slane %v10386_v8, 2  ;;  %v4538_v60 = vrot.slane %v4245_v18, 2 }
 0x40d   : > { %v4144_v59 = vadd.f32 %v6585_v46, %v3919_v42  ;;  %v5185_v36 = vpop.permute.xlu0 %5184  ;;  %v5411_v51 = vsel %vm5408_vm6, %v5378_v30, %v4886_v22  ;;  %v5347_v43 = vsel %vm5343_vm4, %v5314_v26, %v10279_v17  ;;  %v5282_v4 = vsel %vm4147_vm14, %v10065_v40, %v10289_v38 }
 0x40e   : > { %v5508_v52 = vsel %vm1429_vm11, %v5476_v33, %v5185_v36  ;;  %4606 = vrot.lane.b32.xlu1 %v4534_v23, %s7310_s23  ;;  %4800 = vrot.lane.b32.xlu0 %v4356_v14, %s7307_s21  ;;  %v5379_v11 = vsel %vm2424_vm12, %v5347_v43, %v10328_v0  ;;  %v5315_v30 = vsel %vm5310_vm5, %v5282_v4, %v10297_v5  ;;  %v4541_v26 = vrot.slane %v10467_v25, 2  ;;  %v10543_v4 = vld [vmem:[#allocation4 + $0xe0] sm:$0xff] }
 0x40f   : > { %4221 = vst.msk [vmem:[#allocation4 + $0x189] sm:$0xff] %vm4147_vm14, %v4144_v59  ;;  %6605 = vmatmul.mubr.msk.f32.vlgmr.msra.gmra.mxu0 %vm5555_vm9, %v5508_v52  ;;  %v5283_v5 = vsel %vm4147_vm14, %v10074_v7, %v10295_v39 }
 0x410   : > { %v4888_v57 = vpop.permute.xlu1 %4887 }
 0x411   : > { %v10370_v34 = vpop.permute.xlu0 %4686  ;;  %v5412_v3 = vsel %vm5408_vm6, %v5379_v11, %v4888_v57 }
 0x412   : > { %4802 = vrot.lane.b32.xlu1 %v4358_v12, %s7307_s21  ;;  %5097 = vrot.lane.b32.xlu0 %v4356_v14, %s7312_s9  ;;  %v10391_v14 = vld [vmem:[#allocation4 + $0xb0] sm:$0xff] }
 0x413   : > { %v4360_v49 = vrot.slane %v10391_v14, 1  ;;  %v4536_v19 = vrot.slane %v10391_v14, 2 }
 0x414   : > { %v10374_v46 = vpop.permute.xlu1 %4688 }
 0x415   : > { %v4984_v63 = vpop.permute.xlu0 %4983  ;;  %v4361_v2 = vsel %vm1266_vm10, %v4359_v24, %v4360_v49  ;;  %v4537_v61 = vsel %vm2778_vm0, %v4535_v47, %v4536_v19  ;;  %v4539_v33 = vsel %vm2778_vm0, %v4536_v19, %v4538_v60  ;;  %v4365_v24 = vrot.slane %v10467_v25, 1 }
 0x416   : > { %5099 = vrot.lane.b32.xlu1 %v4358_v12, %s7312_s9  ;;  %5198 = vrot.lane.b32.xlu0 %v4532_v50, %s7305_s11  ;;  %v5444_v62 = vsel %vm5441_vm7, %v5411_v51, %v4984_v63 }
 0x418   : > { %v4986_v53 = vpop.permute.xlu1 %4985 }
 0x419   : > { %v10378_v28 = vpop.permute.xlu0 %4416  ;;  %v5445_v17 = vsel %vm5441_vm7, %v5412_v3, %v4986_v53 }
 0x41a   : > { %4901 = vrot.lane.b32.xlu1 %v4532_v50, %s7314_s15  ;;  %5200 = vrot.lane.b32.xlu0 %v4534_v23, %s7305_s11  ;;  %v4363_v50 = vsel %vm1266_vm10, %v4360_v49, %v4362_v45  ;;  %v10462_v49 = vld [vmem:[#allocation4 + $0xc0] sm:$0xff]  ;;  %v5348_v45 = vsel %vm5343_vm4, %v5315_v30, %v10370_v34  ;;  %v5316_v34 = vsel %vm5310_vm5, %v5283_v5, %v10310_v29 }
 0x41b   : > { %v4540_v47 = vrot.slane %v10462_v49, 2  ;;  %v5349_v43 = vsel %vm5343_vm4, %v5316_v34, %v10374_v46  ;;  %v4546_v34 = vrot.slane %v10543_v4, 2 }
 0x41c   : > { %v10382_v55 = vpop.permute.xlu1 %4418 }
 0x41d   : > { %v10384_v13 = vpop.permute.xlu0 %4592  ;;  %v4542_v29 = vsel %vm2778_vm0, %v4540_v47, %v4541_v26 }
 0x41e   : > { %4903 = vrot.lane.b32.xlu1 %v4534_v23, %s7314_s15  ;;  %4702 = vrot.lane.b32.xlu0 %v10386_v8, %s7313_s14 }
 0x420   : > { %v10393_v56 = vpop.permute.xlu1 %4594 }
 0x421   : > { %v10395_v41 = vpop.permute.xlu0 %4788 }
 0x422   : > { %4704 = vrot.lane.b32.xlu1 %v10391_v14, %s7313_s14  ;;  %4999 = vrot.lane.b32.xlu0 %v10386_v8, %s7311_s26  ;;  %v5380_v40 = vsel %vm2424_vm12, %v5348_v45, %v10395_v41  ;;  %v5284_v45 = vsel %vm4147_vm14, %v10133_v58, %v10378_v28 }
 0x424   : > { %v10410_v1 = vpop.permute.xlu1 %4790 }
 0x425   : > { %v5086_v37 = vpop.permute.xlu0 %5085 }
 0x426   : > { %5001 = vrot.lane.b32.xlu1 %v10391_v14, %s7311_s26  ;;  %4432 = vrot.lane.b32.xlu0 %v4361_v2, %s7309_s29  ;;  %v5477_v32 = vsel %vm5474_vm8, %v5444_v62, %v5086_v37  ;;  %v4248_v37 = vld [vmem:[#allocation4 + $0xd0] sm:$0x3] }
 0x427   : > { %v4367_v51 = vrot.slane %v4248_v37, 1 }
 0x428   : > { %v5088_v16 = vpop.permute.xlu1 %5087 }
 0x429   : > { %v5187_v6 = vpop.permute.xlu0 %5186  ;;  %v5478_v42 = vsel %vm5474_vm8, %v5445_v17, %v5088_v16  ;;  %v4543_v16 = vrot.slane %v4248_v37, 2  ;;  %v4368_v11 = vsel %vm1266_vm10, %v4365_v24, %v4367_v51 }
 0x42a   : > { %v5509_v12 = vsel %vm1429_vm11, %v5477_v32, %v5187_v6  ;;  %4434 = vrot.lane.b32.xlu1 %v4363_v50, %s7309_s29  ;;  %4608 = vrot.lane.b32.xlu0 %v4537_v61, %s7310_s23  ;;  %v5381_v6 = vsel %vm2424_vm12, %v5349_v43, %v10410_v1 }
 0x42b   : > { %6607 = vmatprep.mubr.msk.f32.mxu0 %vm5555_vm9, %v5509_v12  ;;  %v4544_v17 = vsel %vm2778_vm0, %v4541_v26, %v4543_v16 }
 0x42c   : > { %v4890_v10 = vpop.permute.xlu1 %4889 }
 0x42d   : > { %v5189_v0 = vpop.permute.xlu0 %5188  ;;  %v5413_v62 = vsel %vm5408_vm6, %v5380_v40, %v4890_v10  ;;  %v5317_v40 = vsel %vm5310_vm5, %v5284_v45, %v10384_v13  ;;  %v5285_v13 = vsel %vm4147_vm14, %v10139_v54, %v10382_v55  ;;  %v10619_v45 = vld [vmem:[#allocation4 + $0xf8] sm:$0xff] }
 0x42e   : > { %v5510_v15 = vsel %vm1429_vm11, %v5478_v42, %v5189_v0  ;;  %4610 = vrot.lane.b32.xlu1 %v4539_v33, %s7310_s23  ;;  %4804 = vrot.lane.b32.xlu0 %v4361_v2, %s7307_s21 }
 0x42f   : > { %6608 = vmatmul.mubr.msk.f32.gmra.mxu0 %vm5555_vm9, %v5510_v15 }
 0x430   : > { %v4892_v59 = vpop.permute.xlu1 %4891 }
 0x431   : > { %v10446_v22 = vpop.permute.xlu0 %4690  ;;  %v5414_v12 = vsel %vm5408_vm6, %v5381_v6, %v4892_v59 }
 0x432   : > { %4806 = vrot.lane.b32.xlu1 %v4363_v50, %s7307_s21  ;;  %5101 = vrot.lane.b32.xlu0 %v4361_v2, %s7312_s9  ;;  %v4364_v2 = vrot.slane %v10462_v49, 1  ;;  %v5350_v51 = vsel %vm5343_vm4, %v5317_v40, %v10446_v22  ;;  %v5318_v22 = vsel %vm5310_vm5, %v5285_v13, %v10393_v56 }
 0x434   : > { %v10450_v36 = vpop.permute.xlu1 %4692  ;;  %v4366_v38 = vsel %vm1266_vm10, %v4364_v2, %v4365_v24  ;;  %v10538_v24 = vld [vmem:[#allocation4 + $0xd8] sm:$0xff]  ;;  %v4370_v2 = vrot.slane %v10543_v4, 1 }
 0x435   : > { %v4988_v52 = vpop.permute.xlu0 %4987  ;;  %v4545_v47 = vrot.slane %v10538_v24, 2  ;;  %v5351_v43 = vsel %vm5343_vm4, %v5318_v22, %v10450_v36  ;;  %v4551_v22 = vrot.slane %v10619_v45, 2 }
 0x436   : > { %5103 = vrot.lane.b32.xlu1 %v4363_v50, %s7312_s9  ;;  %5202 = vrot.lane.b32.xlu0 %v4537_v61, %s7305_s11  ;;  %v5446_v41 = vsel %vm5441_vm7, %v5413_v62, %v4988_v52 }
 0x437   : > { %v4547_v56 = vsel %vm2778_vm0, %v4545_v47, %v4546_v34 }
 0x438   : > { %v4990_v23 = vpop.permute.xlu1 %4989 }
 0x439   : > { %v10454_v57 = vpop.permute.xlu0 %4420  ;;  %v5447_v46 = vsel %vm5441_vm7, %v5414_v12, %v4990_v23 }
 0x43a   : > { %4905 = vrot.lane.b32.xlu1 %v4537_v61, %s7314_s15  ;;  %5204 = vrot.lane.b32.xlu0 %v4539_v33, %s7305_s11 }
 0x43c   : > { %v10458_v63 = vpop.permute.xlu1 %4422 }
 0x43d   : > { %v10460_v53 = vpop.permute.xlu0 %4596 }
 0x43e   : > { %4907 = vrot.lane.b32.xlu1 %v4539_v33, %s7314_s15  ;;  %4706 = vrot.lane.b32.xlu0 %v10462_v49, %s7313_s14 }
 0x440   : > { %v10469_v18 = vpop.permute.xlu1 %4598 }
 0x441   : > { %v10471_v35 = vpop.permute.xlu0 %4792 }
 0x442   : > { %4708 = vrot.lane.b32.xlu1 %v10467_v25, %s7313_s14  ;;  %5003 = vrot.lane.b32.xlu0 %v10462_v49, %s7311_s26  ;;  %v5382_v58 = vsel %vm2424_vm12, %v5350_v51, %v10471_v35  ;;  %v5286_v51 = vsel %vm4147_vm14, %v10174_v21, %v10454_v57 }
 0x444   : > { %v10486_v19 = vpop.permute.xlu1 %4794 }
 0x445   : > { %v5090_v48 = vpop.permute.xlu0 %5089 }
 0x446   : > { %5005 = vrot.lane.b32.xlu1 %v10467_v25, %s7311_s26  ;;  %4436 = vrot.lane.b32.xlu0 %v4366_v38, %s7309_s29  ;;  %v5479_v32 = vsel %vm5474_vm8, %v5446_v41, %v5090_v48  ;;  %v4251_v48 = vld [vmem:[#allocation4 + $0xe8] sm:$0x3] }
 0x447   : > { %v4372_v62 = vrot.slane %v4251_v48, 1 }
 0x448   : > { %v5092_v7 = vpop.permute.xlu1 %5091 }
 0x449   : > { %v5191_v39 = vpop.permute.xlu0 %5190  ;;  %v5480_v50 = vsel %vm5474_vm8, %v5447_v46, %v5092_v7  ;;  %v4548_v7 = vrot.slane %v4251_v48, 2  ;;  %v4373_v6 = vsel %vm1266_vm10, %v4370_v2, %v4372_v62 }
 0x44a   : > { %v5511_v60 = vsel %vm1429_vm11, %v5479_v32, %v5191_v39  ;;  %4438 = vrot.lane.b32.xlu1 %v4368_v11, %s7309_s29  ;;  %4612 = vrot.lane.b32.xlu0 %v4542_v29, %s7310_s23  ;;  %v5383_v39 = vsel %vm2424_vm12, %v5351_v43, %v10486_v19 }
 0x44b   : > { %6610 = vmatprep.mubr.msk.f32.mxu0 %vm5555_vm9, %v5511_v60  ;;  %v4549_v46 = vsel %vm2778_vm0, %v4546_v34, %v4548_v7 }
 0x44c   : > { %v4894_v61 = vpop.permute.xlu1 %4893 }
 0x44d   : > { %v5193_v1 = vpop.permute.xlu0 %5192  ;;  %v5415_v41 = vsel %vm5408_vm6, %v5382_v58, %v4894_v61  ;;  %v5319_v58 = vsel %vm5310_vm5, %v5286_v51, %v10460_v53  ;;  %v5287_v53 = vsel %vm4147_vm14, %v10179_v9, %v10458_v63  ;;  %v10695_v51 = vld [vmem:[#allocation4 + $0x110] sm:$0xff] }
 0x44e   : > { %v5512_v3 = vsel %vm1429_vm11, %v5480_v50, %v5193_v1  ;;  %4614 = vrot.lane.b32.xlu1 %v4544_v17, %s7310_s23  ;;  %4808 = vrot.lane.b32.xlu0 %v4366_v38, %s7307_s21 }
 0x44f   : > { %6611 = vmatmul.mubr.msk.f32.gmra.mxu0 %vm5555_vm9, %v5512_v3 }
 0x450   : > { %v4896_v42 = vpop.permute.xlu1 %4895 }
 0x451   : > { %v10522_v10 = vpop.permute.xlu0 %4694  ;;  %v5416_v60 = vsel %vm5408_vm6, %v5383_v39, %v4896_v42 }
 0x452   : > { %4810 = vrot.lane.b32.xlu1 %v4368_v11, %s7307_s21  ;;  %5105 = vrot.lane.b32.xlu0 %v4366_v38, %s7312_s9  ;;  %v4369_v38 = vrot.slane %v10538_v24, 1  ;;  %v5352_v62 = vsel %vm5343_vm4, %v5319_v58, %v10522_v10  ;;  %v5320_v10 = vsel %vm5310_vm5, %v5287_v53, %v10469_v18 }
 0x454   : > { %v10526_v0 = vpop.permute.xlu1 %4696  ;;  %v4371_v28 = vsel %vm1266_vm10, %v4369_v38, %v4370_v2  ;;  %v10614_v2 = vld [vmem:[#allocation4 + $0xf0] sm:$0xff]  ;;  %v4375_v38 = vrot.slane %v10619_v45, 1 }
 0x455   : > { %v4992_v15 = vpop.permute.xlu0 %4991  ;;  %v4550_v47 = vrot.slane %v10614_v2, 2  ;;  %v5353_v43 = vsel %vm5343_vm4, %v5320_v10, %v10526_v0  ;;  %v4556_v10 = vrot.slane %v10695_v51, 2 }
 0x456   : > { %5107 = vrot.lane.b32.xlu1 %v4368_v11, %s7312_s9  ;;  %5206 = vrot.lane.b32.xlu0 %v4542_v29, %s7305_s11  ;;  %v5448_v35 = vsel %vm5441_vm7, %v5415_v41, %v4992_v15 }
 0x457   : > { %v4552_v18 = vsel %vm2778_vm0, %v4550_v47, %v4551_v22 }
 0x458   : > { %v4994_v33 = vpop.permute.xlu1 %4993 }
 0x459   : > { %v10530_v59 = vpop.permute.xlu0 %4424  ;;  %v5449_v36 = vsel %vm5441_vm7, %v5416_v60, %v4994_v33 }
 0x45a   : > { %4909 = vrot.lane.b32.xlu1 %v4542_v29, %s7314_s15  ;;  %5208 = vrot.lane.b32.xlu0 %v4544_v17, %s7305_s11 }
 0x45c   : > { %v10534_v52 = vpop.permute.xlu1 %4426 }
 0x45d   : > { %v10536_v23 = vpop.permute.xlu0 %4600 }
 0x45e   : > { %4911 = vrot.lane.b32.xlu1 %v4544_v17, %s7314_s15  ;;  %4710 = vrot.lane.b32.xlu0 %v10538_v24, %s7313_s14 }
 0x460   : > { %v10545_v37 = vpop.permute.xlu1 %4602 }
 0x461   : > { %v10547_v30 = vpop.permute.xlu0 %4796 }
 0x462   : > { %4712 = vrot.lane.b32.xlu1 %v10543_v4, %s7313_s14  ;;  %5007 = vrot.lane.b32.xlu0 %v10538_v24, %s7311_s26  ;;  %v5384_v21 = vsel %vm2424_vm12, %v5352_v62, %v10547_v30  ;;  %v5288_v62 = vsel %vm4147_vm14, %v10223_v44, %v10530_v59 }
 0x464   : > { %v10562_v26 = vpop.permute.xlu1 %4798 }
 0x465   : > { %v5094_v5 = vpop.permute.xlu0 %5093 }
 0x466   : > { %5009 = vrot.lane.b32.xlu1 %v10543_v4, %s7311_s26  ;;  %4440 = vrot.lane.b32.xlu0 %v4371_v28, %s7309_s29  ;;  %v5481_v32 = vsel %vm5474_vm8, %v5448_v35, %v5094_v5  ;;  %v4254_v5 = vld [vmem:[#allocation4 + $0x100] sm:$0x3] }
 0x467   : > { %v4377_v41 = vrot.slane %v4254_v5, 1 }
 0x468   : > { %v5096_v54 = vpop.permute.xlu1 %5095 }
 0x469   : > { %v5195_v55 = vpop.permute.xlu0 %5194  ;;  %v5482_v11 = vsel %vm5474_vm8, %v5449_v36, %v5096_v54  ;;  %v4553_v54 = vrot.slane %v4254_v5, 2  ;;  %v4378_v39 = vsel %vm1266_vm10, %v4375_v38, %v4377_v41 }
 0x46a   : > { %v5513_v16 = vsel %vm1429_vm11, %v5481_v32, %v5195_v55  ;;  %4442 = vrot.lane.b32.xlu1 %v4373_v6, %s7309_s29  ;;  %4616 = vrot.lane.b32.xlu0 %v4547_v56, %s7310_s23  ;;  %v5385_v55 = vsel %vm2424_vm12, %v5353_v43, %v10562_v26 }
 0x46b   : > { %6613 = vmatprep.mubr.msk.f32.mxu0 %vm5555_vm9, %v5513_v16  ;;  %v4554_v36 = vsel %vm2778_vm0, %v4551_v22, %v4553_v54 }
 0x46c   : > { %v4898_v29 = vpop.permute.xlu1 %4897 }
 0x46d   : > { %v5197_v19 = vpop.permute.xlu0 %5196  ;;  %v5417_v35 = vsel %vm5408_vm6, %v5384_v21, %v4898_v29  ;;  %v5321_v21 = vsel %vm5310_vm5, %v5288_v62, %v10536_v23  ;;  %v5289_v23 = vsel %vm4147_vm14, %v10232_v27, %v10534_v52  ;;  %v10771_v62 = vld [vmem:[#allocation4 + $0x128] sm:$0xff] }
 0x46e   : > { %v5514_v12 = vsel %vm1429_vm11, %v5482_v11, %v5197_v19  ;;  %4618 = vrot.lane.b32.xlu1 %v4549_v46, %s7310_s23  ;;  %4812 = vrot.lane.b32.xlu0 %v4371_v28, %s7307_s21 }
 0x46f   : > { %6614 = vmatmul.mubr.msk.f32.gmra.mxu0 %vm5555_vm9, %v5514_v12 }
 0x470   : > { %v4900_v50 = vpop.permute.xlu1 %4899 }
 0x471   : > { %v10598_v61 = vpop.permute.xlu0 %4698  ;;  %v5418_v16 = vsel %vm5408_vm6, %v5385_v55, %v4900_v50 }
 0x472   : > { %4814 = vrot.lane.b32.xlu1 %v4373_v6, %s7307_s21  ;;  %5109 = vrot.lane.b32.xlu0 %v4371_v28, %s7312_s9  ;;  %v4374_v28 = vrot.slane %v10614_v2, 1  ;;  %v5354_v41 = vsel %vm5343_vm4, %v5321_v21, %v10598_v61  ;;  %v5322_v61 = vsel %vm5310_vm5, %v5289_v23, %v10545_v37 }
 0x474   : > { %v10602_v1 = vpop.permute.xlu1 %4700  ;;  %v4376_v57 = vsel %vm1266_vm10, %v4374_v28, %v4375_v38  ;;  %v10690_v38 = vld [vmem:[#allocation4 + $0x108] sm:$0xff]  ;;  %v4380_v28 = vrot.slane %v10695_v51, 1 }
 0x475   : > { %v4996_v3 = vpop.permute.xlu0 %4995  ;;  %v4555_v47 = vrot.slane %v10690_v38, 2  ;;  %v5355_v43 = vsel %vm5343_vm4, %v5322_v61, %v10602_v1  ;;  %v4561_v61 = vrot.slane %v10771_v62, 2 }
 0x476   : > { %5111 = vrot.lane.b32.xlu1 %v4373_v6, %s7312_s9  ;;  %5210 = vrot.lane.b32.xlu0 %v4547_v56, %s7305_s11  ;;  %v5450_v30 = vsel %vm5441_vm7, %v5417_v35, %v4996_v3 }
 0x477   : > { %v4557_v37 = vsel %vm2778_vm0, %v4555_v47, %v4556_v10 }
 0x478   : > { %v4998_v17 = vpop.permute.xlu1 %4997 }
 0x479   : > { %v10606_v42 = vpop.permute.xlu0 %4428  ;;  %v5451_v0 = vsel %vm5441_vm7, %v5418_v16, %v4998_v17 }
 0x47a   : > { %4913 = vrot.lane.b32.xlu1 %v4547_v56, %s7314_s15  ;;  %5212 = vrot.lane.b32.xlu0 %v4549_v46, %s7305_s11 }
 0x47c   : > { %v10610_v15 = vpop.permute.xlu1 %4430 }
 0x47d   : > { %v10612_v33 = vpop.permute.xlu0 %4604 }
 0x47e   : > { %4915 = vrot.lane.b32.xlu1 %v4549_v46, %s7314_s15  ;;  %4714 = vrot.lane.b32.xlu0 %v10614_v2, %s7313_s14 }
 0x480   : > { %v10621_v48 = vpop.permute.xlu1 %4606 }
 0x481   : > { %v10623_v40 = vpop.permute.xlu0 %4800 }
 0x482   : > { %4716 = vrot.lane.b32.xlu1 %v10619_v45, %s7313_s14  ;;  %5011 = vrot.lane.b32.xlu0 %v10614_v2, %s7311_s26  ;;  %v5386_v44 = vsel %vm2424_vm12, %v5354_v41, %v10623_v40  ;;  %v5290_v41 = vsel %vm4147_vm14, %v10299_v20, %v10606_v42 }
 0x484   : > { %v10638_v34 = vpop.permute.xlu1 %4802 }
 0x485   : > { %v5098_v13 = vpop.permute.xlu0 %5097 }
 0x486   : > { %5013 = vrot.lane.b32.xlu1 %v10619_v45, %s7311_s26  ;;  %4444 = vrot.lane.b32.xlu0 %v4376_v57, %s7309_s29  ;;  %v5483_v32 = vsel %vm5474_vm8, %v5450_v30, %v5098_v13  ;;  %v4257_v13 = vld [vmem:[#allocation4 + $0x118] sm:$0x3] }
 0x487   : > { %v4382_v35 = vrot.slane %v4257_v13, 1 }
 0x488   : > { %v5100_v9 = vpop.permute.xlu1 %5099 }
 0x489   : > { %v5199_v63 = vpop.permute.xlu0 %5198  ;;  %v5484_v6 = vsel %vm5474_vm8, %v5451_v0, %v5100_v9  ;;  %v4558_v9 = vrot.slane %v4257_v13, 2  ;;  %v4383_v55 = vsel %vm1266_vm10, %v4380_v28, %v4382_v35 }
 0x48a   : > { %v5515_v7 = vsel %vm1429_vm11, %v5483_v32, %v5199_v63  ;;  %4446 = vrot.lane.b32.xlu1 %v4378_v39, %s7309_s29  ;;  %4620 = vrot.lane.b32.xlu0 %v4552_v18, %s7310_s23  ;;  %v5387_v63 = vsel %vm2424_vm12, %v5355_v43, %v10638_v34 }
 0x48b   : > { %6616 = vmatprep.mubr.msk.f32.mxu0 %vm5555_vm9, %v5515_v7  ;;  %v4559_v0 = vsel %vm2778_vm0, %v4556_v10, %v4558_v9 }
 0x48c   : > { %v4902_v56 = vpop.permute.xlu1 %4901 }
 0x48d   : > { %v5201_v26 = vpop.permute.xlu0 %5200  ;;  %v5419_v30 = vsel %vm5408_vm6, %v5386_v44, %v4902_v56  ;;  %v5323_v44 = vsel %vm5310_vm5, %v5290_v41, %v10612_v33  ;;  %v5291_v33 = vsel %vm4147_vm14, %v10306_v31, %v10610_v15 }
 0x48e   : > { %v5516_v60 = vsel %vm1429_vm11, %v5484_v6, %v5201_v26  ;;  %4622 = vrot.lane.b32.xlu1 %v4554_v36, %s7310_s23  ;;  %4816 = vrot.lane.b32.xlu0 %v4376_v57, %s7307_s21 }
 0x48f   : > { %6617 = vmatmul.mubr.msk.f32.gmra.mxu0 %vm5555_vm9, %v5516_v60 }
 0x490   : > { %v4904_v11 = vpop.permute.xlu1 %4903 }
 0x491   : > { %v10674_v29 = vpop.permute.xlu0 %4702  ;;  %v5420_v7 = vsel %vm5408_vm6, %v5387_v63, %v4904_v11 }
 0x492   : > { %4818 = vrot.lane.b32.xlu1 %v4378_v39, %s7307_s21  ;;  %5113 = vrot.lane.b32.xlu0 %v4376_v57, %s7312_s9  ;;  %v4379_v57 = vrot.slane %v10690_v38, 1  ;;  %v5356_v35 = vsel %vm5343_vm4, %v5323_v44, %v10674_v29  ;;  %v5324_v29 = vsel %vm5310_vm5, %v5291_v33, %v10621_v48  ;;  %v4263_v33 = vld [vmem:[#allocation4 + $0x148] sm:$0x3] }
 0x494   : > { %v10678_v19 = vpop.permute.xlu1 %4704  ;;  %v4381_v59 = vsel %vm1266_vm10, %v4379_v57, %v4380_v28  ;;  %v10766_v28 = vld [vmem:[#allocation4 + $0x120] sm:$0xff]  ;;  %v4385_v57 = vrot.slane %v10771_v62, 1 }
 0x495   : > { %v5000_v12 = vpop.permute.xlu0 %4999  ;;  %v4560_v47 = vrot.slane %v10766_v28, 2  ;;  %v5357_v43 = vsel %vm5343_vm4, %v5324_v29, %v10678_v19 }
 0x496   : > { %5115 = vrot.lane.b32.xlu1 %v4378_v39, %s7312_s9  ;;  %5214 = vrot.lane.b32.xlu0 %v4552_v18, %s7305_s11  ;;  %v5452_v40 = vsel %vm5441_vm7, %v5419_v30, %v5000_v12 }
 0x497   : > { %v4562_v48 = vsel %vm2778_vm0, %v4560_v47, %v4561_v61 }
 0x498   : > { %v5002_v46 = vpop.permute.xlu1 %5001 }
 0x499   : > { %v10682_v50 = vpop.permute.xlu0 %4432  ;;  %v5453_v1 = vsel %vm5441_vm7, %v5420_v7, %v5002_v46 }
 0x49a   : > { %4917 = vrot.lane.b32.xlu1 %v4552_v18, %s7314_s15  ;;  %5216 = vrot.lane.b32.xlu0 %v4554_v36, %s7305_s11 }
 0x49c   : > { %v10686_v3 = vpop.permute.xlu1 %4434 }
 0x49d   : > { %v10688_v17 = vpop.permute.xlu0 %4608 }
 0x49e   : > { %4919 = vrot.lane.b32.xlu1 %v4554_v36, %s7314_s15  ;;  %4718 = vrot.lane.b32.xlu0 %v10690_v38, %s7313_s14 }
 0x4a0   : > { %v10697_v5 = vpop.permute.xlu1 %4610 }
 0x4a1   : > { %v10699_v58 = vpop.permute.xlu0 %4804 }
 0x4a2   : > { %4720 = vrot.lane.b32.xlu1 %v10695_v51, %s7313_s14  ;;  %5015 = vrot.lane.b32.xlu0 %v10690_v38, %s7311_s26  ;;  %v5388_v20 = vsel %vm2424_vm12, %v5356_v35, %v10699_v58  ;;  %v10850_v35 = vld [vmem:[#allocation4 + $0x138] sm:$0xff] }
 0x4a3   : > { %v4389_v29 = vrot.slane %v10850_v35, 1 }
 0x4a4   : > { %v10714_v22 = vpop.permute.xlu1 %4806 }
 0x4a5   : > { %v5102_v53 = vpop.permute.xlu0 %5101 }
 0x4a6   : > { %5017 = vrot.lane.b32.xlu1 %v10695_v51, %s7311_s26  ;;  %4448 = vrot.lane.b32.xlu0 %v4381_v59, %s7309_s29  ;;  %v5485_v32 = vsel %vm5474_vm8, %v5452_v40, %v5102_v53  ;;  %v4260_v53 = vld [vmem:[#allocation4 + $0x130] sm:$0x3] }
 0x4a7   : > { %v4387_v30 = vrot.slane %v4260_v53, 1 }
 0x4a8   : > { %v5104_v27 = vpop.permute.xlu1 %5103 }
 0x4a9   : > { %v5203_v52 = vpop.permute.xlu0 %5202  ;;  %v5486_v39 = vsel %vm5474_vm8, %v5453_v1, %v5104_v27  ;;  %v4563_v27 = vrot.slane %v4260_v53, 2  ;;  %v4388_v63 = vsel %vm1266_vm10, %v4385_v57, %v4387_v30 }
 0x4aa   : > { %v5517_v54 = vsel %vm1429_vm11, %v5485_v32, %v5203_v52  ;;  %4450 = vrot.lane.b32.xlu1 %v4383_v55, %s7309_s29  ;;  %4624 = vrot.lane.b32.xlu0 %v4557_v37, %s7310_s23  ;;  %v5389_v52 = vsel %vm2424_vm12, %v5357_v43, %v10714_v22 }
 0x4ab   : > { %6619 = vmatprep.mubr.msk.f32.mxu0 %vm5555_vm9, %v5517_v54  ;;  %v4564_v1 = vsel %vm2778_vm0, %v4561_v61, %v4563_v27  ;;  %v5292_v61 = vsel %vm4147_vm14, %v10386_v8, %v10682_v50  ;;  %v4565_v27 = vrot.slane %v10850_v35, 2 }
 0x4ac   : > { %v4906_v18 = vpop.permute.xlu1 %4905 }
 0x4ad   : > { %v5205_v34 = vpop.permute.xlu0 %5204  ;;  %v5421_v40 = vsel %vm5408_vm6, %v5388_v20, %v4906_v18 }
 0x4ae   : > { %v5518_v16 = vsel %vm1429_vm11, %v5486_v39, %v5205_v34  ;;  %4626 = vrot.lane.b32.xlu1 %v4559_v0, %s7310_s23  ;;  %5117 = vrot.lane.b32.xlu0 %v4381_v59, %s7312_s9  ;;  %v10828_v34 = vld [vmem:[#allocation4 + $0x1a0] sm:$0xff] }
 0x4af   : > { %6620 = vmatmul.mubr.msk.f32.gmra.mxu0 %vm5555_vm9, %v5518_v16  ;;  %v5178_v16 = vrot.slane %v10828_v34, 2 }
 0x4b0   : > { %v4908_v6 = vpop.permute.xlu1 %4907 }
 0x4b1   : > { %v10750_v56 = vpop.permute.xlu0 %4706  ;;  %v5422_v54 = vsel %vm5408_vm6, %v5389_v52, %v4908_v6 }
 0x4b2   : > { %4820 = vrot.lane.b32.xlu1 %v4381_v59, %s7307_s21  ;;  %5119 = vrot.lane.b32.xlu0 %v4383_v55, %s7312_s9  ;;  %v4384_v59 = vrot.slane %v10766_v28, 1 }
 0x4b4   : > { %v10754_v26 = vpop.permute.xlu1 %4708  ;;  %v4386_v42 = vsel %vm1266_vm10, %v4384_v59, %v4385_v57 }
 0x4b5   : > { %v5004_v60 = vpop.permute.xlu0 %5003 }
 0x4b6   : > { %5218 = vrot.lane.b32.xlu1 %v4557_v37, %s7305_s11  ;;  %4822 = vrot.lane.b32.xlu0 %v4383_v55, %s7307_s21  ;;  %v5454_v58 = vsel %vm5441_vm7, %v5421_v40, %v5004_v60  ;;  %v5325_v40 = vsel %vm5310_vm5, %v5292_v61, %v10688_v17  ;;  %v5293_v17 = vsel %vm4147_vm14, %v10391_v14, %v10686_v3 }
 0x4b8   : > { %v5006_v36 = vpop.permute.xlu1 %5005 }
 0x4b9   : > { %v10758_v11 = vpop.permute.xlu0 %4436  ;;  %v5455_v19 = vsel %vm5441_vm7, %v5422_v54, %v5006_v36 }
 0x4ba   : > { %4921 = vrot.lane.b32.xlu1 %v4557_v37, %s7314_s15  ;;  %5220 = vrot.lane.b32.xlu0 %v4559_v0, %s7305_s11 }
 0x4bc   : > { %v10762_v12 = vpop.permute.xlu1 %4438 }
 0x4bd   : > { %v10764_v46 = vpop.permute.xlu0 %4612 }
 0x4be   : > { %4923 = vrot.lane.b32.xlu1 %v4559_v0, %s7314_s15  ;;  %4722 = vrot.lane.b32.xlu0 %v10766_v28, %s7313_s14  ;;  %v7294_v0 = vld [vmem:[#allocation4 + $0x198] sm:$0xff] }
 0x4bf   : > { %v5177_v6 = vrot.slane %v7294_v0, 2 }
 0x4c0   : > { %v10773_v13 = vpop.permute.xlu1 %4614 }
 0x4c1   : > { %v10775_v21 = vpop.permute.xlu0 %4808  ;;  %v10840_v57 = vsel %vm2778_vm0, %v5177_v6, %v5178_v16 }
 0x4c2   : > { %4724 = vrot.lane.b32.xlu1 %v10771_v62, %s7313_s14  ;;  %5019 = vrot.lane.b32.xlu0 %v10766_v28, %s7311_s26 }
 0x4c4   : > { %v10790_v10 = vpop.permute.xlu1 %4810 }
 0x4c5   : > { %v5106_v23 = vpop.permute.xlu0 %5105 }
 0x4c6   : > { %5021 = vrot.lane.b32.xlu1 %v10771_v62, %s7311_s26  ;;  %4452 = vrot.lane.b32.xlu0 %v4386_v42, %s7309_s29  ;;  %v5487_v32 = vsel %vm5474_vm8, %v5454_v58, %v5106_v23  ;;  %v10855_v23 = vld [vmem:[#allocation4 + $0x140] sm:$0xff]  ;;  %v5358_v58 = vsel %vm5343_vm4, %v5325_v40, %v10750_v56  ;;  %v5326_v56 = vsel %vm5310_vm5, %v5293_v17, %v10697_v5  ;;  %v10926_v40 = vld [vmem:[#allocation4 + $0x150] sm:$0xff] }
 0x4c7   : > { %v4390_v30 = vrot.slane %v10855_v23, 1  ;;  %v5390_v8 = vsel %vm2424_vm12, %v5358_v58, %v10775_v21  ;;  %v5359_v52 = vsel %vm5343_vm4, %v5326_v56, %v10754_v26  ;;  %v4394_v17 = vrot.slane %v10926_v40, 1 }
 0x4c8   : > { %v5108_v31 = vpop.permute.xlu1 %5107 }
 0x4c9   : > { %v5207_v15 = vpop.permute.xlu0 %5206  ;;  %v5488_v55 = vsel %vm5474_vm8, %v5455_v19, %v5108_v31  ;;  %v4391_v50 = vsel %vm1266_vm10, %v4389_v29, %v4390_v30  ;;  %v4566_v31 = vrot.slane %v10855_v23, 2  ;;  %v10931_v29 = vld [vmem:[#allocation4 + $0x158] sm:$0xff] }
 0x4ca   : > { %v5519_v9 = vsel %vm1429_vm11, %v5487_v32, %v5207_v15  ;;  %4454 = vrot.lane.b32.xlu1 %v4388_v63, %s7309_s29  ;;  %4628 = vrot.lane.b32.xlu0 %v4562_v48, %s7310_s23  ;;  %v4392_v32 = vrot.slane %v4263_v33, 1 }
 0x4cb   : > { %6622 = vmatprep.mubr.msk.f32.mxu0 %vm5555_vm9, %v5519_v9  ;;  %v4567_v5 = vsel %vm2778_vm0, %v4565_v27, %v4566_v31 }
 0x4cc   : > { %v4910_v37 = vpop.permute.xlu1 %4909  ;;  %v4393_v19 = vsel %vm1266_vm10, %v4390_v30, %v4392_v32  ;;  %v4266_v32 = vld [vmem:[#allocation4 + $0x160] sm:$0x3] }
 0x4cd   : > { %v5209_v22 = vpop.permute.xlu0 %5208  ;;  %v5423_v15 = vsel %vm5408_vm6, %v5390_v8, %v4910_v37  ;;  %v4395_v8 = vrot.slane %v10931_v29, 1  ;;  %v4397_v27 = vrot.slane %v4266_v32, 1 }
 0x4ce   : > { %v5520_v7 = vsel %vm1429_vm11, %v5488_v55, %v5209_v22  ;;  %4630 = vrot.lane.b32.xlu1 %v4564_v1, %s7310_s23  ;;  %5121 = vrot.lane.b32.xlu0 %v4386_v42, %s7312_s9 }
 0x4cf   : > { %6623 = vmatmul.mubr.msk.f32.gmra.mxu0 %vm5555_vm9, %v5520_v7 }
 0x4d0   : > { %v4912_v39 = vpop.permute.xlu1 %4911 }
 0x4d1   : > { %v10826_v18 = vpop.permute.xlu0 %4710 }
 0x4d2   : > { %4824 = vrot.lane.b32.xlu1 %v4386_v42, %s7307_s21  ;;  %5123 = vrot.lane.b32.xlu0 %v4388_v63, %s7312_s9 }
 0x4d4   : > { %v10833_v60 = vpop.permute.xlu1 %4712 }
 0x4d5   : > { %v5008_v36 = vpop.permute.xlu0 %5007 }
 0x4d6   : > { %5222 = vrot.lane.b32.xlu1 %v4562_v48, %s7305_s11  ;;  %4826 = vrot.lane.b32.xlu0 %v4388_v63, %s7307_s21  ;;  %v5456_v21 = vsel %vm5441_vm7, %v5423_v15, %v5008_v36  ;;  %v4568_v63 = vrot.slane %v4263_v33, 2 }
 0x4d8   : > { %v5010_v41 = vpop.permute.xlu1 %5009 }
 0x4d9   : > { %v10842_v53 = vpop.permute.xlu0 %4440 }
 0x4da   : > { %4925 = vrot.lane.b32.xlu1 %v4562_v48, %s7314_s15  ;;  %5224 = vrot.lane.b32.xlu0 %v4564_v1, %s7305_s11  ;;  %v5391_v48 = vsel %vm2424_vm12, %v5359_v52, %v10790_v10  ;;  %v4571_v52 = vrot.slane %v10931_v29, 2 }
 0x4db   : > { %v5424_v55 = vsel %vm5408_vm6, %v5391_v48, %v4912_v39  ;;  %v4573_v48 = vrot.slane %v4266_v32, 2 }
 0x4dc   : > { %v10846_v44 = vpop.permute.xlu1 %4442  ;;  %v5457_v26 = vsel %vm5441_vm7, %v5424_v55, %v5010_v41 }
 0x4dd   : > { %v10848_v59 = vpop.permute.xlu0 %4616 }
 0x4de   : > { %4927 = vrot.lane.b32.xlu1 %v4564_v1, %s7314_s15  ;;  %4726 = vrot.lane.b32.xlu0 %v10850_v35, %s7313_s14  ;;  %v4569_v1 = vsel %vm2778_vm0, %v4566_v31, %v4568_v63 }
 0x4e0   : > { %v10857_v20 = vpop.permute.xlu1 %4618 }
 0x4e1   : > { %v10859_v42 = vpop.permute.xlu0 %4812 }
 0x4e2   : > { %4728 = vrot.lane.b32.xlu1 %v10855_v23, %s7313_s14  ;;  %5023 = vrot.lane.b32.xlu0 %v10850_v35, %s7311_s26 }
 0x4e4   : > { %v10874_v47 = vpop.permute.xlu1 %4814 }
 0x4e5   : > { %v5110_v43 = vpop.permute.xlu0 %5109 }
 0x4e6   : > { %5025 = vrot.lane.b32.xlu1 %v10855_v23, %s7311_s26  ;;  %4456 = vrot.lane.b32.xlu0 %v4391_v50, %s7309_s29  ;;  %v5489_v9 = vsel %vm5474_vm8, %v5456_v21, %v5110_v43 }
 0x4e8   : > { %v5112_v14 = vpop.permute.xlu1 %5111 }
 0x4e9   : > { %v5211_v3 = vpop.permute.xlu0 %5210  ;;  %v5490_v37 = vsel %vm5474_vm8, %v5457_v26, %v5112_v14  ;;  %v4570_v14 = vrot.slane %v10926_v40, 2 }
 0x4ea   : > { %v5521_v54 = vsel %vm1429_vm11, %v5489_v9, %v5211_v3  ;;  %4458 = vrot.lane.b32.xlu1 %v4393_v19, %s7309_s29  ;;  %4632 = vrot.lane.b32.xlu0 %v4567_v5, %s7310_s23 }
 0x4eb   : > { %6625 = vmatprep.mubr.msk.f32.mxu0 %vm5555_vm9, %v5521_v54 }
 0x4ec   : > { %v4914_v22 = vpop.permute.xlu1 %4913 }
 0x4ed   : > { %v5213_v10 = vpop.permute.xlu0 %5212 }
 0x4ee   : > { %v5522_v7 = vsel %vm1429_vm11, %v5490_v37, %v5213_v10  ;;  %4634 = vrot.lane.b32.xlu1 %v4569_v1, %s7310_s23  ;;  %5125 = vrot.lane.b32.xlu0 %v4391_v50, %s7312_s9  ;;  %v4574_v10 = vsel %vm2778_vm0, %v4571_v52, %v4573_v48 }
 0x4ef   : > { %6626 = vmatmul.mubr.msk.f32.gmra.mxu0 %vm5555_vm9, %v5522_v7 }
 0x4f0   : > { %v4916_v39 = vpop.permute.xlu1 %4915 }
 0x4f1   : > { %v10910_v0 = vpop.permute.xlu0 %4714 }
 0x4f2   : > { %4828 = vrot.lane.b32.xlu1 %v4391_v50, %s7307_s21  ;;  %5127 = vrot.lane.b32.xlu0 %v4393_v19, %s7312_s9  ;;  %v5294_v50 = vsel %vm4147_vm14, %v10462_v49, %v10758_v11  ;;  %v4396_v11 = vsel %vm1266_vm10, %v4394_v17, %v4395_v8 }
 0x4f3   : > { %v5327_v31 = vsel %vm5310_vm5, %v5294_v50, %v10764_v46  ;;  %v5295_v46 = vsel %vm4147_vm14, %v10467_v25, %v10762_v12 }
 0x4f4   : > { %v10914_v6 = vpop.permute.xlu1 %4716  ;;  %v5360_v15 = vsel %vm5343_vm4, %v5327_v31, %v10826_v18  ;;  %v5328_v18 = vsel %vm5310_vm5, %v5295_v46, %v10773_v13  ;;  %v4572_v13 = vsel %vm2778_vm0, %v4570_v14, %v4571_v52  ;;  %v5296_v46 = vsel %vm4147_vm14, %v10538_v24, %v10842_v53 }
 0x4f5   : > { %v5012_v36 = vpop.permute.xlu0 %5011  ;;  %v5392_v49 = vsel %vm2424_vm12, %v5360_v15, %v10859_v42  ;;  %v5361_v3 = vsel %vm5343_vm4, %v5328_v18, %v10833_v60  ;;  %v11001_v15 = vld [vmem:[#allocation4 + $0x168] sm:$0xff] }
 0x4f6   : > { %5226 = vrot.lane.b32.xlu1 %v4567_v5, %s7305_s11  ;;  %4830 = vrot.lane.b32.xlu0 %v4393_v19, %s7307_s21  ;;  %v5425_v9 = vsel %vm5408_vm6, %v5392_v49, %v4914_v22  ;;  %v5393_v54 = vsel %vm2424_vm12, %v5361_v3, %v10874_v47  ;;  %v4399_v18 = vrot.slane %v11001_v15, 1  ;;  %v4575_v48 = vrot.slane %v11001_v15, 2 }
 0x4f7   : > { %v5458_v42 = vsel %vm5441_vm7, %v5425_v9, %v5012_v36  ;;  %v5426_v55 = vsel %vm5408_vm6, %v5393_v54, %v4916_v39  ;;  %v4269_v9 = vld [vmem:[#allocation4 + $0x178] sm:$0x3] }
 0x4f8   : > { %v5014_v41 = vpop.permute.xlu1 %5013 }
 0x4f9   : > { %v10918_v30 = vpop.permute.xlu0 %4444  ;;  %v5459_v60 = vsel %vm5441_vm7, %v5426_v55, %v5014_v41 }
 0x4fa   : > { %4929 = vrot.lane.b32.xlu1 %v4567_v5, %s7314_s15  ;;  %5228 = vrot.lane.b32.xlu0 %v4569_v1, %s7305_s11  ;;  %v4398_v5 = vsel %vm1266_vm10, %v4395_v8, %v4397_v27 }
 0x4fc   : > { %v10922_v61 = vpop.permute.xlu1 %4446 }
 0x4fd   : > { %v10924_v33 = vpop.permute.xlu0 %4620 }
 0x4fe   : > { %4931 = vrot.lane.b32.xlu1 %v4569_v1, %s7314_s15  ;;  %4730 = vrot.lane.b32.xlu0 %v10926_v40, %s7313_s14 }
 0x500   : > { %v10933_v58 = vpop.permute.xlu1 %4622 }
 0x501   : > { %v10935_v43 = vpop.permute.xlu0 %4816 }
 0x502   : > { %4732 = vrot.lane.b32.xlu1 %v10931_v29, %s7313_s14  ;;  %5027 = vrot.lane.b32.xlu0 %v10926_v40, %s7311_s26 }
 0x504   : > { %v10950_v56 = vpop.permute.xlu1 %4818 }
 0x505   : > { %v5114_v21 = vpop.permute.xlu0 %5113 }
 0x506   : > { %5029 = vrot.lane.b32.xlu1 %v10931_v29, %s7311_s26  ;;  %4460 = vrot.lane.b32.xlu0 %v4396_v11, %s7309_s29  ;;  %v5491_v63 = vsel %vm5474_vm8, %v5458_v42, %v5114_v21  ;;  %v11006_v21 = vld [vmem:[#allocation4 + $0x170] sm:$0xff] }
 0x507   : > { %v4400_v52 = vrot.slane %v11006_v21, 1 }
 0x508   : > { %v5116_v25 = vpop.permute.xlu1 %5115 }
 0x509   : > { %v5215_v12 = vpop.permute.xlu0 %5214  ;;  %v5492_v26 = vsel %vm5474_vm8, %v5459_v60, %v5116_v25  ;;  %v4401_v53 = vsel %vm1266_vm10, %v4399_v18, %v4400_v52  ;;  %v4576_v25 = vrot.slane %v11006_v21, 2 }
 0x50a   : > { %v5523_v19 = vsel %vm1429_vm11, %v5491_v63, %v5215_v12  ;;  %4462 = vrot.lane.b32.xlu1 %v4398_v5, %s7309_s29  ;;  %4636 = vrot.lane.b32.xlu0 %v4572_v13, %s7310_s23  ;;  %v4402_v63 = vrot.slane %v4269_v9, 1 }
 0x50b   : > { %6628 = vmatprep.mubr.msk.f32.mxu0 %vm5555_vm9, %v5523_v19  ;;  %v4577_v60 = vsel %vm2778_vm0, %v4575_v48, %v4576_v25 }
 0x50c   : > { %v4918_v37 = vpop.permute.xlu1 %4917 }
 0x50d   : > { %v5217_v47 = vpop.permute.xlu0 %5216 }
 0x50e   : > { %v5524_v22 = vsel %vm1429_vm11, %v5492_v26, %v5217_v47  ;;  %4638 = vrot.lane.b32.xlu1 %v4574_v10, %s7310_s23  ;;  %5129 = vrot.lane.b32.xlu0 %v4396_v11, %s7312_s9 }
 0x50f   : > { %6629 = vmatmul.mubr.msk.f32.gmra.mxu0 %vm5555_vm9, %v5524_v22 }
 0x510   : > { %v4920_v7 = vpop.permute.xlu1 %4919 }
 0x511   : > { %v10986_v1 = vpop.permute.xlu0 %4718 }
 0x512   : > { %4832 = vrot.lane.b32.xlu1 %v4396_v11, %s7307_s21  ;;  %5131 = vrot.lane.b32.xlu0 %v4398_v5, %s7312_s9 }
 0x514   : > { %v10990_v39 = vpop.permute.xlu1 %4720 }
 0x515   : > { %v5016_v36 = vpop.permute.xlu0 %5015 }
 0x516   : > { %5230 = vrot.lane.b32.xlu1 %v4572_v13, %s7305_s11  ;;  %4834 = vrot.lane.b32.xlu0 %v4398_v5, %s7307_s21  ;;  %v4578_v5 = vrot.slane %v4269_v9, 2 }
 0x518   : > { %v5018_v41 = vpop.permute.xlu1 %5017 }
 0x519   : > { %v4449_v8 = vpop.permute.xlu0 %4448 }
 0x51a   : > { %4933 = vrot.lane.b32.xlu1 %v4572_v13, %s7314_s15  ;;  %5232 = vrot.lane.b32.xlu0 %v4574_v10, %s7305_s11  ;;  %v5300_v50 = vsel %vm4147_vm14, %v10690_v38, %v4449_v8 }
 0x51c   : > { %v4451_v32 = vpop.permute.xlu1 %4450 }
 0x51d   : > { %v4625_v31 = vpop.permute.xlu0 %4624  ;;  %v5301_v49 = vsel %vm4147_vm14, %v10695_v51, %v4451_v32  ;;  %v5329_v51 = vsel %vm5310_vm5, %v5296_v46, %v10848_v59  ;;  %v5297_v59 = vsel %vm4147_vm14, %v10543_v4, %v10846_v44  ;;  %v4271_v46 = vld [vmem:[#allocation4 + $0x188] sm:$0xff] }
 0x51e   : > { %v10999_v17 = vsel %vm5310_vm5, %v5300_v50, %v4625_v31  ;;  %4935 = vrot.lane.b32.xlu1 %v4574_v10, %s7314_s15  ;;  %4734 = vrot.lane.b32.xlu0 %v11001_v15, %s7313_s14  ;;  %v5362_v42 = vsel %vm5343_vm4, %v5329_v51, %v10910_v0  ;;  %v5330_v0 = vsel %vm5310_vm5, %v5297_v59, %v10857_v20 }
 0x51f   : > { %v5394_v24 = vsel %vm2424_vm12, %v5362_v42, %v10935_v43  ;;  %v5363_v54 = vsel %vm5343_vm4, %v5330_v0, %v10914_v6  ;;  %v4403_v20 = vsel %vm1266_vm10, %v4400_v52, %v4402_v63  ;;  %v4579_v10 = vsel %vm2778_vm0, %v4576_v25, %v4578_v5  ;;  %v4270_v52 = vld [vmem:[#allocation4 + $0x180] sm:$0xff] }
 0x520   : > { %v4627_v11 = vpop.permute.xlu1 %4626  ;;  %v5427_v12 = vsel %vm5408_vm6, %v5394_v24, %v4918_v37  ;;  %v5395_v13 = vsel %vm2424_vm12, %v5363_v54, %v10950_v56  ;;  %v4272_v24 = vld [vmem:[#allocation4 + $0x190] sm:$0x3]  ;;  %v4775_v63 = vrot.slane %v4270_v52, 1 }
 0x521   : > { %v5118_v27 = vpop.permute.xlu0 %5117  ;;  %v11011_v38 = vsel %vm5310_vm5, %v5301_v49, %v4627_v11  ;;  %v5460_v43 = vsel %vm5441_vm7, %v5427_v12, %v5016_v36  ;;  %v5428_v26 = vsel %vm5408_vm6, %v5395_v13, %v4920_v7 }
 0x522   : > { %4736 = vrot.lane.b32.xlu1 %v11006_v21, %s7313_s14  ;;  %5031 = vrot.lane.b32.xlu0 %v11001_v15, %s7311_s26  ;;  %v5493_v19 = vsel %vm5474_vm8, %v5460_v43, %v5118_v27  ;;  %v5461_v6 = vsel %vm5441_vm7, %v5428_v26, %v5018_v41 }
 0x524   : > { %v11026_v14 = vpop.permute.xlu1 %4820 }
 0x525   : > { %v5120_v3 = vpop.permute.xlu0 %5119 }
 0x526   : > { %5033 = vrot.lane.b32.xlu1 %v11006_v21, %s7311_s26  ;;  %4464 = vrot.lane.b32.xlu0 %v4401_v53, %s7309_s29  ;;  %v5494_v37 = vsel %vm5474_vm8, %v5461_v6, %v5120_v3  ;;  %v5298_v3 = vsel %vm4147_vm14, %v10614_v2, %v10918_v30  ;;  %v4778_v2 = vrot.slane %v4272_v24, 1  ;;  %v5299_v30 = vsel %vm4147_vm14, %v10619_v45, %v10922_v61 }
 0x527   : > { %v4877_v61 = vrot.slane %v4271_v46, 2  ;;  %v4879_v6 = vrot.slane %v4272_v24, 2 }
 0x528   : > { %v5219_v4 = vpop.permute.xlu1 %5218 }
 0x529   : > { %v11046_v44 = vpop.permute.xlu0 %4822  ;;  %v5525_v55 = vsel %vm1429_vm11, %v5493_v19, %v5219_v4 }
 0x52a   : > { %4466 = vrot.lane.b32.xlu1 %v4403_v20, %s7309_s29  ;;  %4640 = vrot.lane.b32.xlu0 %v4577_v60, %s7310_s23  ;;  %s6168_s29 = sshll.u32 %s11420_s25, 3 }
 0x52b   : > { %6631 = vmatprep.mubr.msk.f32.mxu0 %vm5555_vm9, %v5525_v55 }
 0x52c   : > { %v4922_v47 = vpop.permute.xlu1 %4921 }
 0x52d   : > { %v5221_v56 = vpop.permute.xlu0 %5220 }
 0x52e   : > { %v5526_v22 = vsel %vm1429_vm11, %v5494_v37, %v5221_v56  ;;  %4642 = vrot.lane.b32.xlu1 %v4579_v10, %s7310_s23  ;;  %5133 = vrot.lane.b32.xlu0 %v4401_v53, %s7312_s9  ;;  %v4880_v56 = vsel %vm2778_vm0, %v4877_v61, %v4879_v6 }
 0x52f   : > { %6632 = vmatmul.mubr.msk.f32.gmra.mxu0 %vm5555_vm9, %v5526_v22  ;;  %v7295_v22 = vld [vmem:[#allocation4 + $0x1a8] sm:$0x3] }
 0x530   : > { %v4924_v7 = vpop.permute.xlu1 %4923 }
 0x531   : > { %v11064_v36 = vpop.permute.xlu0 %4722 }
 0x532   : > { %4836 = vrot.lane.b32.xlu1 %v4401_v53, %s7307_s21  ;;  %5135 = vrot.lane.b32.xlu0 %v4403_v20, %s7312_s9  ;;  %v5331_v53 = vsel %vm5310_vm5, %v5298_v3, %v10924_v33  ;;  %v5332_v33 = vsel %vm5310_vm5, %v5299_v30, %v10933_v58 }
 0x534   : > { %v11068_v41 = vpop.permute.xlu1 %4724 }
 0x535   : > { %v5020_v8 = vpop.permute.xlu0 %5019 }
 0x536   : > { %5234 = vrot.lane.b32.xlu1 %v4577_v60, %s7305_s11  ;;  %4838 = vrot.lane.b32.xlu0 %v4403_v20, %s7307_s21 }
 0x538   : > { %v5022_v50 = vpop.permute.xlu1 %5021 }
 0x539   : > { %v4453_v32 = vpop.permute.xlu0 %4452 }
 0x53a   : > { %4937 = vrot.lane.b32.xlu1 %v4577_v60, %s7314_s15  ;;  %5236 = vrot.lane.b32.xlu0 %v4579_v10, %s7305_s11  ;;  %v5302_v31 = vsel %vm4147_vm14, %v10766_v28, %v4453_v32  ;;  %v4776_v28 = vrot.slane %v4271_v46, 1 }
 0x53c   : > { %v4455_v49 = vpop.permute.xlu1 %4454  ;;  %v4777_v0 = vsel %vm1266_vm10, %v4775_v63, %v4776_v28  ;;  %v4779_v5 = vsel %vm1266_vm10, %v4776_v28, %v4778_v2 }
 0x53d   : > { %v4629_v11 = vpop.permute.xlu0 %4628  ;;  %v5303_v9 = vsel %vm4147_vm14, %v10771_v62, %v4455_v49  ;;  %v5364_v62 = vsel %vm5343_vm4, %v5331_v53, %v10986_v1 }
 0x53e   : > { %v11077_v27 = vsel %vm5310_vm5, %v5302_v31, %v4629_v11  ;;  %4939 = vrot.lane.b32.xlu1 %v4579_v10, %s7314_s15  ;;  %4738 = vrot.lane.b32.xlu0 %v4270_v52, %s7313_s14  ;;  %v5396_v12 = vsel %vm2424_vm12, %v5364_v62, %v11026_v14  ;;  %v5365_v14 = vsel %vm5343_vm4, %v5332_v33, %v10990_v39  ;;  %v4876_v39 = vrot.slane %v4270_v52, 2 }
 0x53f   : > { %v5429_v43 = vsel %vm5408_vm6, %v5396_v12, %v4922_v47  ;;  %v5397_v45 = vsel %vm2424_vm12, %v5365_v14, %v11046_v44  ;;  %v5180_v10 = vrot.slane %v7295_v22, 2 }
 0x540   : > { %v4631_v51 = vpop.permute.xlu1 %4630  ;;  %v5462_v1 = vsel %vm5441_vm7, %v5429_v43, %v5020_v8  ;;  %v5430_v13 = vsel %vm5408_vm6, %v5397_v45, %v4924_v7  ;;  %v4878_v26 = vsel %vm2778_vm0, %v4876_v39, %v4877_v61 }
 0x541   : > { %v5122_v18 = vpop.permute.xlu0 %5121  ;;  %v11084_v42 = vsel %vm5310_vm5, %v5303_v9, %v4631_v51  ;;  %v5463_v58 = vsel %vm5441_vm7, %v5430_v13, %v5022_v50  ;;  %v5181_v50 = vsel %vm2778_vm0, %v5178_v16, %v5180_v10  ;;  %v5366_v16 = vsel %vm5343_vm4, %v10999_v17, %v11064_v36 }
 0x542   : > { %4740 = vrot.lane.b32.xlu1 %v4271_v46, %s7313_s14  ;;  %5035 = vrot.lane.b32.xlu0 %v4270_v52, %s7311_s26  ;;  %v5495_v48 = vsel %vm5474_vm8, %v5462_v1, %v5122_v18  ;;  %v11172_v1 = vld [vmem:[%s11322_s6] ss:$0 sm:$0xff] }
 0x544   : > { %v4825_v25 = vpop.permute.xlu1 %4824 }
 0x545   : > { %v5124_v59 = vpop.permute.xlu0 %5123 }
 0x546   : > { %5037 = vrot.lane.b32.xlu1 %v4271_v46, %s7311_s26  ;;  %5137 = vrot.lane.b32.xlu0 %v4777_v0, %s7312_s9  ;;  %v5496_v55 = vsel %vm5474_vm8, %v5463_v58, %v5124_v59 }
 0x548   : > { %v5223_v54 = vpop.permute.xlu1 %5222 }
 0x549   : > { %v4827_v19 = vpop.permute.xlu0 %4826  ;;  %v5527_v4 = vsel %vm1429_vm11, %v5495_v48, %v5223_v54 }
 0x54a   : > { %4840 = vrot.lane.b32.xlu1 %v4777_v0, %s7307_s21  ;;  %5139 = vrot.lane.b32.xlu0 %v4779_v5, %s7312_s9  ;;  %s278_s9 = scalar_lea.vmem %s11323_s7, %s6168_s29 }
 0x54b   : > { %6634 = vmatprep.mubr.msk.f32.mxu0 %vm5555_vm9, %v5527_v4 }
 0x54c   : > { %v4926_v20 = vpop.permute.xlu1 %4925 }
 0x54d   : > { %v5225_v44 = vpop.permute.xlu0 %5224 }
 0x54e   : > { %v5528_v60 = vsel %vm1429_vm11, %v5496_v55, %v5225_v44  ;;  %5238 = vrot.lane.b32.xlu1 %v4878_v26, %s7305_s11  ;;  %4842 = vrot.lane.b32.xlu0 %v4779_v5, %s7307_s21 }
 0x54f   : > { %6635 = vmatmul.mubr.msk.f32.gmra.mxu0 %vm5555_vm9, %v5528_v60 }
 0x550   : > { %v4928_v37 = vpop.permute.xlu1 %4927 }
 0x551   : > { %v11125_v47 = vpop.permute.xlu0 %4726 }
 0x552   : > { %4941 = vrot.lane.b32.xlu1 %v4878_v26, %s7314_s15  ;;  %5240 = vrot.lane.b32.xlu0 %v4880_v56, %s7305_s11 }
 0x554   : > { %v11130_v7 = vpop.permute.xlu1 %4728 }
 0x555   : > { %v5024_v8 = vpop.permute.xlu0 %5023 }
 0x556   : > { %4943 = vrot.lane.b32.xlu1 %v4880_v56, %s7314_s15  ;;  %5242 = vrot.lane.b32.xlu0 %v10840_v57, %s7305_s11  ;;  %v5368_v56 = vsel %vm5343_vm4, %v11077_v27, %v11125_v47 }
 0x558   : > { %v5026_v32 = vpop.permute.xlu1 %5025 }
 0x559   : > { %v4457_v31 = vpop.permute.xlu0 %4456 }
 0x55a   : > { %5244 = vrot.lane.b32.xlu1 %v5181_v50, %s7305_s11  ;;  %v5304_v49 = vsel %vm4147_vm14, %v10850_v35, %v4457_v31  ;;  %v5398_v35 = vsel %vm2424_vm12, %v5366_v16, %v4825_v25  ;;  %v6606_v25 = vpop.f32.mrf.mxu0 }
 0x55b   : > { %v5431_v3 = vsel %vm5408_vm6, %v5398_v35, %v4926_v20  ;;  %v5724_v45 = vadd.f32 %v6606_v25, %v11172_v1 }
 0x55c   : > { %v4459_v11 = vpop.permute.xlu1 %4458  ;;  %v5464_v24 = vsel %vm5441_vm7, %v5431_v3, %v5024_v8 }
 0x55d   : > { %v4633_v52 = vpop.permute.xlu0 %4632  ;;  %v5305_v9 = vsel %vm4147_vm14, %v10855_v23, %v4459_v11  ;;  %v5367_v23 = vsel %vm5343_vm4, %v11011_v38, %v11068_v41  ;;  %v5718_v41 = vpop.f32.mrf.mxu0  ;;  %v5369_v11 = vsel %vm5343_vm4, %v11084_v42, %v11130_v7 }
 0x55e   : > { %v11142_v46 = vsel %vm5310_vm5, %v5304_v49, %v4633_v52  ;;  %v5399_v59 = vsel %vm2424_vm12, %v5367_v23, %v4827_v19  ;;  %v5719_v14 = vadd.f32 %v11172_v1, %v5718_v41 }
 0x55f   : > { %v5432_v36 = vsel %vm5408_vm6, %v5399_v59, %v4928_v37  ;;  %v6609_v48 = vpop.f32.mrf.mxu0 }
 0x560   : > { %v4635_v57 = vpop.permute.xlu1 %4634  ;;  %v5465_v12 = vsel %vm5441_vm7, %v5432_v36, %v5026_v32  ;;  %v5734_v20 = vadd.f32 %v6609_v48, %v11172_v1 }
 0x561   : > { %v5126_v51 = vpop.permute.xlu0 %5125  ;;  %v11147_v34 = vsel %vm5310_vm5, %v5305_v9, %v4635_v57  ;;  %v5728_v61 = vpop.f32.mrf.mxu0 }
 0x562   : > { %v5497_v53 = vsel %vm5474_vm8, %v5464_v24, %v5126_v51  ;;  %v5729_v13 = vadd.f32 %v11172_v1, %v5728_v61 }
 0x563   : > { %v6612_v58 = vpop.f32.mrf.mxu0 }
 0x564   : > { %v4829_v18 = vpop.permute.xlu1 %4828  ;;  %v5744_v50 = vadd.f32 %v6612_v58, %v11172_v1 }
 0x565   : > { %v5128_v28 = vpop.permute.xlu0 %5127  ;;  %v5738_v44 = vpop.f32.mrf.mxu0  ;;  %v5400_v8 = vsel %vm2424_vm12, %v5368_v56, %v4829_v18 }
 0x566   : > { %v5498_v0 = vsel %vm5474_vm8, %v5465_v12, %v5128_v28  ;;  %v5739_v6 = vadd.f32 %v11172_v1, %v5738_v44 }
 0x567   : > { %v6615_v37 = vpop.f32.mrf.mxu0 }
 0x568   : > { %v5227_v63 = vpop.permute.xlu1 %5226  ;;  %v5754_v24 = vadd.f32 %v6615_v37, %v11172_v1 }
 0x569   : > { %v4831_v62 = vpop.permute.xlu0 %4830  ;;  %v5529_v17 = vsel %vm1429_vm11, %v5497_v53, %v5227_v63  ;;  %v5748_v31 = vpop.f32.mrf.mxu0 }
 0x56a   : > { %6637 = vmatprep.mubr.msk.f32.mxu0 %vm5555_vm9, %v5529_v17  ;;  %v5401_v47 = vsel %vm2424_vm12, %v5369_v11, %v4831_v62  ;;  %v5749_v51 = vadd.f32 %v11172_v1, %v5748_v31 }
 0x56b   : > { %v6618_v18 = vpop.f32.mrf.mxu0 }
 0x56c   : > { %v4930_v2 = vpop.permute.xlu1 %4929  ;;  %v5764_v25 = vadd.f32 %v6618_v18, %v11172_v1 }
 0x56d   : > { %v5229_v30 = vpop.permute.xlu0 %5228  ;;  %v5433_v32 = vsel %vm5408_vm6, %v5400_v8, %v4930_v2  ;;  %v5758_v23 = vpop.f32.mrf.mxu0 }
 0x56e   : > { %v5530_v38 = vsel %vm1429_vm11, %v5498_v0, %v5229_v30  ;;  %v5759_v62 = vadd.f32 %v11172_v1, %v5758_v23 }
 0x56f   : > { %6638 = vmatmul.mubr.msk.f32.gmra.mxu0 %vm5555_vm9, %v5530_v38  ;;  %v6621_v59 = vpop.f32.mrf.mxu0 }
 0x570   : > { %v4932_v43 = vpop.permute.xlu1 %4931 }
 0x571   : > { %v11167_v33 = vpop.permute.xlu0 %4730  ;;  %v5434_v16 = vsel %vm5408_vm6, %v5401_v47, %v4932_v43  ;;  %v5768_v12 = vpop.f32.mrf.mxu0 }
 0x572   : > { %v5769_v30 = vadd.f32 %v11172_v1, %v5768_v12 }
 0x574   : > { %v11175_v54 = vpop.permute.xlu1 %4732  ;;  %5877 = vxpose.xlu0.b32.start [1/16] (narrow) %v5719_v14, 8  ;;  %v5774_v14 = vadd.f32 %v6621_v59, %v11172_v1 }
 0x575   : > { %v5028_v19 = vpop.permute.xlu0 %5027  ;;  %v5371_v37 = vsel %vm5343_vm4, %v11147_v34, %v11175_v54 }
 0x576   : > { %v5466_v49 = vsel %vm5441_vm7, %v5433_v32, %v5028_v19 }
 0x578   : > { %v5030_v4 = vpop.permute.xlu1 %5029  ;;  %5878 = vxpose.xlu0.b32.cont [2/16] (narrow) %v5724_v45, 8 }
 0x579   : > { %v11178_v5 = vpop.permute.xlu0 %4460  ;;  %v5467_v28 = vsel %vm5441_vm7, %v5434_v16, %v5030_v4  ;;  %v5370_v4 = vsel %vm5343_vm4, %v11142_v46, %v11167_v33 }
 0x57c   : > { %v11181_v39 = vpop.permute.xlu1 %4462  ;;  %5879 = vxpose.xlu0.b32.cont [3/16] (narrow) %v5729_v13, 8 }
 0x57d   : > { %v11183_v55 = vpop.permute.xlu0 %4636  ;;  %v5307_v23 = vsel %vm4147_vm14, %v10931_v29, %v11181_v39 }
 0x580   : > { %v11186_v60 = vpop.permute.xlu1 %4638  ;;  %5880 = vxpose.xlu0.b32.cont [4/16] (narrow) %v5734_v20, 8 }
 0x581   : > { %v5130_v26 = vpop.permute.xlu0 %5129 }
 0x582   : > { %v5499_v52 = vsel %vm5474_vm8, %v5466_v49, %v5130_v26 }
 0x584   : > { %v4833_v22 = vpop.permute.xlu1 %4832  ;;  %5881 = vxpose.xlu0.b32.cont [5/16] (narrow) %v5739_v6, 8 }
 0x585   : > { %v5132_v10 = vpop.permute.xlu0 %5131  ;;  %v5402_v20 = vsel %vm2424_vm12, %v5370_v4, %v4833_v22 }
 0x586   : > { %v5500_v42 = vsel %vm5474_vm8, %v5467_v28, %v5132_v10  ;;  %v5306_v28 = vsel %vm4147_vm14, %v10926_v40, %v11178_v5 }
 0x588   : > { %v5231_v9 = vpop.permute.xlu1 %5230  ;;  %5882 = vxpose.xlu0.b32.cont [6/16] (narrow) %v5744_v50, 8 }
 0x589   : > { %v4835_v27 = vpop.permute.xlu0 %4834  ;;  %v5531_v57 = vsel %vm1429_vm11, %v5499_v52, %v5231_v9 }
 0x58a   : > { %6640 = vmatprep.mubr.msk.f32.mxu0 %vm5555_vm9, %v5531_v57  ;;  %v5403_v33 = vsel %vm2424_vm12, %v5371_v37, %v4835_v27  ;;  %v11418_v37 = vld [vmem:[#allocation19_spill] sm:$0xff] }
 0x58c   : > { %v4934_v7 = vpop.permute.xlu1 %4933  ;;  %5883 = vxpose.xlu0.b32.cont [7/16] (narrow) %v5749_v51, 8 }
 0x58d   : > { %v5233_v35 = vpop.permute.xlu0 %5232  ;;  %v5435_v44 = vsel %vm5408_vm6, %v5402_v20, %v4934_v7 }
 0x58e   : > { %v5532_v3 = vsel %vm1429_vm11, %v5500_v42, %v5233_v35  ;;  %v5339_v42 = vsel %vm5310_vm5, %v5306_v28, %v11183_v55 }
 0x58f   : > { %6641 = vmatmul.mubr.msk.f32.gmra.mxu0 %vm5555_vm9, %v5532_v3  ;;  %v6624_v38 = vpop.f32.mrf.mxu0 }
 0x590   : > { %v4936_v53 = vpop.permute.xlu1 %4935  ;;  %5884 = vxpose.xlu0.b32.cont [8/16] (narrow) %v5754_v24, 8  ;;  %v5784_v26 = vadd.f32 %v6624_v38, %v11172_v1 }
 0x591   : > { %v4735_v63 = vpop.permute.xlu0 %4734  ;;  %v5778_v48 = vpop.f32.mrf.mxu0  ;;  %v5436_v22 = vsel %vm5408_vm6, %v5403_v33, %v4936_v53 }
 0x592   : > { %v5779_v61 = vadd.f32 %v11172_v1, %v5778_v48  ;;  %v5372_v7 = vsel %vm5343_vm4, %v5339_v42, %v4735_v63 }
 0x594   : > { %v11211_v17 = vpop.permute.xlu1 %4736  ;;  %5885 = vxpose.xlu0.b32.cont [9/16] (narrow) %v5759_v62, 8  ;;  %v5340_v62 = vsel %vm5310_vm5, %v5307_v23, %v11186_v60 }
 0x595   : > { %v5032_v36 = vpop.permute.xlu0 %5031  ;;  %v5373_v5 = vsel %vm5343_vm4, %v5340_v62, %v11211_v17 }
 0x596   : > { %v5468_v6 = vsel %vm5441_vm7, %v5435_v44, %v5032_v36 }
 0x598   : > { %v5034_v0 = vpop.permute.xlu1 %5033  ;;  %5886 = vxpose.xlu0.b32.cont [10/16] (narrow) %v5764_v25, 8 }
 0x599   : > { %v4465_v2 = vpop.permute.xlu0 %4464  ;;  %v5469_v50 = vsel %vm5441_vm7, %v5436_v22, %v5034_v0 }
 0x59a   : > { %v5308_v36 = vsel %vm4147_vm14, %v11001_v15, %v4465_v2 }
 0x59c   : > { %v11215_v41 = vpop.permute.xlu1 %4466  ;;  %5887 = vxpose.xlu0.b32.cont [11/16] (narrow) %v5769_v30, 8 }
 0x59d   : > { %v4641_v43 = vpop.permute.xlu0 %4640  ;;  %v5309_v2 = vsel %vm4147_vm14, %v11006_v21, %v11215_v41 }
 0x59e   : > { %v5341_v39 = vsel %vm5310_vm5, %v5308_v36, %v4641_v43 }
 0x5a0   : > { %v11218_v19 = vpop.permute.xlu1 %4642  ;;  %5888 = vxpose.xlu0.b32.cont [12/16] (narrow) %v5774_v14, 8 }
 0x5a1   : > { %v5134_v45 = vpop.permute.xlu0 %5133  ;;  %v5342_v48 = vsel %vm5310_vm5, %v5309_v2, %v11218_v19 }
 0x5a2   : > { %v5501_v56 = vsel %vm5474_vm8, %v5468_v6, %v5134_v45  ;;  %v11415_v45 = vld [vmem:[#allocation13_spill] sm:$0xff]  ;;  %v11417_v6 = vld [vmem:[#allocation14_spill] sm:$0xff] }
 0x5a4   : > { %v4837_v13 = vpop.permute.xlu1 %4836  ;;  %5889 = vxpose.xlu0.b32.cont [13/16] (narrow) %v5779_v61, 8 }
 0x5a5   : > { %v5136_v58 = vpop.permute.xlu0 %5135  ;;  %v5404_v24 = vsel %vm2424_vm12, %v5372_v7, %v4837_v13  ;;  %v11416_v13 = vld [vmem:[#allocation15_spill] sm:$0xff] }
 0x5a6   : > { %v5502_v32 = vsel %vm5474_vm8, %v5469_v50, %v5136_v58 }
 0x5a8   : > { %v5235_v10 = vpop.permute.xlu1 %5234  ;;  %5890 = vxpose.xlu0.b32.cont [14/16] (narrow) %v5784_v26, 8 }
 0x5a9   : > { %v4839_v46 = vpop.permute.xlu0 %4838  ;;  %v5533_v8 = vsel %vm1429_vm11, %v5501_v56, %v5235_v10 }
 0x5aa   : > { %6643 = vmatprep.mubr.msk.f32.mxu0 %vm5555_vm9, %v5533_v8  ;;  %v5405_v25 = vsel %vm2424_vm12, %v5373_v5, %v4839_v46 }
 0x5ac   : > { %v4938_v31 = vpop.permute.xlu1 %4937 }
 0x5ad   : > { %v5237_v49 = vpop.permute.xlu0 %5236  ;;  %v5437_v53 = vsel %vm5408_vm6, %v5404_v24, %v4938_v31 }
 0x5ae   : > { %v5534_v34 = vsel %vm1429_vm11, %v5502_v32, %v5237_v49 }
 0x5af   : > { %6644 = vmatmul.mubr.msk.f32.gmra.mxu0 %vm5555_vm9, %v5534_v34  ;;  %v6627_v54 = vpop.f32.mrf.mxu0 }
 0x5b0   : > { %v4940_v11 = vpop.permute.xlu1 %4939  ;;  %v5794_v51 = vadd.f32 %v6627_v54, %v11172_v1 }
 0x5b1   : > { %v4739_v52 = vpop.permute.xlu0 %4738  ;;  %v5788_v9 = vpop.f32.mrf.mxu0  ;;  %v5438_v60 = vsel %vm5408_vm6, %v5405_v25, %v4940_v11 }
 0x5b2   : > { %v5789_v27 = vadd.f32 %v11172_v1, %v5788_v9  ;;  %v5374_v12 = vsel %vm5343_vm4, %v5341_v39, %v4739_v52 }
 0x5b4   : > { %5891 = vxpose.xlu0.b32.cont [15/16] (narrow) %v5789_v27, 8  ;;  %v4741_v47 = vpop.permute.xlu1 %4740 }
 0x5b5   : > { %v5036_v57 = vpop.permute.xlu0 %5035  ;;  %v5375_v4 = vsel %vm5343_vm4, %v5342_v48, %v4741_v47 }
 0x5b6   : > { %v5470_v40 = vsel %vm5441_vm7, %v5437_v53, %v5036_v57 }
 0x5b8   : > { %5892 = vxpose.xlu0.b32.end [16/16] (narrow) %v5794_v51, 8  ;;  %v5038_v16 = vpop.permute.xlu1 %5037 }
 0x5b9   : > { %v5138_v18 = vpop.permute.xlu0 %5137  ;;  %v5471_v17 = vsel %vm5441_vm7, %v5438_v60, %v5038_v16 }
 0x5ba   : > { %v5503_v55 = vsel %vm5474_vm8, %v5470_v40, %v5138_v18 }
 0x5bc   : > { %v4841_v35 = vpop.permute.xlu1 %4840 }
 0x5bd   : > { %v5140_v3 = vpop.permute.xlu0 %5139  ;;  %v5406_v0 = vsel %vm2424_vm12, %v5374_v12, %v4841_v35 }
 0x5be   : > { %v5504_v30 = vsel %vm5474_vm8, %v5471_v17, %v5140_v3 }
 0x5c0   : > { %v5239_v63 = vpop.permute.xlu1 %5238 }
 0x5c1   : > { %v4843_v59 = vpop.permute.xlu0 %4842  ;;  %v5535_v29 = vsel %vm1429_vm11, %v5503_v55, %v5239_v63 }
 0x5c2   : > { %6646 = vmatprep.mubr.msk.f32.mxu0 %vm5555_vm9, %v5535_v29  ;;  %v5407_v20 = vsel %vm2424_vm12, %v5375_v4, %v4843_v59 }
 0x5c4   : > { %v4942_v38 = vpop.permute.xlu1 %4941 }
 0x5c5   : > { %v5241_v15 = vpop.permute.xlu0 %5240  ;;  %v5439_v43 = vsel %vm5408_vm6, %v5406_v0, %v4942_v38 }
 0x5c6   : > { %v5536_v14 = vsel %vm1429_vm11, %v5504_v30, %v5241_v15  ;;  %v5472_v61 = vsel %vm5441_vm7, %v5439_v43, %v11415_v45 }
 0x5c7   : > { %6647 = vmatmul.mubr.msk.f32.gmra.mxu0 %vm5555_vm9, %v5536_v14  ;;  %v5505_v58 = vsel %vm5474_vm8, %v5472_v61, %v11416_v13 }
 0x5c8   : > { %v4944_v21 = vpop.permute.xlu1 %4943 }
 0x5c9   : > { %v5243_v41 = vpop.permute.xlu0 %5242  ;;  %v5440_v44 = vsel %vm5408_vm6, %v5407_v20, %v4944_v21 }
 0x5ca   : > { %v5537_v26 = vsel %vm1429_vm11, %v5505_v58, %v5243_v41  ;;  %v5473_v19 = vsel %vm5441_vm7, %v5440_v44, %v11417_v6 }
 0x5cb   : > { %6649 = vmatprep.mubr.msk.f32.mxu0 %vm5555_vm9, %v5537_v26  ;;  %v5506_v56 = vsel %vm5474_vm8, %v5473_v19, %v11418_v37 }
 0x5cc   : > { %v5245_v10 = vpop.permute.xlu1 %5244 }
 0x5cd   : > { %v5538_v46 = vsel %vm1429_vm11, %v5506_v56, %v5245_v10 }
 0x5ce   : > { %6650 = vmatmul.mubr.msk.f32.gmra.mxu0 %vm5555_vm9, %v5538_v46 }
 0x5cf   : > { %v6630_v33 = vpop.f32.mrf.mxu0 }
 0x5d0   : > { %v5804_v50 = vadd.f32 %v6630_v33, %v11172_v1 }
 0x5d1   : > { %v5798_v8 = vpop.f32.mrf.mxu0 }
 0x5d2   : > { %v5799_v22 = vadd.f32 %v11172_v1, %v5798_v8 }
 0x5d4   : > { %5909 = vxpose.xlu1.b32.start [1/16] (narrow) %v5799_v22, 8 }
 0x5d8   : > { %5910 = vxpose.xlu1.b32.cont [2/16] (narrow) %v5804_v50, 8 }
 0x5ef   : > { %v6633_v32 = vpop.f32.mrf.mxu0 }
 0x5f0   : > { %v5814_v34 = vadd.f32 %v6633_v32, %v11172_v1 }
 0x5f1   : > { %v5808_v31 = vpop.f32.mrf.mxu0 }
 0x5f2   : > { %v5809_v49 = vadd.f32 %v11172_v1, %v5808_v31 }
 0x5f4   : > { %5911 = vxpose.xlu1.b32.cont [3/16] (narrow) %v5809_v49, 8 }
 0x5f8   : > { %5912 = vxpose.xlu1.b32.cont [4/16] (narrow) %v5814_v34, 8  ;;  %v5893_v36 = vpop.trf.xlu0 }
 0x60f   : > { %v6636_v54 = vpop.f32.mrf.mxu0 }
 0x610   : > { %v5824_v9 = vadd.f32 %v6636_v54, %v11172_v1 }
 0x611   : > { %v5818_v11 = vpop.f32.mrf.mxu0 }
 0x612   : > { %v5819_v52 = vadd.f32 %v11172_v1, %v5818_v11 }
 0x614   : > { %5913 = vxpose.xlu1.b32.cont [5/16] (narrow) %v5819_v52, 8 }
 0x618   : > { %5914 = vxpose.xlu1.b32.cont [6/16] (narrow) %v5824_v9, 8 }
 0x62f   : > { %v6639_v27 = vpop.f32.mrf.mxu0 }
 0x630   : > { %v5834_v51 = vadd.f32 %v6639_v27, %v11172_v1 }
 0x631   : > { %v5828_v47 = vpop.f32.mrf.mxu0 }
 0x632   : > { %v5829_v57 = vadd.f32 %v11172_v1, %v5828_v47 }
 0x634   : > { %5915 = vxpose.xlu1.b32.cont [7/16] (narrow) %v5829_v57, 8 }
 0x638   : > { %5916 = vxpose.xlu1.b32.cont [8/16] (narrow) %v5834_v51, 8 }
 0x64f   : > { %v6642_v16 = vpop.f32.mrf.mxu0 }
 0x650   : > { %v5844_v42 = vadd.f32 %v6642_v16, %v11172_v1 }
 0x651   : > { %v5838_v18 = vpop.f32.mrf.mxu0 }
 0x652   : > { %v5839_v28 = vadd.f32 %v11172_v1, %v5838_v18 }
 0x654   : > { %5917 = vxpose.xlu1.b32.cont [9/16] (narrow) %v5839_v28, 8 }
 0x658   : > { %5918 = vxpose.xlu1.b32.cont [10/16] (narrow) %v5844_v42, 8 }
 0x66f   : > { %v6645_v7 = vpop.f32.mrf.mxu0 }
 0x670   : > { %v5854_v24 = vadd.f32 %v6645_v7, %v11172_v1 }
 0x671   : > { %v5848_v35 = vpop.f32.mrf.mxu0 }
 0x672   : > { %v5849_v3 = vadd.f32 %v11172_v1, %v5848_v35 }
 0x674   : > { %5919 = vxpose.xlu1.b32.cont [11/16] (narrow) %v5849_v3, 8 }
 0x678   : > { %5920 = vxpose.xlu1.b32.cont [12/16] (narrow) %v5854_v24, 8 }
 0x687   : > { %v6648_v23 = vpop.f32.mrf.mxu0 }
 0x688   : > { %v5864_v40 = vadd.f32 %v6648_v23, %v11172_v1 }
 0x689   : > { %v5858_v53 = vpop.f32.mrf.mxu0 }
 0x68a   : > { %v5859_v62 = vadd.f32 %v11172_v1, %v5858_v53 }
 0x68c   : > { %5921 = vxpose.xlu1.b32.cont [13/16] (narrow) %v5859_v62, 8 }
 0x68e   : > { %v6651_v5 = vpop.f32.mrf.mxu0 }
 0x68f   : > { %v5874_v59 = vadd.f32 %v6651_v5, %v11172_v1 }
 0x690   : > { %5922 = vxpose.xlu1.b32.cont [14/16] (narrow) %v5864_v40, 8  ;;  %v5868_v55 = vpop.f32.mrf.mxu0 }
 0x691   : > { %v5869_v63 = vadd.f32 %v11172_v1, %v5868_v55 }
 0x694   : > { %5923 = vxpose.xlu1.b32.cont [15/16] (narrow) %v5869_v63, 8 }
 0x698   : > { %5924 = vxpose.xlu1.b32.end [16/16] (narrow) %v5874_v59, 8 }
 0x6d8   : > { %v5925_v25 = vpop.trf.xlu1 }
 0x6d9   : > { %v5943_v29 = vcombine.low %v5893_v36, %v5925_v25 }
 0x6db   : > { %5945 = vst [vmem:[%s278_s9] sm:$0x77] %v5943_v29 }
 0x6dc PF: > { %s17_s24 = sadd.s32 1, %s7302_s24  }
 0x6dd   : > { %p14_p4 = scmp.ge.s32.totalorder %s17_s24, 4  }
 0x6df   :  { %16 = sbr.rel (!%p14_p4) target bundleno = 1 (0x1), region = 84 }

</bundles_post_ra>
